<compile_context>
chip_gen: v5e
topology: v5e:2x2
jax: 0.10.0
libtpu: 0.0.40
codegen_flags: <defaults>
</compile_context>

<pallas_src>
import numpy as np

import jax
import jax.numpy as jnp
from jax.experimental import pallas as pl
from jax.experimental.pallas import tpu as pltpu


# Fixed by the module: 26x26 input -> 24x24 -> pool 12x12 -> 10x10 -> pool 5x5
_C1, _C2 = 32, 64       # conv channel counts
_H1 = 12                # pooled spatial size after block 1
_Q = 5                  # pooled spatial size after block 2
_HEAD_PAD = 8           # batch rows padded to one sublane tile for the FC head


# ----------------------------- constant gather matrices -----------------------------

def _build_gather_constants(n):
    """One-hot gather matrices (f32) consumed inside the fused kernel.

    G (9*4*P2, n*144): for each conv2 kernel offset k and pool phase (a, b), row
       (n, qh, qw) selects the block-1 activation row n*144 + (2qh+a+ki)*12 + (2qw+b+kj).
       Padding rows (to make each phase block a multiple of 8 sublanes) are all-zero.
    F (25*8, P2): re-packs pooled block-2 rows (n*25 + p) into per-spatial-position
       blocks of 8 rows so fc1 is a sum of 8-aligned (8,64)@(64,128) matmuls
       (this realizes the flatten without any in-kernel transpose/reshape).
    """
    assert n <= _HEAD_PAD
    r1 = n * _H1 * _H1                       # 288 block-1 rows
    valid2 = n * _Q * _Q                     # 50 valid block-2 rows
    p2 = ((valid2 + 7) // 8) * 8             # 56 (8-aligned phase block)
    phases = ((0, 0), (0, 1), (1, 0), (1, 1))

    g = np.zeros((9 * 4 * p2, r1), np.float32)
    for k in range(9):
        ki, kj = divmod(k, 3)
        for pi, (a, b) in enumerate(phases):
            base = (k * 4 + pi) * p2
            for nn in range(n):
                for qh in range(_Q):
                    for qw in range(_Q):
                        r = base + nn * _Q * _Q + qh * _Q + qw
                        src = nn * _H1 * _H1 + (2 * qh + a + ki) * _H1 + (2 * qw + b + kj)
                        g[r, src] = 1.0

    f = np.zeros((_Q * _Q * _HEAD_PAD, p2), np.float32)
    for p in range(_Q * _Q):
        for nn in range(n):
            f[p * _HEAD_PAD + nn, nn * _Q * _Q + p] = 1.0
    return jnp.asarray(g), jnp.asarray(f)


# ----------------------------------- fused kernel -----------------------------------

def _fused_net_kernel(patches1_ref, g2_ref, gf_ref,
                      w1_ref, b1_ref, s1_ref, t1_ref,
                      w2_ref, b2_ref, s2_ref, t2_ref,
                      fw1_ref, fb1_ref, fw2_ref, fb2_ref, o_ref):
    f32 = jnp.float32

    # -------- block 1: conv1 (im2col GEMM) -> maxpool2 -> leaky_relu -> folded bn1 ---
    p1 = patches1_ref[...]                               # (4*R1, 9): 4 pool-phase blocks
    r1 = p1.shape[0] // 4
    c1 = jnp.dot(p1, w1_ref[...], preferred_element_type=f32) + b1_ref[...]
    m1 = jnp.maximum(jnp.maximum(c1[0 * r1:1 * r1], c1[1 * r1:2 * r1]),
                     jnp.maximum(c1[2 * r1:3 * r1], c1[3 * r1:4 * r1]))
    a1 = jnp.where(m1 > 0, m1, 0.01 * m1)                # leaky_relu (slope 0.01)
    h1 = a1 * s1_ref[...] + t1_ref[...]                  # (R1, 32), rows = (n, ph, pw)

    # -------- block 2: conv2 via 9 one-hot gather matmuls -> maxpool2 -> lrelu -> bn2 -
    # TODO(synk): Dropout2d after conv2 is identity (inference semantics).
    g2 = g2_ref[...]                                     # (9*4*P2, R1)
    w2 = w2_ref[...]                                     # (288, 64), rows = (ki, kj, c_in)
    blk = g2.shape[0] // 9                               # 4*P2
    p2 = blk // 4
    acc = jnp.zeros((blk, w2.shape[1]), f32)
    for k in range(9):
        gk = g2[k * blk:(k + 1) * blk]                   # aligned row slice (one-hot gather)
        gathered = jnp.dot(gk, h1, preferred_element_type=f32)            # (4*P2, 32)
        acc = acc + jnp.dot(gathered, w2[k * _C1:(k + 1) * _C1],
                            preferred_element_type=f32)                   # (4*P2, 64)
    c2 = acc + b2_ref[...]
    m2 = jnp.maximum(jnp.maximum(c2[0 * p2:1 * p2], c2[1 * p2:2 * p2]),
                     jnp.maximum(c2[2 * p2:3 * p2], c2[3 * p2:4 * p2]))
    a2 = jnp.where(m2 > 0, m2, 0.01 * m2)
    h2 = a2 * s2_ref[...] + t2_ref[...]                  # (P2, 64), rows = (n, qh, qw)+pad

    # -------- head: flatten (F gather) -> fc1 -> relu -> fc2 -> log_softmax ----------
    # TODO(synk): F.dropout after fc1 is identity (inference semantics).
    h2p = jnp.dot(gf_ref[...], h2, preferred_element_type=f32)            # (25*8, 64)
    fw1 = fw1_ref[...]                                   # (1600, 128), rows = (qh, qw, c)
    z1 = jnp.zeros((_HEAD_PAD, fw1.shape[1]), f32)
    for p in range(_Q * _Q):                             # 25 aligned (8,64)@(64,128) dots
        z1 = z1 + jnp.dot(h2p[p * _HEAD_PAD:(p + 1) * _HEAD_PAD],
                          fw1[p * _C2:(p + 1) * _C2],
                          preferred_element_type=f32)
    z1 = jnp.maximum(z1 + fb1_ref[...], 0.0)             # fc1 bias + relu
    z2 = jnp.dot(z1, fw2_ref[...], preferred_element_type=f32) + fb2_ref[...]
    mz = jnp.max(z2, axis=-1, keepdims=True)
    lse = mz + jnp.log(jnp.sum(jnp.exp(z2 - mz), axis=-1, keepdims=True))
    o_ref[...] = z2 - lse                                # (8, 2); rows >= N are padding


# ------------------------------------ glue / model ----------------------------------

def _conv1_phase_patches(x):
    """x: (N, 26, 26) -> (4*N*144, 9) conv1 im2col patches, grouped by the 4 pool phases.

    Rows: phase (a, b) major, then (n, ph, pw) raster. Cols: kernel offset (ki, kj).
    ~40 KB; the only XLA-side prep before the fused kernel.
    """
    n = x.shape[0]
    blocks = []
    for a in (0, 1):
        for b in (0, 1):
            cols = [x[:, a + i:a + i + 2 * _H1:2, b + j:b + j + 2 * _H1:2]
                    for i in range(3) for j in range(3)]          # each (N, 12, 12)
            blocks.append(jnp.stack(cols, axis=-1).reshape(n * _H1 * _H1, 9))
    return jnp.concatenate(blocks, axis=0)


def net_forward(x, kp):
    """Forward pass of Net (inference semantics): (N, 26, 26) -> (N, 2) log-probs."""
    x = x.astype(jnp.float32)
    n = x.shape[0]
    patches1 = _conv1_phase_patches(x)
    args = (patches1, kp["gather2"], kp["gatherF"],
            kp["conv1_w"], kp["conv1_b"], kp["bn1_scale"], kp["bn1_shift"],
            kp["conv2_w"], kp["conv2_b"], kp["bn2_scale"], kp["bn2_shift"],
            kp["fc1_w"], kp["fc1_b"], kp["fc2_w"], kp["fc2_b"])
    out = pl.pallas_call(
        _fused_net_kernel,
        out_shape=jax.ShapeDtypeStruct((_HEAD_PAD, 2), jnp.float32),
        grid=(1,),
        in_specs=[pl.BlockSpec(a.shape, lambda i: (0, 0)) for a in args],
        out_specs=pl.BlockSpec((_HEAD_PAD, 2), lambda i: (0, 0)),
        compiler_params=pltpu.CompilerParams(
            dimension_semantics=("arbitrary",),
            vmem_limit_bytes=48 * 1024 * 1024),
    )(*args)
    return out[:n]


def init_params(key):
    ks = jax.random.split(key, 8)
    return {
        # Conv weights in im2col GEMM layout: (kh*kw*in_c, out_c), rows ordered (kh, kw, in_c).
        # (Porting PyTorch (out_c, in_c, kh, kw): transpose to (kh, kw, in_c, out_c), reshape.)
        "conv1_w": jax.random.normal(ks[0], (9 * 1, _C1), jnp.float32) * 0.1,
        "conv1_b": jax.random.normal(ks[1], (1, _C1), jnp.float32) * 0.1,
        "bn1_g": jnp.ones((_C1,), jnp.float32),
        "bn1_b": jnp.zeros((_C1,), jnp.float32),
        "bn1_m": jnp.zeros((_C1,), jnp.float32),
        "bn1_v": jnp.ones((_C1,), jnp.float32),
        "conv2_w": jax.random.normal(ks[2], (9 * _C1, _C2), jnp.float32) * 0.05,
        "conv2_b": jax.random.normal(ks[3], (1, _C2), jnp.float32) * 0.05,
        "bn2_g": jnp.ones((_C2,), jnp.float32),
        "bn2_b": jnp.zeros((_C2,), jnp.float32),
        "bn2_m": jnp.zeros((_C2,), jnp.float32),
        "bn2_v": jnp.ones((_C2,), jnp.float32),
        # fc1 weight stored (in, out) with rows in NHWC flatten order (qh, qw, c); this
        # folds PyTorch's NCHW view(-1, 64*5*5) permutation into the weights (porting from
        # PyTorch requires permuting rows from (c, qh, qw) order and transposing).
        "fc1_w": jax.random.normal(ks[4], (_Q * _Q * _C2, 128), jnp.float32) * 0.02,
        "fc1_b": jax.random.normal(ks[5], (1, 128), jnp.float32) * 0.02,
        "fc2_w": jax.random.normal(ks[6], (128, 2), jnp.float32) * 0.05,
        "fc2_b": jax.random.normal(ks[7], (1, 2), jnp.float32) * 0.05,
    }


def prepare_params(raw, n_batch):
    """Fold eval-mode BatchNorm into (scale, shift) and attach the gather constants."""
    eps = 1e-5
    s1 = raw["bn1_g"] * jax.lax.rsqrt(raw["bn1_v"] + eps)
    t1 = raw["bn1_b"] - raw["bn1_m"] * s1
    s2 = raw["bn2_g"] * jax.lax.rsqrt(raw["bn2_v"] + eps)
    t2 = raw["bn2_b"] - raw["bn2_m"] * s2
    g2, gf = _build_gather_constants(n_batch)
    return {
        "gather2": g2, "gatherF": gf,
        "conv1_w": raw["conv1_w"], "conv1_b": raw["conv1_b"],
        "bn1_scale": s1.reshape(1, _C1), "bn1_shift": t1.reshape(1, _C1),
        "conv2_w": raw["conv2_w"], "conv2_b": raw["conv2_b"],
        "bn2_scale": s2.reshape(1, _C2), "bn2_shift": t2.reshape(1, _C2),
        "fc1_w": raw["fc1_w"], "fc1_b": raw["fc1_b"],
        "fc2_w": raw["fc2_w"], "fc2_b": raw["fc2_b"],
    }


if __name__ == "__main__":
    # 26x26 input so that after two (conv3x3 + maxpool2) blocks spatial = 5x5 (as fc1 expects)
    x = jax.random.normal(jax.random.PRNGKey(0), (2, 26, 26), jnp.float32)
    raw_params = init_params(jax.random.PRNGKey(42))
    kparams = prepare_params(raw_params, n_batch=2)

    fwd = jax.jit(net_forward)
    out = fwd(x, kparams)
    jax.block_until_ready(out)

    assert out.shape == (2, 2), out.shape
    assert out.dtype == jnp.float32
    # rows of log_softmax should exp-sum to 1
    assert bool(jnp.allclose(jnp.sum(jnp.exp(out), axis=1), 1.0, atol=1e-4))
    print("KERNEL_OK")
</pallas_src>

<mosaic_0001>
module attributes {stable_mosaic.version = 11 : i64} {
  func.func @_fused_net_kernel(%arg0: i32, %arg1: memref<1152x9xf32, #tpu.memory_space<vmem>>, %arg2: memref<2016x288xf32, #tpu.memory_space<vmem>>, %arg3: memref<200x56xf32, #tpu.memory_space<vmem>>, %arg4: memref<9x32xf32, #tpu.memory_space<vmem>>, %arg5: memref<1x32xf32, #tpu.memory_space<vmem>>, %arg6: memref<1x32xf32, #tpu.memory_space<vmem>>, %arg7: memref<1x32xf32, #tpu.memory_space<vmem>>, %arg8: memref<288x64xf32, #tpu.memory_space<vmem>>, %arg9: memref<1x64xf32, #tpu.memory_space<vmem>>, %arg10: memref<1x64xf32, #tpu.memory_space<vmem>>, %arg11: memref<1x64xf32, #tpu.memory_space<vmem>>, %arg12: memref<1600x128xf32, #tpu.memory_space<vmem>>, %arg13: memref<1x128xf32, #tpu.memory_space<vmem>>, %arg14: memref<128x2xf32, #tpu.memory_space<vmem>>, %arg15: memref<1x2xf32, #tpu.memory_space<vmem>>, %arg16: memref<8x2xf32, #tpu.memory_space<vmem>>) attributes {dimension_semantics = [#tpu.dimension_semantics<arbitrary>], iteration_bounds = array<i64: 1>, scalar_prefetch = 0 : i64, scratch_operands = 0 : i64, tpu.core_type = #tpu.core_type<tc>, window_params = [{pipeline_mode = #tpu.pipeline_mode<synchronous>, transform_indices = @transform_0, window_bounds = array<i64: 1152, 9>}, {pipeline_mode = #tpu.pipeline_mode<synchronous>, transform_indices = @transform_1, window_bounds = array<i64: 2016, 288>}, {pipeline_mode = #tpu.pipeline_mode<synchronous>, transform_indices = @transform_2, window_bounds = array<i64: 200, 56>}, {pipeline_mode = #tpu.pipeline_mode<synchronous>, transform_indices = @transform_3, window_bounds = array<i64: 9, 32>}, {pipeline_mode = #tpu.pipeline_mode<synchronous>, transform_indices = @transform_4, window_bounds = array<i64: 1, 32>}, {pipeline_mode = #tpu.pipeline_mode<synchronous>, transform_indices = @transform_5, window_bounds = array<i64: 1, 32>}, {pipeline_mode = #tpu.pipeline_mode<synchronous>, transform_indices = @transform_6, window_bounds = array<i64: 1, 32>}, {pipeline_mode = #tpu.pipeline_mode<synchronous>, transform_indices = @transform_7, window_bounds = array<i64: 288, 64>}, {pipeline_mode = #tpu.pipeline_mode<synchronous>, transform_indices = @transform_8, window_bounds = array<i64: 1, 64>}, {pipeline_mode = #tpu.pipeline_mode<synchronous>, transform_indices = @transform_9, window_bounds = array<i64: 1, 64>}, {pipeline_mode = #tpu.pipeline_mode<synchronous>, transform_indices = @transform_10, window_bounds = array<i64: 1, 64>}, {pipeline_mode = #tpu.pipeline_mode<synchronous>, transform_indices = @transform_11, window_bounds = array<i64: 1600, 128>}, {pipeline_mode = #tpu.pipeline_mode<synchronous>, transform_indices = @transform_12, window_bounds = array<i64: 1, 128>}, {pipeline_mode = #tpu.pipeline_mode<synchronous>, transform_indices = @transform_13, window_bounds = array<i64: 128, 2>}, {pipeline_mode = #tpu.pipeline_mode<synchronous>, transform_indices = @transform_14, window_bounds = array<i64: 1, 2>}, {pipeline_mode = #tpu.pipeline_mode<synchronous>, transform_indices = @transform_15, window_bounds = array<i64: 8, 2>}]} {
    %c0 = arith.constant 0 : index
    %c0_0 = arith.constant 0 : index
    %0 = vector.load %arg1[%c0, %c0_0] : memref<1152x9xf32, #tpu.memory_space<vmem>>, vector<1152x9xf32>
    %c0_1 = arith.constant 0 : index
    %c0_2 = arith.constant 0 : index
    %1 = vector.load %arg4[%c0_1, %c0_2] : memref<9x32xf32, #tpu.memory_space<vmem>>, vector<9x32xf32>
    %cst = arith.constant dense<0.000000e+00> : vector<1152x32xf32>
    %2 = tpu.matmul %0, %1, %cst {dimension_numbers = #tpu.dot_dimension_numbers<[1], [0], [0], [1], [0, 0, 1, 1], [], []>} : vector<1152x9xf32>, vector<9x32xf32>, vector<1152x32xf32> -> vector<1152x32xf32>
    %c0_3 = arith.constant 0 : index
    %c0_4 = arith.constant 0 : index
    %3 = vector.load %arg5[%c0_3, %c0_4] : memref<1x32xf32, #tpu.memory_space<vmem>>, vector<1x32xf32>
    %4 = vector.broadcast %3 : vector<1x32xf32> to vector<1152x32xf32>
    %5 = arith.addf %2, %4 : vector<1152x32xf32>
    %6 = vector.extract_strided_slice %5 {offsets = [0, 0], sizes = [288, 32], strides = [1, 1]} : vector<1152x32xf32> to vector<288x32xf32>
    %7 = vector.extract_strided_slice %5 {offsets = [288, 0], sizes = [288, 32], strides = [1, 1]} : vector<1152x32xf32> to vector<288x32xf32>
    %8 = arith.maximumf %6, %7 : vector<288x32xf32>
    %9 = vector.extract_strided_slice %5 {offsets = [576, 0], sizes = [288, 32], strides = [1, 1]} : vector<1152x32xf32> to vector<288x32xf32>
    %10 = vector.extract_strided_slice %5 {offsets = [864, 0], sizes = [288, 32], strides = [1, 1]} : vector<1152x32xf32> to vector<288x32xf32>
    %11 = arith.maximumf %9, %10 : vector<288x32xf32>
    %12 = arith.maximumf %8, %11 : vector<288x32xf32>
    %cst_5 = arith.constant 0.000000e+00 : f32
    %13 = vector.broadcast %cst_5 : f32 to vector<288x32xf32>
    %14 = arith.cmpf ogt, %12, %13 : vector<288x32xf32>
    %cst_6 = arith.constant 0.00999999977 : f32
    %15 = vector.broadcast %cst_6 : f32 to vector<288x32xf32>
    %16 = arith.mulf %15, %12 : vector<288x32xf32>
    %17 = arith.select %14, %12, %16 : vector<288x32xi1>, vector<288x32xf32>
    %c0_7 = arith.constant 0 : index
    %c0_8 = arith.constant 0 : index
    %18 = vector.load %arg6[%c0_7, %c0_8] : memref<1x32xf32, #tpu.memory_space<vmem>>, vector<1x32xf32>
    %19 = vector.broadcast %18 : vector<1x32xf32> to vector<288x32xf32>
    %20 = arith.mulf %17, %19 : vector<288x32xf32>
    %c0_9 = arith.constant 0 : index
    %c0_10 = arith.constant 0 : index
    %21 = vector.load %arg7[%c0_9, %c0_10] : memref<1x32xf32, #tpu.memory_space<vmem>>, vector<1x32xf32>
    %22 = vector.broadcast %21 : vector<1x32xf32> to vector<288x32xf32>
    %23 = arith.addf %20, %22 : vector<288x32xf32>
    %c0_11 = arith.constant 0 : index
    %c0_12 = arith.constant 0 : index
    %24 = vector.load %arg2[%c0_11, %c0_12] : memref<2016x288xf32, #tpu.memory_space<vmem>>, vector<2016x288xf32>
    %c0_13 = arith.constant 0 : index
    %c0_14 = arith.constant 0 : index
    %25 = vector.load %arg8[%c0_13, %c0_14] : memref<288x64xf32, #tpu.memory_space<vmem>>, vector<288x64xf32>
    %cst_15 = arith.constant 0.000000e+00 : f32
    %26 = vector.broadcast %cst_15 : f32 to vector<224x64xf32>
    %27 = vector.extract_strided_slice %24 {offsets = [0, 0], sizes = [224, 288], strides = [1, 1]} : vector<2016x288xf32> to vector<224x288xf32>
    %cst_16 = arith.constant dense<0.000000e+00> : vector<224x32xf32>
    %28 = tpu.matmul %27, %23, %cst_16 {dimension_numbers = #tpu.dot_dimension_numbers<[1], [0], [0], [1], [0, 0, 1, 1], [], []>} : vector<224x288xf32>, vector<288x32xf32>, vector<224x32xf32> -> vector<224x32xf32>
    %29 = vector.extract_strided_slice %25 {offsets = [0, 0], sizes = [32, 64], strides = [1, 1]} : vector<288x64xf32> to vector<32x64xf32>
    %cst_17 = arith.constant dense<0.000000e+00> : vector<224x64xf32>
    %30 = tpu.matmul %28, %29, %cst_17 {dimension_numbers = #tpu.dot_dimension_numbers<[1], [0], [0], [1], [0, 0, 1, 1], [], []>} : vector<224x32xf32>, vector<32x64xf32>, vector<224x64xf32> -> vector<224x64xf32>
    %31 = arith.addf %26, %30 : vector<224x64xf32>
    %32 = vector.extract_strided_slice %24 {offsets = [224, 0], sizes = [224, 288], strides = [1, 1]} : vector<2016x288xf32> to vector<224x288xf32>
    %cst_18 = arith.constant dense<0.000000e+00> : vector<224x32xf32>
    %33 = tpu.matmul %32, %23, %cst_18 {dimension_numbers = #tpu.dot_dimension_numbers<[1], [0], [0], [1], [0, 0, 1, 1], [], []>} : vector<224x288xf32>, vector<288x32xf32>, vector<224x32xf32> -> vector<224x32xf32>
    %34 = vector.extract_strided_slice %25 {offsets = [32, 0], sizes = [32, 64], strides = [1, 1]} : vector<288x64xf32> to vector<32x64xf32>
    %cst_19 = arith.constant dense<0.000000e+00> : vector<224x64xf32>
    %35 = tpu.matmul %33, %34, %cst_19 {dimension_numbers = #tpu.dot_dimension_numbers<[1], [0], [0], [1], [0, 0, 1, 1], [], []>} : vector<224x32xf32>, vector<32x64xf32>, vector<224x64xf32> -> vector<224x64xf32>
    %36 = arith.addf %31, %35 : vector<224x64xf32>
    %37 = vector.extract_strided_slice %24 {offsets = [448, 0], sizes = [224, 288], strides = [1, 1]} : vector<2016x288xf32> to vector<224x288xf32>
    %cst_20 = arith.constant dense<0.000000e+00> : vector<224x32xf32>
    %38 = tpu.matmul %37, %23, %cst_20 {dimension_numbers = #tpu.dot_dimension_numbers<[1], [0], [0], [1], [0, 0, 1, 1], [], []>} : vector<224x288xf32>, vector<288x32xf32>, vector<224x32xf32> -> vector<224x32xf32>
    %39 = vector.extract_strided_slice %25 {offsets = [64, 0], sizes = [32, 64], strides = [1, 1]} : vector<288x64xf32> to vector<32x64xf32>
    %cst_21 = arith.constant dense<0.000000e+00> : vector<224x64xf32>
    %40 = tpu.matmul %38, %39, %cst_21 {dimension_numbers = #tpu.dot_dimension_numbers<[1], [0], [0], [1], [0, 0, 1, 1], [], []>} : vector<224x32xf32>, vector<32x64xf32>, vector<224x64xf32> -> vector<224x64xf32>
    %41 = arith.addf %36, %40 : vector<224x64xf32>
    %42 = vector.extract_strided_slice %24 {offsets = [672, 0], sizes = [224, 288], strides = [1, 1]} : vector<2016x288xf32> to vector<224x288xf32>
    %cst_22 = arith.constant dense<0.000000e+00> : vector<224x32xf32>
    %43 = tpu.matmul %42, %23, %cst_22 {dimension_numbers = #tpu.dot_dimension_numbers<[1], [0], [0], [1], [0, 0, 1, 1], [], []>} : vector<224x288xf32>, vector<288x32xf32>, vector<224x32xf32> -> vector<224x32xf32>
    %44 = vector.extract_strided_slice %25 {offsets = [96, 0], sizes = [32, 64], strides = [1, 1]} : vector<288x64xf32> to vector<32x64xf32>
    %cst_23 = arith.constant dense<0.000000e+00> : vector<224x64xf32>
    %45 = tpu.matmul %43, %44, %cst_23 {dimension_numbers = #tpu.dot_dimension_numbers<[1], [0], [0], [1], [0, 0, 1, 1], [], []>} : vector<224x32xf32>, vector<32x64xf32>, vector<224x64xf32> -> vector<224x64xf32>
    %46 = arith.addf %41, %45 : vector<224x64xf32>
    %47 = vector.extract_strided_slice %24 {offsets = [896, 0], sizes = [224, 288], strides = [1, 1]} : vector<2016x288xf32> to vector<224x288xf32>
    %cst_24 = arith.constant dense<0.000000e+00> : vector<224x32xf32>
    %48 = tpu.matmul %47, %23, %cst_24 {dimension_numbers = #tpu.dot_dimension_numbers<[1], [0], [0], [1], [0, 0, 1, 1], [], []>} : vector<224x288xf32>, vector<288x32xf32>, vector<224x32xf32> -> vector<224x32xf32>
    %49 = vector.extract_strided_slice %25 {offsets = [128, 0], sizes = [32, 64], strides = [1, 1]} : vector<288x64xf32> to vector<32x64xf32>
    %cst_25 = arith.constant dense<0.000000e+00> : vector<224x64xf32>
    %50 = tpu.matmul %48, %49, %cst_25 {dimension_numbers = #tpu.dot_dimension_numbers<[1], [0], [0], [1], [0, 0, 1, 1], [], []>} : vector<224x32xf32>, vector<32x64xf32>, vector<224x64xf32> -> vector<224x64xf32>
    %51 = arith.addf %46, %50 : vector<224x64xf32>
    %52 = vector.extract_strided_slice %24 {offsets = [1120, 0], sizes = [224, 288], strides = [1, 1]} : vector<2016x288xf32> to vector<224x288xf32>
    %cst_26 = arith.constant dense<0.000000e+00> : vector<224x32xf32>
    %53 = tpu.matmul %52, %23, %cst_26 {dimension_numbers = #tpu.dot_dimension_numbers<[1], [0], [0], [1], [0, 0, 1, 1], [], []>} : vector<224x288xf32>, vector<288x32xf32>, vector<224x32xf32> -> vector<224x32xf32>
    %54 = vector.extract_strided_slice %25 {offsets = [160, 0], sizes = [32, 64], strides = [1, 1]} : vector<288x64xf32> to vector<32x64xf32>
    %cst_27 = arith.constant dense<0.000000e+00> : vector<224x64xf32>
    %55 = tpu.matmul %53, %54, %cst_27 {dimension_numbers = #tpu.dot_dimension_numbers<[1], [0], [0], [1], [0, 0, 1, 1], [], []>} : vector<224x32xf32>, vector<32x64xf32>, vector<224x64xf32> -> vector<224x64xf32>
    %56 = arith.addf %51, %55 : vector<224x64xf32>
    %57 = vector.extract_strided_slice %24 {offsets = [1344, 0], sizes = [224, 288], strides = [1, 1]} : vector<2016x288xf32> to vector<224x288xf32>
    %cst_28 = arith.constant dense<0.000000e+00> : vector<224x32xf32>
    %58 = tpu.matmul %57, %23, %cst_28 {dimension_numbers = #tpu.dot_dimension_numbers<[1], [0], [0], [1], [0, 0, 1, 1], [], []>} : vector<224x288xf32>, vector<288x32xf32>, vector<224x32xf32> -> vector<224x32xf32>
    %59 = vector.extract_strided_slice %25 {offsets = [192, 0], sizes = [32, 64], strides = [1, 1]} : vector<288x64xf32> to vector<32x64xf32>
    %cst_29 = arith.constant dense<0.000000e+00> : vector<224x64xf32>
    %60 = tpu.matmul %58, %59, %cst_29 {dimension_numbers = #tpu.dot_dimension_numbers<[1], [0], [0], [1], [0, 0, 1, 1], [], []>} : vector<224x32xf32>, vector<32x64xf32>, vector<224x64xf32> -> vector<224x64xf32>
    %61 = arith.addf %56, %60 : vector<224x64xf32>
    %62 = vector.extract_strided_slice %24 {offsets = [1568, 0], sizes = [224, 288], strides = [1, 1]} : vector<2016x288xf32> to vector<224x288xf32>
    %cst_30 = arith.constant dense<0.000000e+00> : vector<224x32xf32>
    %63 = tpu.matmul %62, %23, %cst_30 {dimension_numbers = #tpu.dot_dimension_numbers<[1], [0], [0], [1], [0, 0, 1, 1], [], []>} : vector<224x288xf32>, vector<288x32xf32>, vector<224x32xf32> -> vector<224x32xf32>
    %64 = vector.extract_strided_slice %25 {offsets = [224, 0], sizes = [32, 64], strides = [1, 1]} : vector<288x64xf32> to vector<32x64xf32>
    %cst_31 = arith.constant dense<0.000000e+00> : vector<224x64xf32>
    %65 = tpu.matmul %63, %64, %cst_31 {dimension_numbers = #tpu.dot_dimension_numbers<[1], [0], [0], [1], [0, 0, 1, 1], [], []>} : vector<224x32xf32>, vector<32x64xf32>, vector<224x64xf32> -> vector<224x64xf32>
    %66 = arith.addf %61, %65 : vector<224x64xf32>
    %67 = vector.extract_strided_slice %24 {offsets = [1792, 0], sizes = [224, 288], strides = [1, 1]} : vector<2016x288xf32> to vector<224x288xf32>
    %cst_32 = arith.constant dense<0.000000e+00> : vector<224x32xf32>
    %68 = tpu.matmul %67, %23, %cst_32 {dimension_numbers = #tpu.dot_dimension_numbers<[1], [0], [0], [1], [0, 0, 1, 1], [], []>} : vector<224x288xf32>, vector<288x32xf32>, vector<224x32xf32> -> vector<224x32xf32>
    %69 = vector.extract_strided_slice %25 {offsets = [256, 0], sizes = [32, 64], strides = [1, 1]} : vector<288x64xf32> to vector<32x64xf32>
    %cst_33 = arith.constant dense<0.000000e+00> : vector<224x64xf32>
    %70 = tpu.matmul %68, %69, %cst_33 {dimension_numbers = #tpu.dot_dimension_numbers<[1], [0], [0], [1], [0, 0, 1, 1], [], []>} : vector<224x32xf32>, vector<32x64xf32>, vector<224x64xf32> -> vector<224x64xf32>
    %71 = arith.addf %66, %70 : vector<224x64xf32>
    %c0_34 = arith.constant 0 : index
    %c0_35 = arith.constant 0 : index
    %72 = vector.load %arg9[%c0_34, %c0_35] : memref<1x64xf32, #tpu.memory_space<vmem>>, vector<1x64xf32>
    %73 = vector.broadcast %72 : vector<1x64xf32> to vector<224x64xf32>
    %74 = arith.addf %71, %73 : vector<224x64xf32>
    %75 = vector.extract_strided_slice %74 {offsets = [0, 0], sizes = [56, 64], strides = [1, 1]} : vector<224x64xf32> to vector<56x64xf32>
    %76 = vector.extract_strided_slice %74 {offsets = [56, 0], sizes = [56, 64], strides = [1, 1]} : vector<224x64xf32> to vector<56x64xf32>
    %77 = arith.maximumf %75, %76 : vector<56x64xf32>
    %78 = vector.extract_strided_slice %74 {offsets = [112, 0], sizes = [56, 64], strides = [1, 1]} : vector<224x64xf32> to vector<56x64xf32>
    %79 = vector.extract_strided_slice %74 {offsets = [168, 0], sizes = [56, 64], strides = [1, 1]} : vector<224x64xf32> to vector<56x64xf32>
    %80 = arith.maximumf %78, %79 : vector<56x64xf32>
    %81 = arith.maximumf %77, %80 : vector<56x64xf32>
    %cst_36 = arith.constant 0.000000e+00 : f32
    %82 = vector.broadcast %cst_36 : f32 to vector<56x64xf32>
    %83 = arith.cmpf ogt, %81, %82 : vector<56x64xf32>
    %cst_37 = arith.constant 0.00999999977 : f32
    %84 = vector.broadcast %cst_37 : f32 to vector<56x64xf32>
    %85 = arith.mulf %84, %81 : vector<56x64xf32>
    %86 = arith.select %83, %81, %85 : vector<56x64xi1>, vector<56x64xf32>
    %c0_38 = arith.constant 0 : index
    %c0_39 = arith.constant 0 : index
    %87 = vector.load %arg10[%c0_38, %c0_39] : memref<1x64xf32, #tpu.memory_space<vmem>>, vector<1x64xf32>
    %88 = vector.broadcast %87 : vector<1x64xf32> to vector<56x64xf32>
    %89 = arith.mulf %86, %88 : vector<56x64xf32>
    %c0_40 = arith.constant 0 : index
    %c0_41 = arith.constant 0 : index
    %90 = vector.load %arg11[%c0_40, %c0_41] : memref<1x64xf32, #tpu.memory_space<vmem>>, vector<1x64xf32>
    %91 = vector.broadcast %90 : vector<1x64xf32> to vector<56x64xf32>
    %92 = arith.addf %89, %91 : vector<56x64xf32>
    %c0_42 = arith.constant 0 : index
    %c0_43 = arith.constant 0 : index
    %93 = vector.load %arg3[%c0_42, %c0_43] : memref<200x56xf32, #tpu.memory_space<vmem>>, vector<200x56xf32>
    %cst_44 = arith.constant dense<0.000000e+00> : vector<200x64xf32>
    %94 = tpu.matmul %93, %92, %cst_44 {dimension_numbers = #tpu.dot_dimension_numbers<[1], [0], [0], [1], [0, 0, 1, 1], [], []>} : vector<200x56xf32>, vector<56x64xf32>, vector<200x64xf32> -> vector<200x64xf32>
    %c0_45 = arith.constant 0 : index
    %c0_46 = arith.constant 0 : index
    %95 = vector.load %arg12[%c0_45, %c0_46] : memref<1600x128xf32, #tpu.memory_space<vmem>>, vector<1600x128xf32>
    %cst_47 = arith.constant 0.000000e+00 : f32
    %96 = vector.broadcast %cst_47 : f32 to vector<8x128xf32>
    %97 = vector.extract_strided_slice %94 {offsets = [0, 0], sizes = [8, 64], strides = [1, 1]} : vector<200x64xf32> to vector<8x64xf32>
    %98 = vector.extract_strided_slice %95 {offsets = [0, 0], sizes = [64, 128], strides = [1, 1]} : vector<1600x128xf32> to vector<64x128xf32>
    %cst_48 = arith.constant dense<0.000000e+00> : vector<8x128xf32>
    %99 = tpu.matmul %97, %98, %cst_48 {dimension_numbers = #tpu.dot_dimension_numbers<[1], [0], [0], [1], [0, 0, 1, 1], [], []>} : vector<8x64xf32>, vector<64x128xf32>, vector<8x128xf32> -> vector<8x128xf32>
    %100 = arith.addf %96, %99 : vector<8x128xf32>
    %101 = vector.extract_strided_slice %94 {offsets = [8, 0], sizes = [8, 64], strides = [1, 1]} : vector<200x64xf32> to vector<8x64xf32>
    %102 = vector.extract_strided_slice %95 {offsets = [64, 0], sizes = [64, 128], strides = [1, 1]} : vector<1600x128xf32> to vector<64x128xf32>
    %cst_49 = arith.constant dense<0.000000e+00> : vector<8x128xf32>
    %103 = tpu.matmul %101, %102, %cst_49 {dimension_numbers = #tpu.dot_dimension_numbers<[1], [0], [0], [1], [0, 0, 1, 1], [], []>} : vector<8x64xf32>, vector<64x128xf32>, vector<8x128xf32> -> vector<8x128xf32>
    %104 = arith.addf %100, %103 : vector<8x128xf32>
    %105 = vector.extract_strided_slice %94 {offsets = [16, 0], sizes = [8, 64], strides = [1, 1]} : vector<200x64xf32> to vector<8x64xf32>
    %106 = vector.extract_strided_slice %95 {offsets = [128, 0], sizes = [64, 128], strides = [1, 1]} : vector<1600x128xf32> to vector<64x128xf32>
    %cst_50 = arith.constant dense<0.000000e+00> : vector<8x128xf32>
    %107 = tpu.matmul %105, %106, %cst_50 {dimension_numbers = #tpu.dot_dimension_numbers<[1], [0], [0], [1], [0, 0, 1, 1], [], []>} : vector<8x64xf32>, vector<64x128xf32>, vector<8x128xf32> -> vector<8x128xf32>
    %108 = arith.addf %104, %107 : vector<8x128xf32>
    %109 = vector.extract_strided_slice %94 {offsets = [24, 0], sizes = [8, 64], strides = [1, 1]} : vector<200x64xf32> to vector<8x64xf32>
    %110 = vector.extract_strided_slice %95 {offsets = [192, 0], sizes = [64, 128], strides = [1, 1]} : vector<1600x128xf32> to vector<64x128xf32>
    %cst_51 = arith.constant dense<0.000000e+00> : vector<8x128xf32>
    %111 = tpu.matmul %109, %110, %cst_51 {dimension_numbers = #tpu.dot_dimension_numbers<[1], [0], [0], [1], [0, 0, 1, 1], [], []>} : vector<8x64xf32>, vector<64x128xf32>, vector<8x128xf32> -> vector<8x128xf32>
    %112 = arith.addf %108, %111 : vector<8x128xf32>
    %113 = vector.extract_strided_slice %94 {offsets = [32, 0], sizes = [8, 64], strides = [1, 1]} : vector<200x64xf32> to vector<8x64xf32>
    %114 = vector.extract_strided_slice %95 {offsets = [256, 0], sizes = [64, 128], strides = [1, 1]} : vector<1600x128xf32> to vector<64x128xf32>
    %cst_52 = arith.constant dense<0.000000e+00> : vector<8x128xf32>
    %115 = tpu.matmul %113, %114, %cst_52 {dimension_numbers = #tpu.dot_dimension_numbers<[1], [0], [0], [1], [0, 0, 1, 1], [], []>} : vector<8x64xf32>, vector<64x128xf32>, vector<8x128xf32> -> vector<8x128xf32>
    %116 = arith.addf %112, %115 : vector<8x128xf32>
    %117 = vector.extract_strided_slice %94 {offsets = [40, 0], sizes = [8, 64], strides = [1, 1]} : vector<200x64xf32> to vector<8x64xf32>
    %118 = vector.extract_strided_slice %95 {offsets = [320, 0], sizes = [64, 128], strides = [1, 1]} : vector<1600x128xf32> to vector<64x128xf32>
    %cst_53 = arith.constant dense<0.000000e+00> : vector<8x128xf32>
    %119 = tpu.matmul %117, %118, %cst_53 {dimension_numbers = #tpu.dot_dimension_numbers<[1], [0], [0], [1], [0, 0, 1, 1], [], []>} : vector<8x64xf32>, vector<64x128xf32>, vector<8x128xf32> -> vector<8x128xf32>
    %120 = arith.addf %116, %119 : vector<8x128xf32>
    %121 = vector.extract_strided_slice %94 {offsets = [48, 0], sizes = [8, 64], strides = [1, 1]} : vector<200x64xf32> to vector<8x64xf32>
    %122 = vector.extract_strided_slice %95 {offsets = [384, 0], sizes = [64, 128], strides = [1, 1]} : vector<1600x128xf32> to vector<64x128xf32>
    %cst_54 = arith.constant dense<0.000000e+00> : vector<8x128xf32>
    %123 = tpu.matmul %121, %122, %cst_54 {dimension_numbers = #tpu.dot_dimension_numbers<[1], [0], [0], [1], [0, 0, 1, 1], [], []>} : vector<8x64xf32>, vector<64x128xf32>, vector<8x128xf32> -> vector<8x128xf32>
    %124 = arith.addf %120, %123 : vector<8x128xf32>
    %125 = vector.extract_strided_slice %94 {offsets = [56, 0], sizes = [8, 64], strides = [1, 1]} : vector<200x64xf32> to vector<8x64xf32>
    %126 = vector.extract_strided_slice %95 {offsets = [448, 0], sizes = [64, 128], strides = [1, 1]} : vector<1600x128xf32> to vector<64x128xf32>
    %cst_55 = arith.constant dense<0.000000e+00> : vector<8x128xf32>
    %127 = tpu.matmul %125, %126, %cst_55 {dimension_numbers = #tpu.dot_dimension_numbers<[1], [0], [0], [1], [0, 0, 1, 1], [], []>} : vector<8x64xf32>, vector<64x128xf32>, vector<8x128xf32> -> vector<8x128xf32>
    %128 = arith.addf %124, %127 : vector<8x128xf32>
    %129 = vector.extract_strided_slice %94 {offsets = [64, 0], sizes = [8, 64], strides = [1, 1]} : vector<200x64xf32> to vector<8x64xf32>
    %130 = vector.extract_strided_slice %95 {offsets = [512, 0], sizes = [64, 128], strides = [1, 1]} : vector<1600x128xf32> to vector<64x128xf32>
    %cst_56 = arith.constant dense<0.000000e+00> : vector<8x128xf32>
    %131 = tpu.matmul %129, %130, %cst_56 {dimension_numbers = #tpu.dot_dimension_numbers<[1], [0], [0], [1], [0, 0, 1, 1], [], []>} : vector<8x64xf32>, vector<64x128xf32>, vector<8x128xf32> -> vector<8x128xf32>
    %132 = arith.addf %128, %131 : vector<8x128xf32>
    %133 = vector.extract_strided_slice %94 {offsets = [72, 0], sizes = [8, 64], strides = [1, 1]} : vector<200x64xf32> to vector<8x64xf32>
    %134 = vector.extract_strided_slice %95 {offsets = [576, 0], sizes = [64, 128], strides = [1, 1]} : vector<1600x128xf32> to vector<64x128xf32>
    %cst_57 = arith.constant dense<0.000000e+00> : vector<8x128xf32>
    %135 = tpu.matmul %133, %134, %cst_57 {dimension_numbers = #tpu.dot_dimension_numbers<[1], [0], [0], [1], [0, 0, 1, 1], [], []>} : vector<8x64xf32>, vector<64x128xf32>, vector<8x128xf32> -> vector<8x128xf32>
    %136 = arith.addf %132, %135 : vector<8x128xf32>
    %137 = vector.extract_strided_slice %94 {offsets = [80, 0], sizes = [8, 64], strides = [1, 1]} : vector<200x64xf32> to vector<8x64xf32>
    %138 = vector.extract_strided_slice %95 {offsets = [640, 0], sizes = [64, 128], strides = [1, 1]} : vector<1600x128xf32> to vector<64x128xf32>
    %cst_58 = arith.constant dense<0.000000e+00> : vector<8x128xf32>
    %139 = tpu.matmul %137, %138, %cst_58 {dimension_numbers = #tpu.dot_dimension_numbers<[1], [0], [0], [1], [0, 0, 1, 1], [], []>} : vector<8x64xf32>, vector<64x128xf32>, vector<8x128xf32> -> vector<8x128xf32>
    %140 = arith.addf %136, %139 : vector<8x128xf32>
    %141 = vector.extract_strided_slice %94 {offsets = [88, 0], sizes = [8, 64], strides = [1, 1]} : vector<200x64xf32> to vector<8x64xf32>
    %142 = vector.extract_strided_slice %95 {offsets = [704, 0], sizes = [64, 128], strides = [1, 1]} : vector<1600x128xf32> to vector<64x128xf32>
    %cst_59 = arith.constant dense<0.000000e+00> : vector<8x128xf32>
    %143 = tpu.matmul %141, %142, %cst_59 {dimension_numbers = #tpu.dot_dimension_numbers<[1], [0], [0], [1], [0, 0, 1, 1], [], []>} : vector<8x64xf32>, vector<64x128xf32>, vector<8x128xf32> -> vector<8x128xf32>
    %144 = arith.addf %140, %143 : vector<8x128xf32>
    %145 = vector.extract_strided_slice %94 {offsets = [96, 0], sizes = [8, 64], strides = [1, 1]} : vector<200x64xf32> to vector<8x64xf32>
    %146 = vector.extract_strided_slice %95 {offsets = [768, 0], sizes = [64, 128], strides = [1, 1]} : vector<1600x128xf32> to vector<64x128xf32>
    %cst_60 = arith.constant dense<0.000000e+00> : vector<8x128xf32>
    %147 = tpu.matmul %145, %146, %cst_60 {dimension_numbers = #tpu.dot_dimension_numbers<[1], [0], [0], [1], [0, 0, 1, 1], [], []>} : vector<8x64xf32>, vector<64x128xf32>, vector<8x128xf32> -> vector<8x128xf32>
    %148 = arith.addf %144, %147 : vector<8x128xf32>
    %149 = vector.extract_strided_slice %94 {offsets = [104, 0], sizes = [8, 64], strides = [1, 1]} : vector<200x64xf32> to vector<8x64xf32>
    %150 = vector.extract_strided_slice %95 {offsets = [832, 0], sizes = [64, 128], strides = [1, 1]} : vector<1600x128xf32> to vector<64x128xf32>
    %cst_61 = arith.constant dense<0.000000e+00> : vector<8x128xf32>
    %151 = tpu.matmul %149, %150, %cst_61 {dimension_numbers = #tpu.dot_dimension_numbers<[1], [0], [0], [1], [0, 0, 1, 1], [], []>} : vector<8x64xf32>, vector<64x128xf32>, vector<8x128xf32> -> vector<8x128xf32>
    %152 = arith.addf %148, %151 : vector<8x128xf32>
    %153 = vector.extract_strided_slice %94 {offsets = [112, 0], sizes = [8, 64], strides = [1, 1]} : vector<200x64xf32> to vector<8x64xf32>
    %154 = vector.extract_strided_slice %95 {offsets = [896, 0], sizes = [64, 128], strides = [1, 1]} : vector<1600x128xf32> to vector<64x128xf32>
    %cst_62 = arith.constant dense<0.000000e+00> : vector<8x128xf32>
    %155 = tpu.matmul %153, %154, %cst_62 {dimension_numbers = #tpu.dot_dimension_numbers<[1], [0], [0], [1], [0, 0, 1, 1], [], []>} : vector<8x64xf32>, vector<64x128xf32>, vector<8x128xf32> -> vector<8x128xf32>
    %156 = arith.addf %152, %155 : vector<8x128xf32>
    %157 = vector.extract_strided_slice %94 {offsets = [120, 0], sizes = [8, 64], strides = [1, 1]} : vector<200x64xf32> to vector<8x64xf32>
    %158 = vector.extract_strided_slice %95 {offsets = [960, 0], sizes = [64, 128], strides = [1, 1]} : vector<1600x128xf32> to vector<64x128xf32>
    %cst_63 = arith.constant dense<0.000000e+00> : vector<8x128xf32>
    %159 = tpu.matmul %157, %158, %cst_63 {dimension_numbers = #tpu.dot_dimension_numbers<[1], [0], [0], [1], [0, 0, 1, 1], [], []>} : vector<8x64xf32>, vector<64x128xf32>, vector<8x128xf32> -> vector<8x128xf32>
    %160 = arith.addf %156, %159 : vector<8x128xf32>
    %161 = vector.extract_strided_slice %94 {offsets = [128, 0], sizes = [8, 64], strides = [1, 1]} : vector<200x64xf32> to vector<8x64xf32>
    %162 = vector.extract_strided_slice %95 {offsets = [1024, 0], sizes = [64, 128], strides = [1, 1]} : vector<1600x128xf32> to vector<64x128xf32>
    %cst_64 = arith.constant dense<0.000000e+00> : vector<8x128xf32>
    %163 = tpu.matmul %161, %162, %cst_64 {dimension_numbers = #tpu.dot_dimension_numbers<[1], [0], [0], [1], [0, 0, 1, 1], [], []>} : vector<8x64xf32>, vector<64x128xf32>, vector<8x128xf32> -> vector<8x128xf32>
    %164 = arith.addf %160, %163 : vector<8x128xf32>
    %165 = vector.extract_strided_slice %94 {offsets = [136, 0], sizes = [8, 64], strides = [1, 1]} : vector<200x64xf32> to vector<8x64xf32>
    %166 = vector.extract_strided_slice %95 {offsets = [1088, 0], sizes = [64, 128], strides = [1, 1]} : vector<1600x128xf32> to vector<64x128xf32>
    %cst_65 = arith.constant dense<0.000000e+00> : vector<8x128xf32>
    %167 = tpu.matmul %165, %166, %cst_65 {dimension_numbers = #tpu.dot_dimension_numbers<[1], [0], [0], [1], [0, 0, 1, 1], [], []>} : vector<8x64xf32>, vector<64x128xf32>, vector<8x128xf32> -> vector<8x128xf32>
    %168 = arith.addf %164, %167 : vector<8x128xf32>
    %169 = vector.extract_strided_slice %94 {offsets = [144, 0], sizes = [8, 64], strides = [1, 1]} : vector<200x64xf32> to vector<8x64xf32>
    %170 = vector.extract_strided_slice %95 {offsets = [1152, 0], sizes = [64, 128], strides = [1, 1]} : vector<1600x128xf32> to vector<64x128xf32>
    %cst_66 = arith.constant dense<0.000000e+00> : vector<8x128xf32>
    %171 = tpu.matmul %169, %170, %cst_66 {dimension_numbers = #tpu.dot_dimension_numbers<[1], [0], [0], [1], [0, 0, 1, 1], [], []>} : vector<8x64xf32>, vector<64x128xf32>, vector<8x128xf32> -> vector<8x128xf32>
    %172 = arith.addf %168, %171 : vector<8x128xf32>
    %173 = vector.extract_strided_slice %94 {offsets = [152, 0], sizes = [8, 64], strides = [1, 1]} : vector<200x64xf32> to vector<8x64xf32>
    %174 = vector.extract_strided_slice %95 {offsets = [1216, 0], sizes = [64, 128], strides = [1, 1]} : vector<1600x128xf32> to vector<64x128xf32>
    %cst_67 = arith.constant dense<0.000000e+00> : vector<8x128xf32>
    %175 = tpu.matmul %173, %174, %cst_67 {dimension_numbers = #tpu.dot_dimension_numbers<[1], [0], [0], [1], [0, 0, 1, 1], [], []>} : vector<8x64xf32>, vector<64x128xf32>, vector<8x128xf32> -> vector<8x128xf32>
    %176 = arith.addf %172, %175 : vector<8x128xf32>
    %177 = vector.extract_strided_slice %94 {offsets = [160, 0], sizes = [8, 64], strides = [1, 1]} : vector<200x64xf32> to vector<8x64xf32>
    %178 = vector.extract_strided_slice %95 {offsets = [1280, 0], sizes = [64, 128], strides = [1, 1]} : vector<1600x128xf32> to vector<64x128xf32>
    %cst_68 = arith.constant dense<0.000000e+00> : vector<8x128xf32>
    %179 = tpu.matmul %177, %178, %cst_68 {dimension_numbers = #tpu.dot_dimension_numbers<[1], [0], [0], [1], [0, 0, 1, 1], [], []>} : vector<8x64xf32>, vector<64x128xf32>, vector<8x128xf32> -> vector<8x128xf32>
    %180 = arith.addf %176, %179 : vector<8x128xf32>
    %181 = vector.extract_strided_slice %94 {offsets = [168, 0], sizes = [8, 64], strides = [1, 1]} : vector<200x64xf32> to vector<8x64xf32>
    %182 = vector.extract_strided_slice %95 {offsets = [1344, 0], sizes = [64, 128], strides = [1, 1]} : vector<1600x128xf32> to vector<64x128xf32>
    %cst_69 = arith.constant dense<0.000000e+00> : vector<8x128xf32>
    %183 = tpu.matmul %181, %182, %cst_69 {dimension_numbers = #tpu.dot_dimension_numbers<[1], [0], [0], [1], [0, 0, 1, 1], [], []>} : vector<8x64xf32>, vector<64x128xf32>, vector<8x128xf32> -> vector<8x128xf32>
    %184 = arith.addf %180, %183 : vector<8x128xf32>
    %185 = vector.extract_strided_slice %94 {offsets = [176, 0], sizes = [8, 64], strides = [1, 1]} : vector<200x64xf32> to vector<8x64xf32>
    %186 = vector.extract_strided_slice %95 {offsets = [1408, 0], sizes = [64, 128], strides = [1, 1]} : vector<1600x128xf32> to vector<64x128xf32>
    %cst_70 = arith.constant dense<0.000000e+00> : vector<8x128xf32>
    %187 = tpu.matmul %185, %186, %cst_70 {dimension_numbers = #tpu.dot_dimension_numbers<[1], [0], [0], [1], [0, 0, 1, 1], [], []>} : vector<8x64xf32>, vector<64x128xf32>, vector<8x128xf32> -> vector<8x128xf32>
    %188 = arith.addf %184, %187 : vector<8x128xf32>
    %189 = vector.extract_strided_slice %94 {offsets = [184, 0], sizes = [8, 64], strides = [1, 1]} : vector<200x64xf32> to vector<8x64xf32>
    %190 = vector.extract_strided_slice %95 {offsets = [1472, 0], sizes = [64, 128], strides = [1, 1]} : vector<1600x128xf32> to vector<64x128xf32>
    %cst_71 = arith.constant dense<0.000000e+00> : vector<8x128xf32>
    %191 = tpu.matmul %189, %190, %cst_71 {dimension_numbers = #tpu.dot_dimension_numbers<[1], [0], [0], [1], [0, 0, 1, 1], [], []>} : vector<8x64xf32>, vector<64x128xf32>, vector<8x128xf32> -> vector<8x128xf32>
    %192 = arith.addf %188, %191 : vector<8x128xf32>
    %193 = vector.extract_strided_slice %94 {offsets = [192, 0], sizes = [8, 64], strides = [1, 1]} : vector<200x64xf32> to vector<8x64xf32>
    %194 = vector.extract_strided_slice %95 {offsets = [1536, 0], sizes = [64, 128], strides = [1, 1]} : vector<1600x128xf32> to vector<64x128xf32>
    %cst_72 = arith.constant dense<0.000000e+00> : vector<8x128xf32>
    %195 = tpu.matmul %193, %194, %cst_72 {dimension_numbers = #tpu.dot_dimension_numbers<[1], [0], [0], [1], [0, 0, 1, 1], [], []>} : vector<8x64xf32>, vector<64x128xf32>, vector<8x128xf32> -> vector<8x128xf32>
    %196 = arith.addf %192, %195 : vector<8x128xf32>
    %c0_73 = arith.constant 0 : index
    %c0_74 = arith.constant 0 : index
    %197 = vector.load %arg13[%c0_73, %c0_74] : memref<1x128xf32, #tpu.memory_space<vmem>>, vector<1x128xf32>
    %198 = vector.broadcast %197 : vector<1x128xf32> to vector<8x128xf32>
    %199 = arith.addf %196, %198 : vector<8x128xf32>
    %cst_75 = arith.constant 0.000000e+00 : f32
    %200 = vector.broadcast %cst_75 : f32 to vector<8x128xf32>
    %201 = arith.maximumf %199, %200 : vector<8x128xf32>
    %c0_76 = arith.constant 0 : index
    %c0_77 = arith.constant 0 : index
    %202 = vector.load %arg14[%c0_76, %c0_77] : memref<128x2xf32, #tpu.memory_space<vmem>>, vector<128x2xf32>
    %cst_78 = arith.constant dense<0.000000e+00> : vector<8x2xf32>
    %203 = tpu.matmul %201, %202, %cst_78 {dimension_numbers = #tpu.dot_dimension_numbers<[1], [0], [0], [1], [0, 0, 1, 1], [], []>} : vector<8x128xf32>, vector<128x2xf32>, vector<8x2xf32> -> vector<8x2xf32>
    %c0_79 = arith.constant 0 : index
    %c0_80 = arith.constant 0 : index
    %204 = vector.load %arg15[%c0_79, %c0_80] : memref<1x2xf32, #tpu.memory_space<vmem>>, vector<1x2xf32>
    %205 = vector.broadcast %204 : vector<1x2xf32> to vector<8x2xf32>
    %206 = arith.addf %203, %205 : vector<8x2xf32>
    %cst_81 = arith.constant dense<0xFF800000> : vector<8xf32>
    %207 = vector.multi_reduction <maximumf>, %206, %cst_81 [1] : vector<8x2xf32> to vector<8xf32>
    %208 = vector.shape_cast %207 : vector<8xf32> to vector<8x1xf32>
    %209 = vector.broadcast %208 : vector<8x1xf32> to vector<8x2xf32>
    %210 = arith.subf %206, %209 : vector<8x2xf32>
    %211 = math.exp %210 : vector<8x2xf32>
    %cst_82 = arith.constant dense<0.000000e+00> : vector<8xf32>
    %212 = vector.multi_reduction <add>, %211, %cst_82 [1] : vector<8x2xf32> to vector<8xf32>
    %213 = vector.shape_cast %212 : vector<8xf32> to vector<8x1xf32>
    %214 = math.log %213 : vector<8x1xf32>
    %215 = arith.addf %208, %214 : vector<8x1xf32>
    %216 = vector.broadcast %215 : vector<8x1xf32> to vector<8x2xf32>
    %217 = arith.subf %206, %216 : vector<8x2xf32>
    %c0_83 = arith.constant 0 : index
    %c0_84 = arith.constant 0 : index
    %218 = vector.load %arg16[%c0_83, %c0_84] : memref<8x2xf32, #tpu.memory_space<vmem>>, vector<8x2xf32>
    tpu.vector_store %arg16[%c0_83, %c0_84], %217 {strides = array<i32>} : memref<8x2xf32, #tpu.memory_space<vmem>>, vector<8x2xf32>,
    return
  }
  func.func @transform_0(%arg0: i32) -> (i32, i32) {
    %c0_i32 = arith.constant 0 : i32
    %c0_i32_0 = arith.constant 0 : i32
    %c0_i32_1 = arith.constant 0 : i32
    return %c0_i32, %c0_i32_0 : i32, i32
  }
  func.func @transform_1(%arg0: i32) -> (i32, i32) {
    %c0_i32 = arith.constant 0 : i32
    %c0_i32_0 = arith.constant 0 : i32
    %c0_i32_1 = arith.constant 0 : i32
    return %c0_i32, %c0_i32_0 : i32, i32
  }
  func.func @transform_2(%arg0: i32) -> (i32, i32) {
    %c0_i32 = arith.constant 0 : i32
    %c0_i32_0 = arith.constant 0 : i32
    %c0_i32_1 = arith.constant 0 : i32
    return %c0_i32, %c0_i32_0 : i32, i32
  }
  func.func @transform_3(%arg0: i32) -> (i32, i32) {
    %c0_i32 = arith.constant 0 : i32
    %c0_i32_0 = arith.constant 0 : i32
    %c0_i32_1 = arith.constant 0 : i32
    return %c0_i32, %c0_i32_0 : i32, i32
  }
  func.func @transform_4(%arg0: i32) -> (i32, i32) {
    %c0_i32 = arith.constant 0 : i32
    %c0_i32_0 = arith.constant 0 : i32
    %c0_i32_1 = arith.constant 0 : i32
    return %c0_i32, %c0_i32_0 : i32, i32
  }
  func.func @transform_5(%arg0: i32) -> (i32, i32) {
    %c0_i32 = arith.constant 0 : i32
    %c0_i32_0 = arith.constant 0 : i32
    %c0_i32_1 = arith.constant 0 : i32
    return %c0_i32, %c0_i32_0 : i32, i32
  }
  func.func @transform_6(%arg0: i32) -> (i32, i32) {
    %c0_i32 = arith.constant 0 : i32
    %c0_i32_0 = arith.constant 0 : i32
    %c0_i32_1 = arith.constant 0 : i32
    return %c0_i32, %c0_i32_0 : i32, i32
  }
  func.func @transform_7(%arg0: i32) -> (i32, i32) {
    %c0_i32 = arith.constant 0 : i32
    %c0_i32_0 = arith.constant 0 : i32
    %c0_i32_1 = arith.constant 0 : i32
    return %c0_i32, %c0_i32_0 : i32, i32
  }
  func.func @transform_8(%arg0: i32) -> (i32, i32) {
    %c0_i32 = arith.constant 0 : i32
    %c0_i32_0 = arith.constant 0 : i32
    %c0_i32_1 = arith.constant 0 : i32
    return %c0_i32, %c0_i32_0 : i32, i32
  }
  func.func @transform_9(%arg0: i32) -> (i32, i32) {
    %c0_i32 = arith.constant 0 : i32
    %c0_i32_0 = arith.constant 0 : i32
    %c0_i32_1 = arith.constant 0 : i32
    return %c0_i32, %c0_i32_0 : i32, i32
  }
  func.func @transform_10(%arg0: i32) -> (i32, i32) {
    %c0_i32 = arith.constant 0 : i32
    %c0_i32_0 = arith.constant 0 : i32
    %c0_i32_1 = arith.constant 0 : i32
    return %c0_i32, %c0_i32_0 : i32, i32
  }
  func.func @transform_11(%arg0: i32) -> (i32, i32) {
    %c0_i32 = arith.constant 0 : i32
    %c0_i32_0 = arith.constant 0 : i32
    %c0_i32_1 = arith.constant 0 : i32
    return %c0_i32, %c0_i32_0 : i32, i32
  }
  func.func @transform_12(%arg0: i32) -> (i32, i32) {
    %c0_i32 = arith.constant 0 : i32
    %c0_i32_0 = arith.constant 0 : i32
    %c0_i32_1 = arith.constant 0 : i32
    return %c0_i32, %c0_i32_0 : i32, i32
  }
  func.func @transform_13(%arg0: i32) -> (i32, i32) {
    %c0_i32 = arith.constant 0 : i32
    %c0_i32_0 = arith.constant 0 : i32
    %c0_i32_1 = arith.constant 0 : i32
    return %c0_i32, %c0_i32_0 : i32, i32
  }
  func.func @transform_14(%arg0: i32) -> (i32, i32) {
    %c0_i32 = arith.constant 0 : i32
    %c0_i32_0 = arith.constant 0 : i32
    %c0_i32_1 = arith.constant 0 : i32
    return %c0_i32, %c0_i32_0 : i32, i32
  }
  func.func @transform_15(%arg0: i32) -> (i32, i32) {
    %c0_i32 = arith.constant 0 : i32
    %c0_i32_0 = arith.constant 0 : i32
    %c0_i32_1 = arith.constant 0 : i32
    return %c0_i32, %c0_i32_0 : i32, i32
  }
}

</mosaic_0001>

<bundles_post_ra>
// kernel: net_forward.1
= control target key start
LH: loop header
LB: loop body
LE: loop exit
PB: predicated region body
PF: predicated region fallthrough
CT: control target
= control target key end

     0   :  { %vm633_vm0 = vcmask 1040384   ;;  %vm200_vm1 = vcmask 72704   ;;  %s16735_s3 = inlined_call_operand.vmem [shape: f32[9,32], index: 3, kind: input, shape index: {}]   ;;  %s16736_s0 = inlined_call_operand.vmem [shape: f32[1152,9], index: 0, kind: input, shape index: {}]   ;;  %s16737_s4 = inlined_call_operand.vmem [shape: f32[1,32], index: 4, kind: input, shape index: {}]   ;;  %s16738_s5 = inlined_call_operand.vmem [shape: f32[1,32], index: 5, kind: input, shape index: {}]   ;;  %s16739_s6 = inlined_call_operand.vmem [shape: f32[1,32], index: 6, kind: input, shape index: {}]   ;;  %s16740_s1 = inlined_call_operand.vmem [shape: f32[2016,288], index: 1, kind: input, shape index: {}]   ;;  %s16741_s7 = inlined_call_operand.vmem [shape: f32[288,64], index: 7, kind: input, shape index: {}]   ;;  %s16742_s8 = inlined_call_operand.vmem [shape: f32[1,64], index: 8, kind: input, shape index: {}]   ;;  %s16743_s9 = inlined_call_operand.vmem [shape: f32[1,64], index: 9, kind: input, shape index: {}]   ;;  %s16744_s10 = inlined_call_operand.vmem [shape: f32[1,64], index: 10, kind: input, shape index: {}]   ;;  %s16745_s2 = inlined_call_operand.vmem [shape: f32[200,56], index: 2, kind: input, shape index: {}]   ;;  %s16746_s11 = inlined_call_operand.vmem [shape: f32[1600,128], index: 11, kind: input, shape index: {}]   ;;  %s16747_s12 = inlined_call_operand.vmem [shape: f32[1,128], index: 12, kind: input, shape index: {}]   ;;  %s16748_s14 = inlined_call_operand.vmem [shape: f32[1,2], index: 14, kind: input, shape index: {}]   ;;  %s16749_s13 = inlined_call_operand.vmem [shape: f32[128,2], index: 13, kind: input, shape index: {}]   ;;  %s16750_s15 = inlined_call_operand.vmem [shape: f32[8,2], index: 15, kind: output, shape index: {}]  }
   0x1   :  { %v195_v0 = vld [vmem:[%s16735_s3 + $0x8] sm:$0x1]  ;;  %v194_v1 = vld [vmem:[%s16735_s3] sm:$0xff]  ;;  %v52_v4 = vld [vmem:[%s16736_s0 + $0x10] sm:$0xff] }
   0x2   :  { %8672 = vmatpush.msk.msra.mxu0 %vm633_vm0, %v195_v0  ;;  %v50_v2 = vld [vmem:[%s16736_s0] sm:$0xff]  ;;  %v51_v3 = vld [vmem:[%s16736_s0 + $0x8] sm:$0xff]  ;;  %v53_v5 = vld [vmem:[%s16736_s0 + $0x18] sm:$0xff] }
   0x3   :  { %v54_v6 = vld [vmem:[%s16736_s0 + $0x20] sm:$0xff]  ;;  %v55_v7 = vld [vmem:[%s16736_s0 + $0x28] sm:$0xff]  ;;  %v56_v8 = vld [vmem:[%s16736_s0 + $0x30] sm:$0xff] }
   0x4   :  { %652 = vmatpush.msra.mxu0 %v194_v1  ;;  %v57_v9 = vld [vmem:[%s16736_s0 + $0x38] sm:$0xff]  ;;  %v58_v10 = vld [vmem:[%s16736_s0 + $0x40] sm:$0xff]  ;;  %v59_v11 = vld [vmem:[%s16736_s0 + $0x48] sm:$0xff] }
   0x5   :  { %8673 = vmatmul.msk.f32.vlgmr.msra.gmra.mxu0 %vm200_vm1, %v50_v2  ;;  %v60_v12 = vld [vmem:[%s16736_s0 + $0x50] sm:$0xff]  ;;  %v61_v13 = vld [vmem:[%s16736_s0 + $0x58] sm:$0xff]  ;;  %v62_v14 = vld [vmem:[%s16736_s0 + $0x60] sm:$0xff] }
   0x6   :  { %v63_v15 = vld [vmem:[%s16736_s0 + $0x68] sm:$0xff]  ;;  %v64_v16 = vld [vmem:[%s16736_s0 + $0x70] sm:$0xff]  ;;  %v65_v17 = vld [vmem:[%s16736_s0 + $0x78] sm:$0xff] }
   0x7   :  { %v66_v19 = vld [vmem:[%s16736_s0 + $0x80] sm:$0xff]  ;;  %v67_v21 = vld [vmem:[%s16736_s0 + $0x88] sm:$0xff]  ;;  %v68_v23 = vld [vmem:[%s16736_s0 + $0x90] sm:$0xff] }
   0x8   :  { %v69_v25 = vld [vmem:[%s16736_s0 + $0x98] sm:$0xff]  ;;  %v70_v27 = vld [vmem:[%s16736_s0 + $0xa0] sm:$0xff]  ;;  %v71_v29 = vld [vmem:[%s16736_s0 + $0xa8] sm:$0xff] }
   0x9   :  { %v72_v31 = vld [vmem:[%s16736_s0 + $0xb0] sm:$0xff]  ;;  %v73_v33 = vld [vmem:[%s16736_s0 + $0xb8] sm:$0xff]  ;;  %v74_v35 = vld [vmem:[%s16736_s0 + $0xc0] sm:$0xff] }
   0xa   :  { %v75_v37 = vld [vmem:[%s16736_s0 + $0xc8] sm:$0xff]  ;;  %v76_v39 = vld [vmem:[%s16736_s0 + $0xd0] sm:$0xff]  ;;  %v77_v41 = vld [vmem:[%s16736_s0 + $0xd8] sm:$0xff] }
   0xb   :  { %v78_v43 = vld [vmem:[%s16736_s0 + $0xe0] sm:$0xff]  ;;  %v79_v45 = vld [vmem:[%s16736_s0 + $0xe8] sm:$0xff]  ;;  %v80_v47 = vld [vmem:[%s16736_s0 + $0xf0] sm:$0xff] }
   0xc   :  { %v81_v49 = vld [vmem:[%s16736_s0 + $0xf8] sm:$0xff]  ;;  %v82_v51 = vld [vmem:[%s16736_s0 + $0x100] sm:$0xff]  ;;  %v83_v53 = vld [vmem:[%s16736_s0 + $0x108] sm:$0xff] }
   0xd   :  { %8674 = vmatmul.msk.f32.gmra.mxu0 %vm200_vm1, %v51_v3  ;;  %v84_v55 = vld [vmem:[%s16736_s0 + $0x110] sm:$0xff]  ;;  %v85_v57 = vld [vmem:[%s16736_s0 + $0x118] sm:$0xff]  ;;  %v86_v59 = vld [vmem:[%s16736_s0 + $0x120] sm:$0xff] }
   0xe   :  { %v87_v61 = vld [vmem:[%s16736_s0 + $0x128] sm:$0xff]  ;;  %v88_v63 = vld [vmem:[%s16736_s0 + $0x130] sm:$0xff]  ;;  %v89_v1 = vld [vmem:[%s16736_s0 + $0x138] sm:$0xff] }
   0xf   :  { %v90_v3 = vld [vmem:[%s16736_s0 + $0x140] sm:$0xff] }
  0x15   :  { %8675 = vmatmul.msk.f32.gmra.mxu0 %vm200_vm1, %v52_v4 }
  0x1d   :  { %8676 = vmatmul.msk.f32.gmra.mxu0 %vm200_vm1, %v53_v5  ;;  %v91_v5 = vld [vmem:[%s16736_s0 + $0x148] sm:$0xff] }
  0x25   :  { %8677 = vmatmul.msk.f32.gmra.mxu0 %vm200_vm1, %v54_v6 }
  0x2d   :  { %8678 = vmatmul.msk.f32.gmra.mxu0 %vm200_vm1, %v55_v7  ;;  %v92_v7 = vld [vmem:[%s16736_s0 + $0x150] sm:$0xff] }
  0x35   :  { %8679 = vmatmul.msk.f32.gmra.mxu0 %vm200_vm1, %v56_v8 }
  0x3d   :  { %8680 = vmatmul.msk.f32.gmra.mxu0 %vm200_vm1, %v57_v9  ;;  %v93_v9 = vld [vmem:[%s16736_s0 + $0x158] sm:$0xff] }
  0x45   :  { %8681 = vmatmul.msk.f32.gmra.mxu0 %vm200_vm1, %v58_v10 }
  0x4d   :  { %8682 = vmatmul.msk.f32.gmra.mxu0 %vm200_vm1, %v59_v11  ;;  %v94_v11 = vld [vmem:[%s16736_s0 + $0x160] sm:$0xff] }
  0x55   :  { %8683 = vmatmul.msk.f32.gmra.mxu0 %vm200_vm1, %v60_v12 }
  0x5d   :  { %8684 = vmatmul.msk.f32.gmra.mxu0 %vm200_vm1, %v61_v13  ;;  %v95_v13 = vld [vmem:[%s16736_s0 + $0x168] sm:$0xff] }
  0x65   :  { %8685 = vmatmul.msk.f32.gmra.mxu0 %vm200_vm1, %v62_v14 }
  0x6d   :  { %8686 = vmatmul.msk.f32.gmra.mxu0 %vm200_vm1, %v63_v15  ;;  %v96_v15 = vld [vmem:[%s16736_s0 + $0x170] sm:$0xff] }
  0x75   :  { %8687 = vmatmul.msk.f32.gmra.mxu0 %vm200_vm1, %v64_v16 }
  0x7d   :  { %8688 = vmatmul.msk.f32.gmra.mxu0 %vm200_vm1, %v65_v17  ;;  %v97_v17 = vld [vmem:[%s16736_s0 + $0x178] sm:$0xff] }
  0x82   :  { %v9550_v18 = vpop.f32.mrf.mxu0 }
  0x85   :  { %8689 = vmatmul.msk.f32.gmra.mxu0 %vm200_vm1, %v66_v19 }
  0x8a   :  { %v9556_v20 = vpop.f32.mrf.mxu0 }
  0x8d   :  { %8690 = vmatmul.msk.f32.gmra.mxu0 %vm200_vm1, %v67_v21  ;;  %v98_v21 = vld [vmem:[%s16736_s0 + $0x180] sm:$0xff] }
  0x92   :  { %v9562_v22 = vpop.f32.mrf.mxu0 }
  0x95   :  { %8691 = vmatmul.msk.f32.gmra.mxu0 %vm200_vm1, %v68_v23 }
  0x9a   :  { %v9568_v24 = vpop.f32.mrf.mxu0 }
  0x9d   :  { %8692 = vmatmul.msk.f32.gmra.mxu0 %vm200_vm1, %v69_v25  ;;  %v99_v25 = vld [vmem:[%s16736_s0 + $0x188] sm:$0xff] }
  0xa2   :  { %v9574_v26 = vpop.f32.mrf.mxu0 }
  0xa5   :  { %8693 = vmatmul.msk.f32.gmra.mxu0 %vm200_vm1, %v70_v27 }
  0xaa   :  { %v9580_v28 = vpop.f32.mrf.mxu0 }
  0xad   :  { %8694 = vmatmul.msk.f32.gmra.mxu0 %vm200_vm1, %v71_v29  ;;  %v100_v29 = vld [vmem:[%s16736_s0 + $0x190] sm:$0xff] }
  0xb2   :  { %v9586_v30 = vpop.f32.mrf.mxu0 }
  0xb5   :  { %8695 = vmatmul.msk.f32.gmra.mxu0 %vm200_vm1, %v72_v31 }
  0xba   :  { %v9592_v32 = vpop.f32.mrf.mxu0 }
  0xbd   :  { %8696 = vmatmul.msk.f32.gmra.mxu0 %vm200_vm1, %v73_v33  ;;  %v101_v33 = vld [vmem:[%s16736_s0 + $0x198] sm:$0xff] }
  0xc2   :  { %v9598_v34 = vpop.f32.mrf.mxu0 }
  0xc5   :  { %8697 = vmatmul.msk.f32.gmra.mxu0 %vm200_vm1, %v74_v35 }
  0xca   :  { %v9604_v36 = vpop.f32.mrf.mxu0 }
  0xcd   :  { %8698 = vmatmul.msk.f32.gmra.mxu0 %vm200_vm1, %v75_v37  ;;  %v102_v37 = vld [vmem:[%s16736_s0 + $0x1a0] sm:$0xff] }
  0xd2   :  { %v9610_v38 = vpop.f32.mrf.mxu0 }
  0xd5   :  { %8699 = vmatmul.msk.f32.gmra.mxu0 %vm200_vm1, %v76_v39 }
  0xda   :  { %v9616_v40 = vpop.f32.mrf.mxu0 }
  0xdd   :  { %8700 = vmatmul.msk.f32.gmra.mxu0 %vm200_vm1, %v77_v41  ;;  %v103_v41 = vld [vmem:[%s16736_s0 + $0x1a8] sm:$0xff] }
  0xe2   :  { %v9622_v42 = vpop.f32.mrf.mxu0 }
  0xe5   :  { %8701 = vmatmul.msk.f32.gmra.mxu0 %vm200_vm1, %v78_v43 }
  0xea   :  { %v9628_v44 = vpop.f32.mrf.mxu0 }
  0xed   :  { %8702 = vmatmul.msk.f32.gmra.mxu0 %vm200_vm1, %v79_v45  ;;  %v104_v45 = vld [vmem:[%s16736_s0 + $0x1b0] sm:$0xff] }
  0xf2   :  { %v9634_v46 = vpop.f32.mrf.mxu0 }
  0xf5   :  { %8703 = vmatmul.msk.f32.gmra.mxu0 %vm200_vm1, %v80_v47 }
  0xfa   :  { %v9640_v48 = vpop.f32.mrf.mxu0 }
  0xfd   :  { %8704 = vmatmul.msk.f32.gmra.mxu0 %vm200_vm1, %v81_v49  ;;  %v105_v49 = vld [vmem:[%s16736_s0 + $0x1b8] sm:$0xff] }
 0x102   :  { %v9646_v50 = vpop.f32.mrf.mxu0 }
 0x103   :  { %16838 = vst [vmem:[#allocation2_spill] sm:$0xff] %v9646_v50 }
 0x105   :  { %8705 = vmatmul.msk.f32.gmra.mxu0 %vm200_vm1, %v82_v51 }
 0x10a   :  { %v9652_v52 = vpop.f32.mrf.mxu0 }
 0x10b   :  { %16839 = vst [vmem:[#allocation3_spill] sm:$0xff] %v9652_v52 }
 0x10d   :  { %8706 = vmatmul.msk.f32.gmra.mxu0 %vm200_vm1, %v83_v53  ;;  %v106_v53 = vld [vmem:[%s16736_s0 + $0x1c0] sm:$0xff] }
 0x112   :  { %v9658_v54 = vpop.f32.mrf.mxu0 }
 0x113   :  { %16840 = vst [vmem:[#allocation4_spill] sm:$0xff] %v9658_v54 }
 0x115   :  { %8707 = vmatmul.msk.f32.gmra.mxu0 %vm200_vm1, %v84_v55 }
 0x11a   :  { %v9664_v56 = vpop.f32.mrf.mxu0 }
 0x11b   :  { %16841 = vst [vmem:[#allocation5_spill] sm:$0xff] %v9664_v56 }
 0x11d   :  { %8708 = vmatmul.msk.f32.gmra.mxu0 %vm200_vm1, %v85_v57  ;;  %v107_v57 = vld [vmem:[%s16736_s0 + $0x1c8] sm:$0xff] }
 0x122   :  { %v9670_v58 = vpop.f32.mrf.mxu0 }
 0x123   :  { %16842 = vst [vmem:[#allocation6_spill] sm:$0xff] %v9670_v58 }
 0x125   :  { %8709 = vmatmul.msk.f32.gmra.mxu0 %vm200_vm1, %v86_v59 }
 0x12a   :  { %v9676_v60 = vpop.f32.mrf.mxu0 }
 0x12b   :  { %16843 = vst [vmem:[#allocation7_spill] sm:$0xff] %v9676_v60 }
 0x12d   :  { %8710 = vmatmul.msk.f32.gmra.mxu0 %vm200_vm1, %v87_v61  ;;  %v108_v61 = vld [vmem:[%s16736_s0 + $0x1d0] sm:$0xff] }
 0x132   :  { %v9682_v62 = vpop.f32.mrf.mxu0 }
 0x133   :  { %16844 = vst [vmem:[#allocation8_spill] sm:$0xff] %v9682_v62 }
 0x135   :  { %8711 = vmatmul.msk.f32.gmra.mxu0 %vm200_vm1, %v88_v63 }
 0x13a   :  { %v9688_v0 = vpop.f32.mrf.mxu0 }
 0x13b   :  { %16845 = vst [vmem:[#allocation9_spill] sm:$0xff] %v9688_v0 }
 0x13d   :  { %8712 = vmatmul.msk.f32.gmra.mxu0 %vm200_vm1, %v89_v1  ;;  %v109_v1 = vld [vmem:[%s16736_s0 + $0x1d8] sm:$0xff] }
 0x142   :  { %v9694_v2 = vpop.f32.mrf.mxu0 }
 0x143   :  { %16846 = vst [vmem:[#allocation10_spill] sm:$0xff] %v9694_v2 }
 0x145   :  { %8713 = vmatmul.msk.f32.gmra.mxu0 %vm200_vm1, %v90_v3 }
 0x14a   :  { %v9700_v4 = vpop.f32.mrf.mxu0 }
 0x14b   :  { %16847 = vst [vmem:[#allocation11_spill] sm:$0xff] %v9700_v4 }
 0x14d   :  { %8714 = vmatmul.msk.f32.gmra.mxu0 %vm200_vm1, %v91_v5  ;;  %v110_v5 = vld [vmem:[%s16736_s0 + $0x1e0] sm:$0xff] }
 0x152   :  { %v9706_v6 = vpop.f32.mrf.mxu0 }
 0x153   :  { %16848 = vst [vmem:[#allocation12_spill] sm:$0xff] %v9706_v6 }
 0x155   :  { %8715 = vmatmul.msk.f32.gmra.mxu0 %vm200_vm1, %v92_v7 }
 0x15a   :  { %v9712_v8 = vpop.f32.mrf.mxu0 }
 0x15b   :  { %16849 = vst [vmem:[#allocation13_spill] sm:$0xff] %v9712_v8 }
 0x15d   :  { %8716 = vmatmul.msk.f32.gmra.mxu0 %vm200_vm1, %v93_v9  ;;  %v111_v9 = vld [vmem:[%s16736_s0 + $0x1e8] sm:$0xff] }
 0x162   :  { %v9718_v10 = vpop.f32.mrf.mxu0 }
 0x163   :  { %16850 = vst [vmem:[#allocation14_spill] sm:$0xff] %v9718_v10 }
 0x165   :  { %8717 = vmatmul.msk.f32.gmra.mxu0 %vm200_vm1, %v94_v11 }
 0x16a   :  { %v9724_v12 = vpop.f32.mrf.mxu0 }
 0x16b   :  { %16851 = vst [vmem:[#allocation15_spill] sm:$0xff] %v9724_v12 }
 0x16d   :  { %8718 = vmatmul.msk.f32.gmra.mxu0 %vm200_vm1, %v95_v13  ;;  %v112_v13 = vld [vmem:[%s16736_s0 + $0x1f0] sm:$0xff] }
 0x172   :  { %v9730_v14 = vpop.f32.mrf.mxu0 }
 0x173   :  { %16852 = vst [vmem:[#allocation16_spill] sm:$0xff] %v9730_v14 }
 0x175   :  { %8719 = vmatmul.msk.f32.gmra.mxu0 %vm200_vm1, %v96_v15 }
 0x17a   :  { %v9736_v16 = vpop.f32.mrf.mxu0 }
 0x17b   :  { %16853 = vst [vmem:[#allocation17_spill] sm:$0xff] %v9736_v16 }
 0x17d   :  { %8720 = vmatmul.msk.f32.gmra.mxu0 %vm200_vm1, %v97_v17  ;;  %v113_v17 = vld [vmem:[%s16736_s0 + $0x1f8] sm:$0xff] }
 0x182   :  { %v9742_v19 = vpop.f32.mrf.mxu0 }
 0x183   :  { %16854 = vst [vmem:[#allocation18_spill] sm:$0xff] %v9742_v19 }
 0x185   :  { %8721 = vmatmul.msk.f32.gmra.mxu0 %vm200_vm1, %v98_v21 }
 0x18a   :  { %v9748_v23 = vpop.f32.mrf.mxu0 }
 0x18b   :  { %16855 = vst [vmem:[#allocation19_spill] sm:$0xff] %v9748_v23 }
 0x18d   :  { %8722 = vmatmul.msk.f32.gmra.mxu0 %vm200_vm1, %v99_v25  ;;  %v114_v25 = vld [vmem:[%s16736_s0 + $0x200] sm:$0xff] }
 0x192   :  { %v9754_v27 = vpop.f32.mrf.mxu0 }
 0x193   :  { %16856 = vst [vmem:[#allocation20_spill] sm:$0xff] %v9754_v27 }
 0x195   :  { %8723 = vmatmul.msk.f32.gmra.mxu0 %vm200_vm1, %v100_v29 }
 0x19a   :  { %v9760_v31 = vpop.f32.mrf.mxu0 }
 0x19b   :  { %16857 = vst [vmem:[#allocation21_spill] sm:$0xff] %v9760_v31 }
 0x19d   :  { %8724 = vmatmul.msk.f32.gmra.mxu0 %vm200_vm1, %v101_v33  ;;  %v115_v33 = vld [vmem:[%s16736_s0 + $0x208] sm:$0xff] }
 0x1a2   :  { %v9766_v35 = vpop.f32.mrf.mxu0 }
 0x1a5   :  { %8725 = vmatmul.msk.f32.gmra.mxu0 %vm200_vm1, %v102_v37 }
 0x1aa   :  { %v9772_v39 = vpop.f32.mrf.mxu0 }
 0x1ad   :  { %8726 = vmatmul.msk.f32.gmra.mxu0 %vm200_vm1, %v103_v41  ;;  %v116_v41 = vld [vmem:[%s16736_s0 + $0x210] sm:$0xff] }
 0x1b2   :  { %v9778_v43 = vpop.f32.mrf.mxu0 }
 0x1b5   :  { %8727 = vmatmul.msk.f32.gmra.mxu0 %vm200_vm1, %v104_v45 }
 0x1ba   :  { %v9784_v47 = vpop.f32.mrf.mxu0 }
 0x1bd   :  { %8728 = vmatmul.msk.f32.gmra.mxu0 %vm200_vm1, %v105_v49  ;;  %v117_v49 = vld [vmem:[%s16736_s0 + $0x218] sm:$0xff] }
 0x1c2   :  { %v9790_v51 = vpop.f32.mrf.mxu0 }
 0x1c5   :  { %8729 = vmatmul.msk.f32.gmra.mxu0 %vm200_vm1, %v106_v53 }
 0x1ca   :  { %v9796_v55 = vpop.f32.mrf.mxu0 }
 0x1cd   :  { %8730 = vmatmul.msk.f32.gmra.mxu0 %vm200_vm1, %v107_v57  ;;  %v118_v57 = vld [vmem:[%s16736_s0 + $0x220] sm:$0xff] }
 0x1d2   :  { %v9802_v59 = vpop.f32.mrf.mxu0 }
 0x1d5   :  { %8731 = vmatmul.msk.f32.gmra.mxu0 %vm200_vm1, %v108_v61 }
 0x1da   :  { %v9808_v63 = vpop.f32.mrf.mxu0 }
 0x1dd   :  { %8732 = vmatmul.msk.f32.gmra.mxu0 %vm200_vm1, %v109_v1  ;;  %v119_v1 = vld [vmem:[%s16736_s0 + $0x228] sm:$0xff] }
 0x1e2   :  { %v9814_v3 = vpop.f32.mrf.mxu0 }
 0x1e5   :  { %8733 = vmatmul.msk.f32.gmra.mxu0 %vm200_vm1, %v110_v5 }
 0x1ea   :  { %v9820_v7 = vpop.f32.mrf.mxu0 }
 0x1ed   :  { %8734 = vmatmul.msk.f32.gmra.mxu0 %vm200_vm1, %v111_v9  ;;  %v120_v9 = vld [vmem:[%s16736_s0 + $0x230] sm:$0xff] }
 0x1f2   :  { %v9826_v11 = vpop.f32.mrf.mxu0 }
 0x1f5   :  { %8735 = vmatmul.msk.f32.gmra.mxu0 %vm200_vm1, %v112_v13 }
 0x1fa   :  { %v9832_v15 = vpop.f32.mrf.mxu0 }
 0x1fd   :  { %8736 = vmatmul.msk.f32.gmra.mxu0 %vm200_vm1, %v113_v17  ;;  %v121_v17 = vld [vmem:[%s16736_s0 + $0x238] sm:$0xff] }
 0x202   :  { %v9838_v21 = vpop.f32.mrf.mxu0 }
 0x205   :  { %8737 = vmatmul.msk.f32.gmra.mxu0 %vm200_vm1, %v114_v25 }
 0x20a   :  { %v9844_v29 = vpop.f32.mrf.mxu0 }
 0x20d   :  { %8738 = vmatmul.msk.f32.gmra.mxu0 %vm200_vm1, %v115_v33  ;;  %v122_v33 = vld [vmem:[%s16736_s0 + $0x240] sm:$0xff] }
 0x212   :  { %v9850_v37 = vpop.f32.mrf.mxu0 }
 0x215   :  { %8739 = vmatmul.msk.f32.gmra.mxu0 %vm200_vm1, %v116_v41 }
 0x21a   :  { %v9856_v45 = vpop.f32.mrf.mxu0 }
 0x21d   :  { %8740 = vmatmul.msk.f32.gmra.mxu0 %vm200_vm1, %v117_v49  ;;  %v123_v49 = vld [vmem:[%s16736_s0 + $0x248] sm:$0xff] }
 0x222   :  { %v9862_v53 = vpop.f32.mrf.mxu0 }
 0x223   :  { %16858 = vst [vmem:[#allocation22_spill] sm:$0xff] %v9862_v53 }
 0x225   :  { %8741 = vmatmul.msk.f32.gmra.mxu0 %vm200_vm1, %v118_v57 }
 0x22a   :  { %v9868_v61 = vpop.f32.mrf.mxu0 }
 0x22b   :  { %16859 = vst [vmem:[#allocation23_spill] sm:$0xff] %v9868_v61 }
 0x22d   :  { %8742 = vmatmul.msk.f32.gmra.mxu0 %vm200_vm1, %v119_v1  ;;  %v124_v1 = vld [vmem:[%s16736_s0 + $0x250] sm:$0xff] }
 0x232   :  { %v9874_v5 = vpop.f32.mrf.mxu0 }
 0x233   :  { %16860 = vst [vmem:[#allocation24_spill] sm:$0xff] %v9874_v5 }
 0x235   :  { %8743 = vmatmul.msk.f32.gmra.mxu0 %vm200_vm1, %v120_v9 }
 0x23a   :  { %v9880_v13 = vpop.f32.mrf.mxu0 }
 0x23b   :  { %16861 = vst [vmem:[#allocation25_spill] sm:$0xff] %v9880_v13 }
 0x23d   :  { %8744 = vmatmul.msk.f32.gmra.mxu0 %vm200_vm1, %v121_v17  ;;  %v125_v17 = vld [vmem:[%s16736_s0 + $0x258] sm:$0xff] }
 0x242   :  { %v9886_v25 = vpop.f32.mrf.mxu0 }
 0x243   :  { %16862 = vst [vmem:[#allocation26_spill] sm:$0xff] %v9886_v25 }
 0x245   :  { %8745 = vmatmul.msk.f32.gmra.mxu0 %vm200_vm1, %v122_v33 }
 0x24a   :  { %v9892_v41 = vpop.f32.mrf.mxu0 }
 0x24b   :  { %16863 = vst [vmem:[#allocation27_spill] sm:$0xff] %v9892_v41 }
 0x24d   :  { %8746 = vmatmul.msk.f32.gmra.mxu0 %vm200_vm1, %v123_v49  ;;  %v126_v49 = vld [vmem:[%s16736_s0 + $0x260] sm:$0xff] }
 0x252   :  { %v9898_v57 = vpop.f32.mrf.mxu0 }
 0x253   :  { %16864 = vst [vmem:[#allocation28_spill] sm:$0xff] %v9898_v57 }
 0x255   :  { %8747 = vmatmul.msk.f32.gmra.mxu0 %vm200_vm1, %v124_v1  ;;  %v127_v1 = vld [vmem:[%s16736_s0 + $0x268] sm:$0xff] }
 0x25a   :  { %v9904_v9 = vpop.f32.mrf.mxu0 }
 0x25b   :  { %16865 = vst [vmem:[#allocation29_spill] sm:$0xff] %v9904_v9 }
 0x25d   :  { %8748 = vmatmul.msk.f32.gmra.mxu0 %vm200_vm1, %v125_v17  ;;  %v128_v17 = vld [vmem:[%s16736_s0 + $0x270] sm:$0xff] }
 0x262   :  { %v9910_v33 = vpop.f32.mrf.mxu0 }
 0x263   :  { %16866 = vst [vmem:[#allocation30_spill] sm:$0xff] %v9910_v33 }
 0x265   :  { %8749 = vmatmul.msk.f32.gmra.mxu0 %vm200_vm1, %v126_v49  ;;  %v129_v49 = vld [vmem:[%s16736_s0 + $0x278] sm:$0xff] }
 0x26a   :  { %v9916_v31 = vpop.f32.mrf.mxu0 }
 0x26b   :  { %16867 = vst [vmem:[#allocation31_spill] sm:$0xff] %v9916_v31 }
 0x26d   :  { %8750 = vmatmul.msk.f32.gmra.mxu0 %vm200_vm1, %v127_v1  ;;  %v130_v1 = vld [vmem:[%s16736_s0 + $0x280] sm:$0xff] }
 0x272   :  { %v9922_v9 = vpop.f32.mrf.mxu0 }
 0x273   :  { %16868 = vst [vmem:[#allocation32_spill] sm:$0xff] %v9922_v9 }
 0x275   :  { %8751 = vmatmul.msk.f32.gmra.mxu0 %vm200_vm1, %v128_v17  ;;  %v131_v17 = vld [vmem:[%s16736_s0 + $0x288] sm:$0xff] }
 0x27a   :  { %v9928_v33 = vpop.f32.mrf.mxu0 }
 0x27b   :  { %16869 = vst [vmem:[#allocation33_spill] sm:$0xff] %v9928_v33 }
 0x27d   :  { %8752 = vmatmul.msk.f32.gmra.mxu0 %vm200_vm1, %v129_v49  ;;  %v132_v49 = vld [vmem:[%s16736_s0 + $0x290] sm:$0xff] }
 0x282   :  { %v9934_v31 = vpop.f32.mrf.mxu0 }
 0x283   :  { %16870 = vst [vmem:[#allocation34_spill] sm:$0xff] %v9934_v31 }
 0x285   :  { %8753 = vmatmul.msk.f32.gmra.mxu0 %vm200_vm1, %v130_v1  ;;  %v133_v1 = vld [vmem:[%s16736_s0 + $0x298] sm:$0xff] }
 0x28a   :  { %v9940_v9 = vpop.f32.mrf.mxu0 }
 0x28b   :  { %16871 = vst [vmem:[#allocation35_spill] sm:$0xff] %v9940_v9 }
 0x28d   :  { %8754 = vmatmul.msk.f32.gmra.mxu0 %vm200_vm1, %v131_v17  ;;  %v134_v17 = vld [vmem:[%s16736_s0 + $0x2a0] sm:$0xff] }
 0x292   :  { %v9946_v33 = vpop.f32.mrf.mxu0 }
 0x293   :  { %16872 = vst [vmem:[#allocation36_spill] sm:$0xff] %v9946_v33 }
 0x295   :  { %8755 = vmatmul.msk.f32.gmra.mxu0 %vm200_vm1, %v132_v49  ;;  %v135_v49 = vld [vmem:[%s16736_s0 + $0x2a8] sm:$0xff] }
 0x29a   :  { %v9952_v31 = vpop.f32.mrf.mxu0 }
 0x29b   :  { %16873 = vst [vmem:[#allocation37_spill] sm:$0xff] %v9952_v31 }
 0x29d   :  { %8756 = vmatmul.msk.f32.gmra.mxu0 %vm200_vm1, %v133_v1  ;;  %v136_v1 = vld [vmem:[%s16736_s0 + $0x2b0] sm:$0xff] }
 0x2a2   :  { %v9958_v9 = vpop.f32.mrf.mxu0 }
 0x2a3   :  { %16874 = vst [vmem:[#allocation38_spill] sm:$0xff] %v9958_v9 }
 0x2a5   :  { %8757 = vmatmul.msk.f32.gmra.mxu0 %vm200_vm1, %v134_v17  ;;  %v137_v17 = vld [vmem:[%s16736_s0 + $0x2b8] sm:$0xff] }
 0x2aa   :  { %v9964_v33 = vpop.f32.mrf.mxu0 }
 0x2ab   :  { %16875 = vst [vmem:[#allocation39_spill] sm:$0xff] %v9964_v33 }
 0x2ad   :  { %8758 = vmatmul.msk.f32.gmra.mxu0 %vm200_vm1, %v135_v49  ;;  %v138_v49 = vld [vmem:[%s16736_s0 + $0x2c0] sm:$0xff] }
 0x2b2   :  { %v9970_v31 = vpop.f32.mrf.mxu0 }
 0x2b3   :  { %16876 = vst [vmem:[#allocation40_spill] sm:$0xff] %v9970_v31 }
 0x2b5   :  { %8759 = vmatmul.msk.f32.gmra.mxu0 %vm200_vm1, %v136_v1  ;;  %v139_v1 = vld [vmem:[%s16736_s0 + $0x2c8] sm:$0xff] }
 0x2ba   :  { %v9976_v9 = vpop.f32.mrf.mxu0 }
 0x2bb   :  { %16877 = vst [vmem:[#allocation41_spill] sm:$0xff] %v9976_v9 }
 0x2bd   :  { %8760 = vmatmul.msk.f32.gmra.mxu0 %vm200_vm1, %v137_v17  ;;  %v140_v17 = vld [vmem:[%s16736_s0 + $0x2d0] sm:$0xff] }
 0x2c2   :  { %v9982_v33 = vpop.f32.mrf.mxu0 }
 0x2c3   :  { %16878 = vst [vmem:[#allocation42_spill] sm:$0xff] %v9982_v33  ;;  %v10277_v33 = vld [vmem:[%s16737_s4] ss:$0 sm:$0xff] }
 0x2c5   :  { %8761 = vmatmul.msk.f32.gmra.mxu0 %vm200_vm1, %v138_v49  ;;  %v141_v49 = vld [vmem:[%s16736_s0 + $0x2d8] sm:$0xff] }
 0x2ca   :  { %v9988_v31 = vpop.f32.mrf.mxu0 }
 0x2cd   :  { %8762 = vmatmul.msk.f32.gmra.mxu0 %vm200_vm1, %v139_v1  ;;  %v142_v1 = vld [vmem:[%s16736_s0 + $0x2e0] sm:$0xff] }
 0x2d2   :  { %v9994_v9 = vpop.f32.mrf.mxu0 }
 0x2d5   :  { %8763 = vmatmul.msk.f32.gmra.mxu0 %vm200_vm1, %v140_v17  ;;  %v143_v17 = vld [vmem:[%s16736_s0 + $0x2e8] sm:$0xff] }
 0x2da   :  { %v10000_v27 = vpop.f32.mrf.mxu0 }
 0x2dd   :  { %8764 = vmatmul.msk.f32.gmra.mxu0 %vm200_vm1, %v141_v49  ;;  %v144_v49 = vld [vmem:[%s16736_s0 + $0x2f0] sm:$0xff] }
 0x2e2   :  { %v10006_v23 = vpop.f32.mrf.mxu0 }
 0x2e5   :  { %8765 = vmatmul.msk.f32.gmra.mxu0 %vm200_vm1, %v142_v1  ;;  %v145_v1 = vld [vmem:[%s16736_s0 + $0x2f8] sm:$0xff] }
 0x2ea   :  { %v10012_v19 = vpop.f32.mrf.mxu0 }
 0x2ed   :  { %8766 = vmatmul.msk.f32.gmra.mxu0 %vm200_vm1, %v143_v17  ;;  %v146_v17 = vld [vmem:[%s16736_s0 + $0x300] sm:$0xff] }
 0x2f2   :  { %v10018_v57 = vpop.f32.mrf.mxu0 }
 0x2f5   :  { %8767 = vmatmul.msk.f32.gmra.mxu0 %vm200_vm1, %v144_v49  ;;  %v147_v49 = vld [vmem:[%s16736_s0 + $0x308] sm:$0xff] }
 0x2fa   :  { %v10024_v41 = vpop.f32.mrf.mxu0 }
 0x2fd   :  { %8768 = vmatmul.msk.f32.gmra.mxu0 %vm200_vm1, %v145_v1  ;;  %v148_v1 = vld [vmem:[%s16736_s0 + $0x310] sm:$0xff] }
 0x302   :  { %v10030_v25 = vpop.f32.mrf.mxu0 }
 0x305   :  { %8769 = vmatmul.msk.f32.gmra.mxu0 %vm200_vm1, %v146_v17  ;;  %v149_v17 = vld [vmem:[%s16736_s0 + $0x318] sm:$0xff] }
 0x30a   :  { %v10036_v16 = vpop.f32.mrf.mxu0 }
 0x30d   :  { %8770 = vmatmul.msk.f32.gmra.mxu0 %vm200_vm1, %v147_v49  ;;  %v150_v49 = vld [vmem:[%s16736_s0 + $0x320] sm:$0xff] }
 0x312   :  { %v10042_v13 = vpop.f32.mrf.mxu0 }
 0x315   :  { %8771 = vmatmul.msk.f32.gmra.mxu0 %vm200_vm1, %v148_v1  ;;  %v151_v1 = vld [vmem:[%s16736_s0 + $0x328] sm:$0xff] }
 0x31a   :  { %v10048_v14 = vpop.f32.mrf.mxu0 }
 0x31d   :  { %8772 = vmatmul.msk.f32.gmra.mxu0 %vm200_vm1, %v149_v17  ;;  %v152_v17 = vld [vmem:[%s16736_s0 + $0x330] sm:$0xff] }
 0x322   :  { %v10054_v12 = vpop.f32.mrf.mxu0 }
 0x325   :  { %8773 = vmatmul.msk.f32.gmra.mxu0 %vm200_vm1, %v150_v49  ;;  %v153_v49 = vld [vmem:[%s16736_s0 + $0x338] sm:$0xff] }
 0x32a   :  { %v10060_v10 = vpop.f32.mrf.mxu0 }
 0x32d   :  { %8774 = vmatmul.msk.f32.gmra.mxu0 %vm200_vm1, %v151_v1  ;;  %v154_v1 = vld [vmem:[%s16736_s0 + $0x340] sm:$0xff] }
 0x332   :  { %v10066_v5 = vpop.f32.mrf.mxu0 }
 0x335   :  { %8775 = vmatmul.msk.f32.gmra.mxu0 %vm200_vm1, %v152_v17  ;;  %v155_v17 = vld [vmem:[%s16736_s0 + $0x348] sm:$0xff] }
 0x33a   :  { %v10072_v61 = vpop.f32.mrf.mxu0 }
 0x33d   :  { %8776 = vmatmul.msk.f32.gmra.mxu0 %vm200_vm1, %v153_v49  ;;  %v156_v49 = vld [vmem:[%s16736_s0 + $0x350] sm:$0xff] }
 0x342   :  { %v10078_v53 = vpop.f32.mrf.mxu0 }
 0x343   :  { %16879 = vst [vmem:[#allocation43_spill] sm:$0xff] %v10078_v53 }
 0x345   :  { %8777 = vmatmul.msk.f32.gmra.mxu0 %vm200_vm1, %v154_v1  ;;  %v157_v1 = vld [vmem:[%s16736_s0 + $0x358] sm:$0xff] }
 0x34a   :  { %v10084_v8 = vpop.f32.mrf.mxu0 }
 0x34b   :  { %16880 = vst [vmem:[#allocation44_spill] sm:$0xff] %v10084_v8 }
 0x34d   :  { %8778 = vmatmul.msk.f32.gmra.mxu0 %vm200_vm1, %v155_v17  ;;  %v158_v17 = vld [vmem:[%s16736_s0 + $0x360] sm:$0xff] }
 0x352   :  { %v10090_v6 = vpop.f32.mrf.mxu0 }
 0x353   :  { %16881 = vst [vmem:[#allocation45_spill] sm:$0xff] %v10090_v6 }
 0x355   :  { %8779 = vmatmul.msk.f32.gmra.mxu0 %vm200_vm1, %v156_v49  ;;  %v159_v49 = vld [vmem:[%s16736_s0 + $0x368] sm:$0xff] }
 0x35a   :  { %v10096_v53 = vpop.f32.mrf.mxu0 }
 0x35b   :  { %16882 = vst [vmem:[#allocation46_spill] sm:$0xff] %v10096_v53 }
 0x35d   :  { %8780 = vmatmul.msk.f32.gmra.mxu0 %vm200_vm1, %v157_v1  ;;  %v160_v1 = vld [vmem:[%s16736_s0 + $0x370] sm:$0xff] }
 0x362   :  { %v10102_v8 = vpop.f32.mrf.mxu0 }
 0x363   :  { %16883 = vst [vmem:[#allocation47_spill] sm:$0xff] %v10102_v8 }
 0x365   :  { %8781 = vmatmul.msk.f32.gmra.mxu0 %vm200_vm1, %v158_v17  ;;  %v161_v17 = vld [vmem:[%s16736_s0 + $0x378] sm:$0xff] }
 0x36a   :  { %v10108_v6 = vpop.f32.mrf.mxu0 }
 0x36b   :  { %16884 = vst [vmem:[#allocation48_spill] sm:$0xff] %v10108_v6 }
 0x36d   :  { %8782 = vmatmul.msk.f32.gmra.mxu0 %vm200_vm1, %v159_v49  ;;  %v162_v49 = vld [vmem:[%s16736_s0 + $0x380] sm:$0xff] }
 0x372   :  { %v10114_v53 = vpop.f32.mrf.mxu0 }
 0x373   :  { %16885 = vst [vmem:[#allocation49_spill] sm:$0xff] %v10114_v53 }
 0x375   :  { %8783 = vmatmul.msk.f32.gmra.mxu0 %vm200_vm1, %v160_v1  ;;  %v163_v1 = vld [vmem:[%s16736_s0 + $0x388] sm:$0xff] }
 0x37a   :  { %v10120_v8 = vpop.f32.mrf.mxu0 }
 0x37b   :  { %16886 = vst [vmem:[#allocation50_spill] sm:$0xff] %v10120_v8 }
 0x37d   :  { %8784 = vmatmul.msk.f32.gmra.mxu0 %vm200_vm1, %v161_v17  ;;  %v164_v17 = vld [vmem:[%s16736_s0 + $0x390] sm:$0xff] }
 0x382   :  { %v10126_v6 = vpop.f32.mrf.mxu0 }
 0x383   :  { %16887 = vst [vmem:[#allocation51_spill] sm:$0xff] %v10126_v6 }
 0x385   :  { %8785 = vmatmul.msk.f32.gmra.mxu0 %vm200_vm1, %v162_v49  ;;  %v165_v49 = vld [vmem:[%s16736_s0 + $0x398] sm:$0xff] }
 0x38a   :  { %v10132_v53 = vpop.f32.mrf.mxu0 }
 0x38b   :  { %16888 = vst [vmem:[#allocation52_spill] sm:$0xff] %v10132_v53 }
 0x38d   :  { %8786 = vmatmul.msk.f32.gmra.mxu0 %vm200_vm1, %v163_v1  ;;  %v166_v1 = vld [vmem:[%s16736_s0 + $0x3a0] sm:$0xff] }
 0x392   :  { %v10138_v8 = vpop.f32.mrf.mxu0 }
 0x393   :  { %16889 = vst [vmem:[#allocation53_spill] sm:$0xff] %v10138_v8 }
 0x395   :  { %8787 = vmatmul.msk.f32.gmra.mxu0 %vm200_vm1, %v164_v17  ;;  %v167_v17 = vld [vmem:[%s16736_s0 + $0x3a8] sm:$0xff] }
 0x39a   :  { %v10144_v6 = vpop.f32.mrf.mxu0 }
 0x39b   :  { %16890 = vst [vmem:[#allocation54_spill] sm:$0xff] %v10144_v6 }
 0x39d   :  { %8788 = vmatmul.msk.f32.gmra.mxu0 %vm200_vm1, %v165_v49  ;;  %v168_v49 = vld [vmem:[%s16736_s0 + $0x3b0] sm:$0xff] }
 0x3a2   :  { %v10150_v53 = vpop.f32.mrf.mxu0 }
 0x3a3   :  { %16891 = vst [vmem:[#allocation55_spill] sm:$0xff] %v10150_v53 }
 0x3a5   :  { %8789 = vmatmul.msk.f32.gmra.mxu0 %vm200_vm1, %v166_v1  ;;  %v169_v1 = vld [vmem:[%s16736_s0 + $0x3b8] sm:$0xff] }
 0x3aa   :  { %v10156_v8 = vpop.f32.mrf.mxu0 }
 0x3ab   :  { %16892 = vst [vmem:[#allocation56_spill] sm:$0xff] %v10156_v8 }
 0x3ad   :  { %8790 = vmatmul.msk.f32.gmra.mxu0 %vm200_vm1, %v167_v17  ;;  %v170_v17 = vld [vmem:[%s16736_s0 + $0x3c0] sm:$0xff] }
 0x3b2   :  { %v10162_v6 = vpop.f32.mrf.mxu0 }
 0x3b3   :  { %16893 = vst [vmem:[#allocation57_spill] sm:$0xff] %v10162_v6 }
 0x3b5   :  { %8791 = vmatmul.msk.f32.gmra.mxu0 %vm200_vm1, %v168_v49  ;;  %v171_v49 = vld [vmem:[%s16736_s0 + $0x3c8] sm:$0xff] }
 0x3ba   :  { %v10168_v53 = vpop.f32.mrf.mxu0 }
 0x3bb   :  { %16894 = vst [vmem:[#allocation58_spill] sm:$0xff] %v10168_v53 }
 0x3bd   :  { %8792 = vmatmul.msk.f32.gmra.mxu0 %vm200_vm1, %v169_v1  ;;  %v172_v1 = vld [vmem:[%s16736_s0 + $0x3d0] sm:$0xff] }
 0x3c2   :  { %v10174_v8 = vpop.f32.mrf.mxu0 }
 0x3c3   :  { %16895 = vst [vmem:[#allocation59_spill] sm:$0xff] %v10174_v8 }
 0x3c5   :  { %8793 = vmatmul.msk.f32.gmra.mxu0 %vm200_vm1, %v170_v17  ;;  %v173_v17 = vld [vmem:[%s16736_s0 + $0x3d8] sm:$0xff] }
 0x3ca   :  { %v10180_v6 = vpop.f32.mrf.mxu0 }
 0x3cb   :  { %16896 = vst [vmem:[#allocation60_spill] sm:$0xff] %v10180_v6 }
 0x3cd   :  { %8794 = vmatmul.msk.f32.gmra.mxu0 %vm200_vm1, %v171_v49  ;;  %v174_v49 = vld [vmem:[%s16736_s0 + $0x3e0] sm:$0xff] }
 0x3d2   :  { %v10186_v53 = vpop.f32.mrf.mxu0 }
 0x3d3   :  { %16897 = vst [vmem:[#allocation61_spill] sm:$0xff] %v10186_v53 }
 0x3d5   :  { %8795 = vmatmul.msk.f32.gmra.mxu0 %vm200_vm1, %v172_v1  ;;  %v175_v1 = vld [vmem:[%s16736_s0 + $0x3e8] sm:$0xff] }
 0x3da   :  { %v10192_v8 = vpop.f32.mrf.mxu0 }
 0x3db   :  { %16898 = vst [vmem:[#allocation62_spill] sm:$0xff] %v10192_v8 }
 0x3dd   :  { %8796 = vmatmul.msk.f32.gmra.mxu0 %vm200_vm1, %v173_v17  ;;  %v176_v17 = vld [vmem:[%s16736_s0 + $0x3f0] sm:$0xff] }
 0x3e2   :  { %v10198_v6 = vpop.f32.mrf.mxu0 }
 0x3e3   :  { %16899 = vst [vmem:[#allocation63_spill] sm:$0xff] %v10198_v6  ;;  %v187_v6 = vld [vmem:[%s16736_s0 + $0x448] sm:$0xff] }
 0x3e5   :  { %8797 = vmatmul.msk.f32.gmra.mxu0 %vm200_vm1, %v174_v49  ;;  %v177_v49 = vld [vmem:[%s16736_s0 + $0x3f8] sm:$0xff] }
 0x3ea   :  { %v10204_v53 = vpop.f32.mrf.mxu0 }
 0x3eb   :  { %16900 = vst [vmem:[#allocation64_spill] sm:$0xff] %v10204_v53  ;;  %v10288_v53 = vadd.f32 %v10277_v33, %v9556_v20  ;;  %v10308_v20 = vadd.f32 %v10277_v33, %v9586_v30  ;;  %v10328_v30 = vadd.f32 %v10277_v33, %v9796_v55  ;;  %v10349_v55 = vadd.f32 %v10277_v33, %v9622_v42 }
 0x3ec   :  { %v10385_v42 = vadd.f32 %v10277_v33, %v9814_v3  ;;  %v805_v3 = vadd.f32 %v10277_v33, %v9850_v37 }
 0x3ed   :  { %8798 = vmatmul.msk.f32.gmra.mxu0 %vm200_vm1, %v175_v1  ;;  %v178_v1 = vld [vmem:[%s16736_s0 + $0x400] sm:$0xff] }
 0x3f2   :  { %v10210_v8 = vpop.f32.mrf.mxu0 }
 0x3f3   :  { %16901 = vst [vmem:[#allocation65_spill] sm:$0xff] %v10210_v8  ;;  %v10296_v8 = vadd.f32 %v10277_v33, %v9568_v24  ;;  %v10316_v24 = vadd.f32 %v10277_v33, %v9592_v32  ;;  %v10337_v32 = vadd.f32 %v10277_v33, %v9604_v36  ;;  %v10357_v36 = vadd.f32 %v10277_v33, %v9640_v48 }
 0x3f4   :  { %v796_v48 = vadd.f32 %v10277_v33, %v9832_v15  ;;  %v799_v15 = vadd.f32 %v10277_v33, %v9838_v21 }
 0x3f5   :  { %8799 = vmatmul.msk.f32.gmra.mxu0 %vm200_vm1, %v176_v17  ;;  %v179_v17 = vld [vmem:[%s16736_s0 + $0x408] sm:$0xff] }
 0x3fa   :  { %v10216_v4 = vpop.f32.mrf.mxu0 }
 0x3fb   :  { %16902 = vst [vmem:[#allocation66_spill] sm:$0xff] %v10216_v4  ;;  %v10300_v4 = vadd.f32 %v10277_v33, %v9574_v26  ;;  %v10320_v26 = vadd.f32 %v10277_v33, %v9784_v47  ;;  %v10341_v47 = vadd.f32 %v10277_v33, %v9610_v38  ;;  %v10361_v38 = vadd.f32 %v10277_v33, %v9766_v35 }
 0x3fd   :  { %8800 = vmatmul.msk.f32.gmra.mxu0 %vm200_vm1, %v177_v49  ;;  %v180_v49 = vld [vmem:[%s16736_s0 + $0x410] sm:$0xff]  ;;  %16906 = vst [vmem:[#allocation70_spill] sm:$0xff] %v10361_v38 }
 0x402   :  { %v10222_v2 = vpop.f32.mrf.mxu0 }
 0x405   :  { %8801 = vmatmul.msk.f32.gmra.mxu0 %vm200_vm1, %v178_v1  ;;  %v181_v1 = vld [vmem:[%s16736_s0 + $0x418] sm:$0xff] }
 0x40a   :  { %v10228_v0 = vpop.f32.mrf.mxu0 }
 0x40d   :  { %8802 = vmatmul.msk.f32.gmra.mxu0 %vm200_vm1, %v179_v17  ;;  %v182_v17 = vld [vmem:[%s16736_s0 + $0x420] sm:$0xff] }
 0x412   :  { %v10234_v62 = vpop.f32.mrf.mxu0 }
 0x415   :  { %8803 = vmatmul.msk.f32.gmra.mxu0 %vm200_vm1, %v180_v49  ;;  %v183_v49 = vld [vmem:[%s16736_s0 + $0x428] sm:$0xff] }
 0x41a   :  { %v10240_v60 = vpop.f32.mrf.mxu0 }
 0x41d   :  { %8804 = vmatmul.msk.f32.gmra.mxu0 %vm200_vm1, %v181_v1  ;;  %v184_v1 = vld [vmem:[%s16736_s0 + $0x430] sm:$0xff] }
 0x422   :  { %v10246_v58 = vpop.f32.mrf.mxu0 }
 0x425   :  { %8805 = vmatmul.msk.f32.gmra.mxu0 %vm200_vm1, %v182_v17  ;;  %v185_v17 = vld [vmem:[%s16736_s0 + $0x438] sm:$0xff] }
 0x42a   :  { %v10252_v56 = vpop.f32.mrf.mxu0 }
 0x42d   :  { %8806 = vmatmul.msk.f32.gmra.mxu0 %vm200_vm1, %v183_v49  ;;  %v186_v49 = vld [vmem:[%s16736_s0 + $0x440] sm:$0xff] }
 0x432   :  { %v10258_v54 = vpop.f32.mrf.mxu0 }
 0x435   :  { %8807 = vmatmul.msk.f32.gmra.mxu0 %vm200_vm1, %v184_v1 }
 0x43a   :  { %v10264_v52 = vpop.f32.mrf.mxu0 }
 0x43d   :  { %8808 = vmatmul.msk.f32.gmra.mxu0 %vm200_vm1, %v185_v17  ;;  %v10284_v17 = vadd.f32 %v10277_v33, %v9550_v18  ;;  %v10304_v18 = vadd.f32 %v10277_v33, %v9580_v28  ;;  %v10324_v28 = vadd.f32 %v10277_v33, %v9790_v51  ;;  %v10345_v51 = vadd.f32 %v10277_v33, %v9616_v40 }
 0x43e   :  { %v10365_v40 = vadd.f32 %v10277_v33, %v9772_v39  ;;  %v10381_v39 = vadd.f32 %v10277_v33, %v9808_v63  ;;  %v188_v63 = vld [vmem:[%s16736_s0 + $0x450] sm:$0xff] }
 0x43f   :  { %16903 = vst [vmem:[#allocation67_spill] sm:$0xff] %v10284_v17  ;;  %v913_v17 = vadd.f32 %v10277_v33, %v10066_v5  ;;  %v910_v5 = vadd.f32 %v10277_v33, %v10060_v10  ;;  %v907_v10 = vadd.f32 %v10277_v33, %v10054_v12 }
 0x442   :  { %v1014_v50 = vpop.f32.mrf.mxu0 }
 0x445   :  { %8809 = vmatmul.msk.f32.gmra.mxu0 %vm200_vm1, %v186_v49  ;;  %v10292_v49 = vadd.f32 %v10277_v33, %v9562_v22  ;;  %v10312_v22 = vadd.f32 %v10277_v33, %v9778_v43  ;;  %v10333_v43 = vadd.f32 %v10277_v33, %v9598_v34  ;;  %v694_v34 = vadd.f32 %v10277_v33, %v9628_v44 }
 0x446   :  { %v10371_v44 = vadd.f32 %v10277_v33, %v9802_v59  ;;  %v10389_v59 = vadd.f32 %v10277_v33, %v9820_v7 }
 0x447   :  { %16904 = vst [vmem:[#allocation68_spill] sm:$0xff] %v10292_v49  ;;  %v808_v49 = vadd.f32 %v10277_v33, %v9856_v45 }
 0x448   :  { %16905 = vst [vmem:[#allocation69_spill] sm:$0xff] %v10312_v22  ;;  %v802_v22 = vadd.f32 %v10277_v33, %v9844_v29  ;;  %v1095_v29 = vmax.f32 %v10337_v32, %v10389_v59  ;;  %v1009_v32 = vadd.f32 %v10277_v33, %v10258_v54  ;;  %v901_v54 = vadd.f32 %v10277_v33, %v10042_v13 }
 0x449   :  { %v1101_v21 = vmax.f32 %v10357_v36, %v808_v49  ;;  %v10465_v13 = vadd.f32 %v10277_v33, %v10012_v19  ;;  %v1000_v19 = vadd.f32 %v10277_v33, %v10240_v60  ;;  %v10485_v60 = vld [vmem:[%s16738_s5] ss:$0 sm:$0xff] }
 0x44a   :  { %v1017_v1 = vpop.f32.mrf.mxu0 }
 0x44b   :  { %v1018_v7 = vadd.f32 %v10277_v33, %v1017_v1  ;;  %v1015_v1 = vadd.f32 %v10277_v33, %v1014_v50  ;;  %v1012_v50 = vadd.f32 %v10277_v33, %v10264_v52  ;;  %v10443_v52 = vadd.f32 %v10277_v33, %v9994_v9 }
 0x44d   :  { %8810 = vmatmul.msk.f32.gmra.mxu0 %vm200_vm1, %v187_v6  ;;  %v697_v6 = vadd.f32 %v10277_v33, %v9634_v46  ;;  %v10393_v46 = vadd.f32 %v10277_v33, %v9826_v11  ;;  %v1097_v11 = vmax.f32 %v10345_v51, %v796_v48  ;;  %v904_v51 = vadd.f32 %v10277_v33, %v10048_v14  ;;  %v189_v14 = vld [vmem:[%s16736_s0 + $0x458] sm:$0xff] }
 0x44e   :  { %v1134_v12 = vmax.f32 %v907_v10, %v1015_v1  ;;  %v898_v48 = vadd.f32 %v10277_v33, %v10036_v16  ;;  %v997_v16 = vadd.f32 %v10277_v33, %v10234_v62 }
 0x44f   :  { %v1096_v45 = vmax.f32 %v10341_v47, %v10393_v46  ;;  %v1100_v37 = vmax.f32 %v697_v6, %v805_v3  ;;  %v10437_v47 = vadd.f32 %v10277_v33, %v9988_v31  ;;  %v916_v31 = vadd.f32 %v10277_v33, %v10072_v61 }
 0x450   :  { %v1133_v9 = vmax.f32 %v904_v51, %v1012_v50  ;;  %v1003_v61 = vadd.f32 %v10277_v33, %v10246_v58  ;;  %v1132_v46 = vmax.f32 %v901_v54, %v1009_v32  ;;  %v10497_v32 = vld [vmem:[%s16739_s6] ss:$0 sm:$0xff] }
 0x452   :  { %v1020_v35 = vpop.f32.mrf.mxu0 }
 0x453   :  { %v1021_v38 = vadd.f32 %v10277_v33, %v1020_v35 }
 0x455   :  { %v1136_v35 = vmax.f32 %v913_v17, %v1021_v38  ;;  %8811 = vmatmul.msk.f32.gmra.mxu0 %vm200_vm1, %v188_v63  ;;  %v1135_v17 = vmax.f32 %v910_v5, %v1018_v7  ;;  %v1098_v38 = vmax.f32 %v10349_v55, %v799_v15  ;;  %v1099_v63 = vmax.f32 %v694_v34, %v802_v22 }
 0x456   :  { %v10447_v22 = vadd.f32 %v10277_v33, %v10000_v27  ;;  %v1006_v55 = vadd.f32 %v10277_v33, %v10252_v56  ;;  %v10461_v27 = vadd.f32 %v10277_v33, %v10006_v23  ;;  %v892_v23 = vadd.f32 %v10277_v33, %v10024_v41 }
 0x457   :  { %v1172_v6 = vmax.f32 %v1100_v37, %v1136_v35  ;;  %v1171_v34 = vmax.f32 %v1099_v63, %v1135_v17  ;;  %v1170_v56 = vmax.f32 %v1098_v38, %v1134_v12  ;;  %v895_v7 = vadd.f32 %v10277_v33, %v10030_v25 }
 0x458   :  { %v1131_v58 = vmax.f32 %v898_v48, %v1006_v55  ;;  %v1169_v15 = vmax.f32 %v1097_v11, %v1133_v9  ;;  %v1168_v35 = vmax.f32 %v1096_v45, %v1132_v46  ;;  %v889_v25 = vadd.f32 %v10277_v33, %v10018_v57  ;;  %v190_v45 = vld [vmem:[%s16736_s0 + $0x460] sm:$0xff]  ;;  %v16911_v46 = vld [vmem:[#allocation65_spill] sm:$0xff] }
 0x459   :  { %v1244_v59 = vmul.f32 0.01, %v1172_v6  ;;  %vm1208_vm2 = vcmp.gt.f32.partialorder %v1172_v6, 0.0  ;;  %v1243_v37 = vmul.f32 0.01, %v1171_v34  ;;  %v1130_v1 = vmax.f32 %v895_v7, %v1003_v61  ;;  %v16914_v7 = vld [vmem:[#allocation64_spill] sm:$0xff] }
 0x45a   :  { %v1023_v49 = vpop.f32.mrf.mxu0  ;;  %vm1207_vm3 = vcmp.gt.f32.partialorder %v1171_v34, 0.0  ;;  %v1242_v10 = vmul.f32 0.01, %v1170_v56  ;;  %v994_v11 = vadd.f32 %v10277_v33, %v10228_v0  ;;  %vm1206_vm5 = vcmp.gt.f32.partialorder %v1170_v56, 0.0 }
 0x45b   :  { %v1024_v36 = vadd.f32 %v10277_v33, %v1023_v49  ;;  %v1280_v50 = vsel %vm1208_vm2, %v1172_v6, %v1244_v59  ;;  %v1167_v17 = vmax.f32 %v1095_v29, %v1131_v58  ;;  %v1241_v38 = vmul.f32 0.01, %v1169_v15 }
 0x45c   :  { %v1279_v63 = vsel %vm1207_vm3, %v1171_v34, %v1243_v37  ;;  %v991_v0 = vadd.f32 %v10277_v33, %v10222_v2  ;;  %vm1205_vm6 = vcmp.gt.f32.partialorder %v1169_v15, 0.0  ;;  %v1320_v51 = vmul.f32 %v10485_v60, %v1280_v50 }
 0x45d   :  { %v1137_v3 = vmax.f32 %v916_v31, %v1024_v36  ;;  %8812 = vmatmul.msk.f32.gmra.mxu0 %vm200_vm1, %v189_v14  ;;  %v1128_v6 = vmax.f32 %v889_v25, %v997_v16  ;;  %v16907_v29 = vmax.f32 %v10333_v43, %v10385_v42  ;;  %v1240_v31 = vmul.f32 0.01, %v1168_v35  ;;  %v16908_v14 = vld [vmem:[#allocation66_spill] sm:$0xff] }
 0x45e   :  { %v1278_v49 = vsel %vm1206_vm5, %v1170_v56, %v1242_v10  ;;  %v988_v55 = vadd.f32 %v10277_v33, %v16908_v14  ;;  %vm1204_vm7 = vcmp.gt.f32.partialorder %v1168_v35, 0.0  ;;  %v1319_v2 = vmul.f32 %v10485_v60, %v1279_v63  ;;  %v192_v14 = vld [vmem:[%s16736_s0 + $0x470] sm:$0xff] }
 0x45f   :  { %v1173_v5 = vmax.f32 %v1101_v21, %v1137_v3  ;;  %v1129_v21 = vmax.f32 %v892_v23, %v1000_v19  ;;  %v1166_v54 = vmax.f32 %v16907_v29, %v1130_v1  ;;  %v1127_v34 = vmax.f32 %v10465_v13, %v994_v11 }
 0x460   :  { %v16910_v36 = vmax.f32 %v10316_v24, %v10381_v39  ;;  %v1239_v42 = vmul.f32 0.01, %v1167_v17  ;;  %v1277_v61 = vsel %vm1205_vm6, %v1169_v15, %v1241_v38  ;;  %v985_v48 = vadd.f32 %v10277_v33, %v16911_v46 }
 0x461   :  { %vm1209_vm4 = vcmp.gt.f32.partialorder %v1173_v5, 0.0  ;;  %v1245_v41 = vmul.f32 0.01, %v1173_v5  ;;  %vm1203_vm8 = vcmp.gt.f32.partialorder %v1167_v17, 0.0  ;;  %v1318_v56 = vmul.f32 %v10485_v60, %v1278_v49 }
 0x462   :  { %v10489_v62 = vpop.f32.mrf.mxu0  ;;  %v1165_v43 = vmax.f32 %v16910_v36, %v1129_v21  ;;  %v10521_v59 = vadd.f32 %v10497_v32, %v1320_v51  ;;  %v1126_v13 = vmax.f32 %v10461_v27, %v991_v0  ;;  %v16913_v24 = vmax.f32 %v10308_v20, %v10371_v44  ;;  %v191_v20 = vld [vmem:[%s16736_s0 + $0x468] sm:$0xff]  ;;  %v16920_v21 = vld [vmem:[#allocation42_spill] sm:$0xff] }
 0x463   :  { %v1281_v57 = vsel %vm1209_vm4, %v1173_v5, %v1245_v41  ;;  %v1238_v3 = vmul.f32 0.01, %v1166_v54  ;;  %v1276_v23 = vsel %vm1204_vm7, %v1168_v35, %v1240_v31  ;;  %v982_v19 = vadd.f32 %v10277_v33, %v16914_v7  ;;  %v16917_v35 = vld [vmem:[#allocation63_spill] sm:$0xff] }
 0x464   :  { %v1321_v12 = vmul.f32 %v10485_v60, %v1281_v57  ;;  %16912 = vst [vmem:[#allocation65_spill] sm:$0xff] %v10521_v59  ;;  %v1164_v39 = vmax.f32 %v16913_v24, %v1128_v6  ;;  %vm1202_vm9 = vcmp.gt.f32.partialorder %v1166_v54, 0.0  ;;  %v1317_v58 = vmul.f32 %v10485_v60, %v1277_v61  ;;  %v16924_v6 = vld [vmem:[#allocation68_spill] sm:$0xff] }
 0x465   :  { %8813 = vmatmul.msk.f32.gmra.mxu0 %vm200_vm1, %v190_v45  ;;  %v10534_v15 = vadd.f32 %v10497_v32, %v1319_v2  ;;  %v1125_v44 = vmax.f32 %v10447_v22, %v988_v55  ;;  %v16916_v27 = vmax.f32 %v10304_v18, %v10328_v30  ;;  %v1237_v16 = vmul.f32 0.01, %v1165_v43  ;;  %v16928_v55 = vld [vmem:[#allocation70_spill] sm:$0xff]  ;;  %v16929_v2 = vld [vmem:[#allocation67_spill] sm:$0xff] }
 0x466   :  { %v10511_v9 = vadd.f32 %v10497_v32, %v1321_v12  ;;  %v1275_v1 = vsel %vm1203_vm8, %v1167_v17, %v1239_v42  ;;  %v979_v10 = vadd.f32 %v10277_v33, %v16917_v35  ;;  %vm1201_vm10 = vcmp.gt.f32.partialorder %v1165_v43, 0.0 }
 0x467   :  { %16915 = vst [vmem:[#allocation64_spill] sm:$0xff] %v10534_v15  ;;  %v1163_v5 = vmax.f32 %v16916_v27, %v1127_v34  ;;  %v1316_v50 = vmul.f32 %v10485_v60, %v1276_v23  ;;  %v10552_v41 = vadd.f32 %v10497_v32, %v1318_v56  ;;  %v1124_v22 = vmax.f32 %v10443_v52, %v985_v48 }
 0x468   :  { %16909 = vst [vmem:[#allocation66_spill] sm:$0xff] %v10511_v9  ;;  %2259 = vmatpush.msrb.mxu0 %v10511_v9  ;;  %9371 = vmatpush.msra.mxu1 %v10511_v9  ;;  %v16919_v18 = vmax.f32 %v10300_v4, %v10324_v28  ;;  %v1236_v25 = vmul.f32 0.01, %v1164_v39  ;;  %v1274_v11 = vsel %vm1202_vm9, %v1166_v54, %v1238_v3  ;;  %vm1200_vm11 = vcmp.gt.f32.partialorder %v1164_v39, 0.0 }
 0x469   :  { %16918 = vst [vmem:[#allocation63_spill] sm:$0xff] %v10552_v41  ;;  %v871_v45 = vadd.f32 %v10277_v33, %v16920_v21  ;;  %v1315_v17 = vmul.f32 %v10485_v60, %v1275_v1  ;;  %v10566_v38 = vadd.f32 %v10497_v32, %v1317_v58  ;;  %v1123_v4 = vmax.f32 %v10437_v47, %v982_v19 }
 0x46a   :  { %v10536_v37 = vpop.f32.mrf.mxu0  ;;  %2260 = vmatpush.msrb.mxu0 %v10521_v59  ;;  %9372 = vmatpush.msra.mxu1 %v10521_v59  ;;  %v1162_v30 = vmax.f32 %v16919_v18, %v1126_v13  ;;  %v16922_v28 = vmax.f32 %v10296_v8, %v10320_v26  ;;  %v1235_v63 = vmul.f32 0.01, %v1163_v5  ;;  %v1273_v57 = vsel %vm1201_vm10, %v1165_v43, %v1237_v16  ;;  %v16925_v8 = vld [vmem:[#allocation69_spill] sm:$0xff]  ;;  %v16982_v59 = vld [vmem:[#allocation39_spill] sm:$0xff] }
 0x46b   :  { %16921 = vst [vmem:[#allocation42_spill] sm:$0xff] %v10566_v38  ;;  %v1087_v0 = vmax.f32 %v10288_v53, %v10365_v40  ;;  %vm1199_vm12 = vcmp.gt.f32.partialorder %v1163_v5, 0.0  ;;  %v1314_v51 = vmul.f32 %v10485_v60, %v1274_v11  ;;  %v10579_v12 = vadd.f32 %v10497_v32, %v1316_v50  ;;  %v193_v16 = vld [vmem:[%s16736_s0 + $0x478] sm:$0xff] }
 0x46c   :  { %2261 = vmatpush.msrb.mxu0 %v10534_v15  ;;  %9373 = vmatpush.msra.mxu1 %v10534_v15  ;;  %v1161_v52 = vmax.f32 %v16922_v28, %v1125_v44  ;;  %v1122_v47 = vmax.f32 %v871_v45, %v979_v10  ;;  %v16926_v26 = vmax.f32 %v16924_v6, %v16925_v8  ;;  %v1234_v54 = vmul.f32 0.01, %v1162_v30  ;;  %v1388_v28 = vld [vmem:[%s16740_s1 + $0x30] sm:$0xff] }
 0x46d   :  { %8814 = vmatmul.msk.f32.gmra.mxu0 %vm200_vm1, %v191_v20  ;;  %16923 = vst [vmem:[#allocation71_spill] sm:$0xff] %v10579_v12  ;;  %v1272_v31 = vsel %vm1200_vm11, %v1164_v39, %v1236_v25  ;;  %vm1198_vm13 = vcmp.gt.f32.partialorder %v1162_v30, 0.0  ;;  %v1313_v53 = vmul.f32 %v10485_v60, %v1273_v57  ;;  %v10589_v40 = vadd.f32 %v10497_v32, %v1315_v17  ;;  %v1385_v17 = vld [vmem:[%s16740_s1 + $0x18] sm:$0xff]  ;;  %v1400_v8 = vld [vmem:[%s16740_s1 + $0x90] sm:$0xff] }
 0x46e   :  { %2262 = vmatpush.msrb.mxu0 %v10552_v41  ;;  %9374 = vmatpush.msra.mxu1 %v10552_v41  ;;  %v1160_v29 = vmax.f32 %v16926_v26, %v1124_v22  ;;  %v1086_v34 = vmax.f32 %v16929_v2, %v16928_v55  ;;  %v1159_v36 = vmax.f32 %v1087_v0, %v1123_v4  ;;  %v1233_v43 = vmul.f32 0.01, %v1161_v52  ;;  %v1394_v0 = vld [vmem:[%s16740_s1 + $0x60] sm:$0xff] }
 0x46f   :  { %16927 = vst [vmem:[#allocation68_spill] sm:$0xff] %v10589_v40  ;;  %v1271_v42 = vsel %vm1199_vm12, %v1163_v5, %v1235_v63  ;;  %vm1197_vm14 = vcmp.gt.f32.partialorder %v1161_v52, 0.0  ;;  %v1312_v61 = vmul.f32 %v10485_v60, %v1272_v31  ;;  %v10603_v46 = vadd.f32 %v10497_v32, %v1314_v51  ;;  %v1391_v63 = vld [vmem:[%s16740_s1 + $0x48] sm:$0xff]  ;;  %v1406_v31 = vld [vmem:[%s16740_s1 + $0xc0] sm:$0xff] }
 0x470   :  { %2263 = vmatpush.msrb.mxu0 %v10566_v38  ;;  %9375 = vmatpush.msra.mxu1 %v10566_v38  ;;  %v1158_v48 = vmax.f32 %v1086_v34, %v1122_v47  ;;  %v1232_v56 = vmul.f32 0.01, %v1160_v29  ;;  %v1270_v13 = vsel %vm1198_vm13, %v1162_v30, %v1234_v54  ;;  %vm1196_vm15 = vcmp.gt.f32.partialorder %v1160_v29, 0.0  ;;  %v1397_v47 = vld [vmem:[%s16740_s1 + $0x78] sm:$0xff]  ;;  %v16939_v55 = vld [vmem:[#allocation2_spill] sm:$0xff]  ;;  %v16941_v34 = vld [vmem:[#allocation3_spill] sm:$0xff] }
 0x471   :  { %16930 = vst [vmem:[#allocation69_spill] sm:$0xff] %v10603_v46  ;;  %v1311_v24 = vmul.f32 %v10485_v60, %v1271_v42  ;;  %v10611_v39 = vadd.f32 %v10497_v32, %v1313_v53  ;;  %v1231_v3 = vmul.f32 0.01, %v1159_v36  ;;  %v1269_v23 = vsel %vm1197_vm14, %v1161_v52, %v1233_v43  ;;  %v16942_v43 = vld [vmem:[#allocation4_spill] sm:$0xff]  ;;  %v16980_v38 = vld [vmem:[#allocation37_spill] sm:$0xff] }
 0x472   :  { %v10591_v49 = vpop.f32.mrf.mxu0  ;;  %2264 = vmatpush.msrb.mxu0 %v10579_v12  ;;  %9376 = vmatpush.msra.mxu1 %v10579_v12  ;;  %vm1195_vm0 = vcmp.gt.f32.partialorder %v1159_v36, 0.0  ;;  %v1310_v7 = vmul.f32 %v10485_v60, %v1270_v13  ;;  %v10617_v19 = vadd.f32 %v10497_v32, %v1312_v61  ;;  %v1230_v58 = vmul.f32 0.01, %v1158_v48  ;;  %v16943_v61 = vld [vmem:[#allocation5_spill] sm:$0xff] }
 0x473   :  { %16931 = vst [vmem:[#allocation70_spill] sm:$0xff] %v10611_v39  ;;  %v1268_v20 = vsel %vm1196_vm15, %v1160_v29, %v1232_v56  ;;  %vm1194_vm2 = vcmp.gt.f32.partialorder %v1158_v48, 0.0  ;;  %v1309_v44 = vmul.f32 %v10485_v60, %v1269_v23  ;;  %v10623_v27 = vadd.f32 %v10497_v32, %v1311_v24  ;;  %v1403_v29 = vld [vmem:[%s16740_s1 + $0xa8] sm:$0xff]  ;;  %v16944_v56 = vld [vmem:[#allocation6_spill] sm:$0xff]  ;;  %v16946_v23 = vld [vmem:[#allocation8_spill] sm:$0xff] }
 0x474   :  { %2265 = vmatpush.msrb.mxu0 %v10589_v40  ;;  %9377 = vmatpush.msra.mxu1 %v10589_v40  ;;  %16932 = vst [vmem:[#allocation67_spill] sm:$0xff] %v10617_v19  ;;  %v1267_v1 = vsel %vm1195_vm0, %v1159_v36, %v1231_v3  ;;  %v1308_v35 = vmul.f32 %v10485_v60, %v1268_v20  ;;  %v16945_v24 = vld [vmem:[#allocation7_spill] sm:$0xff] }
 0x475   :  { %8815 = vmatmul.msk.f32.gmra.mxu0 %vm200_vm1, %v192_v14  ;;  %16933 = vst [vmem:[#allocation72_spill] sm:$0xff] %v10623_v27  ;;  %v10634_v10 = vadd.f32 %v10497_v32, %v1310_v7  ;;  %v1266_v50 = vsel %vm1194_vm2, %v1158_v48, %v1230_v58  ;;  %v1307_v22 = vmul.f32 %v10485_v60, %v1267_v1  ;;  %v1409_v14 = vld [vmem:[%s16740_s1 + $0xd8] sm:$0xff]  ;;  %v16949_v1 = vld [vmem:[#allocation11_spill] sm:$0xff] }
 0x476   :  { %2266 = vmatpush.msrb.mxu0 %v10603_v46  ;;  %9378 = vmatpush.msra.mxu1 %v10603_v46  ;;  %v10641_v18 = vadd.f32 %v10497_v32, %v1309_v44  ;;  %v1306_v30 = vmul.f32 %v10485_v60, %v1266_v50  ;;  %v10647_v25 = vadd.f32 %v10497_v32, %v1308_v35  ;;  %v16947_v58 = vld [vmem:[#allocation9_spill] sm:$0xff]  ;;  %v16948_v44 = vld [vmem:[#allocation10_spill] sm:$0xff]  ;;  %v16950_v50 = vld [vmem:[#allocation12_spill] sm:$0xff] }
 0x477   :  { %16934 = vst [vmem:[#allocation73_spill] sm:$0xff] %v10634_v10  ;;  %v10652_v11 = vadd.f32 %v10497_v32, %v1307_v22  ;;  %v10708_v2 = vadd.f32 %v10277_v33, %v16939_v55  ;;  %v10712_v36 = vadd.f32 %v10277_v33, %v16941_v34  ;;  %v10716_v42 = vadd.f32 %v10277_v33, %v16942_v43  ;;  %v16957_v34 = vld [vmem:[#allocation15_spill] sm:$0xff] }
 0x478   :  { %2267 = vmatpush.msrb.mxu0 %v10611_v39  ;;  %9379 = vmatpush.msra.mxu1 %v10611_v39  ;;  %16935 = vst [vmem:[#allocation74_spill] sm:$0xff] %v10641_v18  ;;  %v10659_v45 = vadd.f32 %v10497_v32, %v1306_v30  ;;  %v10720_v48 = vadd.f32 %v10277_v33, %v16943_v61  ;;  %v16958_v61 = vld [vmem:[#allocation16_spill] sm:$0xff]  ;;  %v16977_v39 = vld [vmem:[#allocation34_spill] sm:$0xff]  ;;  %v16978_v46 = vld [vmem:[#allocation35_spill] sm:$0xff] }
 0x479   :  { %16936 = vst [vmem:[#allocation75_spill] sm:$0xff] %v10647_v25  ;;  %v10724_v13 = vadd.f32 %v10277_v33, %v16944_v56  ;;  %v10728_v3 = vadd.f32 %v10277_v33, %v16945_v24  ;;  %v10732_v7 = vadd.f32 %v10277_v33, %v16946_v23  ;;  %v10736_v20 = vadd.f32 %v10277_v33, %v16947_v58  ;;  %v16959_v24 = vld [vmem:[#allocation25_spill] sm:$0xff]  ;;  %v1412_v58 = vld [vmem:[%s16740_s1 + $0xf0] sm:$0xff] }
 0x47a   :  { %v10625_v5 = vpop.f32.mrf.mxu0  ;;  %2268 = vmatpush.msrb.mxu0 %v10617_v19  ;;  %9380 = vmatpush.msra.mxu1 %v10617_v19  ;;  %16937 = vst [vmem:[#allocation76_spill] sm:$0xff] %v10652_v11  ;;  %v10744_v35 = vadd.f32 %v10277_v33, %v16949_v1  ;;  %v10748_v22 = vadd.f32 %v10277_v33, %v16950_v50  ;;  %v16961_v50 = vld [vmem:[#allocation26_spill] sm:$0xff] }
 0x47b   :  { %16938 = vst [vmem:[#allocation77_spill] sm:$0xff] %v10659_v45  ;;  %v10772_v43 = vadd.f32 %v10277_v33, %v16957_v34  ;;  %v745_v56 = vadd.f32 %v10277_v33, %v16958_v61  ;;  %v10778_v23 = vadd.f32 %v10277_v33, %v16959_v24  ;;  %v16964_v34 = vld [vmem:[#allocation18_spill] sm:$0xff]  ;;  %v16966_v24 = vld [vmem:[#allocation19_spill] sm:$0xff]  ;;  %v850_v40 = vadd.f32 %v10277_v33, %v16978_v46 }
 0x47c   :  { %2269 = vmatpush.msrb.mxu0 %v10623_v27  ;;  %9381 = vmatpush.msra.mxu1 %v10623_v27  ;;  %16940 = vst [vmem:[#allocation2_spill] sm:$0xff] %v10708_v2  ;;  %v10801_v61 = vadd.f32 %v10277_v33, %v16964_v34  ;;  %v16974_v27 = vld [vmem:[#allocation31_spill] sm:$0xff]  ;;  %v16981_v34 = vld [vmem:[#allocation57_spill] sm:$0xff]  ;;  %v10869_v9 = vadd.f32 %v10277_v33, %v16982_v59 }
 0x47d   :  { %8816 = vmatmul.msk.f32.gmra.mxu0 %vm200_vm1, %v193_v16  ;;  %v10740_v16 = vadd.f32 %v10277_v33, %v16948_v44  ;;  %v16960_v44 = vld [vmem:[#allocation17_spill] sm:$0xff]  ;;  %v961_v15 = vadd.f32 %v10277_v33, %v16981_v34  ;;  %v1415_v34 = vld [vmem:[%s16740_s1 + $0x108] sm:$0xff] }
 0x47e   :  { %2270 = vmatpush.msrb.mxu0 %v10634_v10  ;;  %9382 = vmatpush.msra.mxu1 %v10634_v10  ;;  %v10785_v1 = vadd.f32 %v10277_v33, %v16960_v44  ;;  %16965 = vst [vmem:[#allocation4_spill] sm:$0xff] %v10801_v61  ;;  %v10805_v44 = vadd.f32 %v10277_v33, %v16966_v24  ;;  %v16973_v10 = vld [vmem:[#allocation30_spill] sm:$0xff] }
 0x47f   :  { %16983 = vst [vmem:[#allocation8_spill] sm:$0xff] %v10869_v9  ;;  %v16985_v61 = vld [vmem:[#allocation38_spill] sm:$0xff] }
 0x480   :  { %2271 = vmatpush.msrb.mxu0 %v10641_v18  ;;  %9383 = vmatpush.msra.mxu1 %v10641_v18  ;;  %16967 = vst [vmem:[#allocation5_spill] sm:$0xff] %v10805_v44  ;;  %v16972_v18 = vld [vmem:[#allocation29_spill] sm:$0xff]  ;;  %v17001_v44 = vld [vmem:[#allocation51_spill] sm:$0xff] }
 0x481   :  { %v10823_v24 = vadd.f32 %v10277_v33, %v16972_v18  ;;  %v856_v18 = vadd.f32 %v10277_v33, %v16980_v38 }
 0x482   :  { %v10654_v21 = vpop.f32.mrf.mxu0  ;;  %2272 = vmatpush.msrb.mxu0 %v10647_v25  ;;  %9384 = vmatpush.msra.mxu1 %v10647_v25  ;;  %v16975_v25 = vld [vmem:[#allocation32_spill] sm:$0xff] }
 0x483   :  { %v10837_v19 = vadd.f32 %v10277_v33, %v16975_v25  ;;  %v16979_v25 = vld [vmem:[#allocation36_spill] sm:$0xff]  ;;  %v1117_v59 = vmax.f32 %v10785_v1, %v856_v18 }
 0x484   :  { %2273 = vmatpush.msrb.mxu0 %v10652_v11  ;;  %9385 = vmatpush.msra.mxu1 %v10652_v11  ;;  %v16970_v11 = vld [vmem:[#allocation21_spill] sm:$0xff]  ;;  %v853_v12 = vadd.f32 %v10277_v33, %v16979_v25 }
 0x485   :  { %v1112_v38 = vmax.f32 %v10748_v22, %v10837_v19  ;;  %v1115_v19 = vmax.f32 %v10772_v43, %v850_v40  ;;  %v16990_v40 = vld [vmem:[#allocation43_spill] sm:$0xff] }
 0x486   :  { %2274 = vmatpush.msrb.mxu0 %v10659_v45  ;;  %9386 = vmatpush.msra.mxu1 %v10659_v45  ;;  %v16968_v45 = vld [vmem:[#allocation20_spill] sm:$0xff]  ;;  %v1116_v22 = vmax.f32 %v745_v56, %v853_v12 }
 0x487   :  { %2278 = vmatmul.f32.vlgmr.msra.gmra.mxu1 %v1385_v17  ;;  %v16951_v17 = vld [vmem:[#allocation13_spill] sm:$0xff] }
 0x48a   :  { %v10668_v4 = vpop.f32.mrf.mxu0 }
 0x48f   :  { %2281 = vmatmul.f32.gmra.mxu1 %v1388_v28  ;;  %v10752_v28 = vadd.f32 %v10277_v33, %v16951_v17  ;;  %v10789_v17 = vadd.f32 %v10277_v33, %v16961_v50  ;;  %v10809_v50 = vadd.f32 %v10277_v33, %v16968_v45  ;;  %v16976_v45 = vld [vmem:[#allocation33_spill] sm:$0xff] }
 0x491   :  { %16969 = vst [vmem:[#allocation6_spill] sm:$0xff] %v10809_v50  ;;  %v10883_v50 = vadd.f32 %v10277_v33, %v16985_v61 }
 0x492   :  { %v10673_v52 = vpop.f32.mrf.mxu0 }
 0x493   :  { %16986 = vst [vmem:[#allocation9_spill] sm:$0xff] %v10883_v50 }
 0x497   :  { %2284 = vmatmul.f32.gmra.mxu1 %v1391_v63  ;;  %v16952_v63 = vld [vmem:[#allocation22_spill] sm:$0xff] }
 0x49a   :  { %v10678_v57 = vpop.f32.mrf.mxu0 }
 0x49f   :  { %2287 = vmatmul.f32.gmra.mxu1 %v1394_v0  ;;  %v10756_v0 = vadd.f32 %v10277_v33, %v16952_v63  ;;  %v16962_v63 = vld [vmem:[#allocation27_spill] sm:$0xff] }
 0x4a1   :  { %16953 = vst [vmem:[#allocation3_spill] sm:$0xff] %v10756_v0  ;;  %v16987_v0 = vld [vmem:[#allocation55_spill] sm:$0xff] }
 0x4a2   :  { %v10683_v51 = vpop.f32.mrf.mxu0 }
 0x4a7   :  { %2290 = vmatmul.f32.gmra.mxu1 %v1397_v47  ;;  %v16954_v47 = vld [vmem:[#allocation23_spill] sm:$0xff] }
 0x4aa   :  { %v10688_v6 = vpop.f32.mrf.mxu0 }
 0x4af   :  { %2293 = vmatmul.f32.gmra.mxu1 %v1400_v8  ;;  %v10760_v8 = vadd.f32 %v10277_v33, %v16954_v47  ;;  %v10793_v47 = vadd.f32 %v10277_v33, %v16962_v63  ;;  %v10813_v63 = vadd.f32 %v10277_v33, %v16970_v11  ;;  %v10829_v11 = vadd.f32 %v10277_v33, %v16973_v10 }
 0x4b0   :  { %v844_v10 = vadd.f32 %v10277_v33, %v16976_v45 }
 0x4b1   :  { %16971 = vst [vmem:[#allocation7_spill] sm:$0xff] %v10813_v63 }
 0x4b2   :  { %v10693_v26 = vpop.f32.mrf.mxu0 }
 0x4b3   :  { %v1057_v43 = vadd.f32 %v10277_v33, %v10693_v26 }
 0x4b7   :  { %2296 = vmatmul.f32.gmra.mxu1 %v1403_v29  ;;  %v16955_v29 = vld [vmem:[#allocation24_spill] sm:$0xff] }
 0x4ba   :  { %v10698_v54 = vpop.f32.mrf.mxu0 }
 0x4bf   :  { %2299 = vmatmul.f32.gmra.mxu1 %v1406_v31  ;;  %v10764_v31 = vadd.f32 %v10277_v33, %v16955_v29  ;;  %v16963_v29 = vld [vmem:[#allocation28_spill] sm:$0xff] }
 0x4c2   :  { %v1062_v53 = vpop.f32.mrf.mxu0 }
 0x4c3   :  { %v1063_v46 = vadd.f32 %v10277_v33, %v1062_v53  ;;  %v16988_v53 = vld [vmem:[#allocation40_spill] sm:$0xff] }
 0x4c4   :  { %v10893_v12 = vadd.f32 %v10277_v33, %v16988_v53  ;;  %v16996_v53 = vld [vmem:[#allocation58_spill] sm:$0xff] }
 0x4c6   :  { %16989 = vst [vmem:[#allocation10_spill] sm:$0xff] %v10893_v12 }
 0x4c7   :  { %2302 = vmatmul.f32.gmra.mxu1 %v1409_v14  ;;  %v16956_v14 = vld [vmem:[#allocation14_spill] sm:$0xff] }
 0x4c8   :  { %v10768_v55 = vadd.f32 %v10277_v33, %v16956_v14  ;;  %v10797_v14 = vadd.f32 %v10277_v33, %v16963_v29  ;;  %v10833_v29 = vadd.f32 %v10277_v33, %v16974_v27  ;;  %v847_v27 = vadd.f32 %v10277_v33, %v16977_v39 }
 0x4ca   :  { %v1065_v30 = vpop.f32.mrf.mxu0  ;;  %v1114_v25 = vmax.f32 %v10768_v55, %v847_v27  ;;  %v10897_v55 = vadd.f32 %v10277_v33, %v16990_v40  ;;  %v964_v40 = vadd.f32 %v10277_v33, %v16996_v53 }
 0x4cb   :  { %v1066_v45 = vadd.f32 %v10277_v33, %v1065_v30  ;;  %v1113_v30 = vmax.f32 %v10752_v28, %v844_v10  ;;  %v955_v28 = vadd.f32 %v10277_v33, %v16987_v0  ;;  %v1060_v10 = vadd.f32 %v10277_v33, %v10698_v54  ;;  %v16991_v0 = vld [vmem:[#allocation44_spill] sm:$0xff]  ;;  %v16992_v54 = vld [vmem:[#allocation54_spill] sm:$0xff] }
 0x4cc   :  { %v10903_v56 = vadd.f32 %v10277_v33, %v16991_v0  ;;  %v952_v1 = vadd.f32 %v10277_v33, %v16992_v54  ;;  %v1054_v54 = vadd.f32 %v10277_v33, %v10688_v6  ;;  %v1418_v6 = vld [vmem:[%s16740_s1 + $0x120] sm:$0xff] }
 0x4cd   :  { %v1150_v61 = vmax.f32 %v955_v28, %v1063_v46  ;;  %v16997_v28 = vld [vmem:[#allocation47_spill] sm:$0xff] }
 0x4ce   :  { %v1149_v46 = vmax.f32 %v952_v1, %v1060_v10  ;;  %v16999_v10 = vld [vmem:[#allocation52_spill] sm:$0xff] }
 0x4cf   :  { %2305 = vmatmul.f32.gmra.mxu1 %v1412_v58 }
 0x4d2   :  { %v1068_v41 = vpop.f32.mrf.mxu0 }
 0x4d3   :  { %v1069_v39 = vadd.f32 %v10277_v33, %v1068_v41  ;;  %v16984_v41 = vld [vmem:[#allocation56_spill] sm:$0xff] }
 0x4d4   :  { %v958_v58 = vadd.f32 %v10277_v33, %v16984_v41 }
 0x4d5   :  { %v1152_v63 = vmax.f32 %v961_v15, %v1069_v39 }
 0x4d6   :  { %v1151_v41 = vmax.f32 %v958_v58, %v1066_v45  ;;  %v16993_v58 = vld [vmem:[#allocation45_spill] sm:$0xff]  ;;  %v16994_v45 = vld [vmem:[#allocation46_spill] sm:$0xff] }
 0x4d7   :  { %2308 = vmatmul.f32.gmra.mxu1 %v1415_v34  ;;  %v1188_v18 = vmax.f32 %v1116_v22, %v1152_v63  ;;  %v10909_v27 = vadd.f32 %v10277_v33, %v16993_v58  ;;  %v10913_v39 = vadd.f32 %v10277_v33, %v16994_v45  ;;  %v16995_v34 = vld [vmem:[#allocation53_spill] sm:$0xff]  ;;  %v10924_v58 = vadd.f32 %v10277_v33, %v16997_v28  ;;  %v16998_v45 = vld [vmem:[#allocation48_spill] sm:$0xff]  ;;  %v17000_v28 = vld [vmem:[#allocation50_spill] sm:$0xff] }
 0x4d8   :  { %v949_v26 = vadd.f32 %v10277_v33, %v16995_v34  ;;  %v1187_v63 = vmax.f32 %v1115_v19, %v1151_v41  ;;  %v10928_v15 = vadd.f32 %v10277_v33, %v16998_v45  ;;  %v1051_v34 = vadd.f32 %v10277_v33, %v10683_v51 }
 0x4d9   :  { %v946_v19 = vadd.f32 %v10277_v33, %v16999_v10  ;;  %v1186_v41 = vmax.f32 %v1114_v25, %v1150_v61  ;;  %v1260_v1 = vmul.f32 0.01, %v1188_v18  ;;  %v940_v9 = vadd.f32 %v10277_v33, %v17000_v28 }
 0x4da   :  { %v1071_v0 = vpop.f32.mrf.mxu0  ;;  %v1148_v53 = vmax.f32 %v949_v26, %v1057_v43  ;;  %v943_v45 = vadd.f32 %v10277_v33, %v17001_v44  ;;  %v1048_v51 = vadd.f32 %v10277_v33, %v10678_v57  ;;  %vm1224_vm1 = vcmp.gt.f32.partialorder %v1188_v18, 0.0  ;;  %v17002_v44 = vld [vmem:[#allocation49_spill] sm:$0xff] }
 0x4db   :  { %v1072_v22 = vadd.f32 %v10277_v33, %v1071_v0  ;;  %v1147_v43 = vmax.f32 %v946_v19, %v1054_v54  ;;  %v1185_v26 = vmax.f32 %v1113_v30, %v1149_v46  ;;  %v1259_v50 = vmul.f32 0.01, %v1187_v63 }
 0x4dc   :  { %v1045_v25 = vadd.f32 %v10277_v33, %v10673_v52  ;;  %v1146_v61 = vmax.f32 %v943_v45, %v1051_v34  ;;  %vm1223_vm3 = vcmp.gt.f32.partialorder %v1187_v63, 0.0  ;;  %v1296_v10 = vsel %vm1224_vm1, %v1188_v18, %v1260_v1  ;;  %v1382_v1 = vld [vmem:[%s16740_s1] sm:$0xff] }
 0x4dd   :  { %v1153_v0 = vmax.f32 %v964_v40, %v1072_v22  ;;  %v1184_v40 = vmax.f32 %v1112_v38, %v1148_v53  ;;  %v1258_v22 = vmul.f32 0.01, %v1186_v41  ;;  %v937_v2 = vadd.f32 %v10277_v33, %v17002_v44  ;;  %2275 = vmatmul.f32.vlgmr.msrb.gmra.mxu0 %v1382_v1 }
 0x4de   :  { %v1042_v57 = vadd.f32 %v10277_v33, %v10668_v4  ;;  %v1145_v30 = vmax.f32 %v940_v9, %v1048_v51  ;;  %vm1222_vm5 = vcmp.gt.f32.partialorder %v1186_v41, 0.0  ;;  %v17003_v52 = vmax.f32 %v10744_v35, %v10833_v29  ;;  %v1421_v9 = vld [vmem:[%s16740_s1 + $0x138] sm:$0xff] }
 0x4df   :  { %v1189_v12 = vmax.f32 %v1117_v59, %v1153_v0  ;;  %2311 = vmatmul.f32.gmra.mxu1 %v1418_v6  ;;  %v1257_v38 = vmul.f32 0.01, %v1185_v26  ;;  %v1295_v46 = vsel %vm1223_vm3, %v1187_v63, %v1259_v50  ;;  %v1039_v18 = vadd.f32 %v10277_v33, %v10654_v21 }
 0x4e0   :  { %v1183_v54 = vmax.f32 %v17003_v52, %v1147_v43  ;;  %vm1221_vm6 = vcmp.gt.f32.partialorder %v1185_v26, 0.0  ;;  %v1336_v53 = vmul.f32 %v10485_v60, %v1296_v10  ;;  %v1144_v4 = vmax.f32 %v937_v2, %v1045_v25 }
 0x4e1   :  { %vm1225_vm4 = vcmp.gt.f32.partialorder %v1189_v12, 0.0  ;;  %v1261_v28 = vmul.f32 0.01, %v1189_v12  ;;  %v17004_v35 = vmax.f32 %v10740_v16, %v10829_v11  ;;  %v1256_v19 = vmul.f32 0.01, %v1184_v40 }
 0x4e2   :  { %v10949_v59 = vpop.f32.mrf.mxu0  ;;  %v1294_v50 = vsel %vm1222_vm5, %v1186_v41, %v1258_v22  ;;  %vm1220_vm7 = vcmp.gt.f32.partialorder %v1184_v40, 0.0  ;;  %v1335_v21 = vmul.f32 %v10485_v60, %v1295_v46  ;;  %v1143_v2 = vmax.f32 %v10928_v15, %v1042_v57 }
 0x4e3   :  { %v1297_v34 = vsel %vm1225_vm4, %v1189_v12, %v1261_v28  ;;  %v1182_v29 = vmax.f32 %v17004_v35, %v1146_v61  ;;  %v1036_v12 = vadd.f32 %v10277_v33, %v10625_v5  ;;  %v17006_v16 = vmax.f32 %v10736_v20, %v10823_v24 }
 0x4e4   :  { %v1337_v6 = vmul.f32 %v10485_v60, %v1297_v34  ;;  %v1255_v41 = vmul.f32 0.01, %v1183_v54  ;;  %v1293_v0 = vsel %vm1221_vm6, %v1185_v26, %v1257_v38  ;;  %v1033_v5 = vadd.f32 %v10277_v33, %v10591_v49 }
 0x4e5   :  { %v1181_v11 = vmax.f32 %v17006_v16, %v1145_v30  ;;  %vm1219_vm8 = vcmp.gt.f32.partialorder %v1183_v54, 0.0  ;;  %v1334_v45 = vmul.f32 %v10485_v60, %v1294_v50  ;;  %v10982_v51 = vadd.f32 %v10497_v32, %v1336_v53 }
 0x4e6   :  { %v10968_v63 = vadd.f32 %v10497_v32, %v1337_v6  ;;  %v1142_v20 = vmax.f32 %v10924_v58, %v1039_v18  ;;  %v17008_v24 = vmax.f32 %v10732_v7, %v10797_v14  ;;  %v1254_v43 = vmul.f32 0.01, %v1182_v29 }
 0x4e7   :  { %2314 = vmatmul.f32.gmra.mxu1 %v1421_v9  ;;  %17007 = vst [vmem:[#allocation12_spill] sm:$0xff] %v10982_v51  ;;  %v1292_v26 = vsel %vm1220_vm7, %v1184_v40, %v1256_v19  ;;  %v1030_v49 = vadd.f32 %v10277_v33, %v10536_v37  ;;  %vm1218_vm9 = vcmp.gt.f32.partialorder %v1182_v29, 0.0  ;;  %v1333_v25 = vmul.f32 %v10485_v60, %v1293_v0  ;;  %v17017_v9 = vld [vmem:[#allocation61_spill] sm:$0xff] }
 0x4e8   :  { %17005 = vst [vmem:[#allocation11_spill] sm:$0xff] %v10968_v63  ;;  %2360 = vmatpush.msra.mxu2 %v10968_v63  ;;  %2747 = vmatpush.msrb.mxu1 %v10968_v63  ;;  %v1180_v15 = vmax.f32 %v17008_v24, %v1144_v4  ;;  %v10995_v61 = vadd.f32 %v10497_v32, %v1335_v21  ;;  %v1253_v40 = vmul.f32 0.01, %v1181_v11  ;;  %vm1217_vm10 = vcmp.gt.f32.partialorder %v1181_v11, 0.0 }
 0x4e9   :  { %v1141_v7 = vmax.f32 %v10913_v39, %v1036_v12  ;;  %v17010_v14 = vmax.f32 %v10728_v3, %v10793_v47  ;;  %v1291_v37 = vsel %vm1219_vm8, %v1183_v54, %v1255_v41  ;;  %v1027_v10 = vadd.f32 %v10277_v33, %v10489_v62  ;;  %v1424_v3 = vld [vmem:[%s16740_s1 + $0x150] sm:$0xff] }
 0x4ea   :  { %17009 = vst [vmem:[#allocation13_spill] sm:$0xff] %v10995_v61  ;;  %v1077_v22 = vpop.f32.mrf.mxu0  ;;  %2361 = vmatpush.msra.mxu2 %v10982_v51  ;;  %2748 = vmatpush.msrb.mxu1 %v10982_v51  ;;  %v1332_v28 = vmul.f32 %v10485_v60, %v1292_v26  ;;  %v11008_v44 = vadd.f32 %v10497_v32, %v1334_v45  ;;  %v1252_v57 = vmul.f32 0.01, %v1180_v15  ;;  %vm1216_vm11 = vcmp.gt.f32.partialorder %v1180_v15, 0.0  ;;  %v17026_v26 = vld [vmem:[#allocation6_spill] sm:$0xff] }
 0x4eb   :  { %v1179_v58 = vmax.f32 %v17010_v14, %v1143_v2  ;;  %v1140_v47 = vmax.f32 %v10909_v27, %v1033_v5  ;;  %v17012_v39 = vmax.f32 %v10724_v13, %v10789_v17  ;;  %v1290_v30 = vsel %vm1218_vm9, %v1182_v29, %v1254_v43  ;;  %v17014_v27 = vld [vmem:[#allocation60_spill] sm:$0xff]  ;;  %v1427_v5 = vld [vmem:[%s16740_s1 + $0x168] sm:$0xff]  ;;  %v17025_v43 = vld [vmem:[#allocation10_spill] sm:$0xff] }
 0x4ec   :  { %17011 = vst [vmem:[#allocation22_spill] sm:$0xff] %v11008_v44  ;;  %2362 = vmatpush.msra.mxu2 %v10995_v61  ;;  %2749 = vmatpush.msrb.mxu1 %v10995_v61  ;;  %v1139_v52 = vmax.f32 %v10903_v56, %v1030_v49  ;;  %v1331_v54 = vmul.f32 %v10485_v60, %v1291_v37  ;;  %v17029_v37 = vld [vmem:[#allocation41_spill] sm:$0xff]  ;;  %vm2174_vm6 = vcmask 261120  }
 0x4ed   :  { %v1178_v62 = vmax.f32 %v17012_v39, %v1142_v20  ;;  %v11023_v38 = vadd.f32 %v10497_v32, %v1333_v25  ;;  %v11029_v46 = vadd.f32 %v10277_v33, %v17014_v27  ;;  %v17015_v13 = vmax.f32 %v10720_v48, %v10778_v23 }
 0x4ee   :  { %2363 = vmatpush.msra.mxu2 %v11008_v44  ;;  %2750 = vmatpush.msrb.mxu1 %v11008_v44  ;;  %v1251_v34 = vmul.f32 0.01, %v1179_v58  ;;  %v1289_v56 = vsel %vm1217_vm10, %v1181_v11, %v1253_v40  ;;  %v1138_v18 = vmax.f32 %v10897_v55, %v1027_v10  ;;  %vm1215_vm12 = vcmp.gt.f32.partialorder %v1179_v58, 0.0 }
 0x4ef   :  { %17013 = vst [vmem:[#allocation23_spill] sm:$0xff] %v11023_v38  ;;  %v1177_v17 = vmax.f32 %v17015_v13, %v1141_v7  ;;  %2317 = vmatmul.f32.gmra.mxu1 %v1424_v3  ;;  %v1330_v53 = vmul.f32 %v10485_v60, %v1290_v30  ;;  %v11038_v6 = vadd.f32 %v10497_v32, %v1332_v28  ;;  %v1250_v35 = vmul.f32 0.01, %v1178_v62  ;;  %v17028_v7 = vld [vmem:[#allocation59_spill] sm:$0xff]  ;;  %v17031_v30 = vld [vmem:[#allocation9_spill] sm:$0xff] }
 0x4f0   :  { %2364 = vmatpush.msra.mxu2 %v11023_v38  ;;  %2751 = vmatpush.msrb.mxu1 %v11023_v38  ;;  %v973_v48 = vadd.f32 %v10277_v33, %v17017_v9  ;;  %v17018_v23 = vmax.f32 %v10716_v42, %v10764_v31  ;;  %v1288_v55 = vsel %vm1216_vm11, %v1180_v15, %v1252_v57  ;;  %vm1214_vm13 = vcmp.gt.f32.partialorder %v1178_v62, 0.0  ;;  %v9399_v13 = vld [vmem:[%s16737_s4] ss:$0 sm:$0xff] }
 0x4f1   :  { %17016 = vst [vmem:[#allocation24_spill] sm:$0xff] %v11038_v6  ;;  %v17019_v29 = vmax.f32 %v10712_v36, %v10760_v8  ;;  %v1329_v50 = vmul.f32 %v10485_v60, %v1289_v56  ;;  %v11053_v12 = vadd.f32 %v10497_v32, %v1331_v54  ;;  %v1249_v42 = vmul.f32 0.01, %v1177_v17  ;;  %v17021_v36 = vld [vmem:[#allocation2_spill] sm:$0xff]  ;;  %v17022_v8 = vld [vmem:[#allocation3_spill] sm:$0xff] }
 0x4f2   :  { %v1176_v4 = vmax.f32 %v17018_v23, %v1140_v47  ;;  %v1080_v21 = vpop.f32.mrf.mxu0  ;;  %2365 = vmatpush.msra.mxu2 %v11038_v6  ;;  %2752 = vmatpush.msrb.mxu1 %v11038_v6  ;;  %v1287_v31 = vsel %vm1215_vm12, %v1179_v58, %v1251_v34  ;;  %v1078_v1 = vadd.f32 %v10277_v33, %v1077_v22  ;;  %vm1213_vm14 = vcmp.gt.f32.partialorder %v1177_v17, 0.0 }
 0x4f3   :  { %v1175_v19 = vmax.f32 %v17019_v29, %v1139_v52  ;;  %17020 = vst [vmem:[#allocation14_spill] sm:$0xff] %v11053_v12  ;;  %v1081_v2 = vadd.f32 %v10277_v33, %v1080_v21  ;;  %v17023_v16 = vmax.f32 %v17021_v36, %v17022_v8  ;;  %v1328_v41 = vmul.f32 %v10485_v60, %v1288_v55  ;;  %v17032_v52 = vld [vmem:[#allocation4_spill] sm:$0xff] }
 0x4f4   :  { %v11065_v0 = vadd.f32 %v10497_v32, %v1330_v53  ;;  %2366 = vmatpush.msra.mxu2 %v11053_v12  ;;  %2753 = vmatpush.msrb.mxu1 %v11053_v12  ;;  %v1248_v45 = vmul.f32 0.01, %v1176_v4  ;;  %v1286_v20 = vsel %vm1214_vm13, %v1178_v62, %v1250_v35  ;;  %v1075_v24 = vadd.f32 %v10277_v33, %v10949_v59  ;;  %v17036_v53 = vld [vmem:[#allocation8_spill] sm:$0xff] }
 0x4f5   :  { %v1174_v11 = vmax.f32 %v17023_v16, %v1138_v18  ;;  %v1156_v15 = vmax.f32 %v973_v48, %v1081_v2  ;;  %v1120_v49 = vmax.f32 %v17026_v26, %v17025_v43  ;;  %vm1212_vm15 = vcmp.gt.f32.partialorder %v1176_v4, 0.0  ;;  %v17035_v18 = vld [vmem:[#allocation5_spill] sm:$0xff] }
 0x4f6   :  { %17024 = vst [vmem:[#allocation15_spill] sm:$0xff] %v11065_v0  ;;  %v1327_v25 = vmul.f32 %v10485_v60, %v1287_v31  ;;  %v11079_v22 = vadd.f32 %v10497_v32, %v1329_v50  ;;  %2367 = vmatpush.msra.mxu2 %v11065_v0  ;;  %2754 = vmatpush.msrb.mxu1 %v11065_v0  ;;  %v1247_v58 = vmul.f32 0.01, %v1175_v19  ;;  %vm1211_vm0 = vcmp.gt.f32.partialorder %v1175_v19, 0.0 }
 0x4f7   :  { %v967_v14 = vadd.f32 %v10277_v33, %v17028_v7  ;;  %v1285_v59 = vsel %vm1213_vm14, %v1177_v17, %v1249_v42  ;;  %v1155_v40 = vmax.f32 %v11029_v46, %v1078_v1  ;;  %2320 = vmatmul.f32.gmra.mxu1 %v1427_v5  ;;  %v868_v10 = vadd.f32 %v10277_v33, %v17029_v37  ;;  %v17034_v17 = vld [vmem:[#allocation62_spill] sm:$0xff]  ;;  %v1383_v7 = vld [vmem:[%s16740_s1 + $0x8] sm:$0xff] }
 0x4f8   :  { %17027 = vst [vmem:[#allocation16_spill] sm:$0xff] %v11079_v22  ;;  %v1326_v28 = vmul.f32 %v10485_v60, %v1286_v20  ;;  %v11091_v3 = vadd.f32 %v10497_v32, %v1328_v41  ;;  %2368 = vmatpush.msra.mxu2 %v11079_v22  ;;  %2755 = vmatpush.msrb.mxu1 %v11079_v22  ;;  %v1246_v47 = vmul.f32 0.01, %v1174_v11  ;;  %vm1210_vm2 = vcmp.gt.f32.partialorder %v1174_v11, 0.0 }
 0x4f9   :  { %v1284_v39 = vsel %vm1212_vm15, %v1176_v4, %v1248_v45  ;;  %v1154_v62 = vmax.f32 %v967_v14, %v1075_v24  ;;  %v1192_v57 = vmax.f32 %v1120_v49, %v1156_v15  ;;  %v1118_v54 = vmax.f32 %v17032_v52, %v17031_v30  ;;  %v17038_v4 = vld [vmem:[#allocation7_spill] sm:$0xff]  ;;  %v17044_v30 = vld [vmem:[#allocation66_spill] sm:$0xff]  ;;  %v17045_v52 = vld [vmem:[#allocation65_spill] sm:$0xff] }
 0x4fa   :  { %17030 = vst [vmem:[#allocation25_spill] sm:$0xff] %v11091_v3  ;;  %v1325_v33 = vmul.f32 %v10485_v60, %v1285_v59  ;;  %v11100_v27 = vadd.f32 %v10497_v32, %v1327_v25  ;;  %v1083_v46 = vpop.f32.mrf.mxu0  ;;  %2369 = vmatpush.msra.mxu2 %v11091_v3  ;;  %2756 = vmatpush.msrb.mxu1 %v11091_v3  ;;  %v1433_v25 = vld [vmem:[%s16740_s1 + $0x198] sm:$0xff]  ;;  %vm7640_vm14 = vcmask 457728   ;;  %vm8008_vm15 = vcmask 523264  }
 0x4fb   :  { %v976_v34 = vadd.f32 %v9399_v13, %v17034_v17  ;;  %v1283_v56 = vsel %vm1211_vm0, %v1175_v19, %v1247_v58  ;;  %v17037_v9 = vmax.f32 %v17035_v18, %v17036_v53  ;;  %v1084_v23 = vadd.f32 %v9399_v13, %v1083_v46  ;;  %v1430_v19 = vld [vmem:[%s16740_s1 + $0x180] sm:$0xff]  ;;  %v1439_v46 = vld [vmem:[%s16740_s1 + $0x1c8] sm:$0xff]  ;;  %v1389_v13 = vld [vmem:[%s16740_s1 + $0x38] sm:$0xff] }
 0x4fc   :  { %17033 = vst [vmem:[#allocation17_spill] sm:$0xff] %v11100_v27  ;;  %v1121_v35 = vmax.f32 %v17038_v4, %v868_v10  ;;  %v1324_v55 = vmul.f32 %v10485_v60, %v1284_v39  ;;  %v11115_v29 = vadd.f32 %v10497_v32, %v1326_v28  ;;  %2370 = vmatpush.msra.mxu2 %v11100_v27  ;;  %v1264_v42 = vmul.f32 0.01, %v1192_v57  ;;  %v17047_v17 = vld [vmem:[#allocation63_spill] sm:$0xff]  ;;  %v17048_v18 = vld [vmem:[#allocation42_spill] sm:$0xff] }
 0x4fd   :  { %v1191_v48 = vmax.f32 %v17037_v9, %v1155_v40  ;;  %2757 = vmatpush.msrb.mxu1 %v11100_v27  ;;  %v1282_v50 = vsel %vm1210_vm2, %v1174_v11, %v1246_v47  ;;  %v1190_v21 = vmax.f32 %v1118_v54, %v1154_v62  ;;  %v1157_v31 = vmax.f32 %v976_v34, %v1084_v23  ;;  %v1436_v47 = vld [vmem:[%s16740_s1 + $0x1b0] sm:$0xff]  ;;  %v1386_v62 = vld [vmem:[%s16740_s1 + $0x20] sm:$0xff]  ;;  %v1387_v34 = vld [vmem:[%s16740_s1 + $0x28] sm:$0xff] }
 0x4fe   :  { %17039 = vst [vmem:[#allocation26_spill] sm:$0xff] %v11115_v29  ;;  %v1323_v1 = vmul.f32 %v10485_v60, %v1283_v56  ;;  %v11125_v2 = vadd.f32 %v10497_v32, %v1325_v33  ;;  %vm1228_vm1 = vcmp.gt.f32.partialorder %v1192_v57, 0.0  ;;  %2371 = vmatpush.msra.mxu2 %v11115_v29  ;;  %v1322_v16 = vmul.f32 %v10485_v60, %v1282_v50  ;;  %v17046_v33 = vld [vmem:[#allocation64_spill] sm:$0xff]  ;;  %v1723_v56 = vld [vmem:[%s16740_s1 + $0xaa8] sm:$0xff]  ;;  %v1390_v4 = vld [vmem:[%s16740_s1 + $0x40] sm:$0xff] }
 0x4ff   :  { %2758 = vmatpush.msrb.mxu1 %v11115_v29  ;;  %v1263_v36 = vmul.f32 0.01, %v1191_v48  ;;  %v1193_v8 = vmax.f32 %v1121_v35, %v1157_v31  ;;  %v11131_v11 = vadd.f32 %v10497_v32, %v1324_v55  ;;  %vm1227_vm3 = vcmp.gt.f32.partialorder %v1191_v48, 0.0  ;;  %v17049_v9 = vld [vmem:[#allocation71_spill] sm:$0xff]  ;;  %v17050_v23 = vld [vmem:[#allocation68_spill] sm:$0xff]  ;;  %v17051_v55 = vld [vmem:[#allocation69_spill] sm:$0xff] }
 0x500   :  { %17040 = vst [vmem:[#allocation27_spill] sm:$0xff] %v11125_v2  ;;  %2323 = vmatmul.f32.gmra.mxu1 %v1430_v19  ;;  %2372 = vmatpush.msra.mxu2 %v11125_v2  ;;  %v1262_v41 = vmul.f32 0.01, %v1190_v21  ;;  %v1300_v5 = vsel %vm1228_vm1, %v1192_v57, %v1264_v42  ;;  %v11136_v20 = vadd.f32 %v10497_v32, %v1323_v1  ;;  %vm1226_vm5 = vcmp.gt.f32.partialorder %v1190_v21, 0.0  ;;  %v1720_v57 = vld [vmem:[%s16740_s1 + $0xa90] sm:$0xff]  ;;  %v1726_v19 = vld [vmem:[%s16740_s1 + $0xac0] sm:$0xff] }
 0x501   :  { %17041 = vst [vmem:[#allocation28_spill] sm:$0xff] %v11131_v11  ;;  %2759 = vmatpush.msrb.mxu1 %v11125_v2  ;;  %vm1229_vm4 = vcmp.gt.f32.partialorder %v1193_v8, 0.0  ;;  %v1265_v45 = vmul.f32 0.01, %v1193_v8  ;;  %v1299_v24 = vsel %vm1227_vm3, %v1191_v48, %v1263_v36  ;;  %v11141_v43 = vadd.f32 %v10497_v32, %v1322_v16  ;;  %v1442_v48 = vld [vmem:[%s16740_s1 + $0x1e0] sm:$0xff]  ;;  %v1392_v35 = vld [vmem:[%s16740_s1 + $0x50] sm:$0xff] }
 0x502   :  { %17042 = vst [vmem:[#allocation18_spill] sm:$0xff] %v11136_v20  ;;  %2373 = vmatpush.msra.mxu2 %v11131_v11  ;;  %v1340_v26 = vmul.f32 %v10485_v60, %v1300_v5  ;;  %v1298_v58 = vsel %vm1226_vm5, %v1190_v21, %v1262_v41  ;;  %v1339_v59 = vmul.f32 %v10485_v60, %v1299_v24  ;;  %v17052_v50 = vld [vmem:[#allocation70_spill] sm:$0xff]  ;;  %v17053_v42 = vld [vmem:[#allocation67_spill] sm:$0xff]  ;;  %v1445_v31 = vld [vmem:[%s16740_s1 + $0x1f8] sm:$0xff]  ;;  %vm8653_vm0 = vcmask 15360  }
 0x503   :  { %2760 = vmatpush.msrb.mxu1 %v11131_v11  ;;  %v1301_v15 = vsel %vm1229_vm4, %v1193_v8, %v1265_v45  ;;  %17043 = vst [vmem:[#allocation19_spill] sm:$0xff] %v11141_v43  ;;  %v1338_v37 = vmul.f32 %v10485_v60, %v1298_v58  ;;  %v17054_v1 = vld [vmem:[#allocation72_spill] sm:$0xff]  ;;  %v1393_v36 = vld [vmem:[%s16740_s1 + $0x58] sm:$0xff]  ;;  %v1395_v8 = vld [vmem:[%s16740_s1 + $0x68] sm:$0xff] }
 0x504   :  { %v1341_v49 = vmul.f32 %v10485_v60, %v1301_v15  ;;  %2374 = vmatpush.msra.mxu2 %v11136_v20  ;;  %v11153_v14 = vpop.f32.mrf.mxu1  ;;  %v11163_v10 = vadd.f32 %v10497_v32, %v1340_v26  ;;  %v11169_v28 = vadd.f32 %v10497_v32, %v1339_v59  ;;  %v17055_v16 = vld [vmem:[#allocation73_spill] sm:$0xff]  ;;  %v17056_v5 = vld [vmem:[#allocation74_spill] sm:$0xff]  ;;  %v17057_v24 = vld [vmem:[#allocation75_spill] sm:$0xff] }
 0x505   :  { %2761 = vmatpush.msrb.mxu1 %v11136_v20  ;;  %v11175_v60 = vadd.f32 %v10497_v32, %v1338_v37  ;;  %v1729_v41 = vld [vmem:[%s16740_s1 + $0xad8] sm:$0xff]  ;;  %v1448_v15 = vld [vmem:[%s16740_s1 + $0x210] sm:$0xff]  ;;  %v1451_v37 = vld [vmem:[%s16740_s1 + $0x228] sm:$0xff] }
 0x506   :  { %v11157_v40 = vadd.f32 %v10497_v32, %v1341_v49  ;;  %2375 = vmatpush.msra.mxu2 %v11141_v43  ;;  %v1384_v32 = vld [vmem:[%s16740_s1 + $0x10] sm:$0xff] }
 0x507   :  { %2762 = vmatpush.msrb.mxu1 %v11141_v43  ;;  %2376 = vmatmul.f32.vlgmr.msra.gmra.mxu2 %v1383_v7  ;;  %v17058_v26 = vld [vmem:[#allocation76_spill] sm:$0xff]  ;;  %v17059_v7 = vld [vmem:[#allocation77_spill] sm:$0xff] }
 0x508   :  { %2326 = vmatmul.f32.gmra.mxu1 %v1433_v25  ;;  %2473 = vmatpush.msra.mxu3 %v11157_v40  ;;  %v1396_v49 = vld [vmem:[%s16740_s1 + $0x70] sm:$0xff]  ;;  %v1398_v25 = vld [vmem:[%s16740_s1 + $0x80] sm:$0xff] }
 0x509   :  { %2860 = vmatpush.msrb.mxu2 %v11157_v40  ;;  %4817 = vmatpush.msra.mxu0 %v11157_v40  ;;  %v1732_v58 = vld [vmem:[%s16740_s1 + $0xaf0] sm:$0xff] }
 0x50a   :  { %2474 = vmatpush.msra.mxu3 %v11163_v10 }
 0x50b   :  { %2861 = vmatpush.msrb.mxu2 %v11163_v10  ;;  %4818 = vmatpush.msra.mxu0 %v11163_v10 }
 0x50c   :  { %2475 = vmatpush.msra.mxu3 %v11169_v28  ;;  %v11182_v39 = vpop.f32.mrf.mxu1 }
 0x50d   :  { %2862 = vmatpush.msrb.mxu2 %v11169_v28  ;;  %4819 = vmatpush.msra.mxu0 %v11169_v28 }
 0x50e   :  { %2476 = vmatpush.msra.mxu3 %v11175_v60 }
 0x50f   :  { %2863 = vmatpush.msrb.mxu2 %v11175_v60  ;;  %4820 = vmatpush.msra.mxu0 %v11175_v60 }
 0x510   :  { %2329 = vmatmul.f32.gmra.mxu1 %v1436_v47  ;;  %2379 = vmatmul.f32.gmra.mxu2 %v1386_v62  ;;  %v1399_v47 = vld [vmem:[%s16740_s1 + $0x88] sm:$0xff]  ;;  %v1401_v62 = vld [vmem:[%s16740_s1 + $0x98] sm:$0xff] }
 0x511   :  { %8817 = vmatmul.msk.f32.vlgmr.msra.gmra.mxu3 %vm2174_vm6, %v1384_v32  ;;  %3403 = vmatpush.msra.mxu2 %v17044_v30  ;;  %v1735_v32 = vld [vmem:[%s16740_s1 + $0xb08] sm:$0xff] }
 0x512   :  { %2646 = vmatpush.msrb.mxu3 %v17044_v30  ;;  %9041 = vmatmul.msk.f32.vlgmr.msra.gmra.mxu0 %vm2174_vm6, %v1720_v57  ;;  %v2141_v57 = vld [vmem:[%s16741_s7 + $0x18] sm:$0xff] }
 0x513   :  { %5417 = vmatpush.msrb.mxu0 %v11157_v40  ;;  %3404 = vmatpush.msra.mxu2 %v17045_v52 }
 0x514   :  { %2647 = vmatpush.msrb.mxu3 %v17045_v52  ;;  %v11204_v54 = vpop.f32.mrf.mxu1  ;;  %3230 = vmatpush.msra.mxu1 %v2141_v57  ;;  %v1411_v57 = vld [vmem:[%s16740_s1 + $0xe8] sm:$0xff] }
 0x515   :  { %5418 = vmatpush.msrb.mxu0 %v11163_v10  ;;  %3405 = vmatpush.msra.mxu2 %v17046_v33 }
 0x516   :  { %2648 = vmatpush.msrb.mxu3 %v17046_v33 }
 0x517   :  { %5419 = vmatpush.msrb.mxu0 %v11169_v28  ;;  %3406 = vmatpush.msra.mxu2 %v17047_v17 }
 0x518   :  { %2649 = vmatpush.msrb.mxu3 %v17047_v17  ;;  %2332 = vmatmul.f32.gmra.mxu1 %v1439_v46  ;;  %v2140_v46 = vld [vmem:[%s16741_s7 + $0x10] sm:$0xff] }
 0x519   :  { %5420 = vmatpush.msrb.mxu0 %v11175_v60  ;;  %2382 = vmatmul.f32.gmra.mxu2 %v1389_v13 }
 0x51a   :  { %8818 = vmatmul.msk.f32.gmra.mxu3 %vm2174_vm6, %v1387_v34  ;;  %3407 = vmatpush.msra.mxu2 %v17048_v18  ;;  %v1454_v34 = vld [vmem:[%s16740_s1 + $0x240] sm:$0xff] }
 0x51b   :  { %6017 = vmatpush.msra.mxu0 %v11157_v40  ;;  %2650 = vmatpush.msrb.mxu3 %v17048_v18 }
 0x51c   :  { %9042 = vmatmul.msk.f32.gmra.mxu0 %vm2174_vm6, %v1723_v56  ;;  %v11230_v53 = vpop.f32.mrf.mxu1  ;;  %3408 = vmatpush.msra.mxu2 %v17049_v9  ;;  %v2139_v56 = vld [vmem:[%s16741_s7 + $0x8] sm:$0xff] }
 0x51d   :  { %6018 = vmatpush.msra.mxu0 %v11163_v10  ;;  %2651 = vmatpush.msrb.mxu3 %v17049_v9 }
 0x51e   :  { %3409 = vmatpush.msra.mxu2 %v17050_v23  ;;  %3231 = vmatpush.msra.mxu1 %v2140_v46  ;;  %v1413_v46 = vld [vmem:[%s16740_s1 + $0xf8] sm:$0xff] }
 0x51f   :  { %6019 = vmatpush.msra.mxu0 %v11169_v28  ;;  %2652 = vmatpush.msrb.mxu3 %v17050_v23 }
 0x520   :  { %2335 = vmatmul.f32.gmra.mxu1 %v1442_v48  ;;  %3410 = vmatpush.msra.mxu2 %v17051_v55  ;;  %v1402_v48 = vld [vmem:[%s16740_s1 + $0xa0] sm:$0xff] }
 0x521   :  { %6020 = vmatpush.msra.mxu0 %v11175_v60  ;;  %2653 = vmatpush.msrb.mxu3 %v17051_v55  ;;  %v1512_v55 = vld [vmem:[%s16740_s1 + $0x410] sm:$0xff] }
 0x522   :  { %8819 = vmatmul.msk.f32.gmra.mxu3 %vm2174_vm6, %v1390_v4  ;;  %2385 = vmatmul.f32.gmra.mxu2 %v1392_v35  ;;  %v1404_v4 = vld [vmem:[%s16740_s1 + $0xb0] sm:$0xff]  ;;  %v2138_v35 = vld [vmem:[%s16741_s7] sm:$0xff] }
 0x523   :  { %2654 = vmatpush.msrb.mxu3 %v17052_v50  ;;  %3411 = vmatpush.msra.mxu2 %v17052_v50 }
 0x524   :  { %9043 = vmatmul.msk.f32.gmra.mxu0 %vm2174_vm6, %v1726_v19  ;;  %v11257_v21 = vpop.f32.mrf.mxu1  ;;  %v1738_v19 = vld [vmem:[%s16740_s1 + $0xb20] sm:$0xff]  ;;  %3232 = vmatpush.msra.mxu1 %v2139_v56 }
 0x525   :  { %2655 = vmatpush.msrb.mxu3 %v17053_v42  ;;  %3412 = vmatpush.msra.mxu2 %v17053_v42 }
 0x526   :  { %3233 = vmatpush.msra.mxu1 %v2138_v35  ;;  %v1416_v35 = vld [vmem:[%s16740_s1 + $0x110] sm:$0xff] }
 0x527   :  { %2656 = vmatpush.msrb.mxu3 %v17054_v1  ;;  %3413 = vmatpush.msra.mxu2 %v17054_v1 }
 0x528   :  { %2338 = vmatmul.f32.gmra.mxu1 %v1445_v31 }
 0x529   :  { %2657 = vmatpush.msrb.mxu3 %v17055_v16  ;;  %3414 = vmatpush.msra.mxu2 %v17055_v16  ;;  %v1444_v16 = vld [vmem:[%s16740_s1 + $0x1f0] sm:$0xff] }
 0x52a   :  { %8820 = vmatmul.msk.f32.gmra.mxu3 %vm2174_vm6, %v1393_v36  ;;  %2388 = vmatmul.f32.gmra.mxu2 %v1395_v8  ;;  %v1457_v36 = vld [vmem:[%s16740_s1 + $0x258] sm:$0xff] }
 0x52b   :  { %2658 = vmatpush.msrb.mxu3 %v17056_v5  ;;  %3415 = vmatpush.msra.mxu2 %v17056_v5  ;;  %v1405_v8 = vld [vmem:[%s16740_s1 + $0xb8] sm:$0xff] }
 0x52c   :  { %9044 = vmatmul.msk.f32.gmra.mxu0 %vm2174_vm6, %v1729_v41  ;;  %v11281_v45 = vpop.f32.mrf.mxu1  ;;  %v1407_v41 = vld [vmem:[%s16740_s1 + $0xc8] sm:$0xff]  ;;  %v1441_v5 = vld [vmem:[%s16740_s1 + $0x1d8] sm:$0xff] }
 0x52d   :  { %2659 = vmatpush.msrb.mxu3 %v17057_v24  ;;  %3416 = vmatpush.msra.mxu2 %v17057_v24  ;;  %v1438_v24 = vld [vmem:[%s16740_s1 + $0x1c0] sm:$0xff] }
 0x52f   :  { %2660 = vmatpush.msrb.mxu3 %v17058_v26  ;;  %3417 = vmatpush.msra.mxu2 %v17058_v26 }
 0x530   :  { %2341 = vmatmul.f32.gmra.mxu1 %v1448_v15  ;;  %v1741_v15 = vld [vmem:[%s16740_s1 + $0xb38] sm:$0xff] }
 0x531   :  { %2661 = vmatpush.msrb.mxu3 %v17059_v7  ;;  %3418 = vmatpush.msra.mxu2 %v17059_v7  ;;  %v1488_v7 = vld [vmem:[%s16740_s1 + $0x350] sm:$0xff] }
 0x532   :  { %8821 = vmatmul.msk.f32.gmra.mxu3 %vm2174_vm6, %v1396_v49  ;;  %2391 = vmatmul.f32.gmra.mxu2 %v1398_v25  ;;  %v1460_v25 = vld [vmem:[%s16740_s1 + $0x270] sm:$0xff] }
 0x534   :  { %9045 = vmatmul.msk.f32.gmra.mxu0 %vm2174_vm6, %v1732_v58  ;;  %v11303_v59 = vpop.f32.mrf.mxu1  ;;  %v1408_v58 = vld [vmem:[%s16740_s1 + $0xd0] sm:$0xff] }
 0x538   :  { %2344 = vmatmul.f32.gmra.mxu1 %v1451_v37  ;;  %v1410_v37 = vld [vmem:[%s16740_s1 + $0xe0] sm:$0xff] }
 0x53a   :  { %8822 = vmatmul.msk.f32.gmra.mxu3 %vm2174_vm6, %v1399_v47  ;;  %2394 = vmatmul.f32.gmra.mxu2 %v1401_v62  ;;  %v1744_v47 = vld [vmem:[%s16740_s1 + $0xb50] sm:$0xff] }
 0x53c   :  { %9046 = vmatmul.msk.f32.gmra.mxu0 %vm2174_vm6, %v1735_v32  ;;  %v11325_v13 = vpop.f32.mrf.mxu1  ;;  %v1463_v32 = vld [vmem:[%s16740_s1 + $0x288] sm:$0xff] }
 0x540   :  { %2347 = vmatmul.f32.gmra.mxu1 %v1454_v34  ;;  %v1747_v34 = vld [vmem:[%s16740_s1 + $0xb68] sm:$0xff] }
 0x542   :  { %8823 = vmatmul.msk.f32.gmra.mxu3 %vm2174_vm6, %v1402_v48  ;;  %2397 = vmatmul.f32.gmra.mxu2 %v1404_v4  ;;  %v1467_v48 = vld [vmem:[%s16740_s1 + $0x2a8] sm:$0xff]  ;;  %v1414_v4 = vld [vmem:[%s16740_s1 + $0x100] sm:$0xff] }
 0x544   :  { %9047 = vmatmul.msk.f32.gmra.mxu0 %vm2174_vm6, %v1738_v19  ;;  %v11347_v31 = vpop.f32.mrf.mxu1  ;;  %v1750_v19 = vld [vmem:[%s16740_s1 + $0xb80] sm:$0xff] }
 0x548   :  { %2350 = vmatmul.f32.gmra.mxu1 %v1457_v36 }
 0x54a   :  { %8824 = vmatmul.msk.f32.gmra.mxu3 %vm2174_vm6, %v1405_v8  ;;  %2400 = vmatmul.f32.gmra.mxu2 %v1407_v41  ;;  %v1470_v8 = vld [vmem:[%s16740_s1 + $0x2c0] sm:$0xff]  ;;  %v1417_v41 = vld [vmem:[%s16740_s1 + $0x118] sm:$0xff] }
 0x54c   :  { %9048 = vmatmul.msk.f32.gmra.mxu0 %vm2174_vm6, %v1741_v15  ;;  %v11363_v49 = vpop.f32.mrf.mxu1  ;;  %v1419_v15 = vld [vmem:[%s16740_s1 + $0x128] sm:$0xff] }
 0x550   :  { %2353 = vmatmul.f32.gmra.mxu1 %v1460_v25  ;;  %v1753_v25 = vld [vmem:[%s16740_s1 + $0xb98] sm:$0xff] }
 0x552   :  { %8825 = vmatmul.msk.f32.gmra.mxu3 %vm2174_vm6, %v1408_v58  ;;  %2403 = vmatmul.f32.gmra.mxu2 %v1410_v37  ;;  %v1473_v37 = vld [vmem:[%s16740_s1 + $0x2d8] sm:$0xff] }
 0x554   :  { %9049 = vmatmul.msk.f32.gmra.mxu0 %vm2174_vm6, %v1744_v47  ;;  %v11379_v62 = vpop.f32.mrf.mxu1  ;;  %v1420_v47 = vld [vmem:[%s16740_s1 + $0x130] sm:$0xff] }
 0x558   :  { %2356 = vmatmul.f32.gmra.mxu1 %v1463_v32  ;;  %v1422_v32 = vld [vmem:[%s16740_s1 + $0x140] sm:$0xff] }
 0x55a   :  { %8826 = vmatmul.msk.f32.gmra.mxu3 %vm2174_vm6, %v1411_v57  ;;  %2406 = vmatmul.f32.gmra.mxu2 %v1413_v46  ;;  %v1756_v57 = vld [vmem:[%s16740_s1 + $0xbb0] sm:$0xff] }
 0x55c   :  { %9050 = vmatmul.msk.f32.gmra.mxu0 %vm2174_vm6, %v1747_v34  ;;  %v11395_v56 = vpop.f32.mrf.mxu1  ;;  %v1476_v34 = vld [vmem:[%s16740_s1 + $0x2f0] sm:$0xff] }
 0x560   :  { %2763 = vmatmul.f32.vlgmr.msrb.gmra.mxu1 %v1467_v48  ;;  %v1423_v48 = vld [vmem:[%s16740_s1 + $0x148] sm:$0xff] }
 0x561   :  { %3617 = vmatpush.msrb.mxu1 %v11157_v40 }
 0x562   :  { %8827 = vmatmul.msk.f32.gmra.mxu3 %vm2174_vm6, %v1414_v4  ;;  %2409 = vmatmul.f32.gmra.mxu2 %v1416_v35  ;;  %v1425_v4 = vld [vmem:[%s16740_s1 + $0x158] sm:$0xff]  ;;  %v1759_v35 = vld [vmem:[%s16740_s1 + $0xbc8] sm:$0xff] }
 0x563   :  { %3618 = vmatpush.msrb.mxu1 %v11163_v10 }
 0x564   :  { %9051 = vmatmul.msk.f32.gmra.mxu0 %vm2174_vm6, %v1750_v19  ;;  %v11413_v36 = vpop.f32.mrf.mxu1 }
 0x565   :  { %3619 = vmatpush.msrb.mxu1 %v11169_v28 }
 0x567   :  { %3620 = vmatpush.msrb.mxu1 %v11175_v60 }
 0x568   :  { %2766 = vmatmul.f32.gmra.mxu1 %v1470_v8  ;;  %v1479_v8 = vld [vmem:[%s16740_s1 + $0x308] sm:$0xff] }
 0x56a   :  { %8828 = vmatmul.msk.f32.gmra.mxu3 %vm2174_vm6, %v1417_v41  ;;  %2412 = vmatmul.f32.gmra.mxu2 %v1419_v15  ;;  %v1426_v41 = vld [vmem:[%s16740_s1 + $0x160] sm:$0xff]  ;;  %v1428_v15 = vld [vmem:[%s16740_s1 + $0x170] sm:$0xff] }
 0x56c   :  { %9052 = vmatmul.msk.f32.gmra.mxu0 %vm2174_vm6, %v1753_v25  ;;  %v11431_v58 = vpop.f32.mrf.mxu1  ;;  %v1762_v25 = vld [vmem:[%s16740_s1 + $0xbe0] sm:$0xff] }
 0x570   :  { %2769 = vmatmul.f32.gmra.mxu1 %v1473_v37 }
 0x572   :  { %8829 = vmatmul.msk.f32.gmra.mxu3 %vm2174_vm6, %v1420_v47  ;;  %2415 = vmatmul.f32.gmra.mxu2 %v1422_v32  ;;  %v1482_v47 = vld [vmem:[%s16740_s1 + $0x320] sm:$0xff]  ;;  %v1429_v32 = vld [vmem:[%s16740_s1 + $0x178] sm:$0xff] }
 0x574   :  { %9053 = vmatmul.msk.f32.gmra.mxu0 %vm2174_vm6, %v1756_v57  ;;  %v11447_v46 = vpop.f32.mrf.mxu1  ;;  %v1431_v57 = vld [vmem:[%s16740_s1 + $0x188] sm:$0xff] }
 0x578   :  { %2772 = vmatmul.f32.gmra.mxu1 %v1476_v34  ;;  %v1765_v34 = vld [vmem:[%s16740_s1 + $0xbf8] sm:$0xff] }
 0x57a   :  { %8830 = vmatmul.msk.f32.gmra.mxu3 %vm2174_vm6, %v1423_v48  ;;  %2418 = vmatmul.f32.gmra.mxu2 %v1425_v4 }
 0x57c   :  { %9054 = vmatmul.msk.f32.gmra.mxu0 %vm2174_vm6, %v1759_v35  ;;  %v1485_v35 = vld [vmem:[%s16740_s1 + $0x338] sm:$0xff] }
 0x57d   :  { %v11463_v19 = vpop.f32.mrf.mxu1 }
 0x580   :  { %2775 = vmatmul.f32.gmra.mxu1 %v1479_v8  ;;  %v2276_v8 = vpop.f32.mrf.mxu0 }
 0x582   :  { %8831 = vmatmul.msk.f32.gmra.mxu3 %vm2174_vm6, %v1426_v41  ;;  %2421 = vmatmul.f32.gmra.mxu2 %v1428_v15  ;;  %v1432_v41 = vld [vmem:[%s16740_s1 + $0x190] sm:$0xff]  ;;  %v1434_v15 = vld [vmem:[%s16740_s1 + $0x1a0] sm:$0xff] }
 0x584   :  { %9055 = vmatmul.msk.f32.gmra.mxu0 %vm2174_vm6, %v1762_v25 }
 0x585   :  { %v11479_v37 = vpop.f32.mrf.mxu1 }
 0x588   :  { %2778 = vmatmul.f32.gmra.mxu1 %v1482_v47  ;;  %v1768_v47 = vld [vmem:[%s16740_s1 + $0xc10] sm:$0xff] }
 0x58a   :  { %8832 = vmatmul.msk.f32.gmra.mxu3 %vm2174_vm6, %v1429_v32  ;;  %v2377_v48 = vpop.f32.mrf.mxu2  ;;  %2424 = vmatmul.f32.gmra.mxu2 %v1431_v57 }
 0x58b   :  { %v2378_v25 = vadd.f32 %v2377_v48, %v2276_v8  ;;  %v1435_v48 = vld [vmem:[%s16740_s1 + $0x1a8] sm:$0xff] }
 0x58c   :  { %9056 = vmatmul.msk.f32.gmra.mxu0 %vm2174_vm6, %v1765_v34  ;;  %v1771_v8 = vld [vmem:[%s16740_s1 + $0xc28] sm:$0xff] }
 0x58d   :  { %v11495_v4 = vpop.f32.mrf.mxu1 }
 0x590   :  { %2781 = vmatmul.f32.gmra.mxu1 %v1485_v35  ;;  %v1437_v35 = vld [vmem:[%s16740_s1 + $0x1b8] sm:$0xff] }
 0x592   :  { %8833 = vmatmul.msk.f32.gmra.mxu3 %vm2174_vm6, %v1432_v41  ;;  %2427 = vmatmul.f32.gmra.mxu2 %v1434_v15 }
 0x593   :  { %v2380_v57 = vpop.f32.mrf.mxu2 }
 0x594   :  { %v2478_v32 = vpop.f32.mrf.mxu3  ;;  %9057 = vmatmul.msk.f32.gmra.mxu0 %vm2174_vm6, %v1768_v47  ;;  %v2381_v41 = vadd.f32 %v2380_v57, %v11153_v14  ;;  %v1491_v47 = vld [vmem:[%s16740_s1 + $0x368] sm:$0xff]  ;;  %v1440_v14 = vld [vmem:[%s16740_s1 + $0x1d0] sm:$0xff]  ;;  %v1774_v57 = vld [vmem:[%s16740_s1 + $0xc40] sm:$0xff] }
 0x595   :  { %v11511_v34 = vadd.f32 %v2478_v32, %v2378_v25  ;;  %v11516_v26 = vpop.f32.mrf.mxu1 }
 0x598   :  { %2784 = vmatmul.f32.gmra.mxu1 %v1488_v7 }
 0x59a   :  { %8834 = vmatmul.msk.f32.gmra.mxu3 %vm2174_vm6, %v1435_v48  ;;  %2430 = vmatmul.f32.gmra.mxu2 %v1437_v35 }
 0x59c   :  { %9058 = vmatmul.msk.f32.gmra.mxu0 %vm2174_vm6, %v1771_v8  ;;  %v2383_v15 = vpop.f32.mrf.mxu2  ;;  %v1494_v8 = vld [vmem:[%s16740_s1 + $0x380] sm:$0xff] }
 0x59d   :  { %v2481_v25 = vpop.f32.mrf.mxu3  ;;  %v11533_v32 = vpop.f32.mrf.mxu1  ;;  %v2384_v48 = vadd.f32 %v2383_v15, %v11182_v39  ;;  %v1443_v39 = vld [vmem:[%s16740_s1 + $0x1e8] sm:$0xff] }
 0x59e   :  { %v11535_v7 = vadd.f32 %v2481_v25, %v2381_v41 }
 0x5a0   :  { %2787 = vmatmul.f32.gmra.mxu1 %v1491_v47 }
 0x5a2   :  { %8835 = vmatmul.msk.f32.gmra.mxu3 %vm2174_vm6, %v1438_v24  ;;  %2433 = vmatmul.f32.gmra.mxu2 %v1440_v14  ;;  %v1777_v24 = vld [vmem:[%s16740_s1 + $0xc58] sm:$0xff] }
 0x5a4   :  { %9059 = vmatmul.msk.f32.gmra.mxu0 %vm2174_vm6, %v1774_v57  ;;  %v1497_v57 = vld [vmem:[%s16740_s1 + $0x398] sm:$0xff] }
 0x5a5   :  { %v2484_v35 = vpop.f32.mrf.mxu3  ;;  %v11552_v41 = vpop.f32.mrf.mxu1 }
 0x5a6   :  { %v11554_v25 = vadd.f32 %v2484_v35, %v2384_v48  ;;  %v2386_v47 = vpop.f32.mrf.mxu2 }
 0x5a7   :  { %v2387_v15 = vadd.f32 %v2386_v47, %v11204_v54  ;;  %v1446_v54 = vld [vmem:[%s16740_s1 + $0x200] sm:$0xff] }
 0x5a8   :  { %2790 = vmatmul.f32.gmra.mxu1 %v1494_v8 }
 0x5aa   :  { %8836 = vmatmul.msk.f32.gmra.mxu3 %vm2174_vm6, %v1441_v5  ;;  %2436 = vmatmul.f32.gmra.mxu2 %v1443_v39  ;;  %v1780_v5 = vld [vmem:[%s16740_s1 + $0xc70] sm:$0xff]  ;;  %v11586_v39 = vpop.f32.mrf.mxu0 }
 0x5ab   :  { %17060 = vst [vmem:[#allocation20_spill] sm:$0xff] %v11586_v39 }
 0x5ac   :  { %9060 = vmatmul.msk.f32.gmra.mxu0 %vm2174_vm6, %v1777_v24 }
 0x5ad   :  { %v2487_v14 = vpop.f32.mrf.mxu3  ;;  %v11571_v48 = vpop.f32.mrf.mxu1 }
 0x5ae   :  { %v11573_v35 = vadd.f32 %v2487_v14, %v2387_v15  ;;  %v2389_v8 = vpop.f32.mrf.mxu2  ;;  %v1500_v15 = vld [vmem:[%s16740_s1 + $0x3b0] sm:$0xff] }
 0x5af   :  { %v2390_v47 = vadd.f32 %v2389_v8, %v11230_v53  ;;  %v1449_v53 = vld [vmem:[%s16740_s1 + $0x218] sm:$0xff]  ;;  %v1783_v8 = vld [vmem:[%s16740_s1 + $0xc88] sm:$0xff] }
 0x5b0   :  { %2793 = vmatmul.f32.gmra.mxu1 %v1497_v57 }
 0x5b2   :  { %8837 = vmatmul.msk.f32.gmra.mxu3 %vm2174_vm6, %v1444_v16  ;;  %2439 = vmatmul.f32.gmra.mxu2 %v1446_v54  ;;  %v1447_v16 = vld [vmem:[%s16740_s1 + $0x208] sm:$0xff] }
 0x5b4   :  { %9061 = vmatmul.msk.f32.gmra.mxu0 %vm2174_vm6, %v1780_v5  ;;  %v11607_v5 = vpop.f32.mrf.mxu0 }
 0x5b5   :  { %v2490_v24 = vpop.f32.mrf.mxu3  ;;  %v11592_v14 = vpop.f32.mrf.mxu1  ;;  %17061 = vst [vmem:[#allocation21_spill] sm:$0xff] %v11607_v5 }
 0x5b6   :  { %v11594_v57 = vadd.f32 %v2490_v24, %v2390_v47  ;;  %v2392_v1 = vpop.f32.mrf.mxu2  ;;  %v1503_v24 = vld [vmem:[%s16740_s1 + $0x3c8] sm:$0xff] }
 0x5b7   :  { %v2393_v54 = vadd.f32 %v2392_v1, %v11257_v21  ;;  %v1452_v21 = vld [vmem:[%s16740_s1 + $0x230] sm:$0xff]  ;;  %v1786_v1 = vld [vmem:[%s16740_s1 + $0xca0] sm:$0xff] }
 0x5b8   :  { %2796 = vmatmul.f32.gmra.mxu1 %v1500_v15 }
 0x5ba   :  { %8838 = vmatmul.msk.f32.gmra.mxu3 %vm2174_vm6, %v1447_v16  ;;  %2442 = vmatmul.f32.gmra.mxu2 %v1449_v53  ;;  %v1450_v16 = vld [vmem:[%s16740_s1 + $0x220] sm:$0xff] }
 0x5bc   :  { %9062 = vmatmul.msk.f32.gmra.mxu0 %vm2174_vm6, %v1783_v8  ;;  %v11628_v8 = vpop.f32.mrf.mxu0 }
 0x5bd   :  { %v2493_v47 = vpop.f32.mrf.mxu3  ;;  %v11613_v39 = vpop.f32.mrf.mxu1  ;;  %17062 = vst [vmem:[#allocation29_spill] sm:$0xff] %v11628_v8  ;;  %v2142_v8 = vld [vmem:[%s16741_s7 + $0x20] sm:$0xff] }
 0x5be   :  { %v11615_v15 = vadd.f32 %v2493_v47, %v2393_v54  ;;  %v2395_v42 = vpop.f32.mrf.mxu2  ;;  %v1506_v47 = vld [vmem:[%s16740_s1 + $0x3e0] sm:$0xff] }
 0x5bf   :  { %v2396_v53 = vadd.f32 %v2395_v42, %v11281_v45  ;;  %v1455_v42 = vld [vmem:[%s16740_s1 + $0x248] sm:$0xff]  ;;  %v1789_v45 = vld [vmem:[%s16740_s1 + $0xcb8] sm:$0xff] }
 0x5c0   :  { %2799 = vmatmul.f32.gmra.mxu1 %v1503_v24 }
 0x5c2   :  { %8839 = vmatmul.msk.f32.gmra.mxu3 %vm2174_vm6, %v1450_v16  ;;  %2445 = vmatmul.f32.gmra.mxu2 %v1452_v21  ;;  %v1453_v16 = vld [vmem:[%s16740_s1 + $0x238] sm:$0xff] }
 0x5c4   :  { %9063 = vmatmul.msk.f32.gmra.mxu0 %vm2174_vm6, %v1786_v1  ;;  %v11649_v1 = vpop.f32.mrf.mxu0 }
 0x5c5   :  { %v2496_v54 = vpop.f32.mrf.mxu3  ;;  %v11634_v5 = vpop.f32.mrf.mxu1  ;;  %17063 = vst [vmem:[#allocation30_spill] sm:$0xff] %v11649_v1  ;;  %v1456_v1 = vld [vmem:[%s16740_s1 + $0x250] sm:$0xff] }
 0x5c6   :  { %v11636_v24 = vadd.f32 %v2496_v54, %v2396_v53  ;;  %v2398_v50 = vpop.f32.mrf.mxu2  ;;  %v2145_v53 = vld [vmem:[%s16741_s7 + $0x38] sm:$0xff] }
 0x5c7   :  { %v2399_v21 = vadd.f32 %v2398_v50, %v11303_v59  ;;  %3045 = vmatpush.msra.mxu3 %v2145_v53  ;;  %v2143_v59 = vld [vmem:[%s16741_s7 + $0x28] sm:$0xff]  ;;  %v1458_v53 = vld [vmem:[%s16740_s1 + $0x260] sm:$0xff] }
 0x5c8   :  { %2802 = vmatmul.f32.gmra.mxu1 %v1506_v47  ;;  %v1509_v47 = vld [vmem:[%s16740_s1 + $0x3f8] sm:$0xff] }
 0x5ca   :  { %8840 = vmatmul.msk.f32.gmra.mxu3 %vm2174_vm6, %v1453_v16  ;;  %2448 = vmatmul.f32.gmra.mxu2 %v1455_v42  ;;  %v2144_v16 = vld [vmem:[%s16741_s7 + $0x30] sm:$0xff] }
 0x5cb   :  { %3046 = vmatpush.msra.mxu3 %v2144_v16 }
 0x5cc   :  { %9064 = vmatmul.msk.f32.gmra.mxu0 %vm2174_vm6, %v1789_v45  ;;  %v11682_v16 = vpop.f32.mrf.mxu0 }
 0x5cd   :  { %v2499_v54 = vpop.f32.mrf.mxu3  ;;  %v11661_v50 = vpop.f32.mrf.mxu1  ;;  %3047 = vmatpush.msra.mxu3 %v2143_v59  ;;  %17064 = vst [vmem:[#allocation31_spill] sm:$0xff] %v11682_v16 }
 0x5ce   :  { %v11666_v42 = vadd.f32 %v2499_v54, %v2399_v21  ;;  %v2401_v45 = vpop.f32.mrf.mxu2  ;;  %v1792_v21 = vld [vmem:[%s16740_s1 + $0xcd0] sm:$0xff] }
 0x5cf   :  { %v2402_v54 = vadd.f32 %v2401_v45, %v11325_v13  ;;  %3048 = vmatpush.msra.mxu3 %v2142_v8  ;;  %v1459_v13 = vld [vmem:[%s16740_s1 + $0x268] sm:$0xff]  ;;  %v1461_v8 = vld [vmem:[%s16740_s1 + $0x278] sm:$0xff] }
 0x5d0   :  { %2805 = vmatmul.f32.gmra.mxu1 %v1509_v47 }
 0x5d2   :  { %8841 = vmatmul.msk.f32.gmra.mxu3 %vm2174_vm6, %v1456_v1  ;;  %2451 = vmatmul.f32.gmra.mxu2 %v1458_v53  ;;  %v1795_v1 = vld [vmem:[%s16740_s1 + $0xce8] sm:$0xff] }
 0x5d4   :  { %9065 = vmatmul.msk.f32.gmra.mxu0 %vm2174_vm6, %v1792_v21  ;;  %v11704_v53 = vpop.f32.mrf.mxu0 }
 0x5d5   :  { %v2502_v47 = vpop.f32.mrf.mxu3  ;;  %v11688_v23 = vpop.f32.mrf.mxu1  ;;  %17065 = vst [vmem:[#allocation32_spill] sm:$0xff] %v11704_v53 }
 0x5d6   :  { %v11690_v9 = vadd.f32 %v2502_v47, %v2402_v54  ;;  %v2404_v59 = vpop.f32.mrf.mxu2  ;;  %v1515_v54 = vld [vmem:[%s16740_s1 + $0x428] sm:$0xff] }
 0x5d7   :  { %v2405_v45 = vadd.f32 %v2404_v59, %v11347_v31  ;;  %v1464_v31 = vld [vmem:[%s16740_s1 + $0x290] sm:$0xff]  ;;  %v1798_v59 = vld [vmem:[%s16740_s1 + $0xd00] sm:$0xff] }
 0x5d8   :  { %2808 = vmatmul.f32.gmra.mxu1 %v1512_v55 }
 0x5da   :  { %8842 = vmatmul.msk.f32.gmra.mxu3 %vm2174_vm6, %v1459_v13  ;;  %2454 = vmatmul.f32.gmra.mxu2 %v1461_v8  ;;  %v1462_v13 = vld [vmem:[%s16740_s1 + $0x280] sm:$0xff] }
 0x5dc   :  { %9066 = vmatmul.msk.f32.gmra.mxu0 %vm2174_vm6, %v1795_v1  ;;  %v11725_v1 = vpop.f32.mrf.mxu0 }
 0x5dd   :  { %v2505_v21 = vpop.f32.mrf.mxu3  ;;  %v11709_v47 = vpop.f32.mrf.mxu1  ;;  %17066 = vst [vmem:[#allocation33_spill] sm:$0xff] %v11725_v1 }
 0x5de   :  { %v11711_v55 = vadd.f32 %v2505_v21, %v2405_v45  ;;  %v2407_v16 = vpop.f32.mrf.mxu2  ;;  %v1518_v21 = vld [vmem:[%s16740_s1 + $0x440] sm:$0xff] }
 0x5df   :  { %v2408_v8 = vadd.f32 %v2407_v16, %v11363_v49  ;;  %v1468_v49 = vld [vmem:[%s16740_s1 + $0x2b0] sm:$0xff]  ;;  %v1801_v16 = vld [vmem:[%s16740_s1 + $0xd18] sm:$0xff] }
 0x5e0   :  { %2811 = vmatmul.f32.gmra.mxu1 %v1515_v54 }
 0x5e2   :  { %8843 = vmatmul.msk.f32.gmra.mxu3 %vm2174_vm6, %v1462_v13  ;;  %2457 = vmatmul.f32.gmra.mxu2 %v1464_v31  ;;  %v1465_v13 = vld [vmem:[%s16740_s1 + $0x298] sm:$0xff] }
 0x5e4   :  { %9067 = vmatmul.msk.f32.gmra.mxu0 %vm2174_vm6, %v1798_v59  ;;  %v11747_v59 = vpop.f32.mrf.mxu0 }
 0x5e5   :  { %v2508_v45 = vpop.f32.mrf.mxu3  ;;  %v11730_v53 = vpop.f32.mrf.mxu1  ;;  %17067 = vst [vmem:[#allocation34_spill] sm:$0xff] %v11747_v59 }
 0x5e6   :  { %v11732_v54 = vadd.f32 %v2508_v45, %v2408_v8  ;;  %v2410_v18 = vpop.f32.mrf.mxu2  ;;  %v1521_v45 = vld [vmem:[%s16740_s1 + $0x458] sm:$0xff] }
 0x5e7   :  { %v2411_v31 = vadd.f32 %v2410_v18, %v11379_v62  ;;  %v1466_v18 = vld [vmem:[%s16740_s1 + $0x2a0] sm:$0xff]  ;;  %v1471_v62 = vld [vmem:[%s16740_s1 + $0x2c8] sm:$0xff] }
 0x5e8   :  { %2814 = vmatmul.f32.gmra.mxu1 %v1518_v21 }
 0x5ea   :  { %8844 = vmatmul.msk.f32.gmra.mxu3 %vm2174_vm6, %v1465_v13  ;;  %8845 = vmatmul.msk.f32.vlgmr.msrb.gmra.mxu2 %vm2174_vm6, %v1468_v49  ;;  %v1804_v13 = vld [vmem:[%s16740_s1 + $0xd30] sm:$0xff] }
 0x5ec   :  { %9068 = vmatmul.msk.f32.gmra.mxu0 %vm2174_vm6, %v1801_v16  ;;  %v11769_v16 = vpop.f32.mrf.mxu0 }
 0x5ed   :  { %v2511_v8 = vpop.f32.mrf.mxu3  ;;  %v11752_v21 = vpop.f32.mrf.mxu1  ;;  %17069 = vst [vmem:[#allocation36_spill] sm:$0xff] %v11769_v16  ;;  %v1527_v16 = vld [vmem:[%s16740_s1 + $0x488] sm:$0xff] }
 0x5ee   :  { %17068 = vst [vmem:[#allocation35_spill] sm:$0xff] %v11752_v21  ;;  %v11754_v1 = vadd.f32 %v2511_v8, %v2411_v31  ;;  %v2413_v17 = vpop.f32.mrf.mxu2  ;;  %v1524_v8 = vld [vmem:[%s16740_s1 + $0x470] sm:$0xff] }
 0x5ef   :  { %v2414_v49 = vadd.f32 %v2413_v17, %v11395_v56 }
 0x5f0   :  { %2817 = vmatmul.f32.gmra.mxu1 %v1521_v45 }
 0x5f2   :  { %2662 = vmatmul.f32.vlgmr.msrb.gmra.mxu3 %v1466_v18  ;;  %8846 = vmatmul.msk.f32.gmra.mxu2 %vm2174_vm6, %v1471_v62  ;;  %v1469_v18 = vld [vmem:[%s16740_s1 + $0x2b8] sm:$0xff]  ;;  %v1474_v62 = vld [vmem:[%s16740_s1 + $0x2e0] sm:$0xff] }
 0x5f3   :  { %3504 = vmatpush.msrb.mxu3 %v10968_v63 }
 0x5f4   :  { %9097 = vmatmul.msk.f32.vlgmr.msrb.gmra.mxu0 %vm2174_vm6, %v1804_v13  ;;  %v1807_v13 = vld [vmem:[%s16740_s1 + $0xd48] sm:$0xff] }
 0x5f5   :  { %6617 = vmatpush.msrb.mxu0 %v11157_v40  ;;  %3505 = vmatpush.msrb.mxu3 %v10982_v51  ;;  %v2514_v31 = vpop.f32.mrf.mxu3  ;;  %v11776_v45 = vpop.f32.mrf.mxu1 }
 0x5f6   :  { %17070 = vst [vmem:[#allocation37_spill] sm:$0xff] %v11776_v45  ;;  %v11778_v17 = vadd.f32 %v2514_v31, %v2414_v49  ;;  %v2416_v56 = vpop.f32.mrf.mxu2  ;;  %v11798_v31 = vpop.f32.mrf.mxu0 }
 0x5f7   :  { %6618 = vmatpush.msrb.mxu0 %v11163_v10  ;;  %3506 = vmatpush.msrb.mxu3 %v10995_v61  ;;  %v2417_v49 = vadd.f32 %v2416_v56, %v11413_v36  ;;  %17071 = vst [vmem:[#allocation57_spill] sm:$0xff] %v11798_v31  ;;  %v1530_v31 = vld [vmem:[%s16740_s1 + $0x4a0] sm:$0xff] }
 0x5f8   :  { %2820 = vmatmul.f32.gmra.mxu1 %v1524_v8 }
 0x5f9   :  { %6619 = vmatpush.msrb.mxu0 %v11169_v28  ;;  %3507 = vmatpush.msrb.mxu3 %v11008_v44 }
 0x5fa   :  { %2665 = vmatmul.f32.gmra.mxu3 %v1469_v18  ;;  %8847 = vmatmul.msk.f32.gmra.mxu2 %vm2174_vm6, %v1474_v62  ;;  %v1472_v18 = vld [vmem:[%s16740_s1 + $0x2d0] sm:$0xff]  ;;  %v1477_v62 = vld [vmem:[%s16740_s1 + $0x2f8] sm:$0xff] }
 0x5fb   :  { %6620 = vmatpush.msrb.mxu0 %v11175_v60  ;;  %3508 = vmatpush.msrb.mxu3 %v11023_v38 }
 0x5fc   :  { %9098 = vmatmul.msk.f32.gmra.mxu0 %vm2174_vm6, %v1807_v13  ;;  %v1810_v13 = vld [vmem:[%s16740_s1 + $0xd60] sm:$0xff] }
 0x5fd   :  { %v2517_v8 = vpop.f32.mrf.mxu3  ;;  %v11803_v59 = vpop.f32.mrf.mxu1  ;;  %3509 = vmatpush.msrb.mxu3 %v11038_v6 }
 0x5fe   :  { %17072 = vst [vmem:[#allocation39_spill] sm:$0xff] %v11803_v59  ;;  %v11806_v36 = vadd.f32 %v2517_v8, %v2417_v49  ;;  %v2419_v56 = vpop.f32.mrf.mxu2 }
 0x5ff   :  { %3510 = vmatpush.msrb.mxu3 %v11053_v12  ;;  %v2420_v49 = vadd.f32 %v2419_v56, %v11431_v58  ;;  %v1475_v56 = vld [vmem:[%s16740_s1 + $0x2e8] sm:$0xff] }
 0x600   :  { %2823 = vmatmul.f32.gmra.mxu1 %v1527_v16  ;;  %v11823_v16 = vpop.f32.mrf.mxu0 }
 0x601   :  { %3511 = vmatpush.msrb.mxu3 %v11065_v0  ;;  %17073 = vst [vmem:[#allocation56_spill] sm:$0xff] %v11823_v16 }
 0x602   :  { %2668 = vmatmul.f32.gmra.mxu3 %v1472_v18  ;;  %8848 = vmatmul.msk.f32.gmra.mxu2 %vm2174_vm6, %v1477_v62  ;;  %v1480_v18 = vld [vmem:[%s16740_s1 + $0x310] sm:$0xff]  ;;  %v1813_v62 = vld [vmem:[%s16740_s1 + $0xd78] sm:$0xff] }
 0x603   :  { %3512 = vmatpush.msrb.mxu3 %v11079_v22 }
 0x604   :  { %9099 = vmatmul.msk.f32.gmra.mxu0 %vm2174_vm6, %v1810_v13 }
 0x605   :  { %v2520_v8 = vpop.f32.mrf.mxu3  ;;  %v11828_v59 = vpop.f32.mrf.mxu1  ;;  %3513 = vmatpush.msrb.mxu3 %v11091_v3 }
 0x606   :  { %17074 = vst [vmem:[#allocation38_spill] sm:$0xff] %v11828_v59  ;;  %v11831_v45 = vadd.f32 %v2520_v8, %v2420_v49  ;;  %v2422_v58 = vpop.f32.mrf.mxu2  ;;  %v1533_v8 = vld [vmem:[%s16740_s1 + $0x4b8] sm:$0xff] }
 0x607   :  { %3514 = vmatpush.msrb.mxu3 %v11100_v27  ;;  %v2423_v13 = vadd.f32 %v2422_v58, %v11447_v46  ;;  %v1478_v58 = vld [vmem:[%s16740_s1 + $0x300] sm:$0xff] }
 0x608   :  { %2826 = vmatmul.f32.gmra.mxu1 %v1530_v31  ;;  %v11848_v31 = vpop.f32.mrf.mxu0 }
 0x609   :  { %3515 = vmatpush.msrb.mxu3 %v11115_v29  ;;  %17075 = vst [vmem:[#allocation55_spill] sm:$0xff] %v11848_v31 }
 0x60a   :  { %2671 = vmatmul.f32.gmra.mxu3 %v1475_v56  ;;  %8849 = vmatmul.msk.f32.gmra.mxu2 %vm2174_vm6, %v1480_v18  ;;  %v1483_v56 = vld [vmem:[%s16740_s1 + $0x328] sm:$0xff]  ;;  %v1816_v18 = vld [vmem:[%s16740_s1 + $0xd90] sm:$0xff] }
 0x60b   :  { %3516 = vmatpush.msrb.mxu3 %v11125_v2 }
 0x60c   :  { %9100 = vmatmul.msk.f32.gmra.mxu0 %vm2174_vm6, %v1813_v62 }
 0x60d   :  { %v2523_v49 = vpop.f32.mrf.mxu3  ;;  %v11853_v16 = vpop.f32.mrf.mxu1  ;;  %3517 = vmatpush.msrb.mxu3 %v11131_v11 }
 0x60e   :  { %17076 = vst [vmem:[#allocation40_spill] sm:$0xff] %v11853_v16  ;;  %v11856_v59 = vadd.f32 %v2523_v49, %v2423_v13  ;;  %v2425_v46 = vpop.f32.mrf.mxu2 }
 0x60f   :  { %3518 = vmatpush.msrb.mxu3 %v11136_v20  ;;  %v2426_v62 = vadd.f32 %v2425_v46, %v11463_v19  ;;  %v1481_v19 = vld [vmem:[%s16740_s1 + $0x318] sm:$0xff]  ;;  %v1486_v46 = vld [vmem:[%s16740_s1 + $0x340] sm:$0xff] }
 0x610   :  { %2829 = vmatmul.f32.gmra.mxu1 %v1533_v8  ;;  %v11872_v13 = vpop.f32.mrf.mxu0  ;;  %v1536_v8 = vld [vmem:[%s16740_s1 + $0x4d0] sm:$0xff] }
 0x611   :  { %3519 = vmatpush.msrb.mxu3 %v11141_v43  ;;  %17077 = vst [vmem:[#allocation43_spill] sm:$0xff] %v11872_v13 }
 0x612   :  { %2674 = vmatmul.f32.gmra.mxu3 %v1478_v58  ;;  %8850 = vmatmul.msk.f32.gmra.mxu2 %vm2174_vm6, %v1483_v56  ;;  %v1819_v58 = vld [vmem:[%s16740_s1 + $0xda8] sm:$0xff] }
 0x614   :  { %9101 = vmatmul.msk.f32.gmra.mxu0 %vm2174_vm6, %v1816_v18 }
 0x615   :  { %v2526_v49 = vpop.f32.mrf.mxu3  ;;  %v11877_v31 = vpop.f32.mrf.mxu1 }
 0x616   :  { %17078 = vst [vmem:[#allocation44_spill] sm:$0xff] %v11877_v31  ;;  %v11879_v16 = vadd.f32 %v2526_v49, %v2426_v62  ;;  %v2428_v21 = vpop.f32.mrf.mxu2  ;;  %v1539_v49 = vld [vmem:[%s16740_s1 + $0x4e8] sm:$0xff] }
 0x617   :  { %v2429_v56 = vadd.f32 %v2428_v21, %v11479_v37  ;;  %v1484_v37 = vld [vmem:[%s16740_s1 + $0x330] sm:$0xff]  ;;  %v1489_v21 = vld [vmem:[%s16740_s1 + $0x358] sm:$0xff] }
 0x618   :  { %2832 = vmatmul.f32.gmra.mxu1 %v1536_v8  ;;  %v11893_v18 = vpop.f32.mrf.mxu0 }
 0x619   :  { %17079 = vst [vmem:[#allocation54_spill] sm:$0xff] %v11893_v18 }
 0x61a   :  { %2677 = vmatmul.f32.gmra.mxu3 %v1481_v19  ;;  %8851 = vmatmul.msk.f32.gmra.mxu2 %vm2174_vm6, %v1486_v46  ;;  %v1822_v19 = vld [vmem:[%s16740_s1 + $0xdc0] sm:$0xff] }
 0x61c   :  { %9102 = vmatmul.msk.f32.gmra.mxu0 %vm2174_vm6, %v1819_v58 }
 0x61d   :  { %v2529_v62 = vpop.f32.mrf.mxu3  ;;  %v11898_v8 = vpop.f32.mrf.mxu1 }
 0x61e   :  { %17080 = vst [vmem:[#allocation45_spill] sm:$0xff] %v11898_v8  ;;  %v11900_v13 = vadd.f32 %v2529_v62, %v2429_v56  ;;  %v2431_v31 = vpop.f32.mrf.mxu2  ;;  %v1542_v62 = vld [vmem:[%s16740_s1 + $0x500] sm:$0xff] }
 0x61f   :  { %v2432_v46 = vadd.f32 %v2431_v31, %v11495_v4  ;;  %v1487_v4 = vld [vmem:[%s16740_s1 + $0x348] sm:$0xff]  ;;  %v1492_v31 = vld [vmem:[%s16740_s1 + $0x370] sm:$0xff] }
 0x620   :  { %2835 = vmatmul.f32.gmra.mxu1 %v1539_v49  ;;  %v11914_v58 = vpop.f32.mrf.mxu0 }
 0x621   :  { %17081 = vst [vmem:[#allocation46_spill] sm:$0xff] %v11914_v58 }
 0x622   :  { %2680 = vmatmul.f32.gmra.mxu3 %v1484_v37  ;;  %8852 = vmatmul.msk.f32.gmra.mxu2 %vm2174_vm6, %v1489_v21  ;;  %v1825_v37 = vld [vmem:[%s16740_s1 + $0xdd8] sm:$0xff] }
 0x624   :  { %9103 = vmatmul.msk.f32.gmra.mxu0 %vm2174_vm6, %v1822_v19 }
 0x625   :  { %v2532_v56 = vpop.f32.mrf.mxu3  ;;  %v11919_v49 = vpop.f32.mrf.mxu1 }
 0x626   :  { %17082 = vst [vmem:[#allocation53_spill] sm:$0xff] %v11919_v49  ;;  %v11921_v18 = vadd.f32 %v2532_v56, %v2432_v46  ;;  %v2434_v8 = vpop.f32.mrf.mxu2  ;;  %v1545_v56 = vld [vmem:[%s16740_s1 + $0x518] sm:$0xff] }
 0x627   :  { %v2435_v21 = vadd.f32 %v2434_v8, %v11516_v26  ;;  %v1490_v26 = vld [vmem:[%s16740_s1 + $0x360] sm:$0xff]  ;;  %v1495_v8 = vld [vmem:[%s16740_s1 + $0x388] sm:$0xff] }
 0x628   :  { %2838 = vmatmul.f32.gmra.mxu1 %v1542_v62  ;;  %v11935_v19 = vpop.f32.mrf.mxu0 }
 0x629   :  { %17083 = vst [vmem:[#allocation58_spill] sm:$0xff] %v11935_v19 }
 0x62a   :  { %2683 = vmatmul.f32.gmra.mxu3 %v1487_v4  ;;  %8853 = vmatmul.msk.f32.gmra.mxu2 %vm2174_vm6, %v1492_v31  ;;  %v1828_v4 = vld [vmem:[%s16740_s1 + $0xdf0] sm:$0xff] }
 0x62c   :  { %9104 = vmatmul.msk.f32.gmra.mxu0 %vm2174_vm6, %v1825_v37 }
 0x62d   :  { %v2535_v46 = vpop.f32.mrf.mxu3  ;;  %v11940_v62 = vpop.f32.mrf.mxu1 }
 0x62e   :  { %17084 = vst [vmem:[#allocation47_spill] sm:$0xff] %v11940_v62  ;;  %v11942_v58 = vadd.f32 %v2535_v46, %v2435_v21  ;;  %v2437_v49 = vpop.f32.mrf.mxu2  ;;  %v1548_v46 = vld [vmem:[%s16740_s1 + $0x530] sm:$0xff] }
 0x62f   :  { %v2438_v31 = vadd.f32 %v2437_v49, %v11533_v32  ;;  %v1493_v32 = vld [vmem:[%s16740_s1 + $0x378] sm:$0xff]  ;;  %v1498_v49 = vld [vmem:[%s16740_s1 + $0x3a0] sm:$0xff] }
 0x630   :  { %2841 = vmatmul.f32.gmra.mxu1 %v1545_v56  ;;  %v11956_v37 = vpop.f32.mrf.mxu0 }
 0x631   :  { %17085 = vst [vmem:[#allocation48_spill] sm:$0xff] %v11956_v37 }
 0x632   :  { %2686 = vmatmul.f32.gmra.mxu3 %v1490_v26  ;;  %8854 = vmatmul.msk.f32.gmra.mxu2 %vm2174_vm6, %v1495_v8  ;;  %v1831_v26 = vld [vmem:[%s16740_s1 + $0xe08] sm:$0xff] }
 0x634   :  { %9105 = vmatmul.msk.f32.gmra.mxu0 %vm2174_vm6, %v1828_v4 }
 0x635   :  { %v2538_v21 = vpop.f32.mrf.mxu3  ;;  %v11961_v56 = vpop.f32.mrf.mxu1 }
 0x636   :  { %17086 = vst [vmem:[#allocation52_spill] sm:$0xff] %v11961_v56  ;;  %v11963_v19 = vadd.f32 %v2538_v21, %v2438_v31  ;;  %v2440_v62 = vpop.f32.mrf.mxu2  ;;  %v1496_v56 = vld [vmem:[%s16740_s1 + $0x390] sm:$0xff] }
 0x637   :  { %v2441_v8 = vadd.f32 %v2440_v62, %v11552_v41  ;;  %v1501_v41 = vld [vmem:[%s16740_s1 + $0x3b8] sm:$0xff]  ;;  %v1834_v62 = vld [vmem:[%s16740_s1 + $0xe20] sm:$0xff] }
 0x638   :  { %2844 = vmatmul.f32.gmra.mxu1 %v1548_v46  ;;  %v11977_v4 = vpop.f32.mrf.mxu0 }
 0x639   :  { %17087 = vst [vmem:[#allocation50_spill] sm:$0xff] %v11977_v4 }
 0x63a   :  { %2689 = vmatmul.f32.gmra.mxu3 %v1493_v32  ;;  %8855 = vmatmul.msk.f32.gmra.mxu2 %vm2174_vm6, %v1498_v49 }
 0x63c   :  { %9106 = vmatmul.msk.f32.gmra.mxu0 %vm2174_vm6, %v1831_v26 }
 0x63d   :  { %v2541_v31 = vpop.f32.mrf.mxu3  ;;  %v11979_v21 = vpop.f32.mrf.mxu1 }
 0x63e   :  { %v11981_v46 = vadd.f32 %v2541_v31, %v2441_v8  ;;  %v2443_v37 = vpop.f32.mrf.mxu2 }
 0x63f   :  { %v2444_v32 = vadd.f32 %v2443_v37, %v11571_v48  ;;  %v1499_v48 = vld [vmem:[%s16740_s1 + $0x3a8] sm:$0xff]  ;;  %v1504_v37 = vld [vmem:[%s16740_s1 + $0x3d0] sm:$0xff] }
 0x640   :  { %8901 = vmatmul.msk.f32.vlgmr.msra.gmra.mxu1 %vm2174_vm6, %v11511_v34  ;;  %v12002_v34 = vpop.f32.mrf.mxu0 }
 0x641   :  { %4104 = vmatpush.msra.mxu1 %v10968_v63  ;;  %17088 = vst [vmem:[#allocation51_spill] sm:$0xff] %v12002_v34 }
 0x642   :  { %2692 = vmatmul.f32.gmra.mxu3 %v1496_v56  ;;  %8856 = vmatmul.msk.f32.gmra.mxu2 %vm2174_vm6, %v1501_v41  ;;  %v1837_v56 = vld [vmem:[%s16740_s1 + $0xe38] sm:$0xff] }
 0x643   :  { %4105 = vmatpush.msra.mxu1 %v10982_v51 }
 0x644   :  { %9107 = vmatmul.msk.f32.gmra.mxu0 %vm2174_vm6, %v1834_v62 }
 0x645   :  { %v2544_v49 = vpop.f32.mrf.mxu3  ;;  %v11999_v26 = vpop.f32.mrf.mxu1  ;;  %4106 = vmatpush.msra.mxu1 %v10995_v61 }
 0x646   :  { %v12004_v8 = vadd.f32 %v2544_v49, %v2444_v32  ;;  %v2446_v31 = vpop.f32.mrf.mxu2 }
 0x647   :  { %4107 = vmatpush.msra.mxu1 %v11008_v44  ;;  %v2447_v41 = vadd.f32 %v2446_v31, %v11592_v14  ;;  %v1502_v14 = vld [vmem:[%s16740_s1 + $0x3c0] sm:$0xff]  ;;  %v1507_v31 = vld [vmem:[%s16740_s1 + $0x3e8] sm:$0xff]  ;;  %v17124_v44 = vld [vmem:[#allocation76_spill] sm:$0xff] }
 0x648   :  { %8902 = vmatmul.msk.f32.gmra.mxu1 %vm2174_vm6, %v11535_v7 }
 0x649   :  { %4108 = vmatpush.msra.mxu1 %v11023_v38 }
 0x64a   :  { %2695 = vmatmul.f32.gmra.mxu3 %v1499_v48  ;;  %8857 = vmatmul.msk.f32.gmra.mxu2 %vm2174_vm6, %v1504_v37  ;;  %v12035_v48 = vpop.f32.mrf.mxu0  ;;  %v1840_v37 = vld [vmem:[%s16740_s1 + $0xe50] sm:$0xff] }
 0x64b   :  { %4109 = vmatpush.msra.mxu1 %v11038_v6  ;;  %17089 = vst [vmem:[#allocation49_spill] sm:$0xff] %v12035_v48 }
 0x64c   :  { %9108 = vmatmul.msk.f32.gmra.mxu0 %vm2174_vm6, %v1837_v56 }
 0x64d   :  { %v2547_v62 = vpop.f32.mrf.mxu3  ;;  %v12023_v32 = vpop.f32.mrf.mxu1  ;;  %4110 = vmatpush.msra.mxu1 %v11053_v12 }
 0x64e   :  { %v12026_v7 = vadd.f32 %v2547_v62, %v2447_v41  ;;  %v2449_v49 = vpop.f32.mrf.mxu2 }
 0x64f   :  { %4111 = vmatpush.msra.mxu1 %v11065_v0  ;;  %v2450_v56 = vadd.f32 %v2449_v49, %v11613_v39  ;;  %v1505_v39 = vld [vmem:[%s16740_s1 + $0x3d8] sm:$0xff]  ;;  %v1510_v49 = vld [vmem:[%s16740_s1 + $0x400] sm:$0xff] }
 0x650   :  { %8903 = vmatmul.msk.f32.gmra.mxu1 %vm2174_vm6, %v11554_v25 }
 0x651   :  { %4112 = vmatpush.msra.mxu1 %v11079_v22  ;;  %v1538_v22 = vld [vmem:[%s16740_s1 + $0x4e0] sm:$0xff] }
 0x652   :  { %2698 = vmatmul.f32.gmra.mxu3 %v1502_v14  ;;  %8858 = vmatmul.msk.f32.gmra.mxu2 %vm2174_vm6, %v1507_v31  ;;  %v1843_v14 = vld [vmem:[%s16740_s1 + $0xe68] sm:$0xff]  ;;  %v12065_v31 = vpop.f32.mrf.mxu0 }
 0x653   :  { %4113 = vmatpush.msra.mxu1 %v11091_v3  ;;  %17090 = vst [vmem:[#allocation60_spill] sm:$0xff] %v12065_v31 }
 0x654   :  { %9109 = vmatmul.msk.f32.gmra.mxu0 %vm2174_vm6, %v1840_v37 }
 0x655   :  { %v2550_v41 = vpop.f32.mrf.mxu3  ;;  %v12047_v62 = vpop.f32.mrf.mxu1  ;;  %4114 = vmatpush.msra.mxu1 %v11100_v27 }
 0x656   :  { %v12050_v25 = vadd.f32 %v2550_v41, %v2450_v56  ;;  %v2452_v48 = vpop.f32.mrf.mxu2 }
 0x657   :  { %4115 = vmatpush.msra.mxu1 %v11115_v29  ;;  %v2453_v37 = vadd.f32 %v2452_v48, %v11634_v5  ;;  %v1508_v5 = vld [vmem:[%s16740_s1 + $0x3f0] sm:$0xff]  ;;  %v1513_v48 = vld [vmem:[%s16740_s1 + $0x418] sm:$0xff]  ;;  %v2146_v29 = vld [vmem:[%s16741_s7 + $0x40] sm:$0xff] }
 0x658   :  { %8904 = vmatmul.msk.f32.gmra.mxu1 %vm2174_vm6, %v11573_v35 }
 0x659   :  { %4116 = vmatpush.msra.mxu1 %v11125_v2 }
 0x65a   :  { %2701 = vmatmul.f32.gmra.mxu3 %v1505_v39  ;;  %8859 = vmatmul.msk.f32.gmra.mxu2 %vm2174_vm6, %v1510_v49  ;;  %v1846_v39 = vld [vmem:[%s16740_s1 + $0xe80] sm:$0xff] }
 0x65b   :  { %4117 = vmatpush.msra.mxu1 %v11131_v11 }
 0x65c   :  { %9110 = vmatmul.msk.f32.gmra.mxu0 %vm2174_vm6, %v1843_v14  ;;  %v12091_v14 = vpop.f32.mrf.mxu0 }
 0x65d   :  { %v2553_v56 = vpop.f32.mrf.mxu3  ;;  %v12071_v41 = vpop.f32.mrf.mxu1  ;;  %4118 = vmatpush.msra.mxu1 %v11136_v20  ;;  %17091 = vst [vmem:[#allocation61_spill] sm:$0xff] %v12091_v14  ;;  %v1526_v14 = vld [vmem:[%s16740_s1 + $0x480] sm:$0xff]  ;;  %v1532_v20 = vld [vmem:[%s16740_s1 + $0x4b0] sm:$0xff] }
 0x65e   :  { %v12074_v35 = vadd.f32 %v2553_v56, %v2453_v37  ;;  %v2455_v34 = vpop.f32.mrf.mxu2 }
 0x65f   :  { %4119 = vmatpush.msra.mxu1 %v11141_v43  ;;  %v2456_v49 = vadd.f32 %v2455_v34, %v11661_v50  ;;  %v1516_v50 = vld [vmem:[%s16740_s1 + $0x430] sm:$0xff]  ;;  %v1849_v34 = vld [vmem:[%s16740_s1 + $0xe98] sm:$0xff] }
 0x660   :  { %8905 = vmatmul.msk.f32.gmra.mxu1 %vm2174_vm6, %v11594_v57  ;;  %v1511_v57 = vld [vmem:[%s16740_s1 + $0x408] sm:$0xff] }
 0x662   :  { %2704 = vmatmul.f32.gmra.mxu3 %v1508_v5  ;;  %8860 = vmatmul.msk.f32.gmra.mxu2 %vm2174_vm6, %v1513_v48 }
 0x664   :  { %9111 = vmatmul.msk.f32.gmra.mxu0 %vm2174_vm6, %v1846_v39 }
 0x665   :  { %v2556_v37 = vpop.f32.mrf.mxu3  ;;  %v12093_v56 = vpop.f32.mrf.mxu1 }
 0x666   :  { %v12095_v31 = vadd.f32 %v2556_v37, %v2456_v49  ;;  %v2458_v4 = vpop.f32.mrf.mxu2  ;;  %v12113_v49 = vpop.f32.mrf.mxu0 }
 0x667   :  { %v2459_v5 = vadd.f32 %v2458_v4, %v11688_v23  ;;  %17092 = vst [vmem:[#allocation2_spill] sm:$0xff] %v12113_v49  ;;  %v1519_v23 = vld [vmem:[%s16740_s1 + $0x448] sm:$0xff]  ;;  %v1852_v4 = vld [vmem:[%s16740_s1 + $0xeb0] sm:$0xff] }
 0x668   :  { %8906 = vmatmul.msk.f32.gmra.mxu1 %vm2174_vm6, %v11615_v15  ;;  %v1514_v15 = vld [vmem:[%s16740_s1 + $0x420] sm:$0xff]  ;;  %v1523_v49 = vld [vmem:[%s16740_s1 + $0x468] sm:$0xff] }
 0x66a   :  { %2707 = vmatmul.f32.gmra.mxu3 %v1511_v57  ;;  %8861 = vmatmul.msk.f32.gmra.mxu2 %vm2174_vm6, %v1516_v50 }
 0x66c   :  { %9112 = vmatmul.msk.f32.gmra.mxu0 %vm2174_vm6, %v1849_v34  ;;  %v1517_v34 = vld [vmem:[%s16740_s1 + $0x438] sm:$0xff] }
 0x66d   :  { %v2559_v48 = vpop.f32.mrf.mxu3  ;;  %v12111_v39 = vpop.f32.mrf.mxu1 }
 0x66e   :  { %v12115_v37 = vadd.f32 %v2559_v48, %v2459_v5  ;;  %v12140_v5 = vpop.f32.mrf.mxu0  ;;  %v1855_v48 = vld [vmem:[%s16740_s1 + $0xec8] sm:$0xff]  ;;  %v12210_v43 = vpop.f32.mrf.mxu2 }
 0x66f   :  { %17093 = vst [vmem:[#allocation3_spill] sm:$0xff] %v12140_v5 }
 0x670   :  { %8907 = vmatmul.msk.f32.gmra.mxu1 %vm2174_vm6, %v11636_v24  ;;  %v1522_v24 = vld [vmem:[%s16740_s1 + $0x460] sm:$0xff] }
 0x672   :  { %2710 = vmatmul.f32.gmra.mxu3 %v1514_v15  ;;  %8862 = vmatmul.msk.f32.gmra.mxu2 %vm2174_vm6, %v1519_v23 }
 0x674   :  { %9113 = vmatmul.msk.f32.gmra.mxu0 %vm2174_vm6, %v1852_v4  ;;  %v1520_v4 = vld [vmem:[%s16740_s1 + $0x450] sm:$0xff] }
 0x675   :  { %v12130_v57 = vpop.f32.mrf.mxu3  ;;  %v12132_v50 = vpop.f32.mrf.mxu1 }
 0x678   :  { %8908 = vmatmul.msk.f32.gmra.mxu1 %vm2174_vm6, %v11666_v42  ;;  %v1525_v42 = vld [vmem:[%s16740_s1 + $0x478] sm:$0xff] }
 0x67a   :  { %2713 = vmatmul.f32.gmra.mxu3 %v1517_v34  ;;  %8863 = vmatmul.msk.f32.gmra.mxu2 %vm2174_vm6, %v1522_v24  ;;  %v1858_v34 = vld [vmem:[%s16740_s1 + $0xee0] sm:$0xff]  ;;  %v12164_v24 = vpop.f32.mrf.mxu0 }
 0x67b   :  { %17094 = vst [vmem:[#allocation10_spill] sm:$0xff] %v12164_v24 }
 0x67c   :  { %9114 = vmatmul.msk.f32.gmra.mxu0 %vm2174_vm6, %v1855_v48 }
 0x67d   :  { %v12149_v15 = vpop.f32.mrf.mxu3  ;;  %v12151_v23 = vpop.f32.mrf.mxu1 }
 0x680   :  { %8909 = vmatmul.msk.f32.gmra.mxu1 %vm2174_vm6, %v11690_v9  ;;  %v1528_v9 = vld [vmem:[%s16740_s1 + $0x490] sm:$0xff] }
 0x682   :  { %2716 = vmatmul.f32.gmra.mxu3 %v1520_v4  ;;  %8864 = vmatmul.msk.f32.gmra.mxu2 %vm2174_vm6, %v1525_v42  ;;  %v1861_v4 = vld [vmem:[%s16740_s1 + $0xef8] sm:$0xff]  ;;  %v12185_v42 = vpop.f32.mrf.mxu0 }
 0x683   :  { %17095 = vst [vmem:[#allocation6_spill] sm:$0xff] %v12185_v42 }
 0x684   :  { %9115 = vmatmul.msk.f32.gmra.mxu0 %vm2174_vm6, %v1858_v34 }
 0x685   :  { %v12168_v48 = vpop.f32.mrf.mxu1  ;;  %v12170_v5 = vpop.f32.mrf.mxu3 }
 0x688   :  { %8910 = vmatmul.msk.f32.gmra.mxu1 %vm2174_vm6, %v11711_v55  ;;  %v1531_v55 = vld [vmem:[%s16740_s1 + $0x4a8] sm:$0xff] }
 0x68a   :  { %2719 = vmatmul.f32.gmra.mxu3 %v1523_v49  ;;  %8865 = vmatmul.msk.f32.gmra.mxu2 %vm2174_vm6, %v1528_v9  ;;  %v1864_v49 = vld [vmem:[%s16740_s1 + $0xf10] sm:$0xff]  ;;  %v12208_v42 = vpop.f32.mrf.mxu0 }
 0x68b   :  { %17096 = vst [vmem:[#allocation59_spill] sm:$0xff] %v12208_v42 }
 0x68c   :  { %9116 = vmatmul.msk.f32.gmra.mxu0 %vm2174_vm6, %v1861_v4 }
 0x68d   :  { %v12187_v34 = vpop.f32.mrf.mxu1  ;;  %v12189_v24 = vpop.f32.mrf.mxu3 }
 0x690   :  { %8911 = vmatmul.msk.f32.gmra.mxu1 %vm2174_vm6, %v11732_v54  ;;  %v1529_v54 = vld [vmem:[%s16740_s1 + $0x498] sm:$0xff] }
 0x692   :  { %2722 = vmatmul.f32.gmra.mxu3 %v1526_v14  ;;  %8866 = vmatmul.msk.f32.gmra.mxu2 %vm2174_vm6, %v1531_v55  ;;  %v1534_v14 = vld [vmem:[%s16740_s1 + $0x4c0] sm:$0xff]  ;;  %v1867_v55 = vld [vmem:[%s16740_s1 + $0xf28] sm:$0xff]  ;;  %v12235_v11 = vpop.f32.mrf.mxu0 }
 0x693   :  { %17097 = vst [vmem:[#allocation41_spill] sm:$0xff] %v12235_v11 }
 0x694   :  { %9117 = vmatmul.msk.f32.gmra.mxu0 %vm2174_vm6, %v1864_v49 }
 0x695   :  { %v12204_v9 = vpop.f32.mrf.mxu1  ;;  %v12206_v4 = vpop.f32.mrf.mxu3 }
 0x698   :  { %8912 = vmatmul.msk.f32.gmra.mxu1 %vm2174_vm6, %v11754_v1  ;;  %v1537_v1 = vld [vmem:[%s16740_s1 + $0x4d8] sm:$0xff] }
 0x69a   :  { %2725 = vmatmul.f32.gmra.mxu3 %v1529_v54  ;;  %8867 = vmatmul.msk.f32.gmra.mxu2 %vm2174_vm6, %v1534_v14  ;;  %v1870_v54 = vld [vmem:[%s16740_s1 + $0xf40] sm:$0xff]  ;;  %v12242_v14 = vpop.f32.mrf.mxu2  ;;  %v12273_v27 = vpop.f32.mrf.mxu0 }
 0x69b   :  { %17098 = vst [vmem:[#allocation9_spill] sm:$0xff] %v12273_v27 }
 0x69c   :  { %9118 = vmatmul.msk.f32.gmra.mxu0 %vm2174_vm6, %v1867_v55  ;;  %v2149_v55 = vld [vmem:[%s16741_s7 + $0x58] sm:$0xff] }
 0x69d   :  { %v12225_v49 = vpop.f32.mrf.mxu1  ;;  %v12227_v42 = vpop.f32.mrf.mxu3  ;;  %3802 = vmatpush.msrb.mxu2 %v2149_v55  ;;  %v1873_v55 = vld [vmem:[%s16740_s1 + $0xf58] sm:$0xff] }
 0x6a0   :  { %8913 = vmatmul.msk.f32.gmra.mxu1 %vm2174_vm6, %v11778_v17  ;;  %v2148_v17 = vld [vmem:[%s16741_s7 + $0x50] sm:$0xff] }
 0x6a1   :  { %3803 = vmatpush.msrb.mxu2 %v2148_v17 }
 0x6a2   :  { %2728 = vmatmul.f32.gmra.mxu3 %v1532_v20  ;;  %8868 = vmatmul.msk.f32.gmra.mxu2 %vm2174_vm6, %v1537_v1  ;;  %v2147_v20 = vld [vmem:[%s16741_s7 + $0x48] sm:$0xff]  ;;  %v12276_v3 = vpop.f32.mrf.mxu2 }
 0x6a3   :  { %v1535_v1 = vld [vmem:[%s16740_s1 + $0x4c8] sm:$0xff]  ;;  %3804 = vmatpush.msrb.mxu2 %v2147_v20 }
 0x6a4   :  { %9119 = vmatmul.msk.f32.gmra.mxu0 %vm2174_vm6, %v1870_v54  ;;  %v1540_v54 = vld [vmem:[%s16740_s1 + $0x4f0] sm:$0xff]  ;;  %v1543_v20 = vld [vmem:[%s16740_s1 + $0x508] sm:$0xff] }
 0x6a5   :  { %v12249_v11 = vpop.f32.mrf.mxu1  ;;  %v12251_v2 = vpop.f32.mrf.mxu3  ;;  %3805 = vmatpush.msrb.mxu2 %v2146_v29 }
 0x6a6   :  { %v12296_v29 = vpop.f32.mrf.mxu0 }
 0x6a7   :  { %17099 = vst [vmem:[#allocation4_spill] sm:$0xff] %v12296_v29 }
 0x6a8   :  { %8914 = vmatmul.msk.f32.gmra.mxu1 %vm2174_vm6, %v11806_v36 }
 0x6aa   :  { %2731 = vmatmul.f32.gmra.mxu3 %v1535_v1  ;;  %8869 = vmatmul.msk.f32.gmra.mxu2 %vm2174_vm6, %v1540_v54  ;;  %v1876_v1 = vld [vmem:[%s16740_s1 + $0xf70] sm:$0xff]  ;;  %v12298_v54 = vpop.f32.mrf.mxu2 }
 0x6ac   :  { %9120 = vmatmul.msk.f32.gmra.mxu0 %vm2174_vm6, %v1873_v55 }
 0x6ad   :  { %v12279_v36 = vpop.f32.mrf.mxu1  ;;  %v12281_v17 = vpop.f32.mrf.mxu3 }
 0x6ae   :  { %v12321_v0 = vpop.f32.mrf.mxu0 }
 0x6af   :  { %17101 = vst [vmem:[#allocation5_spill] sm:$0xff] %v12321_v0 }
 0x6b0   :  { %8915 = vmatmul.msk.f32.gmra.mxu1 %vm2174_vm6, %v11831_v45  ;;  %v1541_v45 = vld [vmem:[%s16740_s1 + $0x4f8] sm:$0xff] }
 0x6b2   :  { %2734 = vmatmul.f32.gmra.mxu3 %v1538_v22  ;;  %8870 = vmatmul.msk.f32.gmra.mxu2 %vm2174_vm6, %v1543_v20  ;;  %v1546_v22 = vld [vmem:[%s16740_s1 + $0x520] sm:$0xff]  ;;  %v1879_v20 = vld [vmem:[%s16740_s1 + $0xf88] sm:$0xff]  ;;  %v12323_v12 = vpop.f32.mrf.mxu2 }
 0x6b4   :  { %9121 = vmatmul.msk.f32.gmra.mxu0 %vm2174_vm6, %v1876_v1 }
 0x6b5   :  { %v12300_v55 = vpop.f32.mrf.mxu1  ;;  %v12302_v27 = vpop.f32.mrf.mxu3 }
 0x6b6   :  { %v12348_v6 = vpop.f32.mrf.mxu0 }
 0x6b7   :  { %17103 = vst [vmem:[#allocation7_spill] sm:$0xff] %v12348_v6 }
 0x6b8   :  { %8916 = vmatmul.msk.f32.gmra.mxu1 %vm2174_vm6, %v11856_v59  ;;  %v1544_v59 = vld [vmem:[%s16740_s1 + $0x510] sm:$0xff] }
 0x6ba   :  { %2737 = vmatmul.f32.gmra.mxu3 %v1541_v45  ;;  %8871 = vmatmul.msk.f32.gmra.mxu2 %vm2174_vm6, %v1546_v22  ;;  %v1549_v45 = vld [vmem:[%s16740_s1 + $0x538] sm:$0xff]  ;;  %v1882_v22 = vld [vmem:[%s16740_s1 + $0xfa0] sm:$0xff] }
 0x6bc   :  { %9122 = vmatmul.msk.f32.gmra.mxu0 %vm2174_vm6, %v1879_v20 }
 0x6bd   :  { %v12317_v1 = vpop.f32.mrf.mxu1  ;;  %v12319_v29 = vpop.f32.mrf.mxu3 }
 0x6be   :  { %17100 = vst [vmem:[#allocation62_spill] sm:$0xff] %v12317_v1  ;;  %v1547_v1 = vld [vmem:[%s16740_s1 + $0x528] sm:$0xff] }
 0x6c0   :  { %8917 = vmatmul.msk.f32.gmra.mxu1 %vm2174_vm6, %v11879_v16  ;;  %v1550_v16 = vld [vmem:[%s16740_s1 + $0x540] sm:$0xff] }
 0x6c2   :  { %2740 = vmatmul.f32.gmra.mxu3 %v1544_v59  ;;  %8872 = vmatmul.msk.f32.gmra.mxu2 %vm2174_vm6, %v1549_v45  ;;  %v1885_v59 = vld [vmem:[%s16740_s1 + $0xfb8] sm:$0xff]  ;;  %v12355_v45 = vpop.f32.mrf.mxu2 }
 0x6c4   :  { %9123 = vmatmul.msk.f32.gmra.mxu0 %vm2174_vm6, %v1882_v22  ;;  %v2765_v22 = vadd.f32 %v11709_v47, %v12130_v57  ;;  %v12374_v47 = vpop.f32.mrf.mxu0 }
 0x6c5   :  { %v12338_v20 = vpop.f32.mrf.mxu3  ;;  %v12340_v0 = vpop.f32.mrf.mxu1  ;;  %17105 = vst [vmem:[#allocation65_spill] sm:$0xff] %v12374_v47 }
 0x6c6   :  { %17102 = vst [vmem:[#allocation8_spill] sm:$0xff] %v12340_v0  ;;  %v2866_v0 = vadd.f32 %v12210_v43, %v2765_v22  ;;  %v2768_v43 = vadd.f32 %v11730_v53, %v12149_v15  ;;  %v17107_v53 = vld [vmem:[#allocation63_spill] sm:$0xff] }
 0x6c7   :  { %v17109_v15 = vld [vmem:[#allocation35_spill] sm:$0xff] }
 0x6c8   :  { %8918 = vmatmul.msk.f32.gmra.mxu1 %vm2174_vm6, %v11900_v13  ;;  %v17110_v22 = vld [vmem:[#allocation71_spill] sm:$0xff] }
 0x6ca   :  { %2743 = vmatmul.f32.gmra.mxu3 %v1547_v1  ;;  %3419 = vmatmul.f32.vlgmr.msra.gmra.mxu2 %v1550_v16  ;;  %v1888_v1 = vld [vmem:[%s16740_s1 + $0xfd0] sm:$0xff]  ;;  %v2883_v57 = vpop.f32.mrf.mxu2 }
 0x6cb   :  { %4217 = vmatpush.msra.mxu2 %v11157_v40 }
 0x6cc   :  { %9124 = vmatmul.msk.f32.gmra.mxu0 %vm2174_vm6, %v1885_v59 }
 0x6cd   :  { %4218 = vmatpush.msra.mxu2 %v11163_v10  ;;  %v12362_v6 = vpop.f32.mrf.mxu3  ;;  %v12364_v13 = vpop.f32.mrf.mxu1 }
 0x6ce   :  { %17104 = vst [vmem:[#allocation66_spill] sm:$0xff] %v12364_v13  ;;  %v17122_v13 = vld [vmem:[#allocation75_spill] sm:$0xff] }
 0x6cf   :  { %4219 = vmatpush.msra.mxu2 %v11169_v28 }
 0x6d0   :  { %8919 = vmatmul.msk.f32.gmra.mxu1 %vm2174_vm6, %v11921_v18 }
 0x6d1   :  { %4220 = vmatpush.msra.mxu2 %v11175_v60 }
 0x6d2   :  { %8873 = vmatmul.msk.f32.vlgmr.msra.gmra.mxu3 %vm2174_vm6, %v2866_v0  ;;  %v2869_v0 = vadd.f32 %v12242_v14, %v2768_v43  ;;  %v2886_v59 = vpop.f32.mrf.mxu2  ;;  %v17114_v43 = vld [vmem:[#allocation70_spill] sm:$0xff] }
 0x6d3   :  { %4003 = vmatpush.msra.mxu3 %v17044_v30 }
 0x6d4   :  { %9153 = vmatmul.msk.f32.vlgmr.msra.gmra.mxu0 %vm2174_vm6, %v1888_v1  ;;  %v17112_v1 = vld [vmem:[#allocation68_spill] sm:$0xff] }
 0x6d5   :  { %7217 = vmatpush.msra.mxu0 %v11157_v40  ;;  %4004 = vmatpush.msra.mxu3 %v17045_v52  ;;  %v12383_v18 = vpop.f32.mrf.mxu3  ;;  %v12385_v16 = vpop.f32.mrf.mxu1  ;;  %v17108_v40 = vld [vmem:[#allocation42_spill] sm:$0xff] }
 0x6d6   :  { %17106 = vst [vmem:[#allocation64_spill] sm:$0xff] %v12385_v16  ;;  %v17118_v16 = vld [vmem:[#allocation72_spill] sm:$0xff] }
 0x6d7   :  { %7218 = vmatpush.msra.mxu0 %v11163_v10  ;;  %4005 = vmatpush.msra.mxu3 %v17046_v33  ;;  %v2771_v10 = vadd.f32 %v17109_v15, %v12170_v5  ;;  %v17115_v5 = vld [vmem:[#allocation37_spill] sm:$0xff]  ;;  %v17116_v15 = vld [vmem:[#allocation67_spill] sm:$0xff] }
 0x6d8   :  { %8920 = vmatmul.msk.f32.gmra.mxu1 %vm2174_vm6, %v11942_v58 }
 0x6d9   :  { %7219 = vmatpush.msra.mxu0 %v11169_v28  ;;  %4006 = vmatpush.msra.mxu3 %v17107_v53  ;;  %v2872_v58 = vadd.f32 %v12276_v3, %v2771_v10  ;;  %v17119_v10 = vld [vmem:[#allocation73_spill] sm:$0xff] }
 0x6da   :  { %8874 = vmatmul.msk.f32.gmra.mxu3 %vm2174_vm6, %v2869_v0  ;;  %v2774_v0 = vadd.f32 %v17115_v5, %v12189_v24  ;;  %v2889_v3 = vpop.f32.mrf.mxu2  ;;  %v17121_v24 = vld [vmem:[#allocation39_spill] sm:$0xff] }
 0x6db   :  { %7220 = vmatpush.msra.mxu0 %v11175_v60  ;;  %4007 = vmatpush.msra.mxu3 %v17108_v40  ;;  %v17113_v60 = vld [vmem:[#allocation69_spill] sm:$0xff]  ;;  %v2777_v5 = vadd.f32 %v17121_v24, %v12206_v4  ;;  %v17126_v4 = vld [vmem:[#allocation38_spill] sm:$0xff] }
 0x6dd   :  { %4008 = vmatpush.msra.mxu3 %v17110_v22  ;;  %v12400_v14 = vpop.f32.mrf.mxu3  ;;  %v12402_v28 = vpop.f32.mrf.mxu1 }
 0x6de   :  { %17111 = vst [vmem:[#allocation63_spill] sm:$0xff] %v12402_v28 }
 0x6df   :  { %4009 = vmatpush.msra.mxu3 %v17112_v1 }
 0x6e0   :  { %8921 = vmatmul.msk.f32.gmra.mxu1 %vm2174_vm6, %v11963_v19  ;;  %v2875_v19 = vadd.f32 %v12298_v54, %v2774_v0  ;;  %v2878_v54 = vadd.f32 %v12323_v12, %v2777_v5 }
 0x6e1   :  { %4010 = vmatpush.msra.mxu3 %v17113_v60 }
 0x6e2   :  { %8875 = vmatmul.msk.f32.gmra.mxu3 %vm2174_vm6, %v2872_v58  ;;  %v17120_v58 = vld [vmem:[#allocation74_spill] sm:$0xff]  ;;  %v2892_v0 = vpop.f32.mrf.mxu2 }
 0x6e3   :  { %4011 = vmatpush.msra.mxu3 %v17114_v43 }
 0x6e5   :  { %4012 = vmatpush.msra.mxu3 %v17116_v15  ;;  %v12414_v47 = vpop.f32.mrf.mxu3  ;;  %v12416_v28 = vpop.f32.mrf.mxu1 }
 0x6e6   :  { %17117 = vst [vmem:[#allocation42_spill] sm:$0xff] %v12416_v28 }
 0x6e7   :  { %4013 = vmatpush.msra.mxu3 %v17118_v16 }
 0x6e8   :  { %8922 = vmatmul.msk.f32.gmra.mxu1 %vm2174_vm6, %v11981_v46  ;;  %v17125_v46 = vld [vmem:[#allocation77_spill] sm:$0xff] }
 0x6e9   :  { %4014 = vmatpush.msra.mxu3 %v17119_v10 }
 0x6ea   :  { %8876 = vmatmul.msk.f32.gmra.mxu3 %vm2174_vm6, %v2875_v19  ;;  %v2780_v19 = vadd.f32 %v17126_v4, %v12227_v42  ;;  %v2895_v12 = vpop.f32.mrf.mxu2 }
 0x6eb   :  { %4015 = vmatpush.msra.mxu3 %v17120_v58 }
 0x6ed   :  { %4016 = vmatpush.msra.mxu3 %v17122_v13  ;;  %v12428_v28 = vpop.f32.mrf.mxu3  ;;  %v12430_v38 = vpop.f32.mrf.mxu1 }
 0x6ee   :  { %17123 = vst [vmem:[#allocation35_spill] sm:$0xff] %v12430_v38  ;;  %v2881_v38 = vadd.f32 %v12355_v45, %v2780_v19  ;;  %v17129_v45 = vld [vmem:[#allocation44_spill] sm:$0xff] }
 0x6ef   :  { %4017 = vmatpush.msra.mxu3 %v17124_v44  ;;  %v2786_v4 = vadd.f32 %v17129_v45, %v12281_v17 }
 0x6f0   :  { %8923 = vmatmul.msk.f32.gmra.mxu1 %vm2174_vm6, %v12004_v8  ;;  %v17128_v8 = vld [vmem:[#allocation40_spill] sm:$0xff] }
 0x6f1   :  { %4018 = vmatpush.msra.mxu3 %v17125_v46  ;;  %v2783_v5 = vadd.f32 %v17128_v8, %v12251_v2  ;;  %v17131_v2 = vld [vmem:[#allocation45_spill] sm:$0xff] }
 0x6f2   :  { %8877 = vmatmul.msk.f32.gmra.mxu3 %vm2174_vm6, %v2878_v54 }
 0x6f3   :  { %v2884_v42 = vadd.f32 %v2883_v57, %v2783_v5  ;;  %v2789_v57 = vadd.f32 %v17131_v2, %v12302_v27 }
 0x6f5   :  { %v12440_v24 = vpop.f32.mrf.mxu3  ;;  %v12442_v61 = vpop.f32.mrf.mxu1  ;;  %v2890_v5 = vadd.f32 %v2889_v3, %v2789_v57 }
 0x6f6   :  { %17127 = vst [vmem:[#allocation71_spill] sm:$0xff] %v12442_v61  ;;  %v2887_v61 = vadd.f32 %v2886_v59, %v2786_v4  ;;  %v17133_v59 = vld [vmem:[#allocation53_spill] sm:$0xff] }
 0x6f8   :  { %8924 = vmatmul.msk.f32.gmra.mxu1 %vm2174_vm6, %v12026_v7 }
 0x6fa   :  { %8878 = vmatmul.msk.f32.gmra.mxu3 %vm2174_vm6, %v2881_v38  ;;  %v2898_v38 = vpop.f32.mrf.mxu2 }
 0x6fd   :  { %v12450_v51 = vpop.f32.mrf.mxu3  ;;  %v12452_v54 = vpop.f32.mrf.mxu1 }
 0x700   :  { %8925 = vmatmul.msk.f32.gmra.mxu1 %vm2174_vm6, %v12050_v25 }
 0x702   :  { %8879 = vmatmul.msk.f32.gmra.mxu3 %vm2174_vm6, %v2884_v42  ;;  %v2901_v8 = vpop.f32.mrf.mxu2  ;;  %v2792_v42 = vadd.f32 %v17133_v59, %v12319_v29  ;;  %v1552_v29 = vld [vmem:[%s16740_s1 + $0x550] sm:$0xff] }
 0x705   :  { %v12459_v7 = vpop.f32.mrf.mxu3  ;;  %v12461_v19 = vpop.f32.mrf.mxu1 }
 0x706   :  { %17130 = vst [vmem:[#allocation68_spill] sm:$0xff] %v12461_v19  ;;  %v1602_v19 = vld [vmem:[%s16740_s1 + $0x6e0] sm:$0xff] }
 0x708   :  { %8926 = vmatmul.msk.f32.gmra.mxu1 %vm2174_vm6, %v12074_v35 }
 0x70a   :  { %8880 = vmatmul.msk.f32.gmra.mxu3 %vm2174_vm6, %v2887_v61  ;;  %v2893_v61 = vadd.f32 %v2892_v0, %v2792_v42  ;;  %v2904_v27 = vpop.f32.mrf.mxu2  ;;  %v17136_v0 = vld [vmem:[#allocation52_spill] sm:$0xff] }
 0x70b   :  { %v2798_v57 = vadd.f32 %v17136_v0, %v12362_v6  ;;  %v2801_v6 = vadd.f32 %v11979_v21, %v12383_v18  ;;  %v2804_v21 = vadd.f32 %v11999_v26, %v12400_v14  ;;  %v2807_v26 = vadd.f32 %v12023_v32, %v12414_v47  ;;  %v1553_v32 = vld [vmem:[%s16740_s1 + $0x558] sm:$0xff] }
 0x70c   :  { %3422 = vmatmul.f32.gmra.mxu2 %v1553_v32 }
 0x70d   :  { %v12468_v25 = vpop.f32.mrf.mxu3  ;;  %v12472_v17 = vpop.f32.mrf.mxu1  ;;  %v2899_v59 = vadd.f32 %v2898_v38, %v2798_v57 }
 0x70e   :  { %17132 = vst [vmem:[#allocation69_spill] sm:$0xff] %v12472_v17 }
 0x710   :  { %8927 = vmatmul.msk.f32.gmra.mxu1 %vm2174_vm6, %v12095_v31  ;;  %v17135_v31 = vld [vmem:[#allocation47_spill] sm:$0xff] }
 0x711   :  { %v2795_v45 = vadd.f32 %v17135_v31, %v12338_v20 }
 0x712   :  { %8881 = vmatmul.msk.f32.gmra.mxu3 %vm2174_vm6, %v2890_v5 }
 0x713   :  { %v2896_v2 = vadd.f32 %v2895_v12, %v2795_v45  ;;  %v1555_v12 = vld [vmem:[%s16740_s1 + $0x568] sm:$0xff]  ;;  %v2902_v45 = vadd.f32 %v2901_v8, %v2801_v6 }
 0x715   :  { %v12477_v35 = vpop.f32.mrf.mxu3  ;;  %v12482_v3 = vpop.f32.mrf.mxu1 }
 0x716   :  { %17134 = vst [vmem:[#allocation70_spill] sm:$0xff] %v12482_v3 }
 0x718   :  { %8928 = vmatmul.msk.f32.gmra.mxu1 %vm2174_vm6, %v12115_v37  ;;  %v2907_v37 = vpop.f32.mrf.mxu2 }
 0x719   :  { %v2908_v57 = vadd.f32 %v2907_v37, %v2807_v26  ;;  %v1567_v37 = vld [vmem:[%s16740_s1 + $0x5c8] sm:$0xff] }
 0x71a   :  { %8882 = vmatmul.msk.f32.gmra.mxu3 %vm2174_vm6, %v2893_v61  ;;  %v1558_v61 = vld [vmem:[%s16740_s1 + $0x580] sm:$0xff]  ;;  %v1559_v26 = vld [vmem:[%s16740_s1 + $0x588] sm:$0xff] }
 0x71d   :  { %v12486_v4 = vpop.f32.mrf.mxu3  ;;  %v12497_v20 = vpop.f32.mrf.mxu1 }
 0x71e   :  { %17137 = vst [vmem:[#allocation37_spill] sm:$0xff] %v12497_v20 }
 0x720   :  { %8929 = vmatmul.msk.f32.vlgmr.msrb.gmra.mxu1 %vm2174_vm6, %v1552_v29  ;;  %v2910_v38 = vpop.f32.mrf.mxu2  ;;  %v1561_v29 = vld [vmem:[%s16740_s1 + $0x598] sm:$0xff] }
 0x721   :  { %4603 = vmatpush.msrb.mxu1 %v17044_v30 }
 0x722   :  { %8883 = vmatmul.msk.f32.gmra.mxu3 %vm2174_vm6, %v2896_v2  ;;  %v2905_v2 = vadd.f32 %v2904_v27, %v2804_v21  ;;  %v1564_v27 = vld [vmem:[%s16740_s1 + $0x5b0] sm:$0xff] }
 0x723   :  { %4604 = vmatpush.msrb.mxu1 %v17045_v52 }
 0x725   :  { %v12499_v5 = vpop.f32.mrf.mxu3  ;;  %4605 = vmatpush.msrb.mxu1 %v17046_v33  ;;  %v12518_v31 = vpop.f32.mrf.mxu1 }
 0x726   :  { %17138 = vst [vmem:[#allocation67_spill] sm:$0xff] %v12518_v31  ;;  %v1647_v31 = vld [vmem:[%s16740_s1 + $0x848] sm:$0xff] }
 0x727   :  { %4606 = vmatpush.msrb.mxu1 %v17107_v53 }
 0x728   :  { %8930 = vmatmul.msk.f32.gmra.mxu1 %vm2174_vm6, %v1555_v12  ;;  %v2913_v8 = vpop.f32.mrf.mxu2 }
 0x729   :  { %4607 = vmatpush.msrb.mxu1 %v17108_v40 }
 0x72a   :  { %8884 = vmatmul.msk.f32.gmra.mxu3 %vm2174_vm6, %v2899_v59  ;;  %v2810_v59 = vadd.f32 %v12047_v62, %v12428_v28  ;;  %v2813_v62 = vadd.f32 %v12071_v41, %v12440_v24  ;;  %v2816_v41 = vadd.f32 %v12093_v56, %v12450_v51  ;;  %v2819_v51 = vadd.f32 %v12111_v39, %v12459_v7 }
 0x72b   :  { %4608 = vmatpush.msrb.mxu1 %v17110_v22  ;;  %v2822_v39 = vadd.f32 %v12132_v50, %v12468_v25  ;;  %v2825_v50 = vadd.f32 %v12151_v23, %v12477_v35  ;;  %v2828_v23 = vadd.f32 %v12168_v48, %v12486_v4  ;;  %v2831_v48 = vadd.f32 %v12187_v34, %v12499_v5 }
 0x72d   :  { %v12512_v42 = vpop.f32.mrf.mxu3  ;;  %4609 = vmatpush.msrb.mxu1 %v17112_v1  ;;  %v12535_v0 = vpop.f32.mrf.mxu1 }
 0x72e   :  { %17139 = vst [vmem:[#allocation72_spill] sm:$0xff] %v12535_v0  ;;  %v2834_v34 = vadd.f32 %v12204_v9, %v12512_v42 }
 0x72f   :  { %4610 = vmatpush.msrb.mxu1 %v17113_v60 }
 0x730   :  { %8931 = vmatmul.msk.f32.gmra.mxu1 %vm2174_vm6, %v1558_v61  ;;  %v2916_v12 = vpop.f32.mrf.mxu2  ;;  %v2911_v61 = vadd.f32 %v2910_v38, %v2810_v59  ;;  %v1570_v38 = vld [vmem:[%s16740_s1 + $0x5e0] sm:$0xff] }
 0x731   :  { %4611 = vmatpush.msrb.mxu1 %v17114_v43  ;;  %v2917_v32 = vadd.f32 %v2916_v12, %v2816_v41  ;;  %v1562_v59 = vld [vmem:[%s16740_s1 + $0x5a0] sm:$0xff] }
 0x732   :  { %8885 = vmatmul.msk.f32.gmra.mxu3 %vm2174_vm6, %v2902_v45  ;;  %v1556_v45 = vld [vmem:[%s16740_s1 + $0x570] sm:$0xff] }
 0x733   :  { %4612 = vmatpush.msrb.mxu1 %v17116_v15  ;;  %3425 = vmatmul.f32.gmra.mxu2 %v1556_v45 }
 0x735   :  { %v12527_v18 = vpop.f32.mrf.mxu3  ;;  %4613 = vmatpush.msrb.mxu1 %v17118_v16  ;;  %v12554_v47 = vpop.f32.mrf.mxu1 }
 0x736   :  { %17140 = vst [vmem:[#allocation73_spill] sm:$0xff] %v12554_v47  ;;  %v2837_v9 = vadd.f32 %v12225_v49, %v12527_v18 }
 0x737   :  { %4614 = vmatpush.msrb.mxu1 %v17119_v10 }
 0x738   :  { %8932 = vmatmul.msk.f32.gmra.mxu1 %vm2174_vm6, %v1561_v29  ;;  %v2919_v21 = vpop.f32.mrf.mxu2 }
 0x739   :  { %4615 = vmatpush.msrb.mxu1 %v17120_v58  ;;  %v2920_v12 = vadd.f32 %v2919_v21, %v2819_v51  ;;  %v1579_v21 = vld [vmem:[%s16740_s1 + $0x628] sm:$0xff] }
 0x73a   :  { %8886 = vmatmul.msk.f32.gmra.mxu3 %vm2174_vm6, %v2905_v2  ;;  %v2914_v2 = vadd.f32 %v2913_v8, %v2813_v62  ;;  %v1565_v62 = vld [vmem:[%s16740_s1 + $0x5b8] sm:$0xff] }
 0x73b   :  { %4616 = vmatpush.msrb.mxu1 %v17122_v13  ;;  %3428 = vmatmul.f32.gmra.mxu2 %v1559_v26  ;;  %v1568_v26 = vld [vmem:[%s16740_s1 + $0x5d0] sm:$0xff] }
 0x73d   :  { %v12542_v14 = vpop.f32.mrf.mxu3  ;;  %4617 = vmatpush.msrb.mxu1 %v17124_v44  ;;  %v12570_v28 = vpop.f32.mrf.mxu1 }
 0x73e   :  { %17141 = vst [vmem:[#allocation74_spill] sm:$0xff] %v12570_v28  ;;  %v2840_v49 = vadd.f32 %v12249_v11, %v12542_v14 }
 0x73f   :  { %4618 = vmatpush.msrb.mxu1 %v17125_v46 }
 0x740   :  { %8933 = vmatmul.msk.f32.gmra.mxu1 %vm2174_vm6, %v1564_v27  ;;  %v1573_v27 = vld [vmem:[%s16740_s1 + $0x5f8] sm:$0xff] }
 0x742   :  { %8887 = vmatmul.msk.f32.gmra.mxu3 %vm2174_vm6, %v2908_v57  ;;  %v2922_v57 = vpop.f32.mrf.mxu2 }
 0x743   :  { %3431 = vmatmul.f32.gmra.mxu2 %v1562_v59 }
 0x745   :  { %v12558_v6 = vpop.f32.mrf.mxu3  ;;  %v12589_v8 = vpop.f32.mrf.mxu1 }
 0x746   :  { %17142 = vst [vmem:[#allocation39_spill] sm:$0xff] %v12589_v8  ;;  %v2843_v11 = vadd.f32 %v12279_v36, %v12558_v6 }
 0x748   :  { %8934 = vmatmul.msk.f32.gmra.mxu1 %vm2174_vm6, %v1567_v37  ;;  %v1576_v37 = vld [vmem:[%s16740_s1 + $0x610] sm:$0xff] }
 0x74a   :  { %8888 = vmatmul.msk.f32.gmra.mxu3 %vm2174_vm6, %v2911_v61  ;;  %v2925_v61 = vpop.f32.mrf.mxu2 }
 0x74b   :  { %3434 = vmatmul.f32.gmra.mxu2 %v1565_v62  ;;  %v1588_v62 = vld [vmem:[%s16740_s1 + $0x670] sm:$0xff] }
 0x74d   :  { %v12572_v29 = vpop.f32.mrf.mxu3  ;;  %v12604_v45 = vpop.f32.mrf.mxu1 }
 0x74e   :  { %17143 = vst [vmem:[#allocation75_spill] sm:$0xff] %v12604_v45  ;;  %v2846_v36 = vadd.f32 %v12300_v55, %v12572_v29  ;;  %v1606_v29 = vld [vmem:[%s16740_s1 + $0x700] sm:$0xff] }
 0x750   :  { %8935 = vmatmul.msk.f32.gmra.mxu1 %vm2174_vm6, %v1570_v38  ;;  %v2923_v38 = vadd.f32 %v2922_v57, %v2822_v39  ;;  %v2926_v57 = vadd.f32 %v2925_v61, %v2825_v50 }
 0x752   :  { %8889 = vmatmul.msk.f32.gmra.mxu3 %vm2174_vm6, %v2914_v2  ;;  %v2928_v2 = vpop.f32.mrf.mxu2 }
 0x753   :  { %3437 = vmatmul.f32.gmra.mxu2 %v1568_v26  ;;  %v2929_v61 = vadd.f32 %v2928_v2, %v2828_v23  ;;  %v1577_v2 = vld [vmem:[%s16740_s1 + $0x618] sm:$0xff]  ;;  %v1591_v26 = vld [vmem:[%s16740_s1 + $0x688] sm:$0xff] }
 0x755   :  { %v12584_v24 = vpop.f32.mrf.mxu3  ;;  %v12622_v41 = vpop.f32.mrf.mxu1 }
 0x756   :  { %17144 = vst [vmem:[#allocation38_spill] sm:$0xff] %v12622_v41  ;;  %v1630_v41 = vld [vmem:[%s16740_s1 + $0x7c0] sm:$0xff] }
 0x758   :  { %8936 = vmatmul.msk.f32.gmra.mxu1 %vm2174_vm6, %v1573_v27  ;;  %v1582_v27 = vld [vmem:[%s16740_s1 + $0x640] sm:$0xff] }
 0x75a   :  { %8890 = vmatmul.msk.f32.gmra.mxu3 %vm2174_vm6, %v2917_v32  ;;  %v1571_v32 = vld [vmem:[%s16740_s1 + $0x5e8] sm:$0xff]  ;;  %v2931_v59 = vpop.f32.mrf.mxu2 }
 0x75b   :  { %3440 = vmatmul.f32.gmra.mxu2 %v1571_v32  ;;  %v1580_v32 = vld [vmem:[%s16740_s1 + $0x630] sm:$0xff] }
 0x75d   :  { %v12598_v56 = vpop.f32.mrf.mxu3  ;;  %v12638_v35 = vpop.f32.mrf.mxu1 }
 0x75e   :  { %17145 = vst [vmem:[#allocation40_spill] sm:$0xff] %v12638_v35 }
 0x760   :  { %8937 = vmatmul.msk.f32.gmra.mxu1 %vm2174_vm6, %v1576_v37  ;;  %v1585_v37 = vld [vmem:[%s16740_s1 + $0x658] sm:$0xff] }
 0x762   :  { %8891 = vmatmul.msk.f32.gmra.mxu3 %vm2174_vm6, %v2920_v12  ;;  %v1574_v12 = vld [vmem:[%s16740_s1 + $0x600] sm:$0xff]  ;;  %v2934_v39 = vpop.f32.mrf.mxu2 }
 0x763   :  { %3443 = vmatmul.f32.gmra.mxu2 %v1574_v12 }
 0x765   :  { %v12612_v7 = vpop.f32.mrf.mxu3 }
 0x768   :  { %8938 = vmatmul.msk.f32.gmra.mxu1 %vm2174_vm6, %v1579_v21  ;;  %v12657_v21 = vpop.f32.mrf.mxu1 }
 0x769   :  { %17146 = vst [vmem:[#allocation44_spill] sm:$0xff] %v12657_v21 }
 0x76a   :  { %8892 = vmatmul.msk.f32.gmra.mxu3 %vm2174_vm6, %v2923_v38  ;;  %v2932_v38 = vadd.f32 %v2931_v59, %v2831_v48  ;;  %v2937_v50 = vpop.f32.mrf.mxu2  ;;  %v1594_v59 = vld [vmem:[%s16740_s1 + $0x6a0] sm:$0xff]  ;;  %v1597_v48 = vld [vmem:[%s16740_s1 + $0x6b8] sm:$0xff] }
 0x76b   :  { %3446 = vmatmul.f32.gmra.mxu2 %v1577_v2  ;;  %v2938_v23 = vadd.f32 %v2937_v50, %v2837_v9  ;;  %v1589_v50 = vld [vmem:[%s16740_s1 + $0x678] sm:$0xff] }
 0x76d   :  { %v12626_v25 = vpop.f32.mrf.mxu3 }
 0x770   :  { %8939 = vmatmul.msk.f32.gmra.mxu1 %vm2174_vm6, %v1582_v27  ;;  %v2935_v27 = vadd.f32 %v2934_v39, %v2834_v34  ;;  %v1586_v39 = vld [vmem:[%s16740_s1 + $0x660] sm:$0xff]  ;;  %v1600_v34 = vld [vmem:[%s16740_s1 + $0x6d0] sm:$0xff] }
 0x772   :  { %8893 = vmatmul.msk.f32.gmra.mxu3 %vm2174_vm6, %v2926_v57  ;;  %v12672_v57 = vpop.f32.mrf.mxu1 }
 0x773   :  { %17147 = vst [vmem:[#allocation45_spill] sm:$0xff] %v12672_v57  ;;  %3449 = vmatmul.f32.gmra.mxu2 %v1580_v32  ;;  %v1603_v32 = vld [vmem:[%s16740_s1 + $0x6e8] sm:$0xff] }
 0x774   :  { %v1627_v57 = vld [vmem:[%s16740_s1 + $0x7a8] sm:$0xff] }
 0x775   :  { %v12640_v51 = vpop.f32.mrf.mxu3 }
 0x778   :  { %8940 = vmatmul.msk.f32.gmra.mxu1 %vm2174_vm6, %v1585_v37  ;;  %v1583_v37 = vld [vmem:[%s16740_s1 + $0x648] sm:$0xff] }
 0x77a   :  { %8894 = vmatmul.msk.f32.gmra.mxu3 %vm2174_vm6, %v2929_v61  ;;  %v2940_v61 = vpop.f32.mrf.mxu2  ;;  %v12690_v12 = vpop.f32.mrf.mxu1 }
 0x77b   :  { %17148 = vst [vmem:[#allocation53_spill] sm:$0xff] %v12690_v12  ;;  %3452 = vmatmul.f32.gmra.mxu2 %v1583_v37  ;;  %v1551_v37 = vld [vmem:[%s16740_s1 + $0x548] sm:$0xff] }
 0x77d   :  { %v12652_v4 = vpop.f32.mrf.mxu3 }
 0x780   :  { %8941 = vmatmul.msk.f32.gmra.mxu1 %vm2174_vm6, %v1588_v62  ;;  %v2941_v62 = vadd.f32 %v2940_v61, %v2840_v49  ;;  %v1595_v49 = vld [vmem:[%s16740_s1 + $0x6a8] sm:$0xff] }
 0x782   :  { %8895 = vmatmul.msk.f32.gmra.mxu3 %vm2174_vm6, %v2932_v38  ;;  %v2943_v38 = vpop.f32.mrf.mxu2  ;;  %v12706_v14 = vpop.f32.mrf.mxu1 }
 0x783   :  { %3455 = vmatmul.f32.gmra.mxu2 %v1586_v39  ;;  %17149 = vst [vmem:[#allocation47_spill] sm:$0xff] %v12706_v14  ;;  %v1554_v39 = vld [vmem:[%s16740_s1 + $0x560] sm:$0xff] }
 0x785   :  { %v12666_v5 = vpop.f32.mrf.mxu3 }
 0x788   :  { %8942 = vmatmul.msk.f32.gmra.mxu1 %vm2174_vm6, %v1591_v26  ;;  %v2944_v26 = vadd.f32 %v2943_v38, %v2843_v11  ;;  %v1598_v38 = vld [vmem:[%s16740_s1 + $0x6c0] sm:$0xff] }
 0x78a   :  { %8896 = vmatmul.msk.f32.gmra.mxu3 %vm2174_vm6, %v2935_v27  ;;  %v2946_v27 = vpop.f32.mrf.mxu2  ;;  %v12725_v9 = vpop.f32.mrf.mxu1 }
 0x78b   :  { %3458 = vmatmul.f32.gmra.mxu2 %v1589_v50  ;;  %17152 = vst [vmem:[#allocation79_spill] sm:$0xff] %v12725_v9  ;;  %v1624_v9 = vld [vmem:[%s16740_s1 + $0x790] sm:$0xff] }
 0x78d   :  { %v12680_v42 = vpop.f32.mrf.mxu3 }
 0x790   :  { %8943 = vmatmul.msk.f32.gmra.mxu1 %vm2174_vm6, %v1594_v59  ;;  %v2947_v59 = vadd.f32 %v2946_v27, %v2846_v36  ;;  %v1557_v36 = vld [vmem:[%s16740_s1 + $0x578] sm:$0xff] }
 0x791   :  { %v1601_v27 = vld [vmem:[%s16740_s1 + $0x6d8] sm:$0xff] }
 0x792   :  { %8897 = vmatmul.msk.f32.gmra.mxu3 %vm2174_vm6, %v2938_v23  ;;  %v1592_v23 = vld [vmem:[%s16740_s1 + $0x690] sm:$0xff]  ;;  %v12741_v61 = vpop.f32.mrf.mxu1  ;;  %v12765_v50 = vpop.f32.mrf.mxu2 }
 0x793   :  { %3461 = vmatmul.f32.gmra.mxu2 %v1592_v23  ;;  %17154 = vst [vmem:[#allocation81_spill] sm:$0xff] %v12741_v61  ;;  %v1615_v23 = vld [vmem:[%s16740_s1 + $0x748] sm:$0xff] }
 0x795   :  { %v12694_v18 = vpop.f32.mrf.mxu3 }
 0x798   :  { %8944 = vmatmul.msk.f32.gmra.mxu1 %vm2174_vm6, %v1597_v48 }
 0x79a   :  { %8898 = vmatmul.msk.f32.gmra.mxu3 %vm2174_vm6, %v2941_v62  ;;  %v1609_v62 = vld [vmem:[%s16740_s1 + $0x718] sm:$0xff]  ;;  %v12758_v11 = vpop.f32.mrf.mxu1 }
 0x79b   :  { %3464 = vmatmul.f32.gmra.mxu2 %v1595_v49  ;;  %17156 = vst [vmem:[#allocation83_spill] sm:$0xff] %v12758_v11  ;;  %v1604_v49 = vld [vmem:[%s16740_s1 + $0x6f0] sm:$0xff] }
 0x79d   :  { %v12708_v2 = vpop.f32.mrf.mxu3 }
 0x79e   :  { %17150 = vst [vmem:[#allocation52_spill] sm:$0xff] %v12708_v2 }
 0x7a0   :  { %8945 = vmatmul.msk.f32.gmra.mxu1 %vm2174_vm6, %v1600_v34 }
 0x7a2   :  { %8899 = vmatmul.msk.f32.gmra.mxu3 %vm2174_vm6, %v2944_v26  ;;  %v1612_v26 = vld [vmem:[%s16740_s1 + $0x730] sm:$0xff] }
 0x7a3   :  { %3467 = vmatmul.f32.gmra.mxu2 %v1598_v38  ;;  %v1618_v38 = vld [vmem:[%s16740_s1 + $0x760] sm:$0xff] }
 0x7a5   :  { %v12720_v6 = vpop.f32.mrf.mxu3 }
 0x7a6   :  { %17151 = vst [vmem:[#allocation78_spill] sm:$0xff] %v12720_v6 }
 0x7a8   :  { %8946 = vmatmul.msk.f32.gmra.mxu1 %vm2174_vm6, %v1603_v32  ;;  %v12774_v32 = vpop.f32.mrf.mxu1 }
 0x7aa   :  { %8900 = vmatmul.msk.f32.gmra.mxu3 %vm2174_vm6, %v2947_v59 }
 0x7ab   :  { %3470 = vmatmul.f32.gmra.mxu2 %v1601_v27  ;;  %v1607_v27 = vld [vmem:[%s16740_s1 + $0x708] sm:$0xff] }
 0x7ad   :  { %v12732_v55 = vpop.f32.mrf.mxu3 }
 0x7ae   :  { %17153 = vst [vmem:[#allocation80_spill] sm:$0xff] %v12732_v55 }
 0x7b0   :  { %8947 = vmatmul.msk.f32.gmra.mxu1 %vm2174_vm6, %v1606_v29  ;;  %v12781_v29 = vpop.f32.mrf.mxu2 }
 0x7b2   :  { %3520 = vmatmul.f32.vlgmr.msrb.gmra.mxu3 %v1551_v37  ;;  %v1560_v37 = vld [vmem:[%s16740_s1 + $0x590] sm:$0xff] }
 0x7b3   :  { %3473 = vmatmul.f32.gmra.mxu2 %v1604_v49  ;;  %v1621_v49 = vld [vmem:[%s16740_s1 + $0x778] sm:$0xff] }
 0x7b5   :  { %v12746_v48 = vpop.f32.mrf.mxu3 }
 0x7b6   :  { %17155 = vst [vmem:[#allocation82_spill] sm:$0xff] %v12746_v48  ;;  %v1596_v48 = vld [vmem:[%s16740_s1 + $0x6b0] sm:$0xff] }
 0x7b8   :  { %8948 = vmatmul.msk.f32.gmra.mxu1 %vm2174_vm6, %v1609_v62  ;;  %v12790_v62 = vpop.f32.mrf.mxu1 }
 0x7ba   :  { %3523 = vmatmul.f32.gmra.mxu3 %v1554_v39 }
 0x7bb   :  { %3476 = vmatmul.f32.gmra.mxu2 %v1607_v27 }
 0x7bd   :  { %v12760_v34 = vpop.f32.mrf.mxu3 }
 0x7be   :  { %17157 = vst [vmem:[#allocation84_spill] sm:$0xff] %v12760_v34 }
 0x7c0   :  { %8949 = vmatmul.msk.f32.gmra.mxu1 %vm2174_vm6, %v1612_v26  ;;  %v12797_v26 = vpop.f32.mrf.mxu2 }
 0x7c2   :  { %3526 = vmatmul.f32.gmra.mxu3 %v1557_v36  ;;  %v1563_v36 = vld [vmem:[%s16740_s1 + $0x5a8] sm:$0xff] }
 0x7c5   :  { %v12776_v59 = vpop.f32.mrf.mxu3 }
 0x7c6   :  { %17158 = vst [vmem:[#allocation85_spill] sm:$0xff] %v12776_v59 }
 0x7c8   :  { %8950 = vmatmul.msk.f32.gmra.mxu1 %vm2174_vm6, %v1615_v23  ;;  %v12806_v23 = vpop.f32.mrf.mxu1  ;;  %v12813_v11 = vpop.f32.mrf.mxu2 }
 0x7ca   :  { %3529 = vmatmul.f32.gmra.mxu3 %v1560_v37 }
 0x7cd   :  { %v12792_v39 = vpop.f32.mrf.mxu3 }
 0x7ce   :  { %17159 = vst [vmem:[#allocation86_spill] sm:$0xff] %v12792_v39 }
 0x7d0   :  { %8951 = vmatmul.msk.f32.gmra.mxu1 %vm2174_vm6, %v1618_v38  ;;  %v1566_v38 = vld [vmem:[%s16740_s1 + $0x5c0] sm:$0xff]  ;;  %v12822_v27 = vpop.f32.mrf.mxu1  ;;  %v12829_v14 = vpop.f32.mrf.mxu2 }
 0x7d2   :  { %3532 = vmatmul.f32.gmra.mxu3 %v1563_v36  ;;  %v1610_v36 = vld [vmem:[%s16740_s1 + $0x720] sm:$0xff] }
 0x7d3   :  { %3479 = vmatmul.f32.gmra.mxu2 %v1610_v36 }
 0x7d5   :  { %v12808_v37 = vpop.f32.mrf.mxu3 }
 0x7d6   :  { %17160 = vst [vmem:[#allocation87_spill] sm:$0xff] %v12808_v37 }
 0x7d8   :  { %8952 = vmatmul.msk.f32.gmra.mxu1 %vm2174_vm6, %v1621_v49  ;;  %v1569_v49 = vld [vmem:[%s16740_s1 + $0x5d8] sm:$0xff]  ;;  %v12838_v36 = vpop.f32.mrf.mxu1  ;;  %v12845_v21 = vpop.f32.mrf.mxu2 }
 0x7da   :  { %3535 = vmatmul.f32.gmra.mxu3 %v1566_v38  ;;  %v1613_v38 = vld [vmem:[%s16740_s1 + $0x738] sm:$0xff] }
 0x7db   :  { %3482 = vmatmul.f32.gmra.mxu2 %v1613_v38 }
 0x7dd   :  { %v12824_v61 = vpop.f32.mrf.mxu3 }
 0x7de   :  { %17161 = vst [vmem:[#allocation88_spill] sm:$0xff] %v12824_v61  ;;  %v1635_v61 = vld [vmem:[%s16740_s1 + $0x7e8] sm:$0xff] }
 0x7e0   :  { %8953 = vmatmul.msk.f32.gmra.mxu1 %vm2174_vm6, %v1624_v9  ;;  %v1572_v9 = vld [vmem:[%s16740_s1 + $0x5f0] sm:$0xff]  ;;  %v12854_v38 = vpop.f32.mrf.mxu1  ;;  %v12861_v45 = vpop.f32.mrf.mxu2 }
 0x7e2   :  { %3538 = vmatmul.f32.gmra.mxu3 %v1569_v49  ;;  %v1616_v49 = vld [vmem:[%s16740_s1 + $0x750] sm:$0xff] }
 0x7e3   :  { %3485 = vmatmul.f32.gmra.mxu2 %v1616_v49 }
 0x7e5   :  { %v12840_v12 = vpop.f32.mrf.mxu3 }
 0x7e6   :  { %17162 = vst [vmem:[#allocation89_spill] sm:$0xff] %v12840_v12  ;;  %v1633_v12 = vld [vmem:[%s16740_s1 + $0x7d8] sm:$0xff] }
 0x7e8   :  { %8954 = vmatmul.msk.f32.gmra.mxu1 %vm2174_vm6, %v1627_v57  ;;  %v1575_v57 = vld [vmem:[%s16740_s1 + $0x608] sm:$0xff]  ;;  %v12870_v49 = vpop.f32.mrf.mxu1  ;;  %v12877_v8 = vpop.f32.mrf.mxu2 }
 0x7ea   :  { %3541 = vmatmul.f32.gmra.mxu3 %v1572_v9  ;;  %v1619_v9 = vld [vmem:[%s16740_s1 + $0x768] sm:$0xff] }
 0x7eb   :  { %3488 = vmatmul.f32.gmra.mxu2 %v1619_v9 }
 0x7ed   :  { %v12856_v35 = vpop.f32.mrf.mxu3 }
 0x7ee   :  { %17163 = vst [vmem:[#allocation90_spill] sm:$0xff] %v12856_v35 }
 0x7f0   :  { %8955 = vmatmul.msk.f32.gmra.mxu1 %vm2174_vm6, %v1630_v41  ;;  %v1578_v41 = vld [vmem:[%s16740_s1 + $0x620] sm:$0xff]  ;;  %v12886_v9 = vpop.f32.mrf.mxu1  ;;  %v12893_v28 = vpop.f32.mrf.mxu2 }
 0x7f2   :  { %3544 = vmatmul.f32.gmra.mxu3 %v1575_v57  ;;  %v1622_v57 = vld [vmem:[%s16740_s1 + $0x780] sm:$0xff] }
 0x7f3   :  { %3491 = vmatmul.f32.gmra.mxu2 %v1622_v57 }
 0x7f5   :  { %v12872_v35 = vpop.f32.mrf.mxu3 }
 0x7f6   :  { %17164 = vst [vmem:[#allocation91_spill] sm:$0xff] %v12872_v35 }
 0x7f8   :  { %8956 = vmatmul.msk.f32.gmra.mxu1 %vm2174_vm6, %v1633_v12  ;;  %v1581_v12 = vld [vmem:[%s16740_s1 + $0x638] sm:$0xff]  ;;  %v12902_v57 = vpop.f32.mrf.mxu1  ;;  %v12911_v37 = vpop.f32.mrf.mxu2 }
 0x7fa   :  { %3547 = vmatmul.f32.gmra.mxu3 %v1578_v41  ;;  %v1625_v41 = vld [vmem:[%s16740_s1 + $0x798] sm:$0xff] }
 0x7fb   :  { %3494 = vmatmul.f32.gmra.mxu2 %v1625_v41  ;;  %v1628_v41 = vld [vmem:[%s16740_s1 + $0x7b0] sm:$0xff] }
 0x7fd   :  { %v12888_v35 = vpop.f32.mrf.mxu3 }
 0x7fe   :  { %17165 = vst [vmem:[#allocation92_spill] sm:$0xff] %v12888_v35 }
 0x800   :  { %4120 = vmatmul.f32.vlgmr.msra.gmra.mxu1 %v1635_v61  ;;  %v1638_v61 = vld [vmem:[%s16740_s1 + $0x800] sm:$0xff]  ;;  %v12930_v39 = vpop.f32.mrf.mxu2 }
 0x801   :  { %5203 = vmatpush.msra.mxu1 %v17044_v30 }
 0x802   :  { %3550 = vmatmul.f32.gmra.mxu3 %v1581_v12  ;;  %v1584_v12 = vld [vmem:[%s16740_s1 + $0x650] sm:$0xff] }
 0x803   :  { %5204 = vmatpush.msra.mxu1 %v17045_v52  ;;  %3497 = vmatmul.f32.gmra.mxu2 %v1628_v41  ;;  %v1631_v41 = vld [vmem:[%s16740_s1 + $0x7c8] sm:$0xff] }
 0x805   :  { %v12905_v35 = vpop.f32.mrf.mxu3  ;;  %5205 = vmatpush.msra.mxu1 %v17046_v33 }
 0x806   :  { %17166 = vst [vmem:[#allocation93_spill] sm:$0xff] %v12905_v35  ;;  %v12921_v35 = vpop.f32.mrf.mxu1 }
 0x807   :  { %5206 = vmatpush.msra.mxu1 %v17107_v53 }
 0x808   :  { %4123 = vmatmul.f32.gmra.mxu1 %v1638_v61  ;;  %v1641_v61 = vld [vmem:[%s16740_s1 + $0x818] sm:$0xff]  ;;  %v12949_v59 = vpop.f32.mrf.mxu2 }
 0x809   :  { %5207 = vmatpush.msra.mxu1 %v17108_v40 }
 0x80a   :  { %3553 = vmatmul.f32.gmra.mxu3 %v1584_v12  ;;  %v1587_v12 = vld [vmem:[%s16740_s1 + $0x668] sm:$0xff] }
 0x80b   :  { %5208 = vmatpush.msra.mxu1 %v17110_v22  ;;  %3500 = vmatmul.f32.gmra.mxu2 %v1631_v41 }
 0x80d   :  { %v12924_v47 = vpop.f32.mrf.mxu3  ;;  %5209 = vmatpush.msra.mxu1 %v17112_v1 }
 0x80e   :  { %17167 = vst [vmem:[#allocation94_spill] sm:$0xff] %v12924_v47  ;;  %v12940_v47 = vpop.f32.mrf.mxu1 }
 0x80f   :  { %5210 = vmatpush.msra.mxu1 %v17113_v60 }
 0x810   :  { %4126 = vmatmul.f32.gmra.mxu1 %v1641_v61  ;;  %v1644_v61 = vld [vmem:[%s16740_s1 + $0x830] sm:$0xff]  ;;  %v12965_v34 = vpop.f32.mrf.mxu2 }
 0x811   :  { %5211 = vmatpush.msra.mxu1 %v17114_v43 }
 0x812   :  { %3556 = vmatmul.f32.gmra.mxu3 %v1587_v12  ;;  %v1590_v12 = vld [vmem:[%s16740_s1 + $0x680] sm:$0xff] }
 0x813   :  { %5212 = vmatpush.msra.mxu1 %v17116_v15 }
 0x815   :  { %v12943_v0 = vpop.f32.mrf.mxu3  ;;  %5213 = vmatpush.msra.mxu1 %v17118_v16 }
 0x816   :  { %17168 = vst [vmem:[#allocation95_spill] sm:$0xff] %v12943_v0  ;;  %v12956_v41 = vpop.f32.mrf.mxu1 }
 0x817   :  { %5214 = vmatpush.msra.mxu1 %v17119_v10 }
 0x818   :  { %4129 = vmatmul.f32.gmra.mxu1 %v1644_v61  ;;  %v1593_v61 = vld [vmem:[%s16740_s1 + $0x698] sm:$0xff]  ;;  %v12981_v3 = vpop.f32.mrf.mxu2 }
 0x819   :  { %5215 = vmatpush.msra.mxu1 %v17120_v58 }
 0x81a   :  { %3559 = vmatmul.f32.gmra.mxu3 %v1590_v12 }
 0x81b   :  { %5216 = vmatpush.msra.mxu1 %v17122_v13 }
 0x81d   :  { %v12959_v0 = vpop.f32.mrf.mxu3  ;;  %5217 = vmatpush.msra.mxu1 %v17124_v44 }
 0x81e   :  { %17169 = vst [vmem:[#allocation96_spill] sm:$0xff] %v12959_v0  ;;  %v12971_v12 = vpop.f32.mrf.mxu1  ;;  %v1650_v0 = vld [vmem:[%s16740_s1 + $0x860] sm:$0xff] }
 0x81f   :  { %5218 = vmatpush.msra.mxu1 %v17125_v46  ;;  %v17172_v46 = vld [vmem:[#allocation12_spill] sm:$0xff] }
 0x820   :  { %4132 = vmatmul.f32.gmra.mxu1 %v1647_v31  ;;  %v12993_v17 = vpop.f32.mrf.mxu2 }
 0x822   :  { %3562 = vmatmul.f32.gmra.mxu3 %v1593_v61  ;;  %v1653_v61 = vld [vmem:[%s16740_s1 + $0x878] sm:$0xff] }
 0x825   :  { %v12973_v20 = vpop.f32.mrf.mxu3 }
 0x826   :  { %17170 = vst [vmem:[#allocation97_spill] sm:$0xff] %v12973_v20  ;;  %v12983_v55 = vpop.f32.mrf.mxu1  ;;  %v1599_v20 = vld [vmem:[%s16740_s1 + $0x6c8] sm:$0xff] }
 0x828   :  { %4135 = vmatmul.f32.gmra.mxu1 %v1650_v0 }
 0x82a   :  { %3565 = vmatmul.f32.gmra.mxu3 %v1596_v48  ;;  %v1656_v48 = vld [vmem:[%s16740_s1 + $0x890] sm:$0xff] }
 0x82d   :  { %v12985_v31 = vpop.f32.mrf.mxu3 }
 0x82e   :  { %17171 = vst [vmem:[#allocation98_spill] sm:$0xff] %v12985_v31  ;;  %v12995_v6 = vpop.f32.mrf.mxu1 }
 0x830   :  { %4138 = vmatmul.f32.gmra.mxu1 %v1653_v61  ;;  %v13009_v61 = vpop.f32.mrf.mxu2 }
 0x832   :  { %3568 = vmatmul.f32.gmra.mxu3 %v1599_v20 }
 0x835   :  { %v3521_v0 = vpop.f32.mrf.mxu3 }
 0x836   :  { %v3522_v31 = vadd.f32 %v3521_v0, %v12765_v50  ;;  %v13006_v20 = vpop.f32.mrf.mxu1  ;;  %v1659_v50 = vld [vmem:[%s16740_s1 + $0x8a8] sm:$0xff] }
 0x838   :  { %v3623_v2 = vadd.f32 %v12774_v32, %v3522_v31  ;;  %4141 = vmatmul.f32.gmra.mxu1 %v1656_v48  ;;  %v17173_v32 = vld [vmem:[#allocation13_spill] sm:$0xff]  ;;  %v17174_v31 = vld [vmem:[#allocation22_spill] sm:$0xff] }
 0x83a   :  { %3571 = vmatmul.f32.gmra.mxu3 %v1602_v19  ;;  %8957 = vmatmul.msk.f32.vlgmr.msrb.gmra.mxu2 %vm2174_vm6, %v3623_v2  ;;  %v1605_v19 = vld [vmem:[%s16740_s1 + $0x6f8] sm:$0xff] }
 0x83b   :  { %4704 = vmatpush.msrb.mxu2 %v10968_v63  ;;  %v17176_v63 = vld [vmem:[#allocation24_spill] sm:$0xff] }
 0x83d   :  { %4705 = vmatpush.msrb.mxu2 %v17172_v46  ;;  %v3524_v44 = vpop.f32.mrf.mxu3  ;;  %v17175_v46 = vld [vmem:[#allocation23_spill] sm:$0xff] }
 0x83e   :  { %v3525_v0 = vadd.f32 %v3524_v44, %v12781_v29  ;;  %v13023_v48 = vpop.f32.mrf.mxu1  ;;  %v1662_v29 = vld [vmem:[%s16740_s1 + $0x8c0] sm:$0xff] }
 0x83f   :  { %4706 = vmatpush.msrb.mxu2 %v17173_v32  ;;  %v13030_v32 = vpop.f32.mrf.mxu2 }
 0x840   :  { %v3626_v2 = vadd.f32 %v12790_v62, %v3525_v0  ;;  %4144 = vmatmul.f32.gmra.mxu1 %v1659_v50  ;;  %v17177_v50 = vld [vmem:[#allocation14_spill] sm:$0xff]  ;;  %v1608_v0 = vld [vmem:[%s16740_s1 + $0x710] sm:$0xff] }
 0x841   :  { %4707 = vmatpush.msrb.mxu2 %v17174_v31  ;;  %v17180_v31 = vld [vmem:[#allocation25_spill] sm:$0xff] }
 0x842   :  { %3574 = vmatmul.f32.gmra.mxu3 %v1605_v19  ;;  %8958 = vmatmul.msk.f32.gmra.mxu2 %vm2174_vm6, %v3626_v2  ;;  %v17178_v2 = vld [vmem:[#allocation15_spill] sm:$0xff] }
 0x843   :  { %4708 = vmatpush.msrb.mxu2 %v17175_v46  ;;  %v17179_v46 = vld [vmem:[#allocation16_spill] sm:$0xff] }
 0x845   :  { %4709 = vmatpush.msrb.mxu2 %v17176_v63  ;;  %v3527_v44 = vpop.f32.mrf.mxu3 }
 0x846   :  { %v3528_v62 = vadd.f32 %v3527_v44, %v12797_v26  ;;  %v13040_v63 = vpop.f32.mrf.mxu1  ;;  %v1665_v44 = vld [vmem:[%s16740_s1 + $0x8d8] sm:$0xff] }
 0x847   :  { %4710 = vmatpush.msrb.mxu2 %v17177_v50 }
 0x848   :  { %v3629_v19 = vadd.f32 %v12806_v23, %v3528_v62  ;;  %4147 = vmatmul.f32.gmra.mxu1 %v1662_v29  ;;  %v17181_v23 = vld [vmem:[#allocation17_spill] sm:$0xff]  ;;  %v1611_v29 = vld [vmem:[%s16740_s1 + $0x728] sm:$0xff]  ;;  %v13052_v62 = vpop.f32.mrf.mxu2 }
 0x849   :  { %4711 = vmatpush.msrb.mxu2 %v17178_v2 }
 0x84a   :  { %3577 = vmatmul.f32.gmra.mxu3 %v1608_v0  ;;  %8959 = vmatmul.msk.f32.gmra.mxu2 %vm2174_vm6, %v3629_v19  ;;  %v17182_v19 = vld [vmem:[#allocation26_spill] sm:$0xff] }
 0x84b   :  { %4712 = vmatpush.msrb.mxu2 %v17179_v46  ;;  %v17183_v46 = vld [vmem:[#allocation27_spill] sm:$0xff] }
 0x84d   :  { %4713 = vmatpush.msrb.mxu2 %v17180_v31  ;;  %v3530_v26 = vpop.f32.mrf.mxu3 }
 0x84e   :  { %v3531_v50 = vadd.f32 %v3530_v26, %v12813_v11  ;;  %v13057_v31 = vpop.f32.mrf.mxu1  ;;  %v17184_v11 = vld [vmem:[#allocation28_spill] sm:$0xff] }
 0x84f   :  { %4714 = vmatpush.msrb.mxu2 %v17181_v23  ;;  %v1668_v23 = vld [vmem:[%s16740_s1 + $0x8f0] sm:$0xff] }
 0x850   :  { %v3632_v0 = vadd.f32 %v12822_v27, %v3531_v50  ;;  %4150 = vmatmul.f32.gmra.mxu1 %v1665_v44  ;;  %v17185_v27 = vld [vmem:[#allocation18_spill] sm:$0xff] }
 0x851   :  { %4715 = vmatpush.msrb.mxu2 %v17182_v19  ;;  %v1614_v50 = vld [vmem:[%s16740_s1 + $0x740] sm:$0xff] }
 0x852   :  { %3580 = vmatmul.f32.gmra.mxu3 %v1611_v29  ;;  %8960 = vmatmul.msk.f32.gmra.mxu2 %vm2174_vm6, %v3632_v0  ;;  %v17186_v29 = vld [vmem:[#allocation19_spill] sm:$0xff]  ;;  %v13071_v0 = vpop.f32.mrf.mxu2 }
 0x853   :  { %4716 = vmatpush.msrb.mxu2 %v17183_v46 }
 0x855   :  { %4717 = vmatpush.msrb.mxu2 %v17184_v11  ;;  %v3533_v26 = vpop.f32.mrf.mxu3 }
 0x856   :  { %v3534_v2 = vadd.f32 %v3533_v26, %v12829_v14  ;;  %v13074_v11 = vpop.f32.mrf.mxu1  ;;  %v1671_v14 = vld [vmem:[%s16740_s1 + $0x908] sm:$0xff] }
 0x857   :  { %4718 = vmatpush.msrb.mxu2 %v17185_v27 }
 0x858   :  { %v3635_v44 = vadd.f32 %v12838_v36, %v3534_v2  ;;  %4153 = vmatmul.f32.gmra.mxu1 %v1668_v23  ;;  %v1617_v36 = vld [vmem:[%s16740_s1 + $0x758] sm:$0xff] }
 0x859   :  { %4719 = vmatpush.msrb.mxu2 %v17186_v29  ;;  %v1674_v29 = vld [vmem:[%s16740_s1 + $0x920] sm:$0xff] }
 0x85a   :  { %3583 = vmatmul.f32.gmra.mxu3 %v1614_v50  ;;  %8961 = vmatmul.msk.f32.gmra.mxu2 %vm2174_vm6, %v3635_v44  ;;  %v13087_v50 = vpop.f32.mrf.mxu2 }
 0x85d   :  { %v3536_v46 = vpop.f32.mrf.mxu3 }
 0x85e   :  { %v3537_v26 = vadd.f32 %v3536_v46, %v12845_v21  ;;  %v13085_v23 = vpop.f32.mrf.mxu1  ;;  %v1620_v21 = vld [vmem:[%s16740_s1 + $0x770] sm:$0xff] }
 0x860   :  { %v3638_v2 = vadd.f32 %v12854_v38, %v3537_v26  ;;  %4156 = vmatmul.f32.gmra.mxu1 %v1671_v14 }
 0x862   :  { %3586 = vmatmul.f32.gmra.mxu3 %v1617_v36  ;;  %8962 = vmatmul.msk.f32.gmra.mxu2 %vm2174_vm6, %v3638_v2  ;;  %v1677_v36 = vld [vmem:[%s16740_s1 + $0x938] sm:$0xff]  ;;  %v13103_v2 = vpop.f32.mrf.mxu2 }
 0x865   :  { %v3539_v44 = vpop.f32.mrf.mxu3 }
 0x866   :  { %v3540_v46 = vadd.f32 %v3539_v44, %v12861_v45  ;;  %v13098_v14 = vpop.f32.mrf.mxu1  ;;  %v1623_v44 = vld [vmem:[%s16740_s1 + $0x788] sm:$0xff] }
 0x868   :  { %v3641_v38 = vadd.f32 %v12870_v49, %v3540_v46  ;;  %4159 = vmatmul.f32.gmra.mxu1 %v1674_v29 }
 0x86a   :  { %3589 = vmatmul.f32.gmra.mxu3 %v1620_v21  ;;  %8963 = vmatmul.msk.f32.gmra.mxu2 %vm2174_vm6, %v3641_v38  ;;  %v1680_v21 = vld [vmem:[%s16740_s1 + $0x950] sm:$0xff] }
 0x86d   :  { %v3542_v26 = vpop.f32.mrf.mxu3 }
 0x86e   :  { %v3543_v45 = vadd.f32 %v3542_v26, %v12877_v8  ;;  %v13111_v29 = vpop.f32.mrf.mxu1  ;;  %v1626_v8 = vld [vmem:[%s16740_s1 + $0x7a0] sm:$0xff]  ;;  %v13120_v26 = vpop.f32.mrf.mxu2 }
 0x870   :  { %v3644_v49 = vadd.f32 %v12886_v9, %v3543_v45  ;;  %4162 = vmatmul.f32.gmra.mxu1 %v1677_v36 }
 0x872   :  { %3592 = vmatmul.f32.gmra.mxu3 %v1623_v44  ;;  %8964 = vmatmul.msk.f32.gmra.mxu2 %vm2174_vm6, %v3644_v49  ;;  %v1683_v44 = vld [vmem:[%s16740_s1 + $0x968] sm:$0xff]  ;;  %v1629_v49 = vld [vmem:[%s16740_s1 + $0x7b8] sm:$0xff] }
 0x875   :  { %v3545_v46 = vpop.f32.mrf.mxu3 }
 0x876   :  { %v3546_v38 = vadd.f32 %v3545_v46, %v12893_v28  ;;  %v13124_v36 = vpop.f32.mrf.mxu1 }
 0x878   :  { %v3647_v9 = vadd.f32 %v12902_v57, %v3546_v38  ;;  %4165 = vmatmul.f32.gmra.mxu1 %v1680_v21  ;;  %v13134_v57 = vpop.f32.mrf.mxu2 }
 0x87a   :  { %3595 = vmatmul.f32.gmra.mxu3 %v1626_v8  ;;  %8965 = vmatmul.msk.f32.gmra.mxu2 %vm2174_vm6, %v3647_v9  ;;  %v1686_v8 = vld [vmem:[%s16740_s1 + $0x980] sm:$0xff]  ;;  %v1632_v9 = vld [vmem:[%s16740_s1 + $0x7d0] sm:$0xff] }
 0x87d   :  { %v3548_v45 = vpop.f32.mrf.mxu3 }
 0x87e   :  { %v3549_v28 = vadd.f32 %v3548_v45, %v12911_v37  ;;  %v13137_v21 = vpop.f32.mrf.mxu1 }
 0x880   :  { %v3650_v46 = vadd.f32 %v12921_v35, %v3549_v28  ;;  %4168 = vmatmul.f32.gmra.mxu1 %v1683_v44  ;;  %v13150_v44 = vpop.f32.mrf.mxu2 }
 0x882   :  { %3598 = vmatmul.f32.gmra.mxu3 %v1629_v49  ;;  %8966 = vmatmul.msk.f32.gmra.mxu2 %vm2174_vm6, %v3650_v46  ;;  %v1689_v49 = vld [vmem:[%s16740_s1 + $0x998] sm:$0xff] }
 0x885   :  { %v3551_v38 = vpop.f32.mrf.mxu3 }
 0x886   :  { %v3552_v37 = vadd.f32 %v3551_v38, %v12930_v39  ;;  %v13148_v45 = vpop.f32.mrf.mxu1 }
 0x888   :  { %v3653_v35 = vadd.f32 %v12940_v47, %v3552_v37  ;;  %4171 = vmatmul.f32.gmra.mxu1 %v1686_v8  ;;  %v1692_v8 = vld [vmem:[%s16740_s1 + $0x9b0] sm:$0xff]  ;;  %v13163_v37 = vpop.f32.mrf.mxu2 }
 0x88a   :  { %3601 = vmatmul.f32.gmra.mxu3 %v1632_v9  ;;  %8967 = vmatmul.msk.f32.gmra.mxu2 %vm2174_vm6, %v3653_v35 }
 0x88d   :  { %v3554_v28 = vpop.f32.mrf.mxu3 }
 0x88e   :  { %v3555_v39 = vadd.f32 %v3554_v28, %v12949_v59  ;;  %v13158_v47 = vpop.f32.mrf.mxu1  ;;  %v1695_v28 = vld [vmem:[%s16740_s1 + $0x9c8] sm:$0xff] }
 0x890   :  { %v3656_v46 = vadd.f32 %v12956_v41, %v3555_v39  ;;  %4174 = vmatmul.f32.gmra.mxu1 %v1689_v49  ;;  %v13174_v39 = vpop.f32.mrf.mxu2 }
 0x892   :  { %8968 = vmatmul.msk.f32.gmra.mxu2 %vm2174_vm6, %v3656_v46 }
 0x895   :  { %v3557_v38 = vpop.f32.mrf.mxu3 }
 0x896   :  { %v3558_v9 = vadd.f32 %v3557_v38, %v12965_v34  ;;  %v13168_v59 = vpop.f32.mrf.mxu1  ;;  %v1634_v34 = vld [vmem:[%s16740_s1 + $0x7e0] sm:$0xff] }
 0x897   :  { %4019 = vmatmul.f32.vlgmr.msra.gmra.mxu3 %v1634_v34 }
 0x898   :  { %v3659_v35 = vadd.f32 %v12971_v12, %v3558_v9  ;;  %4177 = vmatmul.f32.gmra.mxu1 %v1692_v8  ;;  %v1698_v8 = vld [vmem:[%s16740_s1 + $0x9e0] sm:$0xff] }
 0x89a   :  { %8969 = vmatmul.msk.f32.gmra.mxu2 %vm2174_vm6, %v3659_v35  ;;  %v13191_v35 = vpop.f32.mrf.mxu2 }
 0x89d   :  { %v3560_v41 = vpop.f32.mrf.mxu3 }
 0x89e   :  { %v3561_v49 = vadd.f32 %v3560_v41, %v12981_v3  ;;  %v13181_v12 = vpop.f32.mrf.mxu1 }
 0x8a0   :  { %v3662_v46 = vadd.f32 %v12983_v55, %v3561_v49  ;;  %4180 = vmatmul.f32.gmra.mxu1 %v1695_v28  ;;  %v1637_v55 = vld [vmem:[%s16740_s1 + $0x7f8] sm:$0xff] }
 0x8a1   :  { %4022 = vmatmul.f32.gmra.mxu3 %v1637_v55  ;;  %v1701_v49 = vld [vmem:[%s16740_s1 + $0x9f8] sm:$0xff] }
 0x8a2   :  { %8970 = vmatmul.msk.f32.gmra.mxu2 %vm2174_vm6, %v3662_v46  ;;  %v1640_v46 = vld [vmem:[%s16740_s1 + $0x810] sm:$0xff] }
 0x8a5   :  { %v3563_v38 = vpop.f32.mrf.mxu3 }
 0x8a6   :  { %v3564_v3 = vadd.f32 %v3563_v38, %v12993_v17  ;;  %v13194_v41 = vpop.f32.mrf.mxu1  ;;  %v13207_v38 = vpop.f32.mrf.mxu2 }
 0x8a8   :  { %v3665_v9 = vadd.f32 %v12995_v6, %v3564_v3  ;;  %4183 = vmatmul.f32.gmra.mxu1 %v1698_v8  ;;  %v1704_v3 = vld [vmem:[%s16740_s1 + $0xa10] sm:$0xff] }
 0x8a9   :  { %4025 = vmatmul.f32.gmra.mxu3 %v1640_v46 }
 0x8aa   :  { %8971 = vmatmul.msk.f32.gmra.mxu2 %vm2174_vm6, %v3665_v9  ;;  %v1643_v9 = vld [vmem:[%s16740_s1 + $0x828] sm:$0xff] }
 0x8ad   :  { %v3566_v28 = vpop.f32.mrf.mxu3 }
 0x8ae   :  { %v3567_v17 = vadd.f32 %v3566_v28, %v13009_v61  ;;  %v13205_v34 = vpop.f32.mrf.mxu1  ;;  %v17187_v28 = vld [vmem:[#allocation62_spill] sm:$0xff] }
 0x8b0   :  { %v3668_v6 = vadd.f32 %v13006_v20, %v3567_v17  ;;  %4186 = vmatmul.f32.gmra.mxu1 %v1701_v49  ;;  %v3236_v49 = vadd.f32 %v17187_v28, %v12584_v24 }
 0x8b1   :  { %4028 = vmatmul.f32.gmra.mxu3 %v1643_v9 }
 0x8b2   :  { %8972 = vmatmul.msk.f32.gmra.mxu2 %vm2174_vm6, %v3668_v6 }
 0x8b5   :  { %v3569_v8 = vpop.f32.mrf.mxu3 }
 0x8b6   :  { %v3570_v61 = vadd.f32 %v3569_v8, %v13030_v32  ;;  %v13218_v55 = vpop.f32.mrf.mxu1  ;;  %v1707_v32 = vld [vmem:[%s16740_s1 + $0xa28] sm:$0xff] }
 0x8b8   :  { %v3671_v20 = vadd.f32 %v13023_v48, %v3570_v61  ;;  %4189 = vmatmul.f32.gmra.mxu1 %v1704_v3  ;;  %v1646_v3 = vld [vmem:[%s16740_s1 + $0x840] sm:$0xff]  ;;  %v17189_v61 = vld [vmem:[#allocation8_spill] sm:$0xff] }
 0x8b9   :  { %4031 = vmatmul.f32.gmra.mxu3 %v1646_v3 }
 0x8ba   :  { %8973 = vmatmul.msk.f32.gmra.mxu2 %vm2174_vm6, %v3671_v20  ;;  %v3239_v20 = vadd.f32 %v17189_v61, %v12598_v56 }
 0x8bd   :  { %v3572_v17 = vpop.f32.mrf.mxu3  ;;  %v3807_v6 = vpop.f32.mrf.mxu2 }
 0x8be   :  { %v3573_v48 = vadd.f32 %v3572_v17, %v13052_v62  ;;  %v13226_v46 = vadd.f32 %v3807_v6, %v3236_v49  ;;  %v13233_v24 = vpop.f32.mrf.mxu1  ;;  %v1710_v62 = vld [vmem:[%s16740_s1 + $0xa40] sm:$0xff]  ;;  %v1649_v6 = vld [vmem:[%s16740_s1 + $0x858] sm:$0xff] }
 0x8c0   :  { %17188 = vst [vmem:[#allocation62_spill] sm:$0xff] %v13226_v46  ;;  %v3674_v8 = vadd.f32 %v13040_v63, %v3573_v48  ;;  %4192 = vmatmul.f32.gmra.mxu1 %v1707_v32  ;;  %v17191_v32 = vld [vmem:[#allocation66_spill] sm:$0xff] }
 0x8c1   :  { %4034 = vmatmul.f32.gmra.mxu3 %v1649_v6  ;;  %v3242_v48 = vadd.f32 %v17191_v32, %v12612_v7 }
 0x8c2   :  { %8974 = vmatmul.msk.f32.gmra.mxu2 %vm2174_vm6, %v3674_v8 }
 0x8c5   :  { %v3575_v9 = vpop.f32.mrf.mxu3  ;;  %v3810_v28 = vpop.f32.mrf.mxu2 }
 0x8c6   :  { %v3576_v63 = vadd.f32 %v3575_v9, %v13071_v0  ;;  %v13241_v49 = vadd.f32 %v3810_v28, %v3239_v20  ;;  %v13248_v56 = vpop.f32.mrf.mxu1  ;;  %v1713_v0 = vld [vmem:[%s16740_s1 + $0xa58] sm:$0xff]  ;;  %v1652_v9 = vld [vmem:[%s16740_s1 + $0x870] sm:$0xff] }
 0x8c7   :  { %v17193_v28 = vld [vmem:[#allocation64_spill] sm:$0xff] }
 0x8c8   :  { %17190 = vst [vmem:[#allocation8_spill] sm:$0xff] %v13241_v49  ;;  %v3677_v17 = vadd.f32 %v13057_v31, %v3576_v63  ;;  %4195 = vmatmul.f32.gmra.mxu1 %v1710_v62  ;;  %v3245_v62 = vadd.f32 %v17193_v28, %v12626_v25  ;;  %v1658_v28 = vld [vmem:[%s16740_s1 + $0x8a0] sm:$0xff] }
 0x8c9   :  { %4037 = vmatmul.f32.gmra.mxu3 %v1652_v9 }
 0x8ca   :  { %8975 = vmatmul.msk.f32.gmra.mxu2 %vm2174_vm6, %v3677_v17 }
 0x8cd   :  { %v3578_v8 = vpop.f32.mrf.mxu3  ;;  %v3813_v3 = vpop.f32.mrf.mxu2 }
 0x8ce   :  { %v3579_v31 = vadd.f32 %v3578_v8, %v13087_v50  ;;  %v13256_v61 = vadd.f32 %v3813_v3, %v3242_v48  ;;  %v13263_v7 = vpop.f32.mrf.mxu1  ;;  %v1716_v50 = vld [vmem:[%s16740_s1 + $0xa70] sm:$0xff]  ;;  %v1655_v48 = vld [vmem:[%s16740_s1 + $0x888] sm:$0xff] }
 0x8cf   :  { %v17195_v8 = vld [vmem:[#allocation63_spill] sm:$0xff] }
 0x8d0   :  { %17192 = vst [vmem:[#allocation66_spill] sm:$0xff] %v13256_v61  ;;  %v3680_v20 = vadd.f32 %v13074_v11, %v3579_v31  ;;  %4198 = vmatmul.f32.gmra.mxu1 %v1713_v0  ;;  %v3248_v3 = vadd.f32 %v17195_v8, %v12640_v51 }
 0x8d1   :  { %4040 = vmatmul.f32.gmra.mxu3 %v1655_v48 }
 0x8d2   :  { %8976 = vmatmul.msk.f32.gmra.mxu2 %vm2174_vm6, %v3680_v20 }
 0x8d5   :  { %v3581_v63 = vpop.f32.mrf.mxu3  ;;  %v3816_v17 = vpop.f32.mrf.mxu2 }
 0x8d6   :  { %v3582_v11 = vadd.f32 %v3581_v63, %v13103_v2  ;;  %v13271_v6 = vadd.f32 %v3816_v17, %v3245_v62  ;;  %v13278_v25 = vpop.f32.mrf.mxu1  ;;  %v1718_v2 = vld [vmem:[%s16740_s1 + $0xa80] sm:$0xff] }
 0x8d8   :  { %17194 = vst [vmem:[#allocation64_spill] sm:$0xff] %v13271_v6  ;;  %v3683_v32 = vadd.f32 %v13085_v23, %v3582_v11  ;;  %4201 = vmatmul.f32.gmra.mxu1 %v1716_v50 }
 0x8d9   :  { %4043 = vmatmul.f32.gmra.mxu3 %v1658_v28 }
 0x8da   :  { %8977 = vmatmul.msk.f32.gmra.mxu2 %vm2174_vm6, %v3683_v32 }
 0x8dd   :  { %v3584_v0 = vpop.f32.mrf.mxu3  ;;  %v3819_v31 = vpop.f32.mrf.mxu2 }
 0x8de   :  { %v3585_v23 = vadd.f32 %v3584_v0, %v13120_v26  ;;  %v13286_v20 = vadd.f32 %v3819_v31, %v3248_v3  ;;  %v13294_v51 = vpop.f32.mrf.mxu1  ;;  %v17197_v26 = vld [vmem:[#allocation42_spill] sm:$0xff] }
 0x8df   :  { %v3251_v62 = vadd.f32 %v17197_v26, %v12652_v4  ;;  %v1661_v4 = vld [vmem:[%s16740_s1 + $0x8b8] sm:$0xff] }
 0x8e0   :  { %17196 = vst [vmem:[#allocation63_spill] sm:$0xff] %v13286_v20  ;;  %v3686_v9 = vadd.f32 %v13098_v14, %v3585_v23  ;;  %4619 = vmatmul.f32.vlgmr.msrb.gmra.mxu1 %v1718_v2  ;;  %v1721_v14 = vld [vmem:[%s16740_s1 + $0xa98] sm:$0xff] }
 0x8e1   :  { %5803 = vmatpush.msrb.mxu1 %v17044_v30  ;;  %4046 = vmatmul.f32.gmra.mxu3 %v1661_v4 }
 0x8e2   :  { %8978 = vmatmul.msk.f32.gmra.mxu2 %vm2174_vm6, %v3686_v9 }
 0x8e3   :  { %5804 = vmatpush.msrb.mxu1 %v17045_v52 }
 0x8e5   :  { %v3587_v63 = vpop.f32.mrf.mxu3  ;;  %v3822_v17 = vpop.f32.mrf.mxu2  ;;  %5805 = vmatpush.msrb.mxu1 %v17046_v33 }
 0x8e6   :  { %v3588_v50 = vadd.f32 %v3587_v63, %v13134_v57  ;;  %v13304_v11 = vadd.f32 %v3822_v17, %v3251_v62  ;;  %v13313_v48 = vpop.f32.mrf.mxu1  ;;  %v17199_v57 = vld [vmem:[#allocation35_spill] sm:$0xff] }
 0x8e7   :  { %5806 = vmatpush.msrb.mxu1 %v17107_v53  ;;  %v3254_v8 = vadd.f32 %v17199_v57, %v12666_v5  ;;  %v1664_v5 = vld [vmem:[%s16740_s1 + $0x8d0] sm:$0xff] }
 0x8e8   :  { %17198 = vst [vmem:[#allocation42_spill] sm:$0xff] %v13304_v11  ;;  %v3689_v32 = vadd.f32 %v13111_v29, %v3588_v50  ;;  %4622 = vmatmul.f32.gmra.mxu1 %v1721_v14  ;;  %v1724_v29 = vld [vmem:[%s16740_s1 + $0xab0] sm:$0xff]  ;;  %v1667_v14 = vld [vmem:[%s16740_s1 + $0x8e8] sm:$0xff] }
 0x8e9   :  { %5807 = vmatpush.msrb.mxu1 %v17108_v40  ;;  %4049 = vmatmul.f32.gmra.mxu3 %v1664_v5  ;;  %v17203_v57 = vld [vmem:[#allocation76_spill] sm:$0xff] }
 0x8ea   :  { %8979 = vmatmul.msk.f32.gmra.mxu2 %vm2174_vm6, %v3689_v32  ;;  %v17243_v11 = vld [vmem:[#allocation28_spill] sm:$0xff] }
 0x8eb   :  { %5808 = vmatpush.msrb.mxu1 %v17110_v22 }
 0x8ed   :  { %v3590_v3 = vpop.f32.mrf.mxu3  ;;  %v3825_v0 = vpop.f32.mrf.mxu2  ;;  %5809 = vmatpush.msrb.mxu1 %v17112_v1 }
 0x8ee   :  { %v3591_v31 = vadd.f32 %v3590_v3, %v13150_v44  ;;  %v13323_v2 = vadd.f32 %v3825_v0, %v3254_v8  ;;  %v13332_v9 = vpop.f32.mrf.mxu1  ;;  %v17201_v44 = vld [vmem:[#allocation71_spill] sm:$0xff]  ;;  %v17205_v0 = vld [vmem:[#allocation77_spill] sm:$0xff] }
 0x8ef   :  { %5810 = vmatpush.msrb.mxu1 %v17113_v60  ;;  %v3257_v28 = vadd.f32 %v17201_v44, %v12680_v42 }
 0x8f0   :  { %17200 = vst [vmem:[#allocation35_spill] sm:$0xff] %v13323_v2  ;;  %v3692_v23 = vadd.f32 %v13124_v36, %v3591_v31  ;;  %4625 = vmatmul.f32.gmra.mxu1 %v1724_v29  ;;  %v1727_v36 = vld [vmem:[%s16740_s1 + $0xac8] sm:$0xff]  ;;  %v1670_v29 = vld [vmem:[%s16740_s1 + $0x900] sm:$0xff]  ;;  %v17206_v31 = vld [vmem:[#allocation52_spill] sm:$0xff] }
 0x8f1   :  { %5811 = vmatpush.msrb.mxu1 %v17114_v43  ;;  %4052 = vmatmul.f32.gmra.mxu3 %v1667_v14  ;;  %v17209_v14 = vld [vmem:[#allocation78_spill] sm:$0xff] }
 0x8f2   :  { %8980 = vmatmul.msk.f32.gmra.mxu2 %vm2174_vm6, %v3692_v23  ;;  %v17207_v23 = vld [vmem:[#allocation68_spill] sm:$0xff] }
 0x8f3   :  { %5812 = vmatpush.msrb.mxu1 %v17116_v15  ;;  %v3263_v5 = vadd.f32 %v17207_v23, %v17206_v31  ;;  %v17213_v31 = vld [vmem:[#allocation80_spill] sm:$0xff]  ;;  %v17214_v23 = vld [vmem:[#allocation70_spill] sm:$0xff] }
 0x8f5   :  { %v3593_v26 = vpop.f32.mrf.mxu3  ;;  %v3828_v62 = vpop.f32.mrf.mxu2  ;;  %5813 = vmatpush.msrb.mxu1 %v17118_v16 }
 0x8f6   :  { %v3594_v63 = vadd.f32 %v3593_v26, %v13163_v37  ;;  %v13342_v17 = vadd.f32 %v3828_v62, %v3257_v28  ;;  %v13351_v50 = vpop.f32.mrf.mxu1  ;;  %v3260_v37 = vadd.f32 %v12452_v54, %v12694_v18  ;;  %v1733_v28 = vld [vmem:[%s16740_s1 + $0xaf8] sm:$0xff] }
 0x8f7   :  { %5814 = vmatpush.msrb.mxu1 %v17119_v10 }
 0x8f8   :  { %17202 = vst [vmem:[#allocation71_spill] sm:$0xff] %v13342_v17  ;;  %v3695_v42 = vadd.f32 %v13137_v21, %v3594_v63  ;;  %4628 = vmatmul.f32.gmra.mxu1 %v1727_v36  ;;  %v1730_v21 = vld [vmem:[%s16740_s1 + $0xae0] sm:$0xff] }
 0x8f9   :  { %5815 = vmatpush.msrb.mxu1 %v17120_v58  ;;  %4055 = vmatmul.f32.gmra.mxu3 %v1670_v29 }
 0x8fa   :  { %8981 = vmatmul.msk.f32.gmra.mxu2 %vm2174_vm6, %v3695_v42  ;;  %v17210_v42 = vld [vmem:[#allocation69_spill] sm:$0xff] }
 0x8fb   :  { %5816 = vmatpush.msrb.mxu1 %v17122_v13 }
 0x8fd   :  { %v3596_v32 = vpop.f32.mrf.mxu3  ;;  %v3831_v4 = vpop.f32.mrf.mxu2  ;;  %5817 = vmatpush.msrb.mxu1 %v17203_v57 }
 0x8fe   :  { %v3597_v8 = vadd.f32 %v3596_v32, %v13174_v39  ;;  %v13361_v3 = vadd.f32 %v3831_v4, %v3260_v37  ;;  %v13369_v18 = vpop.f32.mrf.mxu1  ;;  %v3266_v37 = vadd.f32 %v17210_v42, %v17209_v14  ;;  %v17219_v14 = vld [vmem:[#allocation37_spill] sm:$0xff] }
 0x8ff   :  { %5818 = vmatpush.msrb.mxu1 %v17205_v0 }
 0x900   :  { %17204 = vst [vmem:[#allocation76_spill] sm:$0xff] %v13361_v3  ;;  %v3698_v54 = vadd.f32 %v13148_v45, %v3597_v8  ;;  %4631 = vmatmul.f32.gmra.mxu1 %v1730_v21  ;;  %v1673_v45 = vld [vmem:[%s16740_s1 + $0x918] sm:$0xff] }
 0x901   :  { %4058 = vmatmul.f32.gmra.mxu3 %v1673_v45  ;;  %v17217_v45 = vld [vmem:[#allocation11_spill] sm:$0xff] }
 0x902   :  { %8982 = vmatmul.msk.f32.gmra.mxu2 %vm2174_vm6, %v3698_v54 }
 0x905   :  { %v3599_v39 = vpop.f32.mrf.mxu3  ;;  %v3834_v44 = vpop.f32.mrf.mxu2 }
 0x906   :  { %v3600_v26 = vadd.f32 %v3599_v39, %v13191_v35  ;;  %v13377_v62 = vadd.f32 %v3834_v44, %v3263_v5  ;;  %v13384_v63 = vpop.f32.mrf.mxu1  ;;  %v1736_v35 = vld [vmem:[%s16740_s1 + $0xb10] sm:$0xff]  ;;  %v3269_v5 = vadd.f32 %v17214_v23, %v17213_v31  ;;  %v17223_v31 = vld [vmem:[#allocation22_spill] sm:$0xff] }
 0x908   :  { %17208 = vst [vmem:[#allocation77_spill] sm:$0xff] %v13377_v62  ;;  %v3701_v36 = vadd.f32 %v13158_v47, %v3600_v26  ;;  %4634 = vmatmul.f32.gmra.mxu1 %v1733_v28  ;;  %v1676_v47 = vld [vmem:[%s16740_s1 + $0x930] sm:$0xff]  ;;  %v1679_v28 = vld [vmem:[%s16740_s1 + $0x948] sm:$0xff] }
 0x909   :  { %4061 = vmatmul.f32.gmra.mxu3 %v1676_v47  ;;  %v17222_v47 = vld [vmem:[#allocation13_spill] sm:$0xff] }
 0x90a   :  { %8983 = vmatmul.msk.f32.gmra.mxu2 %vm2174_vm6, %v3701_v36  ;;  %v17218_v36 = vld [vmem:[#allocation82_spill] sm:$0xff] }
 0x90b   :  { %v3272_v42 = vadd.f32 %v17219_v14, %v17218_v36  ;;  %v17228_v36 = vld [vmem:[#allocation24_spill] sm:$0xff] }
 0x90d   :  { %v3602_v32 = vpop.f32.mrf.mxu3  ;;  %v3837_v4 = vpop.f32.mrf.mxu2 }
 0x90e   :  { %v3603_v21 = vadd.f32 %v3602_v32, %v13207_v38  ;;  %v13392_v8 = vadd.f32 %v3837_v4, %v3266_v37  ;;  %v13399_v54 = vpop.f32.mrf.mxu1  ;;  %v1739_v38 = vld [vmem:[%s16740_s1 + $0xb28] sm:$0xff]  ;;  %v17220_v37 = vld [vmem:[#allocation12_spill] sm:$0xff]  ;;  %v1742_v4 = vld [vmem:[%s16740_s1 + $0xb40] sm:$0xff] }
 0x90f   :  { %17212 = vst [vmem:[#allocation68_spill] sm:$0xff] %v13399_v54 }
 0x910   :  { %17211 = vst [vmem:[#allocation52_spill] sm:$0xff] %v13392_v8  ;;  %v3704_v29 = vadd.f32 %v13168_v59, %v3603_v21  ;;  %4637 = vmatmul.f32.gmra.mxu1 %v1736_v35  ;;  %v1636_v59 = vld [vmem:[%s16740_s1 + $0x7f0] sm:$0xff]  ;;  %v1682_v21 = vld [vmem:[%s16740_s1 + $0x960] sm:$0xff]  ;;  %v17236_v8 = vld [vmem:[#allocation25_spill] sm:$0xff] }
 0x911   :  { %4064 = vmatmul.f32.gmra.mxu3 %v1679_v28 }
 0x912   :  { %8984 = vmatmul.msk.f32.gmra.mxu2 %vm2174_vm6, %v3704_v29  ;;  %v1639_v29 = vld [vmem:[%s16740_s1 + $0x808] sm:$0xff] }
 0x915   :  { %v3840_v39 = vpop.f32.mrf.mxu2 }
 0x916   :  { %v13406_v44 = vadd.f32 %v3840_v39, %v3269_v5  ;;  %v13415_v26 = vpop.f32.mrf.mxu1  ;;  %v17225_v5 = vld [vmem:[#allocation23_spill] sm:$0xff]  ;;  %v17226_v39 = vld [vmem:[#allocation84_spill] sm:$0xff] }
 0x917   :  { %17216 = vst [vmem:[#allocation69_spill] sm:$0xff] %v13415_v26 }
 0x918   :  { %17215 = vst [vmem:[#allocation78_spill] sm:$0xff] %v13406_v44  ;;  %4640 = vmatmul.f32.gmra.mxu1 %v1739_v38  ;;  %v17227_v38 = vld [vmem:[#allocation67_spill] sm:$0xff] }
 0x919   :  { %4067 = vmatmul.f32.gmra.mxu3 %v1682_v21  ;;  %v17230_v21 = vld [vmem:[#allocation14_spill] sm:$0xff] }
 0x91a   :  { %8985 = vmatmul.msk.f32.vlgmr.msra.gmra.mxu2 %vm2174_vm6, %v1636_v59  ;;  %v3275_v59 = vadd.f32 %v17227_v38, %v17226_v39  ;;  %v13440_v28 = vpop.f32.mrf.mxu3  ;;  %v17231_v39 = vld [vmem:[#allocation15_spill] sm:$0xff] }
 0x91b   :  { %5304 = vmatpush.msra.mxu2 %v17217_v45 }
 0x91d   :  { %5305 = vmatpush.msra.mxu2 %v17220_v37  ;;  %v3843_v32 = vpop.f32.mrf.mxu2 }
 0x91e   :  { %v13424_v35 = vadd.f32 %v3843_v32, %v3272_v42  ;;  %v13435_v23 = vpop.f32.mrf.mxu1  ;;  %v1745_v42 = vld [vmem:[%s16740_s1 + $0xb58] sm:$0xff] }
 0x91f   :  { %5306 = vmatpush.msra.mxu2 %v17222_v47  ;;  %17224 = vst [vmem:[#allocation70_spill] sm:$0xff] %v13435_v23 }
 0x920   :  { %17221 = vst [vmem:[#allocation80_spill] sm:$0xff] %v13424_v35  ;;  %4643 = vmatmul.f32.gmra.mxu1 %v1742_v4  ;;  %v1685_v4 = vld [vmem:[%s16740_s1 + $0x978] sm:$0xff] }
 0x921   :  { %5307 = vmatpush.msra.mxu2 %v17223_v31  ;;  %4070 = vmatmul.f32.gmra.mxu3 %v1685_v4  ;;  %v1688_v4 = vld [vmem:[%s16740_s1 + $0x990] sm:$0xff] }
 0x922   :  { %8986 = vmatmul.msk.f32.gmra.mxu2 %vm2174_vm6, %v1639_v29  ;;  %v1642_v29 = vld [vmem:[%s16740_s1 + $0x820] sm:$0xff] }
 0x923   :  { %5308 = vmatpush.msra.mxu2 %v17225_v5 }
 0x924   :  { %v13462_v44 = vpop.f32.mrf.mxu3 }
 0x925   :  { %5309 = vmatpush.msra.mxu2 %v17228_v36  ;;  %v3846_v14 = vpop.f32.mrf.mxu2 }
 0x926   :  { %v13446_v32 = vadd.f32 %v3846_v14, %v3275_v59  ;;  %v13457_v38 = vpop.f32.mrf.mxu1  ;;  %v17233_v59 = vld [vmem:[#allocation16_spill] sm:$0xff]  ;;  %v17234_v14 = vld [vmem:[#allocation85_spill] sm:$0xff] }
 0x927   :  { %5310 = vmatpush.msra.mxu2 %v17230_v21  ;;  %17232 = vst [vmem:[#allocation82_spill] sm:$0xff] %v13457_v38 }
 0x928   :  { %17229 = vst [vmem:[#allocation11_spill] sm:$0xff] %v13446_v32  ;;  %4646 = vmatmul.f32.gmra.mxu1 %v1745_v42  ;;  %v17235_v32 = vld [vmem:[#allocation72_spill] sm:$0xff] }
 0x929   :  { %5311 = vmatpush.msra.mxu2 %v17231_v39  ;;  %v3278_v35 = vadd.f32 %v17235_v32, %v17234_v14  ;;  %v1748_v42 = vld [vmem:[%s16740_s1 + $0xb70] sm:$0xff]  ;;  %v1645_v32 = vld [vmem:[%s16740_s1 + $0x838] sm:$0xff]  ;;  %4073 = vmatmul.f32.gmra.mxu3 %v1688_v4  ;;  %v1691_v4 = vld [vmem:[%s16740_s1 + $0x9a8] sm:$0xff] }
 0x92a   :  { %8987 = vmatmul.msk.f32.gmra.mxu2 %vm2174_vm6, %v1642_v29  ;;  %v17238_v29 = vld [vmem:[#allocation17_spill] sm:$0xff] }
 0x92b   :  { %5312 = vmatpush.msra.mxu2 %v17233_v59 }
 0x92c   :  { %v13484_v2 = vpop.f32.mrf.mxu3 }
 0x92d   :  { %5313 = vmatpush.msra.mxu2 %v17236_v8  ;;  %v3849_v62 = vpop.f32.mrf.mxu2 }
 0x92e   :  { %v13468_v3 = vadd.f32 %v3849_v62, %v3278_v35  ;;  %v13479_v14 = vpop.f32.mrf.mxu1  ;;  %v17240_v62 = vld [vmem:[#allocation27_spill] sm:$0xff]  ;;  %v17241_v35 = vld [vmem:[#allocation86_spill] sm:$0xff] }
 0x92f   :  { %5314 = vmatpush.msra.mxu2 %v17238_v29  ;;  %17239 = vst [vmem:[#allocation12_spill] sm:$0xff] %v13479_v14  ;;  %v1754_v14 = vld [vmem:[%s16740_s1 + $0xba0] sm:$0xff]  ;;  %v1781_v29 = vld [vmem:[%s16740_s1 + $0xc78] sm:$0xff] }
 0x930   :  { %17237 = vst [vmem:[#allocation37_spill] sm:$0xff] %v13468_v3  ;;  %4649 = vmatmul.f32.gmra.mxu1 %v1748_v42  ;;  %v17242_v3 = vld [vmem:[#allocation73_spill] sm:$0xff]  ;;  %v1751_v42 = vld [vmem:[%s16740_s1 + $0xb88] sm:$0xff] }
 0x931   :  { %5315 = vmatpush.msra.mxu2 %v17182_v19  ;;  %v3281_v17 = vadd.f32 %v17242_v3, %v17241_v35  ;;  %v1648_v3 = vld [vmem:[%s16740_s1 + $0x850] sm:$0xff]  ;;  %4076 = vmatmul.f32.gmra.mxu3 %v1691_v4  ;;  %v1651_v4 = vld [vmem:[%s16740_s1 + $0x868] sm:$0xff] }
 0x932   :  { %8988 = vmatmul.msk.f32.gmra.mxu2 %vm2174_vm6, %v1645_v32  ;;  %v17245_v32 = vld [vmem:[#allocation19_spill] sm:$0xff] }
 0x933   :  { %5316 = vmatpush.msra.mxu2 %v17240_v62 }
 0x934   :  { %v13505_v61 = vpop.f32.mrf.mxu3 }
 0x935   :  { %5317 = vmatpush.msra.mxu2 %v17243_v11  ;;  %v3852_v20 = vpop.f32.mrf.mxu2 }
 0x936   :  { %v13490_v6 = vadd.f32 %v3852_v20, %v3281_v17  ;;  %v13501_v35 = vpop.f32.mrf.mxu1  ;;  %v17247_v20 = vld [vmem:[#allocation87_spill] sm:$0xff]  ;;  %v17248_v17 = vld [vmem:[#allocation74_spill] sm:$0xff] }
 0x937   :  { %5318 = vmatpush.msra.mxu2 %v17185_v27  ;;  %17246 = vst [vmem:[#allocation22_spill] sm:$0xff] %v13501_v35 }
 0x938   :  { %17244 = vst [vmem:[#allocation13_spill] sm:$0xff] %v13490_v6  ;;  %4652 = vmatmul.f32.gmra.mxu1 %v1751_v42  ;;  %v3284_v6 = vadd.f32 %v17248_v17, %v17247_v20  ;;  %v1694_v42 = vld [vmem:[%s16740_s1 + $0x9c0] sm:$0xff]  ;;  %v17251_v20 = vld [vmem:[#allocation88_spill] sm:$0xff]  ;;  %v17252_v17 = vld [vmem:[#allocation39_spill] sm:$0xff] }
 0x939   :  { %5319 = vmatpush.msra.mxu2 %v17245_v32  ;;  %4079 = vmatmul.f32.gmra.mxu3 %v1694_v42  ;;  %v3287_v35 = vadd.f32 %v17252_v17, %v17251_v20  ;;  %v1654_v42 = vld [vmem:[%s16740_s1 + $0x880] sm:$0xff]  ;;  %v17255_v20 = vld [vmem:[#allocation89_spill] sm:$0xff]  ;;  %v17256_v17 = vld [vmem:[#allocation75_spill] sm:$0xff] }
 0x93a   :  { %8989 = vmatmul.msk.f32.gmra.mxu2 %vm2174_vm6, %v1648_v3 }
 0x93c   :  { %v13523_v38 = vpop.f32.mrf.mxu3 }
 0x93d   :  { %v3855_v49 = vpop.f32.mrf.mxu2 }
 0x93e   :  { %v13510_v46 = vadd.f32 %v3855_v49, %v3284_v6  ;;  %v13519_v3 = vpop.f32.mrf.mxu1  ;;  %v1757_v6 = vld [vmem:[%s16740_s1 + $0xbb8] sm:$0xff] }
 0x93f   :  { %17250 = vst [vmem:[#allocation84_spill] sm:$0xff] %v13519_v3  ;;  %v3290_v3 = vadd.f32 %v17256_v17, %v17255_v20  ;;  %v17259_v20 = vld [vmem:[#allocation90_spill] sm:$0xff] }
 0x940   :  { %17249 = vst [vmem:[#allocation23_spill] sm:$0xff] %v13510_v46  ;;  %4655 = vmatmul.f32.gmra.mxu1 %v1754_v14  ;;  %v1697_v14 = vld [vmem:[%s16740_s1 + $0x9d8] sm:$0xff]  ;;  %v17260_v17 = vld [vmem:[#allocation38_spill] sm:$0xff] }
 0x941   :  { %4082 = vmatmul.f32.gmra.mxu3 %v1697_v14  ;;  %v1657_v14 = vld [vmem:[%s16740_s1 + $0x898] sm:$0xff] }
 0x942   :  { %8990 = vmatmul.msk.f32.gmra.mxu2 %vm2174_vm6, %v1651_v4 }
 0x944   :  { %v13541_v23 = vpop.f32.mrf.mxu3 }
 0x945   :  { %v3858_v49 = vpop.f32.mrf.mxu2 }
 0x946   :  { %v13528_v46 = vadd.f32 %v3858_v49, %v3287_v35  ;;  %v13537_v4 = vpop.f32.mrf.mxu1  ;;  %v1760_v49 = vld [vmem:[%s16740_s1 + $0xbd0] sm:$0xff] }
 0x947   :  { %17254 = vst [vmem:[#allocation24_spill] sm:$0xff] %v13537_v4  ;;  %v3293_v4 = vadd.f32 %v17260_v17, %v17259_v20  ;;  %v17263_v20 = vld [vmem:[#allocation91_spill] sm:$0xff]  ;;  %v17264_v17 = vld [vmem:[#allocation40_spill] sm:$0xff] }
 0x948   :  { %17253 = vst [vmem:[#allocation67_spill] sm:$0xff] %v13528_v46  ;;  %4658 = vmatmul.f32.gmra.mxu1 %v1757_v6  ;;  %v1700_v6 = vld [vmem:[%s16740_s1 + $0x9f0] sm:$0xff] }
 0x949   :  { %4085 = vmatmul.f32.gmra.mxu3 %v1700_v6  ;;  %v1660_v6 = vld [vmem:[%s16740_s1 + $0x8b0] sm:$0xff] }
 0x94a   :  { %8991 = vmatmul.msk.f32.gmra.mxu2 %vm2174_vm6, %v1654_v42 }
 0x94c   :  { %v13559_v32 = vpop.f32.mrf.mxu3 }
 0x94d   :  { %v3861_v35 = vpop.f32.mrf.mxu2 }
 0x94e   :  { %v13546_v46 = vadd.f32 %v3861_v35, %v3290_v3  ;;  %v13555_v42 = vpop.f32.mrf.mxu1  ;;  %v1763_v35 = vld [vmem:[%s16740_s1 + $0xbe8] sm:$0xff] }
 0x94f   :  { %17258 = vst [vmem:[#allocation15_spill] sm:$0xff] %v13555_v42  ;;  %v3296_v42 = vadd.f32 %v17264_v17, %v17263_v20  ;;  %v17267_v20 = vld [vmem:[#allocation92_spill] sm:$0xff] }
 0x950   :  { %17257 = vst [vmem:[#allocation14_spill] sm:$0xff] %v13546_v46  ;;  %4661 = vmatmul.f32.gmra.mxu1 %v1760_v49  ;;  %v1703_v49 = vld [vmem:[%s16740_s1 + $0xa08] sm:$0xff]  ;;  %v17268_v17 = vld [vmem:[#allocation44_spill] sm:$0xff] }
 0x951   :  { %4088 = vmatmul.f32.gmra.mxu3 %v1703_v49  ;;  %v1663_v49 = vld [vmem:[%s16740_s1 + $0x8c8] sm:$0xff] }
 0x952   :  { %8992 = vmatmul.msk.f32.gmra.mxu2 %vm2174_vm6, %v1657_v14 }
 0x954   :  { %v13577_v27 = vpop.f32.mrf.mxu3 }
 0x955   :  { %v3864_v3 = vpop.f32.mrf.mxu2 }
 0x956   :  { %v13564_v46 = vadd.f32 %v3864_v3, %v3293_v4  ;;  %v13573_v14 = vpop.f32.mrf.mxu1  ;;  %v1766_v3 = vld [vmem:[%s16740_s1 + $0xc00] sm:$0xff] }
 0x957   :  { %17262 = vst [vmem:[#allocation72_spill] sm:$0xff] %v13573_v14  ;;  %v3299_v14 = vadd.f32 %v17268_v17, %v17267_v20  ;;  %v17271_v20 = vld [vmem:[#allocation93_spill] sm:$0xff] }
 0x958   :  { %17261 = vst [vmem:[#allocation85_spill] sm:$0xff] %v13564_v46  ;;  %4664 = vmatmul.f32.gmra.mxu1 %v1763_v35  ;;  %v1706_v35 = vld [vmem:[%s16740_s1 + $0xa20] sm:$0xff]  ;;  %v17272_v17 = vld [vmem:[#allocation45_spill] sm:$0xff] }
 0x959   :  { %4091 = vmatmul.f32.gmra.mxu3 %v1706_v35  ;;  %v1666_v35 = vld [vmem:[%s16740_s1 + $0x8e0] sm:$0xff] }
 0x95a   :  { %8993 = vmatmul.msk.f32.gmra.mxu2 %vm2174_vm6, %v1660_v6 }
 0x95c   :  { %v13595_v11 = vpop.f32.mrf.mxu3 }
 0x95d   :  { %v3867_v4 = vpop.f32.mrf.mxu2 }
 0x95e   :  { %v13582_v46 = vadd.f32 %v3867_v4, %v3296_v42  ;;  %v13591_v6 = vpop.f32.mrf.mxu1  ;;  %v1769_v4 = vld [vmem:[%s16740_s1 + $0xc18] sm:$0xff] }
 0x95f   :  { %17266 = vst [vmem:[#allocation73_spill] sm:$0xff] %v13591_v6  ;;  %v3302_v6 = vadd.f32 %v17272_v17, %v17271_v20  ;;  %v17275_v20 = vld [vmem:[#allocation94_spill] sm:$0xff]  ;;  %v17276_v17 = vld [vmem:[#allocation53_spill] sm:$0xff] }
 0x960   :  { %17265 = vst [vmem:[#allocation86_spill] sm:$0xff] %v13582_v46  ;;  %4667 = vmatmul.f32.gmra.mxu1 %v1766_v3  ;;  %v1709_v3 = vld [vmem:[%s16740_s1 + $0xa38] sm:$0xff] }
 0x961   :  { %4094 = vmatmul.f32.gmra.mxu3 %v1709_v3  ;;  %v1669_v3 = vld [vmem:[%s16740_s1 + $0x8f8] sm:$0xff] }
 0x962   :  { %8994 = vmatmul.msk.f32.gmra.mxu2 %vm2174_vm6, %v1663_v49 }
 0x964   :  { %v13613_v26 = vpop.f32.mrf.mxu3 }
 0x965   :  { %v3870_v42 = vpop.f32.mrf.mxu2 }
 0x966   :  { %v13600_v46 = vadd.f32 %v3870_v42, %v3299_v14  ;;  %v13609_v49 = vpop.f32.mrf.mxu1  ;;  %v1772_v42 = vld [vmem:[%s16740_s1 + $0xc30] sm:$0xff] }
 0x967   :  { %17270 = vst [vmem:[#allocation74_spill] sm:$0xff] %v13609_v49  ;;  %v3305_v49 = vadd.f32 %v17276_v17, %v17275_v20  ;;  %v17279_v17 = vld [vmem:[#allocation95_spill] sm:$0xff] }
 0x968   :  { %17269 = vst [vmem:[#allocation87_spill] sm:$0xff] %v13600_v46  ;;  %4670 = vmatmul.f32.gmra.mxu1 %v1769_v4  ;;  %v1712_v4 = vld [vmem:[%s16740_s1 + $0xa50] sm:$0xff] }
 0x969   :  { %4097 = vmatmul.f32.gmra.mxu3 %v1712_v4  ;;  %v2153_v4 = vld [vmem:[%s16741_s7 + $0x78] sm:$0xff] }
 0x96a   :  { %8995 = vmatmul.msk.f32.gmra.mxu2 %vm2174_vm6, %v1666_v35  ;;  %4402 = vmatpush.msrb.mxu3 %v2153_v4  ;;  %v2151_v4 = vld [vmem:[%s16741_s7 + $0x68] sm:$0xff] }
 0x96c   :  { %v13631_v62 = vpop.f32.mrf.mxu3 }
 0x96d   :  { %v3873_v14 = vpop.f32.mrf.mxu2 }
 0x96e   :  { %v13618_v46 = vadd.f32 %v3873_v14, %v3302_v6  ;;  %v13627_v35 = vpop.f32.mrf.mxu1  ;;  %v1775_v14 = vld [vmem:[%s16740_s1 + $0xc48] sm:$0xff] }
 0x96f   :  { %17274 = vst [vmem:[#allocation39_spill] sm:$0xff] %v13627_v35 }
 0x970   :  { %17273 = vst [vmem:[#allocation88_spill] sm:$0xff] %v13618_v46  ;;  %4673 = vmatmul.f32.gmra.mxu1 %v1772_v42  ;;  %v1715_v42 = vld [vmem:[%s16740_s1 + $0xa68] sm:$0xff] }
 0x971   :  { %4100 = vmatmul.f32.gmra.mxu3 %v1715_v42 }
 0x972   :  { %8996 = vmatmul.msk.f32.gmra.mxu2 %vm2174_vm6, %v1669_v3  ;;  %v1672_v3 = vld [vmem:[%s16740_s1 + $0x910] sm:$0xff] }
 0x974   :  { %v13655_v35 = vpop.f32.mrf.mxu3 }
 0x975   :  { %v3876_v6 = vpop.f32.mrf.mxu2 }
 0x976   :  { %v13636_v46 = vadd.f32 %v3876_v6, %v3305_v49  ;;  %v13648_v20 = vpop.f32.mrf.mxu1  ;;  %v2152_v49 = vld [vmem:[%s16741_s7 + $0x70] sm:$0xff]  ;;  %v17280_v6 = vld [vmem:[#allocation47_spill] sm:$0xff] }
 0x977   :  { %17278 = vst [vmem:[#allocation75_spill] sm:$0xff] %v13648_v20  ;;  %4403 = vmatpush.msrb.mxu3 %v2152_v49  ;;  %v1675_v49 = vld [vmem:[%s16740_s1 + $0x928] sm:$0xff] }
 0x978   :  { %17277 = vst [vmem:[#allocation89_spill] sm:$0xff] %v13636_v46  ;;  %4676 = vmatmul.f32.gmra.mxu1 %v1775_v14  ;;  %v3308_v46 = vadd.f32 %v17280_v6, %v17279_v17  ;;  %v1778_v14 = vld [vmem:[%s16740_s1 + $0xc60] sm:$0xff] }
 0x979   :  { %4404 = vmatpush.msrb.mxu3 %v2151_v4 }
 0x97a   :  { %8997 = vmatmul.msk.f32.gmra.mxu2 %vm2174_vm6, %v1672_v3  ;;  %v2150_v3 = vld [vmem:[%s16741_s7 + $0x60] sm:$0xff] }
 0x97b   :  { %4405 = vmatpush.msrb.mxu3 %v2150_v3  ;;  %v17287_v3 = vld [vmem:[#allocation97_spill] sm:$0xff] }
 0x97d   :  { %v3879_v19 = vpop.f32.mrf.mxu2 }
 0x97e   :  { %v13660_v42 = vadd.f32 %v3879_v19, %v3308_v46  ;;  %v13672_v17 = vpop.f32.mrf.mxu1  ;;  %v17283_v19 = vld [vmem:[#allocation96_spill] sm:$0xff]  ;;  %v17284_v46 = vld [vmem:[#allocation79_spill] sm:$0xff] }
 0x97f   :  { %17282 = vst [vmem:[#allocation38_spill] sm:$0xff] %v13672_v17  ;;  %v3311_v6 = vadd.f32 %v17284_v46, %v17283_v19  ;;  %v1784_v17 = vld [vmem:[%s16740_s1 + $0xc90] sm:$0xff] }
 0x980   :  { %17281 = vst [vmem:[#allocation90_spill] sm:$0xff] %v13660_v42  ;;  %4679 = vmatmul.f32.gmra.mxu1 %v1778_v14  ;;  %v13676_v42 = vpop.f32.mrf.mxu3  ;;  %v1678_v14 = vld [vmem:[%s16740_s1 + $0x940] sm:$0xff] }
 0x982   :  { %8998 = vmatmul.msk.f32.gmra.mxu2 %vm2174_vm6, %v1675_v49  ;;  %v17288_v49 = vld [vmem:[#allocation81_spill] sm:$0xff] }
 0x983   :  { %v3314_v19 = vadd.f32 %v17288_v49, %v17287_v3  ;;  %v17291_v3 = vld [vmem:[#allocation83_spill] sm:$0xff] }
 0x985   :  { %v3882_v20 = vpop.f32.mrf.mxu2 }
 0x986   :  { %v13681_v8 = vadd.f32 %v3882_v20, %v3311_v6  ;;  %v13687_v4 = vpop.f32.mrf.mxu1 }
 0x987   :  { %17286 = vst [vmem:[#allocation40_spill] sm:$0xff] %v13687_v4  ;;  %v1787_v4 = vld [vmem:[%s16740_s1 + $0xca8] sm:$0xff] }
 0x988   :  { %17285 = vst [vmem:[#allocation91_spill] sm:$0xff] %v13681_v8  ;;  %4682 = vmatmul.f32.gmra.mxu1 %v1781_v29  ;;  %v13694_v54 = vpop.f32.mrf.mxu3  ;;  %v1681_v29 = vld [vmem:[%s16740_s1 + $0x958] sm:$0xff] }
 0x98a   :  { %8999 = vmatmul.msk.f32.gmra.mxu2 %vm2174_vm6, %v1678_v14  ;;  %v17290_v14 = vld [vmem:[#allocation98_spill] sm:$0xff] }
 0x98b   :  { %v3317_v49 = vadd.f32 %v17291_v3, %v17290_v14 }
 0x98d   :  { %v3885_v46 = vpop.f32.mrf.mxu2 }
 0x98e   :  { %v13696_v20 = vadd.f32 %v3885_v46, %v3314_v19  ;;  %v13702_v6 = vpop.f32.mrf.mxu1  ;;  %v1684_v19 = vld [vmem:[%s16740_s1 + $0x970] sm:$0xff] }
 0x990   :  { %17289 = vst [vmem:[#allocation92_spill] sm:$0xff] %v13696_v20  ;;  %4685 = vmatmul.f32.gmra.mxu1 %v1784_v17  ;;  %v13714_v46 = vpop.f32.mrf.mxu3 }
 0x992   :  { %9000 = vmatmul.msk.f32.gmra.mxu2 %vm2174_vm6, %v1681_v29  ;;  %v4122_v29 = vadd.f32 %v13181_v12, %v13440_v28  ;;  %v4125_v12 = vadd.f32 %v13194_v41, %v13462_v44  ;;  %v4128_v41 = vadd.f32 %v13205_v34, %v13484_v2  ;;  %v4131_v34 = vadd.f32 %v13218_v55, %v13505_v61 }
 0x993   :  { %v4134_v55 = vadd.f32 %v13233_v24, %v13523_v38  ;;  %v4137_v38 = vadd.f32 %v13248_v56, %v13541_v23 }
 0x995   :  { %v3888_v8 = vpop.f32.mrf.mxu2 }
 0x996   :  { %v13709_v59 = vadd.f32 %v3888_v8, %v3317_v49  ;;  %v13717_v17 = vpop.f32.mrf.mxu1  ;;  %v1790_v8 = vld [vmem:[%s16740_s1 + $0xcc0] sm:$0xff]  ;;  %v1687_v49 = vld [vmem:[%s16740_s1 + $0x988] sm:$0xff] }
 0x998   :  { %17292 = vst [vmem:[#allocation44_spill] sm:$0xff] %v13709_v59  ;;  %4688 = vmatmul.f32.gmra.mxu1 %v1787_v4  ;;  %v13728_v4 = vpop.f32.mrf.mxu3 }
 0x99a   :  { %9001 = vmatmul.msk.f32.gmra.mxu2 %vm2174_vm6, %v1684_v19 }
 0x99d   :  { %v4222_v14 = vpop.f32.mrf.mxu2 }
 0x99e   :  { %v4223_v3 = vadd.f32 %v4222_v14, %v4122_v29  ;;  %v13731_v19 = vpop.f32.mrf.mxu1  ;;  %v1793_v29 = vld [vmem:[%s16740_s1 + $0xcd8] sm:$0xff] }
 0x9a0   :  { %9013 = vmatmul.msk.f32.vlgmr.msrb.gmra.mxu3 %vm2174_vm6, %v4223_v3  ;;  %4691 = vmatmul.f32.gmra.mxu1 %v1790_v8  ;;  %v1690_v3 = vld [vmem:[%s16740_s1 + $0x9a0] sm:$0xff] }
 0x9a2   :  { %9002 = vmatmul.msk.f32.gmra.mxu2 %vm2174_vm6, %v1687_v49  ;;  %v13745_v49 = vpop.f32.mrf.mxu3 }
 0x9a5   :  { %v4225_v28 = vpop.f32.mrf.mxu2 }
 0x9a6   :  { %v4226_v14 = vadd.f32 %v4225_v28, %v4125_v12  ;;  %v13743_v8 = vpop.f32.mrf.mxu1  ;;  %v1796_v12 = vld [vmem:[%s16740_s1 + $0xcf0] sm:$0xff] }
 0x9a8   :  { %9014 = vmatmul.msk.f32.gmra.mxu3 %vm2174_vm6, %v4226_v14  ;;  %4694 = vmatmul.f32.gmra.mxu1 %v1793_v29  ;;  %v1693_v14 = vld [vmem:[%s16740_s1 + $0x9b8] sm:$0xff] }
 0x9aa   :  { %9003 = vmatmul.msk.f32.gmra.mxu2 %vm2174_vm6, %v1690_v3  ;;  %v1799_v3 = vld [vmem:[%s16740_s1 + $0xd08] sm:$0xff] }
 0x9ad   :  { %v4228_v44 = vpop.f32.mrf.mxu2 }
 0x9ae   :  { %v4229_v28 = vadd.f32 %v4228_v44, %v4128_v41  ;;  %v13757_v29 = vpop.f32.mrf.mxu1  ;;  %v13764_v41 = vpop.f32.mrf.mxu3 }
 0x9b0   :  { %9015 = vmatmul.msk.f32.gmra.mxu3 %vm2174_vm6, %v4229_v28  ;;  %4697 = vmatmul.f32.gmra.mxu1 %v1796_v12  ;;  %v1696_v28 = vld [vmem:[%s16740_s1 + $0x9d0] sm:$0xff] }
 0x9b2   :  { %9004 = vmatmul.msk.f32.gmra.mxu2 %vm2174_vm6, %v1693_v14  ;;  %v1802_v14 = vld [vmem:[%s16740_s1 + $0xd20] sm:$0xff] }
 0x9b5   :  { %v4231_v2 = vpop.f32.mrf.mxu2 }
 0x9b6   :  { %v4232_v44 = vadd.f32 %v4231_v2, %v4131_v34  ;;  %v13771_v12 = vpop.f32.mrf.mxu1  ;;  %v1699_v2 = vld [vmem:[%s16740_s1 + $0x9e8] sm:$0xff]  ;;  %v13781_v59 = vpop.f32.mrf.mxu3 }
 0x9b8   :  { %9016 = vmatmul.msk.f32.gmra.mxu3 %vm2174_vm6, %v4232_v44  ;;  %4700 = vmatmul.f32.gmra.mxu1 %v1799_v3  ;;  %v1805_v44 = vld [vmem:[%s16740_s1 + $0xd38] sm:$0xff] }
 0x9ba   :  { %9005 = vmatmul.msk.f32.gmra.mxu2 %vm2174_vm6, %v1696_v28 }
 0x9bd   :  { %v4234_v61 = vpop.f32.mrf.mxu2 }
 0x9be   :  { %v4235_v34 = vadd.f32 %v4234_v61, %v4134_v55  ;;  %v13786_v24 = vpop.f32.mrf.mxu1  ;;  %v1702_v55 = vld [vmem:[%s16740_s1 + $0xa00] sm:$0xff]  ;;  %v13801_v56 = vpop.f32.mrf.mxu3  ;;  %v4140_v61 = vadd.f32 %v13263_v7, %v13559_v32 }
 0x9c0   :  { %9017 = vmatmul.msk.f32.gmra.mxu3 %vm2174_vm6, %v4235_v34  ;;  %5219 = vmatmul.f32.vlgmr.msra.gmra.mxu1 %v1802_v14  ;;  %v1808_v34 = vld [vmem:[%s16740_s1 + $0xd50] sm:$0xff] }
 0x9c1   :  { %6403 = vmatpush.msra.mxu1 %v17044_v30 }
 0x9c2   :  { %9006 = vmatmul.msk.f32.gmra.mxu2 %vm2174_vm6, %v1699_v2 }
 0x9c3   :  { %6404 = vmatpush.msra.mxu1 %v17045_v52 }
 0x9c5   :  { %v4237_v3 = vpop.f32.mrf.mxu2  ;;  %6405 = vmatpush.msra.mxu1 %v17046_v33 }
 0x9c6   :  { %v4238_v28 = vadd.f32 %v4237_v3, %v4137_v38  ;;  %v13804_v23 = vpop.f32.mrf.mxu1  ;;  %v1705_v38 = vld [vmem:[%s16740_s1 + $0xa18] sm:$0xff]  ;;  %v13823_v32 = vpop.f32.mrf.mxu3  ;;  %v4143_v3 = vadd.f32 %v13278_v25, %v13577_v27  ;;  %v4146_v25 = vadd.f32 %v13294_v51, %v13595_v11  ;;  %v4149_v11 = vadd.f32 %v13313_v48, %v13613_v26 }
 0x9c7   :  { %6406 = vmatpush.msra.mxu1 %v17107_v53  ;;  %v4152_v48 = vadd.f32 %v13332_v9, %v13631_v62  ;;  %v4155_v9 = vadd.f32 %v13351_v50, %v13655_v35  ;;  %v4158_v50 = vadd.f32 %v13369_v18, %v13676_v42  ;;  %v4161_v42 = vadd.f32 %v13384_v63, %v13694_v54  ;;  %v17296_v54 = vld [vmem:[#allocation16_spill] sm:$0xff] }
 0x9c8   :  { %9018 = vmatmul.msk.f32.gmra.mxu3 %vm2174_vm6, %v4238_v28  ;;  %5222 = vmatmul.f32.gmra.mxu1 %v1805_v44  ;;  %v1811_v28 = vld [vmem:[%s16740_s1 + $0xd68] sm:$0xff] }
 0x9c9   :  { %6407 = vmatpush.msra.mxu1 %v17108_v40 }
 0x9ca   :  { %9007 = vmatmul.msk.f32.gmra.mxu2 %vm2174_vm6, %v1702_v55 }
 0x9cb   :  { %6408 = vmatpush.msra.mxu1 %v17110_v22 }
 0x9cd   :  { %v4240_v14 = vpop.f32.mrf.mxu2  ;;  %6409 = vmatpush.msra.mxu1 %v17112_v1 }
 0x9ce   :  { %v4241_v2 = vadd.f32 %v4240_v14, %v4140_v61  ;;  %v13820_v7 = vpop.f32.mrf.mxu1  ;;  %v1708_v61 = vld [vmem:[%s16740_s1 + $0xa30] sm:$0xff] }
 0x9cf   :  { %6410 = vmatpush.msra.mxu1 %v17113_v60 }
 0x9d0   :  { %9019 = vmatmul.msk.f32.gmra.mxu3 %vm2174_vm6, %v4241_v2  ;;  %5225 = vmatmul.f32.gmra.mxu1 %v1808_v34  ;;  %v1814_v34 = vld [vmem:[%s16740_s1 + $0xd80] sm:$0xff]  ;;  %v13847_v2 = vpop.f32.mrf.mxu3 }
 0x9d1   :  { %6411 = vmatpush.msra.mxu1 %v17114_v43 }
 0x9d2   :  { %9008 = vmatmul.msk.f32.gmra.mxu2 %vm2174_vm6, %v1705_v38 }
 0x9d3   :  { %6412 = vmatpush.msra.mxu1 %v17116_v15 }
 0x9d5   :  { %v4243_v44 = vpop.f32.mrf.mxu2  ;;  %6413 = vmatpush.msra.mxu1 %v17118_v16 }
 0x9d6   :  { %v4244_v55 = vadd.f32 %v4243_v44, %v4143_v3  ;;  %v13838_v27 = vpop.f32.mrf.mxu1  ;;  %v1711_v3 = vld [vmem:[%s16740_s1 + $0xa48] sm:$0xff] }
 0x9d7   :  { %6414 = vmatpush.msra.mxu1 %v17119_v10 }
 0x9d8   :  { %9020 = vmatmul.msk.f32.gmra.mxu3 %vm2174_vm6, %v4244_v55  ;;  %5228 = vmatmul.f32.gmra.mxu1 %v1811_v28  ;;  %v1817_v28 = vld [vmem:[%s16740_s1 + $0xd98] sm:$0xff] }
 0x9d9   :  { %6415 = vmatpush.msra.mxu1 %v17120_v58 }
 0x9da   :  { %9009 = vmatmul.msk.f32.gmra.mxu2 %vm2174_vm6, %v1708_v61  ;;  %v1714_v61 = vld [vmem:[%s16740_s1 + $0xa60] sm:$0xff] }
 0x9db   :  { %6416 = vmatpush.msra.mxu1 %v17122_v13 }
 0x9dd   :  { %v4246_v14 = vpop.f32.mrf.mxu2  ;;  %6417 = vmatpush.msra.mxu1 %v17203_v57 }
 0x9de   :  { %v4247_v38 = vadd.f32 %v4246_v14, %v4146_v25  ;;  %v13855_v51 = vpop.f32.mrf.mxu1  ;;  %v13865_v25 = vpop.f32.mrf.mxu3 }
 0x9df   :  { %6418 = vmatpush.msra.mxu1 %v17205_v0 }
 0x9e0   :  { %9021 = vmatmul.msk.f32.gmra.mxu3 %vm2174_vm6, %v4247_v38  ;;  %5231 = vmatmul.f32.gmra.mxu1 %v1814_v34  ;;  %v1820_v34 = vld [vmem:[%s16740_s1 + $0xdb0] sm:$0xff] }
 0x9e2   :  { %9010 = vmatmul.msk.f32.gmra.mxu2 %vm2174_vm6, %v1711_v3  ;;  %v1717_v3 = vld [vmem:[%s16740_s1 + $0xa78] sm:$0xff] }
 0x9e5   :  { %v4249_v44 = vpop.f32.mrf.mxu2 }
 0x9e6   :  { %v4250_v55 = vadd.f32 %v4249_v44, %v4149_v11  ;;  %v13869_v14 = vpop.f32.mrf.mxu1  ;;  %v13880_v11 = vpop.f32.mrf.mxu3 }
 0x9e8   :  { %9022 = vmatmul.msk.f32.gmra.mxu3 %vm2174_vm6, %v4250_v55  ;;  %5234 = vmatmul.f32.gmra.mxu1 %v1817_v28  ;;  %v1823_v28 = vld [vmem:[%s16740_s1 + $0xdc8] sm:$0xff] }
 0x9ea   :  { %9011 = vmatmul.msk.f32.gmra.mxu2 %vm2174_vm6, %v1714_v61  ;;  %v1719_v61 = vld [vmem:[%s16740_s1 + $0xa88] sm:$0xff] }
 0x9ed   :  { %v4252_v26 = vpop.f32.mrf.mxu2 }
 0x9ee   :  { %v4253_v38 = vadd.f32 %v4252_v26, %v4152_v48  ;;  %v13883_v44 = vpop.f32.mrf.mxu1  ;;  %v13897_v26 = vpop.f32.mrf.mxu3 }
 0x9f0   :  { %9023 = vmatmul.msk.f32.gmra.mxu3 %vm2174_vm6, %v4253_v38  ;;  %5237 = vmatmul.f32.gmra.mxu1 %v1820_v34  ;;  %v1826_v34 = vld [vmem:[%s16740_s1 + $0xde0] sm:$0xff] }
 0x9f2   :  { %9012 = vmatmul.msk.f32.gmra.mxu2 %vm2174_vm6, %v1717_v3  ;;  %v1722_v3 = vld [vmem:[%s16740_s1 + $0xaa0] sm:$0xff] }
 0x9f5   :  { %v4255_v62 = vpop.f32.mrf.mxu2 }
 0x9f6   :  { %v4256_v55 = vadd.f32 %v4255_v62, %v4155_v9  ;;  %v13894_v48 = vpop.f32.mrf.mxu1  ;;  %v1829_v62 = vld [vmem:[%s16740_s1 + $0xdf8] sm:$0xff] }
 0x9f7   :  { %17293 = vst [vmem:[#allocation93_spill] sm:$0xff] %v13894_v48  ;;  %v1835_v48 = vld [vmem:[%s16740_s1 + $0xe28] sm:$0xff] }
 0x9f8   :  { %9024 = vmatmul.msk.f32.gmra.mxu3 %vm2174_vm6, %v4256_v55  ;;  %5240 = vmatmul.f32.gmra.mxu1 %v1823_v28  ;;  %v13920_v28 = vpop.f32.mrf.mxu3 }
 0x9fa   :  { %4720 = vmatmul.f32.vlgmr.msrb.gmra.mxu2 %v1719_v61  ;;  %v1725_v61 = vld [vmem:[%s16740_s1 + $0xab8] sm:$0xff] }
 0x9fb   :  { %5904 = vmatpush.msrb.mxu2 %v17217_v45 }
 0x9fd   :  { %5905 = vmatpush.msrb.mxu2 %v17220_v37  ;;  %v4258_v35 = vpop.f32.mrf.mxu2 }
 0x9fe   :  { %v4259_v38 = vadd.f32 %v4258_v35, %v4158_v50  ;;  %v13911_v18 = vpop.f32.mrf.mxu1  ;;  %v17297_v50 = vld [vmem:[#allocation68_spill] sm:$0xff] }
 0x9ff   :  { %5906 = vmatpush.msrb.mxu2 %v17222_v47  ;;  %17294 = vst [vmem:[#allocation45_spill] sm:$0xff] %v13911_v18  ;;  %v4164_v35 = vadd.f32 %v17297_v50, %v13714_v46  ;;  %v17300_v46 = vld [vmem:[#allocation26_spill] sm:$0xff]  ;;  %v17302_v50 = vld [vmem:[#allocation27_spill] sm:$0xff] }
 0xa00   :  { %9025 = vmatmul.msk.f32.gmra.mxu3 %vm2174_vm6, %v4259_v38  ;;  %5243 = vmatmul.f32.gmra.mxu1 %v1826_v34  ;;  %v17298_v34 = vld [vmem:[#allocation25_spill] sm:$0xff] }
 0xa01   :  { %5907 = vmatpush.msrb.mxu2 %v17223_v31 }
 0xa02   :  { %4723 = vmatmul.f32.gmra.mxu2 %v1722_v3  ;;  %v1832_v3 = vld [vmem:[%s16740_s1 + $0xe10] sm:$0xff] }
 0xa03   :  { %5908 = vmatpush.msrb.mxu2 %v17225_v5 }
 0xa05   :  { %5909 = vmatpush.msrb.mxu2 %v17228_v36  ;;  %v4261_v9 = vpop.f32.mrf.mxu2 }
 0xa06   :  { %v4262_v55 = vadd.f32 %v4261_v9, %v4161_v42  ;;  %v13928_v63 = vpop.f32.mrf.mxu1  ;;  %v17299_v9 = vld [vmem:[#allocation17_spill] sm:$0xff] }
 0xa07   :  { %5910 = vmatpush.msrb.mxu2 %v17230_v21  ;;  %17295 = vst [vmem:[#allocation94_spill] sm:$0xff] %v13928_v63  ;;  %v17304_v63 = vld [vmem:[#allocation28_spill] sm:$0xff] }
 0xa08   :  { %9026 = vmatmul.msk.f32.gmra.mxu3 %vm2174_vm6, %v4262_v55  ;;  %5246 = vmatmul.f32.gmra.mxu1 %v1829_v62  ;;  %v1728_v62 = vld [vmem:[%s16740_s1 + $0xad0] sm:$0xff]  ;;  %v13941_v55 = vpop.f32.mrf.mxu3 }
 0xa09   :  { %5911 = vmatpush.msrb.mxu2 %v17231_v39 }
 0xa0a   :  { %4726 = vmatmul.f32.gmra.mxu2 %v1725_v61 }
 0xa0b   :  { %5912 = vmatpush.msrb.mxu2 %v17296_v54 }
 0xa0d   :  { %5913 = vmatpush.msrb.mxu2 %v17298_v34  ;;  %v4264_v38 = vpop.f32.mrf.mxu2 }
 0xa0e   :  { %v4265_v42 = vadd.f32 %v4264_v38, %v4164_v35  ;;  %v13945_v61 = vpop.f32.mrf.mxu1  ;;  %v17303_v35 = vld [vmem:[#allocation69_spill] sm:$0xff] }
 0xa0f   :  { %5914 = vmatpush.msrb.mxu2 %v17299_v9  ;;  %17301 = vst [vmem:[#allocation53_spill] sm:$0xff] %v13945_v61  ;;  %v4167_v38 = vadd.f32 %v17303_v35, %v13728_v4  ;;  %v17307_v35 = vld [vmem:[#allocation70_spill] sm:$0xff] }
 0xa10   :  { %9027 = vmatmul.msk.f32.gmra.mxu3 %vm2174_vm6, %v4265_v42  ;;  %5249 = vmatmul.f32.gmra.mxu1 %v1832_v3  ;;  %v17305_v42 = vld [vmem:[#allocation18_spill] sm:$0xff]  ;;  %v1731_v3 = vld [vmem:[%s16740_s1 + $0xae8] sm:$0xff]  ;;  %v13960_v4 = vpop.f32.mrf.mxu3  ;;  %v4170_v61 = vadd.f32 %v17307_v35, %v13745_v49 }
 0xa11   :  { %5915 = vmatpush.msrb.mxu2 %v17300_v46  ;;  %v17310_v35 = vld [vmem:[#allocation62_spill] sm:$0xff] }
 0xa12   :  { %4729 = vmatmul.f32.gmra.mxu2 %v1728_v62  ;;  %v17306_v62 = vld [vmem:[#allocation19_spill] sm:$0xff] }
 0xa13   :  { %5916 = vmatpush.msrb.mxu2 %v17302_v50 }
 0xa15   :  { %5917 = vmatpush.msrb.mxu2 %v17304_v63  ;;  %v4267_v18 = vpop.f32.mrf.mxu2 }
 0xa16   :  { %v4268_v20 = vadd.f32 %v4267_v18, %v4167_v38  ;;  %v13964_v63 = vpop.f32.mrf.mxu1  ;;  %v1838_v38 = vld [vmem:[%s16740_s1 + $0xe40] sm:$0xff] }
 0xa17   :  { %5918 = vmatpush.msrb.mxu2 %v17305_v42  ;;  %17308 = vst [vmem:[#allocation95_spill] sm:$0xff] %v13964_v63 }
 0xa18   :  { %9028 = vmatmul.msk.f32.gmra.mxu3 %vm2174_vm6, %v4268_v20  ;;  %5252 = vmatmul.f32.gmra.mxu1 %v1835_v48  ;;  %v1734_v20 = vld [vmem:[%s16740_s1 + $0xb00] sm:$0xff] }
 0xa19   :  { %5919 = vmatpush.msrb.mxu2 %v17306_v62 }
 0xa1a   :  { %4732 = vmatmul.f32.gmra.mxu2 %v1731_v3  ;;  %v17309_v3 = vld [vmem:[#allocation82_spill] sm:$0xff] }
 0xa1b   :  { %v4173_v49 = vadd.f32 %v17309_v3, %v13764_v41 }
 0xa1d   :  { %v4270_v18 = vpop.f32.mrf.mxu2 }
 0xa1e   :  { %v4271_v42 = vadd.f32 %v4270_v18, %v4170_v61  ;;  %v1841_v61 = vld [vmem:[%s16740_s1 + $0xe58] sm:$0xff]  ;;  %v13981_v50 = vpop.f32.mrf.mxu1 }
 0xa1f   :  { %17311 = vst [vmem:[#allocation47_spill] sm:$0xff] %v13981_v50  ;;  %v1740_v50 = vld [vmem:[%s16740_s1 + $0xb30] sm:$0xff] }
 0xa20   :  { %9029 = vmatmul.msk.f32.gmra.mxu3 %vm2174_vm6, %v4271_v42  ;;  %5255 = vmatmul.f32.gmra.mxu1 %v1838_v38  ;;  %v1737_v42 = vld [vmem:[%s16740_s1 + $0xb18] sm:$0xff]  ;;  %v17312_v38 = vld [vmem:[#allocation12_spill] sm:$0xff] }
 0xa22   :  { %4735 = vmatmul.f32.gmra.mxu2 %v1734_v20  ;;  %v4176_v20 = vadd.f32 %v17312_v38, %v13781_v59 }
 0xa23   :  { %v4407_v48 = vpop.f32.mrf.mxu3 }
 0xa24   :  { %v13976_v63 = vadd.f32 %v4407_v48, %v17310_v35  ;;  %v17313_v48 = vld [vmem:[#allocation8_spill] sm:$0xff] }
 0xa25   :  { %v4273_v62 = vpop.f32.mrf.mxu2 }
 0xa26   :  { %v4274_v18 = vadd.f32 %v4273_v62, %v4173_v49  ;;  %v1844_v62 = vld [vmem:[%s16740_s1 + $0xe70] sm:$0xff] }
 0xa28   :  { %9030 = vmatmul.msk.f32.gmra.mxu3 %vm2174_vm6, %v4274_v18  ;;  %5258 = vmatmul.f32.gmra.mxu1 %v1841_v61  ;;  %v13999_v61 = vpop.f32.mrf.mxu1  ;;  %v17315_v18 = vld [vmem:[#allocation22_spill] sm:$0xff] }
 0xa29   :  { %17314 = vst [vmem:[#allocation96_spill] sm:$0xff] %v13999_v61 }
 0xa2a   :  { %4738 = vmatmul.f32.gmra.mxu2 %v1737_v42  ;;  %v4179_v42 = vadd.f32 %v17315_v18, %v13801_v56  ;;  %v17319_v18 = vld [vmem:[#allocation64_spill] sm:$0xff] }
 0xa2b   :  { %v4410_v41 = vpop.f32.mrf.mxu3 }
 0xa2c   :  { %v13990_v3 = vadd.f32 %v4410_v41, %v17313_v48  ;;  %v17316_v41 = vld [vmem:[#allocation66_spill] sm:$0xff] }
 0xa2d   :  { %v4276_v35 = vpop.f32.mrf.mxu2 }
 0xa2e   :  { %v4277_v49 = vadd.f32 %v4276_v35, %v4176_v20  ;;  %v1847_v20 = vld [vmem:[%s16740_s1 + $0xe88] sm:$0xff] }
 0xa30   :  { %9031 = vmatmul.msk.f32.gmra.mxu3 %vm2174_vm6, %v4277_v49  ;;  %5261 = vmatmul.f32.gmra.mxu1 %v1844_v62  ;;  %v1743_v62 = vld [vmem:[%s16740_s1 + $0xb48] sm:$0xff]  ;;  %v17318_v49 = vld [vmem:[#allocation84_spill] sm:$0xff] }
 0xa32   :  { %4741 = vmatmul.f32.gmra.mxu2 %v1740_v50  ;;  %v14013_v50 = vpop.f32.mrf.mxu1 }
 0xa33   :  { %v4413_v59 = vpop.f32.mrf.mxu3  ;;  %17317 = vst [vmem:[#allocation79_spill] sm:$0xff] %v14013_v50 }
 0xa34   :  { %v14004_v38 = vadd.f32 %v4413_v59, %v17316_v41  ;;  %v4182_v59 = vadd.f32 %v17318_v49, %v13823_v32  ;;  %v17320_v32 = vld [vmem:[#allocation24_spill] sm:$0xff] }
 0xa35   :  { %v4279_v48 = vpop.f32.mrf.mxu2 }
 0xa36   :  { %v4280_v35 = vadd.f32 %v4279_v48, %v4179_v42  ;;  %v1850_v42 = vld [vmem:[%s16740_s1 + $0xea0] sm:$0xff] }
 0xa38   :  { %9032 = vmatmul.msk.f32.gmra.mxu3 %vm2174_vm6, %v4280_v35  ;;  %5264 = vmatmul.f32.gmra.mxu1 %v1847_v20  ;;  %v1746_v20 = vld [vmem:[%s16740_s1 + $0xb60] sm:$0xff] }
 0xa3a   :  { %4744 = vmatmul.f32.gmra.mxu2 %v1743_v62  ;;  %v4185_v62 = vadd.f32 %v17320_v32, %v13847_v2 }
 0xa3b   :  { %v4416_v56 = vpop.f32.mrf.mxu3 }
 0xa3c   :  { %v14018_v41 = vadd.f32 %v4416_v56, %v17319_v18  ;;  %v17321_v56 = vld [vmem:[#allocation63_spill] sm:$0xff]  ;;  %v14032_v18 = vpop.f32.mrf.mxu1 }
 0xa3d   :  { %v4282_v61 = vpop.f32.mrf.mxu2  ;;  %17322 = vst [vmem:[#allocation97_spill] sm:$0xff] %v14032_v18 }
 0xa3e   :  { %v4283_v48 = vadd.f32 %v4282_v61, %v4182_v59  ;;  %v1853_v61 = vld [vmem:[%s16740_s1 + $0xeb8] sm:$0xff] }
 0xa40   :  { %9033 = vmatmul.msk.f32.gmra.mxu3 %vm2174_vm6, %v4283_v48  ;;  %5267 = vmatmul.f32.gmra.mxu1 %v1850_v42  ;;  %v1749_v42 = vld [vmem:[%s16740_s1 + $0xb78] sm:$0xff]  ;;  %v17323_v48 = vld [vmem:[#allocation15_spill] sm:$0xff] }
 0xa42   :  { %4747 = vmatmul.f32.gmra.mxu2 %v1746_v20  ;;  %v4188_v20 = vadd.f32 %v17323_v48, %v13865_v25 }
 0xa43   :  { %v4419_v35 = vpop.f32.mrf.mxu3 }
 0xa44   :  { %v14030_v49 = vadd.f32 %v4419_v35, %v17321_v56  ;;  %v17324_v35 = vld [vmem:[#allocation42_spill] sm:$0xff]  ;;  %v14049_v18 = vpop.f32.mrf.mxu1 }
 0xa45   :  { %v4285_v50 = vpop.f32.mrf.mxu2  ;;  %17325 = vst [vmem:[#allocation81_spill] sm:$0xff] %v14049_v18  ;;  %v1755_v18 = vld [vmem:[%s16740_s1 + $0xba8] sm:$0xff] }
 0xa46   :  { %v4286_v59 = vadd.f32 %v4285_v50, %v4185_v62  ;;  %v1856_v50 = vld [vmem:[%s16740_s1 + $0xed0] sm:$0xff] }
 0xa48   :  { %9034 = vmatmul.msk.f32.gmra.mxu3 %vm2174_vm6, %v4286_v59  ;;  %5270 = vmatmul.f32.gmra.mxu1 %v1853_v61  ;;  %v1752_v61 = vld [vmem:[%s16740_s1 + $0xb90] sm:$0xff] }
 0xa49   :  { %v17326_v59 = vld [vmem:[#allocation72_spill] sm:$0xff] }
 0xa4a   :  { %4750 = vmatmul.f32.gmra.mxu2 %v1749_v42  ;;  %v4191_v42 = vadd.f32 %v17326_v59, %v13880_v11 }
 0xa4b   :  { %v4422_v2 = vpop.f32.mrf.mxu3 }
 0xa4c   :  { %v14044_v32 = vadd.f32 %v4422_v2, %v17324_v35  ;;  %v17327_v2 = vld [vmem:[#allocation35_spill] sm:$0xff] }
 0xa4d   :  { %v4288_v56 = vpop.f32.mrf.mxu2 }
 0xa4e   :  { %v4289_v62 = vadd.f32 %v4288_v56, %v4188_v20  ;;  %v1859_v20 = vld [vmem:[%s16740_s1 + $0xee8] sm:$0xff] }
 0xa50   :  { %9035 = vmatmul.msk.f32.gmra.mxu3 %vm2174_vm6, %v4289_v62  ;;  %5273 = vmatmul.f32.gmra.mxu1 %v1856_v50  ;;  %v14067_v50 = vpop.f32.mrf.mxu1  ;;  %v17329_v62 = vld [vmem:[#allocation73_spill] sm:$0xff] }
 0xa51   :  { %17328 = vst [vmem:[#allocation98_spill] sm:$0xff] %v14067_v50 }
 0xa52   :  { %4753 = vmatmul.f32.gmra.mxu2 %v1752_v61  ;;  %v4194_v61 = vadd.f32 %v17329_v62, %v13897_v26  ;;  %v1758_v26 = vld [vmem:[%s16740_s1 + $0xbc0] sm:$0xff] }
 0xa53   :  { %v4425_v25 = vpop.f32.mrf.mxu3 }
 0xa54   :  { %v14058_v48 = vadd.f32 %v4425_v25, %v17327_v2  ;;  %v17330_v25 = vld [vmem:[#allocation71_spill] sm:$0xff] }
 0xa55   :  { %v4291_v35 = vpop.f32.mrf.mxu2 }
 0xa56   :  { %v4292_v56 = vadd.f32 %v4291_v35, %v4191_v42  ;;  %v2157_v42 = vld [vmem:[%s16741_s7 + $0x98] sm:$0xff]  ;;  %v1862_v35 = vld [vmem:[%s16740_s1 + $0xf00] sm:$0xff] }
 0xa57   :  { %5002 = vmatpush.msra.mxu3 %v2157_v42 }
 0xa58   :  { %9036 = vmatmul.msk.f32.gmra.mxu3 %vm2174_vm6, %v4292_v56  ;;  %5276 = vmatmul.f32.gmra.mxu1 %v1859_v20  ;;  %v2155_v56 = vld [vmem:[%s16741_s7 + $0x88] sm:$0xff]  ;;  %v14093_v62 = vpop.f32.mrf.mxu1 }
 0xa59   :  { %17331 = vst [vmem:[#allocation83_spill] sm:$0xff] %v14093_v62 }
 0xa5a   :  { %4756 = vmatmul.f32.gmra.mxu2 %v1755_v18  ;;  %v2156_v18 = vld [vmem:[%s16741_s7 + $0x90] sm:$0xff] }
 0xa5b   :  { %v4428_v11 = vpop.f32.mrf.mxu3  ;;  %5003 = vmatpush.msra.mxu3 %v2156_v18  ;;  %v1865_v18 = vld [vmem:[%s16740_s1 + $0xf18] sm:$0xff] }
 0xa5c   :  { %v14072_v59 = vadd.f32 %v4428_v11, %v17330_v25  ;;  %v2154_v11 = vld [vmem:[%s16741_s7 + $0x80] sm:$0xff] }
 0xa5d   :  { %v4294_v2 = vpop.f32.mrf.mxu2  ;;  %5004 = vmatpush.msra.mxu3 %v2155_v56  ;;  %v17332_v25 = vld [vmem:[#allocation74_spill] sm:$0xff] }
 0xa5e   :  { %v4295_v20 = vadd.f32 %v4294_v2, %v4194_v61  ;;  %v4197_v42 = vadd.f32 %v17332_v25, %v13920_v28  ;;  %v17333_v2 = vld [vmem:[#allocation76_spill] sm:$0xff]  ;;  %v17334_v28 = vld [vmem:[#allocation39_spill] sm:$0xff] }
 0xa5f   :  { %5005 = vmatpush.msra.mxu3 %v2154_v11  ;;  %v4200_v11 = vadd.f32 %v17334_v28, %v13941_v55 }
 0xa60   :  { %9037 = vmatmul.msk.f32.gmra.mxu3 %vm2174_vm6, %v4295_v20  ;;  %5279 = vmatmul.f32.gmra.mxu1 %v1862_v35 }
 0xa62   :  { %4759 = vmatmul.f32.gmra.mxu2 %v1758_v26  ;;  %v1761_v26 = vld [vmem:[%s16740_s1 + $0xbd8] sm:$0xff] }
 0xa63   :  { %v4431_v61 = vpop.f32.mrf.mxu3 }
 0xa64   :  { %v14098_v20 = vadd.f32 %v4431_v61, %v17333_v2  ;;  %v17335_v61 = vld [vmem:[#allocation77_spill] sm:$0xff]  ;;  %v14112_v2 = vpop.f32.mrf.mxu1 }
 0xa65   :  { %v4297_v35 = vpop.f32.mrf.mxu2  ;;  %17336 = vst [vmem:[#allocation16_spill] sm:$0xff] %v14112_v2 }
 0xa66   :  { %v4298_v50 = vadd.f32 %v4297_v35, %v4197_v42  ;;  %v1868_v42 = vld [vmem:[%s16740_s1 + $0xf30] sm:$0xff] }
 0xa68   :  { %9038 = vmatmul.msk.f32.gmra.mxu3 %vm2174_vm6, %v4298_v50  ;;  %5282 = vmatmul.f32.gmra.mxu1 %v1865_v18  ;;  %v1764_v50 = vld [vmem:[%s16740_s1 + $0xbf0] sm:$0xff]  ;;  %v17337_v18 = vld [vmem:[#allocation75_spill] sm:$0xff] }
 0xa6a   :  { %4762 = vmatmul.f32.gmra.mxu2 %v1761_v26  ;;  %v4203_v26 = vadd.f32 %v17337_v18, %v13960_v4  ;;  %v1874_v18 = vld [vmem:[%s16740_s1 + $0xf60] sm:$0xff] }
 0xa6b   :  { %v4434_v56 = vpop.f32.mrf.mxu3 }
 0xa6c   :  { %v14110_v25 = vadd.f32 %v4434_v56, %v17335_v61  ;;  %v17338_v56 = vld [vmem:[#allocation52_spill] sm:$0xff]  ;;  %v14129_v2 = vpop.f32.mrf.mxu1 }
 0xa6d   :  { %v4300_v62 = vpop.f32.mrf.mxu2  ;;  %17340 = vst [vmem:[#allocation25_spill] sm:$0xff] %v14129_v2  ;;  %v17344_v2 = vld [vmem:[#allocation20_spill] sm:$0xff] }
 0xa6e   :  { %v4301_v35 = vadd.f32 %v4300_v62, %v4200_v11  ;;  %v1871_v62 = vld [vmem:[%s16740_s1 + $0xf48] sm:$0xff] }
 0xa70   :  { %9039 = vmatmul.msk.f32.gmra.mxu3 %vm2174_vm6, %v4301_v35  ;;  %5285 = vmatmul.f32.gmra.mxu1 %v1868_v42  ;;  %v1767_v42 = vld [vmem:[%s16740_s1 + $0xc08] sm:$0xff]  ;;  %v17341_v35 = vld [vmem:[#allocation78_spill] sm:$0xff] }
 0xa72   :  { %4765 = vmatmul.f32.gmra.mxu2 %v1764_v50 }
 0xa73   :  { %v4437_v55 = vpop.f32.mrf.mxu3 }
 0xa74   :  { %v14124_v28 = vadd.f32 %v4437_v55, %v17338_v56 }
 0xa75   :  { %v4303_v61 = vpop.f32.mrf.mxu2 }
 0xa76   :  { %17339 = vst [vmem:[#allocation68_spill] sm:$0xff] %v14124_v28  ;;  %v4304_v11 = vadd.f32 %v4303_v61, %v4203_v26  ;;  %v17343_v26 = vld [vmem:[#allocation38_spill] sm:$0xff] }
 0xa77   :  { %v1770_v61 = vld [vmem:[%s16740_s1 + $0xc20] sm:$0xff] }
 0xa78   :  { %9040 = vmatmul.msk.f32.gmra.mxu3 %vm2174_vm6, %v4304_v11  ;;  %5288 = vmatmul.f32.gmra.mxu1 %v1871_v62  ;;  %v14146_v62 = vpop.f32.mrf.mxu1 }
 0xa79   :  { %17345 = vst [vmem:[#allocation26_spill] sm:$0xff] %v14146_v62 }
 0xa7a   :  { %4768 = vmatmul.f32.gmra.mxu2 %v1767_v42  ;;  %v17346_v42 = vld [vmem:[#allocation80_spill] sm:$0xff] }
 0xa7b   :  { %v4440_v4 = vpop.f32.mrf.mxu3 }
 0xa7c   :  { %v14136_v50 = vadd.f32 %v4440_v4, %v17341_v35 }
 0xa7d   :  { %v4721_v55 = vpop.f32.mrf.mxu2 }
 0xa7e   :  { %17342 = vst [vmem:[#allocation17_spill] sm:$0xff] %v14136_v50  ;;  %v4722_v56 = vadd.f32 %v4721_v55, %v17343_v26  ;;  %v1877_v55 = vld [vmem:[%s16740_s1 + $0xf78] sm:$0xff]  ;;  %v17347_v26 = vld [vmem:[#allocation40_spill] sm:$0xff] }
 0xa80   :  { %v4823_v28 = vadd.f32 %v17344_v2, %v4722_v56  ;;  %5291 = vmatmul.f32.gmra.mxu1 %v1874_v18  ;;  %v1773_v2 = vld [vmem:[%s16740_s1 + $0xc38] sm:$0xff] }
 0xa81   :  { %v17348_v18 = vld [vmem:[#allocation21_spill] sm:$0xff] }
 0xa82   :  { %4771 = vmatmul.f32.gmra.mxu2 %v1770_v61  ;;  %9069 = vmatmul.msk.f32.vlgmr.msra.gmra.mxu3 %vm2174_vm6, %v4823_v28  ;;  %v14161_v28 = vpop.f32.mrf.mxu1 }
 0xa83   :  { %v4443_v11 = vpop.f32.mrf.mxu3  ;;  %17349 = vst [vmem:[#allocation69_spill] sm:$0xff] %v14161_v28 }
 0xa84   :  { %v14150_v4 = vadd.f32 %v4443_v11, %v17346_v42  ;;  %v17350_v11 = vld [vmem:[#allocation11_spill] sm:$0xff] }
 0xa85   :  { %v4724_v35 = vpop.f32.mrf.mxu2 }
 0xa86   :  { %v4725_v50 = vadd.f32 %v4724_v35, %v17347_v26  ;;  %v1880_v35 = vld [vmem:[%s16740_s1 + $0xf90] sm:$0xff] }
 0xa88   :  { %v4826_v56 = vadd.f32 %v17348_v18, %v4725_v50  ;;  %5294 = vmatmul.f32.gmra.mxu1 %v1877_v55  ;;  %v1776_v50 = vld [vmem:[%s16740_s1 + $0xc50] sm:$0xff]  ;;  %v17351_v55 = vld [vmem:[#allocation29_spill] sm:$0xff] }
 0xa8a   :  { %4774 = vmatmul.f32.gmra.mxu2 %v1773_v2  ;;  %9070 = vmatmul.msk.f32.gmra.mxu3 %vm2174_vm6, %v4826_v56  ;;  %v17352_v56 = vld [vmem:[#allocation37_spill] sm:$0xff] }
 0xa8b   :  { %v4446_v61 = vpop.f32.mrf.mxu3 }
 0xa8c   :  { %v14164_v42 = vadd.f32 %v4446_v61, %v17350_v11  ;;  %v14178_v11 = vpop.f32.mrf.mxu1 }
 0xa8d   :  { %v4727_v62 = vpop.f32.mrf.mxu2  ;;  %17353 = vst [vmem:[#allocation70_spill] sm:$0xff] %v14178_v11  ;;  %v1886_v11 = vld [vmem:[%s16740_s1 + $0xfc0] sm:$0xff] }
 0xa8e   :  { %v4728_v26 = vadd.f32 %v4727_v62, %v13702_v6  ;;  %v1883_v6 = vld [vmem:[%s16740_s1 + $0xfa8] sm:$0xff] }
 0xa90   :  { %v4829_v2 = vadd.f32 %v17351_v55, %v4728_v26  ;;  %5297 = vmatmul.f32.gmra.mxu1 %v1880_v35  ;;  %v1779_v35 = vld [vmem:[%s16740_s1 + $0xc68] sm:$0xff]  ;;  %v17354_v26 = vld [vmem:[#allocation30_spill] sm:$0xff] }
 0xa92   :  { %4777 = vmatmul.f32.gmra.mxu2 %v1776_v50  ;;  %9071 = vmatmul.msk.f32.gmra.mxu3 %vm2174_vm6, %v4829_v2  ;;  %v17355_v2 = vld [vmem:[#allocation13_spill] sm:$0xff] }
 0xa93   :  { %v4449_v18 = vpop.f32.mrf.mxu3 }
 0xa94   :  { %v14176_v61 = vadd.f32 %v4449_v18, %v17352_v56 }
 0xa95   :  { %v4730_v28 = vpop.f32.mrf.mxu2 }
 0xa96   :  { %v4731_v62 = vadd.f32 %v4730_v28, %v13717_v17  ;;  %v14196_v28 = vpop.f32.mrf.mxu1 }
 0xa98   :  { %v4832_v50 = vadd.f32 %v17354_v26, %v4731_v62  ;;  %5300 = vmatmul.f32.gmra.mxu1 %v1883_v6  ;;  %v1782_v6 = vld [vmem:[%s16740_s1 + $0xc80] sm:$0xff]  ;;  %v17356_v62 = vld [vmem:[#allocation31_spill] sm:$0xff] }
 0xa9a   :  { %4780 = vmatmul.f32.gmra.mxu2 %v1779_v35  ;;  %9072 = vmatmul.msk.f32.gmra.mxu3 %vm2174_vm6, %v4832_v50  ;;  %v17357_v50 = vld [vmem:[#allocation23_spill] sm:$0xff] }
 0xa9b   :  { %v4452_v55 = vpop.f32.mrf.mxu3 }
 0xa9c   :  { %v14190_v18 = vadd.f32 %v4452_v55, %v17355_v2 }
 0xa9d   :  { %v4733_v56 = vpop.f32.mrf.mxu2 }
 0xa9e   :  { %v4734_v17 = vadd.f32 %v4733_v56, %v13731_v19 }
 0xaa0   :  { %v4835_v35 = vadd.f32 %v17356_v62, %v4734_v17  ;;  %5819 = vmatmul.f32.vlgmr.msrb.gmra.mxu1 %v1886_v11  ;;  %v17358_v11 = vld [vmem:[#allocation32_spill] sm:$0xff]  ;;  %v17359_v17 = vld [vmem:[#allocation67_spill] sm:$0xff] }
 0xaa1   :  { %7003 = vmatpush.msrb.mxu1 %v17044_v30  ;;  %v1785_v30 = vld [vmem:[%s16740_s1 + $0xc98] sm:$0xff] }
 0xaa2   :  { %4783 = vmatmul.f32.gmra.mxu2 %v1782_v6  ;;  %9073 = vmatmul.msk.f32.gmra.mxu3 %vm2174_vm6, %v4835_v35  ;;  %v17360_v6 = vld [vmem:[#allocation33_spill] sm:$0xff]  ;;  %v17361_v35 = vld [vmem:[#allocation14_spill] sm:$0xff] }
 0xaa3   :  { %v4455_v26 = vpop.f32.mrf.mxu3  ;;  %7004 = vmatpush.msrb.mxu1 %v17045_v52 }
 0xaa4   :  { %v14206_v55 = vadd.f32 %v4455_v26, %v17357_v50  ;;  %v17362_v26 = vld [vmem:[#allocation34_spill] sm:$0xff] }
 0xaa5   :  { %v4736_v19 = vpop.f32.mrf.mxu2  ;;  %7005 = vmatpush.msrb.mxu1 %v17046_v33 }
 0xaa6   :  { %v4737_v2 = vadd.f32 %v4736_v19, %v13743_v8  ;;  %v17363_v19 = vld [vmem:[#allocation85_spill] sm:$0xff] }
 0xaa7   :  { %7006 = vmatpush.msrb.mxu1 %v17107_v53 }
 0xaa8   :  { %v4838_v56 = vadd.f32 %v17358_v11, %v4737_v2  ;;  %v17364_v2 = vld [vmem:[#allocation36_spill] sm:$0xff]  ;;  %v17365_v11 = vld [vmem:[#allocation86_spill] sm:$0xff] }
 0xaa9   :  { %7007 = vmatpush.msrb.mxu1 %v17108_v40  ;;  %v1788_v40 = vld [vmem:[%s16740_s1 + $0xcb0] sm:$0xff] }
 0xaaa   :  { %4786 = vmatmul.f32.gmra.mxu2 %v1785_v30  ;;  %9074 = vmatmul.msk.f32.gmra.mxu3 %vm2174_vm6, %v4838_v56 }
 0xaab   :  { %v4458_v52 = vpop.f32.mrf.mxu3  ;;  %7008 = vmatpush.msrb.mxu1 %v17110_v22 }
 0xaac   :  { %v14219_v33 = vadd.f32 %v4458_v52, %v17359_v17 }
 0xaad   :  { %v4739_v8 = vpop.f32.mrf.mxu2  ;;  %7009 = vmatpush.msrb.mxu1 %v17112_v1 }
 0xaae   :  { %v4740_v53 = vadd.f32 %v4739_v8, %v13757_v29 }
 0xaaf   :  { %7010 = vmatpush.msrb.mxu1 %v17113_v60 }
 0xab0   :  { %v4841_v62 = vadd.f32 %v17360_v6, %v4740_v53  ;;  %v17367_v53 = vld [vmem:[#allocation87_spill] sm:$0xff] }
 0xab1   :  { %7011 = vmatpush.msrb.mxu1 %v17114_v43  ;;  %v1791_v43 = vld [vmem:[%s16740_s1 + $0xcc8] sm:$0xff] }
 0xab2   :  { %4789 = vmatmul.f32.gmra.mxu2 %v1788_v40  ;;  %9075 = vmatmul.msk.f32.gmra.mxu3 %vm2174_vm6, %v4841_v62 }
 0xab3   :  { %v4461_v22 = vpop.f32.mrf.mxu3  ;;  %7012 = vmatpush.msrb.mxu1 %v17116_v15 }
 0xab4   :  { %v14232_v1 = vadd.f32 %v4461_v22, %v17361_v35  ;;  %v17368_v22 = vld [vmem:[#allocation56_spill] sm:$0xff] }
 0xab5   :  { %v4742_v29 = vpop.f32.mrf.mxu2  ;;  %7013 = vmatpush.msrb.mxu1 %v17118_v16 }
 0xab6   :  { %v4743_v60 = vadd.f32 %v4742_v29, %v13771_v12 }
 0xab7   :  { %7014 = vmatpush.msrb.mxu1 %v17119_v10 }
 0xab8   :  { %v4844_v50 = vadd.f32 %v17362_v26, %v4743_v60  ;;  %v17369_v60 = vld [vmem:[#allocation88_spill] sm:$0xff] }
 0xab9   :  { %7015 = vmatpush.msrb.mxu1 %v17120_v58  ;;  %v1794_v58 = vld [vmem:[%s16740_s1 + $0xce0] sm:$0xff] }
 0xaba   :  { %4792 = vmatmul.f32.gmra.mxu2 %v1791_v43  ;;  %9076 = vmatmul.msk.f32.gmra.mxu3 %vm2174_vm6, %v4844_v50 }
 0xabb   :  { %v4464_v15 = vpop.f32.mrf.mxu3  ;;  %7016 = vmatpush.msrb.mxu1 %v17122_v13 }
 0xabc   :  { %v14245_v16 = vadd.f32 %v4464_v15, %v17363_v19  ;;  %v17370_v15 = vld [vmem:[#allocation55_spill] sm:$0xff] }
 0xabd   :  { %v4745_v12 = vpop.f32.mrf.mxu2  ;;  %7017 = vmatpush.msrb.mxu1 %v17203_v57 }
 0xabe   :  { %v4746_v10 = vadd.f32 %v4745_v12, %v13786_v24  ;;  %v17366_v24 = vld [vmem:[#allocation57_spill] sm:$0xff] }
 0xabf   :  { %7018 = vmatpush.msrb.mxu1 %v17205_v0  ;;  %v1797_v0 = vld [vmem:[%s16740_s1 + $0xcf8] sm:$0xff] }
 0xac0   :  { %v4847_v30 = vadd.f32 %v17364_v2, %v4746_v10  ;;  %v17371_v10 = vld [vmem:[#allocation89_spill] sm:$0xff] }
 0xac2   :  { %4795 = vmatmul.f32.gmra.mxu2 %v1794_v58  ;;  %9077 = vmatmul.msk.f32.gmra.mxu3 %vm2174_vm6, %v4847_v30  ;;  %v1806_v30 = vld [vmem:[%s16740_s1 + $0xd40] sm:$0xff] }
 0xac3   :  { %v4467_v13 = vpop.f32.mrf.mxu3 }
 0xac4   :  { %v14256_v56 = vadd.f32 %v4467_v13, %v17365_v11  ;;  %v17372_v13 = vld [vmem:[#allocation43_spill] sm:$0xff] }
 0xac5   :  { %v4748_v52 = vpop.f32.mrf.mxu2 }
 0xac6   :  { %v4749_v57 = vadd.f32 %v4748_v52, %v13804_v23  ;;  %v1800_v23 = vld [vmem:[%s16740_s1 + $0xd10] sm:$0xff] }
 0xac8   :  { %v4850_v17 = vadd.f32 %v17366_v24, %v4749_v57  ;;  %v17373_v57 = vld [vmem:[#allocation90_spill] sm:$0xff] }
 0xaca   :  { %4798 = vmatmul.f32.gmra.mxu2 %v1797_v0  ;;  %9078 = vmatmul.msk.f32.gmra.mxu3 %vm2174_vm6, %v4850_v17  ;;  %v1809_v17 = vld [vmem:[%s16740_s1 + $0xd58] sm:$0xff] }
 0xacb   :  { %v4470_v8 = vpop.f32.mrf.mxu3 }
 0xacc   :  { %v14265_v40 = vadd.f32 %v4470_v8, %v17367_v53  ;;  %v17374_v8 = vld [vmem:[#allocation54_spill] sm:$0xff] }
 0xacd   :  { %v4751_v6 = vpop.f32.mrf.mxu2 }
 0xace   :  { %v4752_v62 = vadd.f32 %v4751_v6, %v13820_v7  ;;  %v1803_v7 = vld [vmem:[%s16740_s1 + $0xd28] sm:$0xff] }
 0xad0   :  { %v4853_v35 = vadd.f32 %v17368_v22, %v4752_v62  ;;  %v17375_v62 = vld [vmem:[#allocation91_spill] sm:$0xff] }
 0xad2   :  { %4801 = vmatmul.f32.gmra.mxu2 %v1800_v23  ;;  %9079 = vmatmul.msk.f32.gmra.mxu3 %vm2174_vm6, %v4853_v35  ;;  %v1812_v35 = vld [vmem:[%s16740_s1 + $0xd70] sm:$0xff] }
 0xad3   :  { %v4473_v29 = vpop.f32.mrf.mxu3 }
 0xad4   :  { %v14274_v43 = vadd.f32 %v4473_v29, %v17369_v60  ;;  %v17376_v29 = vld [vmem:[#allocation46_spill] sm:$0xff] }
 0xad5   :  { %v4754_v26 = vpop.f32.mrf.mxu2 }
 0xad6   :  { %v4755_v50 = vadd.f32 %v4754_v26, %v13838_v27  ;;  %v17377_v26 = vld [vmem:[#allocation27_spill] sm:$0xff] }
 0xad8   :  { %v4856_v19 = vadd.f32 %v17370_v15, %v4755_v50 }
 0xada   :  { %9080 = vmatmul.msk.f32.gmra.mxu3 %vm2174_vm6, %v4856_v19  ;;  %5320 = vmatmul.f32.vlgmr.msra.gmra.mxu2 %v1803_v7  ;;  %v17378_v7 = vld [vmem:[#allocation92_spill] sm:$0xff] }
 0xadb   :  { %6504 = vmatpush.msra.mxu2 %v17217_v45  ;;  %v4476_v12 = vpop.f32.mrf.mxu3 }
 0xadc   :  { %v14284_v58 = vadd.f32 %v4476_v12, %v17371_v10  ;;  %v17380_v12 = vld [vmem:[#allocation93_spill] sm:$0xff] }
 0xadd   :  { %6505 = vmatpush.msra.mxu2 %v17220_v37  ;;  %v4757_v2 = vpop.f32.mrf.mxu2 }
 0xade   :  { %v4758_v27 = vadd.f32 %v4757_v2, %v13855_v51  ;;  %v17381_v2 = vld [vmem:[#allocation18_spill] sm:$0xff] }
 0xadf   :  { %6506 = vmatpush.msra.mxu2 %v17222_v47 }
 0xae0   :  { %v4859_v11 = vadd.f32 %v17372_v13, %v4758_v27  ;;  %v1815_v27 = vld [vmem:[%s16740_s1 + $0xd88] sm:$0xff] }
 0xae1   :  { %6507 = vmatpush.msra.mxu2 %v17223_v31 }
 0xae2   :  { %9081 = vmatmul.msk.f32.gmra.mxu3 %vm2174_vm6, %v4859_v11  ;;  %5323 = vmatmul.f32.gmra.mxu2 %v1806_v30  ;;  %v17382_v30 = vld [vmem:[#allocation58_spill] sm:$0xff]  ;;  %v17383_v11 = vld [vmem:[#allocation19_spill] sm:$0xff] }
 0xae3   :  { %6508 = vmatpush.msra.mxu2 %v17225_v5  ;;  %v4479_v52 = vpop.f32.mrf.mxu3 }
 0xae4   :  { %v14297_v0 = vadd.f32 %v4479_v52, %v17373_v57  ;;  %v17384_v57 = vld [vmem:[#allocation44_spill] sm:$0xff] }
 0xae5   :  { %6509 = vmatpush.msra.mxu2 %v17228_v36  ;;  %v4760_v51 = vpop.f32.mrf.mxu2 }
 0xae6   :  { %v4761_v24 = vadd.f32 %v4760_v51, %v13869_v14 }
 0xae7   :  { %6510 = vmatpush.msra.mxu2 %v17230_v21 }
 0xae8   :  { %v4862_v53 = vadd.f32 %v17374_v8, %v4761_v24 }
 0xae9   :  { %6511 = vmatpush.msra.mxu2 %v17231_v39 }
 0xaea   :  { %9082 = vmatmul.msk.f32.gmra.mxu3 %vm2174_vm6, %v4862_v53  ;;  %5326 = vmatmul.f32.gmra.mxu2 %v1809_v17  ;;  %v17385_v17 = vld [vmem:[#allocation45_spill] sm:$0xff]  ;;  %v1818_v53 = vld [vmem:[%s16740_s1 + $0xda0] sm:$0xff] }
 0xaeb   :  { %6512 = vmatpush.msra.mxu2 %v17296_v54  ;;  %v4482_v6 = vpop.f32.mrf.mxu3 }
 0xaec   :  { %v14310_v23 = vadd.f32 %v4482_v6, %v17375_v62  ;;  %v17386_v6 = vld [vmem:[#allocation48_spill] sm:$0xff] }
 0xaed   :  { %6513 = vmatpush.msra.mxu2 %v17298_v34  ;;  %v4763_v14 = vpop.f32.mrf.mxu2 }
 0xaee   :  { %v4764_v22 = vadd.f32 %v4763_v14, %v13883_v44  ;;  %v17379_v44 = vld [vmem:[#allocation28_spill] sm:$0xff] }
 0xaef   :  { %6514 = vmatpush.msra.mxu2 %v17299_v9 }
 0xaf0   :  { %v4865_v60 = vadd.f32 %v17376_v29, %v4764_v22 }
 0xaf1   :  { %6515 = vmatpush.msra.mxu2 %v17300_v46 }
 0xaf2   :  { %9083 = vmatmul.msk.f32.gmra.mxu3 %vm2174_vm6, %v4865_v60  ;;  %5329 = vmatmul.f32.gmra.mxu2 %v1812_v35  ;;  %v17387_v35 = vld [vmem:[#allocation94_spill] sm:$0xff] }
 0xaf3   :  { %6516 = vmatpush.msra.mxu2 %v17377_v26  ;;  %v4485_v50 = vpop.f32.mrf.mxu3 }
 0xaf4   :  { %v14323_v15 = vadd.f32 %v4485_v50, %v17378_v7  ;;  %v1821_v50 = vld [vmem:[%s16740_s1 + $0xdb8] sm:$0xff]  ;;  %v17388_v7 = vld [vmem:[#allocation50_spill] sm:$0xff] }
 0xaf5   :  { %6517 = vmatpush.msra.mxu2 %v17379_v44  ;;  %v4766_v19 = vpop.f32.mrf.mxu2 }
 0xaf6   :  { %v4767_v10 = vadd.f32 %v4766_v19, %v17380_v12 }
 0xaf7   :  { %6518 = vmatpush.msra.mxu2 %v17381_v2 }
 0xaf8   :  { %v4868_v13 = vadd.f32 %v17382_v30, %v4767_v10 }
 0xaf9   :  { %6519 = vmatpush.msra.mxu2 %v17383_v11 }
 0xafa   :  { %9084 = vmatmul.msk.f32.gmra.mxu3 %vm2174_vm6, %v4868_v13  ;;  %5332 = vmatmul.f32.gmra.mxu2 %v1815_v27  ;;  %v17389_v27 = vld [vmem:[#allocation53_spill] sm:$0xff] }
 0xafb   :  { %v4488_v52 = vpop.f32.mrf.mxu3 }
 0xafc   :  { %v14335_v51 = vadd.f32 %v4488_v52, %v17384_v57  ;;  %v17390_v52 = vld [vmem:[#allocation51_spill] sm:$0xff] }
 0xafd   :  { %v4769_v24 = vpop.f32.mrf.mxu2 }
 0xafe   :  { %v4770_v8 = vadd.f32 %v4769_v24, %v17385_v17 }
 0xb00   :  { %v4871_v62 = vadd.f32 %v17386_v6, %v4770_v8  ;;  %v17391_v8 = vld [vmem:[#allocation95_spill] sm:$0xff] }
 0xb02   :  { %9085 = vmatmul.msk.f32.gmra.mxu3 %vm2174_vm6, %v4871_v62  ;;  %5335 = vmatmul.f32.gmra.mxu2 %v1818_v53  ;;  %v17392_v62 = vld [vmem:[#allocation49_spill] sm:$0xff] }
 0xb05   :  { %v4772_v14 = vpop.f32.mrf.mxu2  ;;  %v5007_v22 = vpop.f32.mrf.mxu3 }
 0xb06   :  { %v4773_v29 = vadd.f32 %v4772_v14, %v17387_v35  ;;  %v14345_v60 = vadd.f32 %v5007_v22, %v13976_v63  ;;  %v1824_v63 = vld [vmem:[%s16740_s1 + $0xdd0] sm:$0xff] }
 0xb08   :  { %v4874_v19 = vadd.f32 %v17388_v7, %v4773_v29  ;;  %v17393_v29 = vld [vmem:[#allocation47_spill] sm:$0xff] }
 0xb0a   :  { %9086 = vmatmul.msk.f32.gmra.mxu3 %vm2174_vm6, %v4874_v19  ;;  %5338 = vmatmul.f32.gmra.mxu2 %v1821_v50  ;;  %v17394_v19 = vld [vmem:[#allocation60_spill] sm:$0xff] }
 0xb0d   :  { %v4775_v12 = vpop.f32.mrf.mxu2  ;;  %v5010_v10 = vpop.f32.mrf.mxu3 }
 0xb0e   :  { %v4776_v30 = vadd.f32 %v4775_v12, %v17389_v27  ;;  %v14354_v13 = vadd.f32 %v5010_v10, %v13990_v3  ;;  %v1827_v3 = vld [vmem:[%s16740_s1 + $0xde8] sm:$0xff] }
 0xb10   :  { %v4877_v57 = vadd.f32 %v17390_v52, %v4776_v30  ;;  %v17395_v30 = vld [vmem:[#allocation96_spill] sm:$0xff] }
 0xb12   :  { %9087 = vmatmul.msk.f32.gmra.mxu3 %vm2174_vm6, %v4877_v57  ;;  %5341 = vmatmul.f32.gmra.mxu2 %v1824_v63  ;;  %v17396_v57 = vld [vmem:[#allocation61_spill] sm:$0xff] }
 0xb15   :  { %v4778_v24 = vpop.f32.mrf.mxu2  ;;  %v5013_v17 = vpop.f32.mrf.mxu3 }
 0xb16   :  { %v4779_v53 = vadd.f32 %v4778_v24, %v17391_v8  ;;  %v14363_v6 = vadd.f32 %v5013_v17, %v14004_v38  ;;  %v1830_v38 = vld [vmem:[%s16740_s1 + $0xe00] sm:$0xff] }
 0xb18   :  { %v4880_v14 = vadd.f32 %v17392_v62, %v4779_v53  ;;  %v17397_v53 = vld [vmem:[#allocation79_spill] sm:$0xff] }
 0xb1a   :  { %9088 = vmatmul.msk.f32.gmra.mxu3 %vm2174_vm6, %v4880_v14  ;;  %5344 = vmatmul.f32.gmra.mxu2 %v1827_v3  ;;  %v17398_v14 = vld [vmem:[#allocation2_spill] sm:$0xff] }
 0xb1d   :  { %v4781_v22 = vpop.f32.mrf.mxu2  ;;  %v5016_v35 = vpop.f32.mrf.mxu3 }
 0xb1e   :  { %v4782_v50 = vadd.f32 %v4781_v22, %v17393_v29  ;;  %v14372_v7 = vadd.f32 %v5016_v35, %v14018_v41  ;;  %v1833_v41 = vld [vmem:[%s16740_s1 + $0xe18] sm:$0xff] }
 0xb20   :  { %v4883_v12 = vadd.f32 %v17394_v19, %v4782_v50  ;;  %v17399_v50 = vld [vmem:[#allocation97_spill] sm:$0xff] }
 0xb22   :  { %9089 = vmatmul.msk.f32.gmra.mxu3 %vm2174_vm6, %v4883_v12  ;;  %5347 = vmatmul.f32.gmra.mxu2 %v1830_v38  ;;  %v17400_v12 = vld [vmem:[#allocation3_spill] sm:$0xff] }
 0xb25   :  { %v4784_v10 = vpop.f32.mrf.mxu2  ;;  %v5019_v27 = vpop.f32.mrf.mxu3 }
 0xb26   :  { %v4785_v63 = vadd.f32 %v4784_v10, %v17395_v30  ;;  %v14381_v52 = vadd.f32 %v5019_v27, %v14030_v49  ;;  %v1836_v49 = vld [vmem:[%s16740_s1 + $0xe30] sm:$0xff]  ;;  %v2161_v27 = vld [vmem:[%s16741_s7 + $0xb8] sm:$0xff] }
 0xb27   :  { %5602 = vmatpush.msrb.mxu3 %v2161_v27  ;;  %v17405_v27 = vld [vmem:[#allocation83_spill] sm:$0xff] }
 0xb28   :  { %v4886_v24 = vadd.f32 %v17396_v57, %v4785_v63 }
 0xb2a   :  { %9090 = vmatmul.msk.f32.gmra.mxu3 %vm2174_vm6, %v4886_v24  ;;  %5350 = vmatmul.f32.gmra.mxu2 %v1833_v41  ;;  %v17401_v41 = vld [vmem:[#allocation81_spill] sm:$0xff]  ;;  %v2160_v24 = vld [vmem:[%s16741_s7 + $0xb0] sm:$0xff] }
 0xb2b   :  { %5603 = vmatpush.msrb.mxu3 %v2160_v24 }
 0xb2d   :  { %v4787_v17 = vpop.f32.mrf.mxu2  ;;  %v5022_v8 = vpop.f32.mrf.mxu3 }
 0xb2e   :  { %v4788_v3 = vadd.f32 %v4787_v17, %v17397_v53  ;;  %v14390_v62 = vadd.f32 %v5022_v8, %v14044_v32  ;;  %v1839_v32 = vld [vmem:[%s16740_s1 + $0xe48] sm:$0xff]  ;;  %v1842_v17 = vld [vmem:[%s16740_s1 + $0xe60] sm:$0xff] }
 0xb2f   :  { %v17402_v8 = vld [vmem:[#allocation10_spill] sm:$0xff] }
 0xb30   :  { %v4889_v22 = vadd.f32 %v17398_v14, %v4788_v3  ;;  %v2159_v3 = vld [vmem:[%s16741_s7 + $0xa8] sm:$0xff] }
 0xb31   :  { %5604 = vmatpush.msrb.mxu3 %v2159_v3  ;;  %v17408_v3 = vld [vmem:[#allocation68_spill] sm:$0xff] }
 0xb32   :  { %9091 = vmatmul.msk.f32.gmra.mxu3 %vm2174_vm6, %v4889_v22  ;;  %5353 = vmatmul.f32.gmra.mxu2 %v1836_v49  ;;  %v17403_v22 = vld [vmem:[#allocation98_spill] sm:$0xff] }
 0xb35   :  { %v4790_v35 = vpop.f32.mrf.mxu2  ;;  %v5025_v29 = vpop.f32.mrf.mxu3 }
 0xb36   :  { %v4791_v38 = vadd.f32 %v4790_v35, %v17399_v50  ;;  %v14399_v19 = vadd.f32 %v5025_v29, %v14058_v48  ;;  %v1845_v50 = vld [vmem:[%s16740_s1 + $0xe78] sm:$0xff] }
 0xb38   :  { %v4892_v10 = vadd.f32 %v17400_v12, %v4791_v38  ;;  %v17404_v38 = vld [vmem:[#allocation6_spill] sm:$0xff] }
 0xb3a   :  { %9092 = vmatmul.msk.f32.gmra.mxu3 %vm2174_vm6, %v4892_v10  ;;  %5356 = vmatmul.f32.gmra.mxu2 %v1839_v32 }
 0xb3d   :  { %v4793_v30 = vpop.f32.mrf.mxu2  ;;  %v5028_v63 = vpop.f32.mrf.mxu3 }
 0xb3e   :  { %v4794_v57 = vadd.f32 %v4793_v30, %v17401_v41  ;;  %v14411_v48 = vadd.f32 %v5028_v63, %v14072_v59  ;;  %v2158_v59 = vld [vmem:[%s16741_s7 + $0xa0] sm:$0xff]  ;;  %v17406_v41 = vld [vmem:[#allocation59_spill] sm:$0xff] }
 0xb3f   :  { %5605 = vmatpush.msrb.mxu3 %v2158_v59 }
 0xb40   :  { %v4895_v53 = vadd.f32 %v17402_v8, %v4794_v57  ;;  %v17407_v8 = vld [vmem:[#allocation16_spill] sm:$0xff] }
 0xb42   :  { %9093 = vmatmul.msk.f32.gmra.mxu3 %vm2174_vm6, %v4895_v53  ;;  %5359 = vmatmul.f32.gmra.mxu2 %v1842_v17 }
 0xb45   :  { %v4796_v49 = vpop.f32.mrf.mxu2  ;;  %v5031_v14 = vpop.f32.mrf.mxu3 }
 0xb46   :  { %v4797_v35 = vadd.f32 %v4796_v49, %v17403_v22  ;;  %v14429_v29 = vadd.f32 %v5031_v14, %v14098_v20  ;;  %v1848_v20 = vld [vmem:[%s16740_s1 + $0xe90] sm:$0xff]  ;;  %v17409_v49 = vld [vmem:[#allocation41_spill] sm:$0xff] }
 0xb48   :  { %v4898_v32 = vadd.f32 %v17404_v38, %v4797_v35 }
 0xb4a   :  { %9094 = vmatmul.msk.f32.gmra.mxu3 %vm2174_vm6, %v4898_v32  ;;  %5362 = vmatmul.f32.gmra.mxu2 %v1845_v50  ;;  %v17410_v50 = vld [vmem:[#allocation17_spill] sm:$0xff] }
 0xb4b   :  { %v17411_v32 = vld [vmem:[#allocation25_spill] sm:$0xff] }
 0xb4d   :  { %v4799_v12 = vpop.f32.mrf.mxu2  ;;  %v5034_v10 = vpop.f32.mrf.mxu3 }
 0xb4e   :  { %v4800_v30 = vadd.f32 %v4799_v12, %v17405_v27  ;;  %v14438_v63 = vadd.f32 %v5034_v10, %v14110_v25  ;;  %v1851_v25 = vld [vmem:[%s16740_s1 + $0xea8] sm:$0xff]  ;;  %v1854_v10 = vld [vmem:[%s16740_s1 + $0xec0] sm:$0xff]  ;;  %v17412_v27 = vld [vmem:[#allocation9_spill] sm:$0xff] }
 0xb50   :  { %v4901_v57 = vadd.f32 %v17406_v41, %v4800_v30 }
 0xb52   :  { %9095 = vmatmul.msk.f32.gmra.mxu3 %vm2174_vm6, %v4901_v57  ;;  %5365 = vmatmul.f32.gmra.mxu2 %v1848_v20 }
 0xb55   :  { %v4802_v24 = vpop.f32.mrf.mxu2  ;;  %v5037_v17 = vpop.f32.mrf.mxu3 }
 0xb56   :  { %v4803_v53 = vadd.f32 %v4802_v24, %v17407_v8  ;;  %v14447_v59 = vadd.f32 %v5037_v17, %v17408_v3  ;;  %v17413_v24 = vld [vmem:[#allocation26_spill] sm:$0xff]  ;;  %v5235_v8 = vpop.f32.mrf.mxu1  ;;  %v1857_v3 = vld [vmem:[%s16740_s1 + $0xed8] sm:$0xff] }
 0xb58   :  { %v4904_v14 = vadd.f32 %v17409_v49, %v4803_v53  ;;  %v5437_v53 = vpop.f32.mrf.mxu0 }
 0xb5a   :  { %9096 = vmatmul.msk.f32.gmra.mxu3 %vm2174_vm6, %v4904_v14  ;;  %5368 = vmatmul.f32.gmra.mxu2 %v1851_v25  ;;  %v17414_v25 = vld [vmem:[#allocation4_spill] sm:$0xff] }
 0xb5d   :  { %v5040_v22 = vpop.f32.mrf.mxu3  ;;  %v5321_v35 = vpop.f32.mrf.mxu2 }
 0xb5e   :  { %v14455_v38 = vadd.f32 %v5040_v22, %v17410_v50  ;;  %v5322_v12 = vadd.f32 %v5321_v35, %v17411_v32  ;;  %v5238_v32 = vpop.f32.mrf.mxu1 }
 0xb60   :  { %v5423_v30 = vadd.f32 %v17412_v27, %v5322_v12  ;;  %v5440_v12 = vpop.f32.mrf.mxu0  ;;  %v17416_v27 = vld [vmem:[#allocation5_spill] sm:$0xff] }
 0xb62   :  { %5371 = vmatmul.f32.gmra.mxu2 %v1854_v10  ;;  %9125 = vmatmul.msk.f32.vlgmr.msrb.gmra.mxu3 %vm2174_vm6, %v5423_v30  ;;  %v1860_v10 = vld [vmem:[%s16740_s1 + $0xef0] sm:$0xff] }
 0xb65   :  { %v5043_v20 = vpop.f32.mrf.mxu3  ;;  %v5324_v41 = vpop.f32.mrf.mxu2 }
 0xb66   :  { %v14464_v57 = vadd.f32 %v5043_v20, %v14150_v4  ;;  %v5325_v17 = vadd.f32 %v5324_v41, %v17413_v24  ;;  %v17415_v4 = vld [vmem:[#allocation69_spill] sm:$0xff] }
 0xb68   :  { %v5426_v49 = vadd.f32 %v17414_v25, %v5325_v17  ;;  %v5443_v25 = vpop.f32.mrf.mxu0 }
 0xb6a   :  { %5374 = vmatmul.f32.gmra.mxu2 %v1857_v3  ;;  %9126 = vmatmul.msk.f32.gmra.mxu3 %vm2174_vm6, %v5426_v49  ;;  %v5241_v3 = vpop.f32.mrf.mxu1  ;;  %v1863_v49 = vld [vmem:[%s16740_s1 + $0xf08] sm:$0xff] }
 0xb6d   :  { %v5046_v14 = vpop.f32.mrf.mxu3  ;;  %v5327_v22 = vpop.f32.mrf.mxu2 }
 0xb6e   :  { %v14473_v35 = vadd.f32 %v5046_v14, %v14164_v42  ;;  %v5328_v50 = vadd.f32 %v5327_v22, %v17415_v4  ;;  %v17417_v42 = vld [vmem:[#allocation70_spill] sm:$0xff]  ;;  %v17418_v14 = vld [vmem:[#allocation7_spill] sm:$0xff] }
 0xb70   :  { %v5429_v30 = vadd.f32 %v17416_v27, %v5328_v50 }
 0xb72   :  { %5377 = vmatmul.f32.gmra.mxu2 %v1860_v10  ;;  %9127 = vmatmul.msk.f32.gmra.mxu3 %vm2174_vm6, %v5429_v30  ;;  %v5244_v27 = vpop.f32.mrf.mxu1  ;;  %v5446_v30 = vpop.f32.mrf.mxu0 }
 0xb75   :  { %v5049_v20 = vpop.f32.mrf.mxu3  ;;  %v5330_v41 = vpop.f32.mrf.mxu2 }
 0xb76   :  { %v14482_v24 = vadd.f32 %v5049_v20, %v14176_v61  ;;  %v5331_v17 = vadd.f32 %v5330_v41, %v17417_v42  ;;  %v1866_v20 = vld [vmem:[%s16740_s1 + $0xf20] sm:$0xff]  ;;  %v17420_v41 = vld [vmem:[#allocation65_spill] sm:$0xff] }
 0xb78   :  { %v5432_v22 = vadd.f32 %v17418_v14, %v5331_v17 }
 0xb7a   :  { %5380 = vmatmul.f32.gmra.mxu2 %v1863_v49  ;;  %9128 = vmatmul.msk.f32.gmra.mxu3 %vm2174_vm6, %v5432_v22  ;;  %v5247_v22 = vpop.f32.mrf.mxu1 }
 0xb7d   :  { %v5052_v4 = vpop.f32.mrf.mxu3  ;;  %v5333_v50 = vpop.f32.mrf.mxu2 }
 0xb7e   :  { %v14491_v10 = vadd.f32 %v5052_v4, %v14190_v18  ;;  %v5334_v61 = vadd.f32 %v5333_v50, %v14196_v28  ;;  %v5449_v4 = vpop.f32.mrf.mxu0  ;;  %v1869_v28 = vld [vmem:[%s16740_s1 + $0xf38] sm:$0xff] }
 0xb80   :  { %17419 = vst [vmem:[#allocation82_spill] sm:$0xff] %v14491_v10  ;;  %v5435_v42 = vadd.f32 %v17420_v41, %v5334_v61 }
 0xb82   :  { %5383 = vmatmul.f32.gmra.mxu2 %v1866_v20  ;;  %9129 = vmatmul.msk.f32.gmra.mxu3 %vm2174_vm6, %v5435_v42  ;;  %v5250_v10 = vpop.f32.mrf.mxu1 }
 0xb85   :  { %v5055_v17 = vpop.f32.mrf.mxu3  ;;  %v5336_v49 = vpop.f32.mrf.mxu2 }
 0xb86   :  { %v14500_v14 = vadd.f32 %v5055_v17, %v14206_v55  ;;  %v5337_v18 = vadd.f32 %v5336_v49, %v5235_v8  ;;  %v5452_v55 = vpop.f32.mrf.mxu0  ;;  %v1872_v8 = vld [vmem:[%s16740_s1 + $0xf50] sm:$0xff] }
 0xb88   :  { %v5438_v50 = vadd.f32 %v5437_v53, %v5337_v18 }
 0xb8a   :  { %5386 = vmatmul.f32.gmra.mxu2 %v1869_v28  ;;  %9130 = vmatmul.msk.f32.gmra.mxu3 %vm2174_vm6, %v5438_v50  ;;  %v5253_v50 = vpop.f32.mrf.mxu1 }
 0xb8d   :  { %v5058_v61 = vpop.f32.mrf.mxu3  ;;  %v5339_v20 = vpop.f32.mrf.mxu2 }
 0xb8e   :  { %v14507_v41 = vadd.f32 %v5058_v61, %v14219_v33  ;;  %v5340_v42 = vadd.f32 %v5339_v20, %v5238_v32  ;;  %v5455_v33 = vpop.f32.mrf.mxu0  ;;  %v1875_v32 = vld [vmem:[%s16740_s1 + $0xf68] sm:$0xff] }
 0xb90   :  { %v5441_v17 = vadd.f32 %v5440_v12, %v5340_v42 }
 0xb92   :  { %5389 = vmatmul.f32.gmra.mxu2 %v1872_v8  ;;  %9131 = vmatmul.msk.f32.gmra.mxu3 %vm2174_vm6, %v5441_v17  ;;  %v5256_v17 = vpop.f32.mrf.mxu1 }
 0xb95   :  { %v5061_v53 = vpop.f32.mrf.mxu3  ;;  %v5342_v49 = vpop.f32.mrf.mxu2 }
 0xb96   :  { %v14514_v18 = vadd.f32 %v5061_v53, %v14232_v1  ;;  %v5343_v28 = vadd.f32 %v5342_v49, %v5241_v3  ;;  %v1878_v1 = vld [vmem:[%s16740_s1 + $0xf80] sm:$0xff]  ;;  %v5458_v3 = vpop.f32.mrf.mxu0 }
 0xb98   :  { %v5444_v61 = vadd.f32 %v5443_v25, %v5343_v28 }
 0xb9a   :  { %5392 = vmatmul.f32.gmra.mxu2 %v1875_v32  ;;  %9132 = vmatmul.msk.f32.gmra.mxu3 %vm2174_vm6, %v5444_v61  ;;  %v5259_v61 = vpop.f32.mrf.mxu1 }
 0xb9d   :  { %v5064_v12 = vpop.f32.mrf.mxu3  ;;  %v5345_v20 = vpop.f32.mrf.mxu2 }
 0xb9e   :  { %v14521_v42 = vadd.f32 %v5064_v12, %v14245_v16  ;;  %v5346_v8 = vadd.f32 %v5345_v20, %v5244_v27  ;;  %v1881_v16 = vld [vmem:[%s16740_s1 + $0xf98] sm:$0xff]  ;;  %v14533_v27 = vpop.f32.mrf.mxu0 }
 0xba0   :  { %v5447_v53 = vadd.f32 %v5446_v30, %v5346_v8  ;;  %v1889_v30 = vld [vmem:[%s16740_s1 + $0xfd8] sm:$0xff] }
 0xba1   :  { %5822 = vmatmul.f32.gmra.mxu1 %v1889_v30 }
 0xba2   :  { %5395 = vmatmul.f32.gmra.mxu2 %v1878_v1  ;;  %9133 = vmatmul.msk.f32.gmra.mxu3 %vm2174_vm6, %v5447_v53  ;;  %v14546_v1 = vpop.f32.mrf.mxu1  ;;  %v1884_v53 = vld [vmem:[%s16740_s1 + $0xfb0] sm:$0xff] }
 0xba5   :  { %v5067_v25 = vpop.f32.mrf.mxu3  ;;  %v5348_v49 = vpop.f32.mrf.mxu2 }
 0xba6   :  { %v14528_v28 = vadd.f32 %v5067_v25, %v14256_v56  ;;  %v5349_v32 = vadd.f32 %v5348_v49, %v5247_v22  ;;  %v1891_v56 = vld [vmem:[%s16740_s1 + $0xfe8] sm:$0xff]  ;;  %v14551_v25 = vpop.f32.mrf.mxu0 }
 0xba7   :  { %9154 = vmatmul.msk.f32.gmra.mxu0 %vm2174_vm6, %v1891_v56  ;;  %v1887_v56 = vld [vmem:[%s16740_s1 + $0xfc8] sm:$0xff] }
 0xba8   :  { %v5450_v12 = vadd.f32 %v5449_v4, %v5349_v32  ;;  %v1892_v32 = vld [vmem:[%s16740_s1 + $0xff0] sm:$0xff] }
 0xba9   :  { %5825 = vmatmul.f32.gmra.mxu1 %v1892_v32 }
 0xbaa   :  { %5398 = vmatmul.f32.gmra.mxu2 %v1881_v16  ;;  %9134 = vmatmul.msk.f32.gmra.mxu3 %vm2174_vm6, %v5450_v12  ;;  %v14564_v30 = vpop.f32.mrf.mxu1 }
 0xbad   :  { %v5070_v22 = vpop.f32.mrf.mxu3  ;;  %v5351_v20 = vpop.f32.mrf.mxu2 }
 0xbae   :  { %v14544_v8 = vadd.f32 %v5070_v22, %v14265_v40  ;;  %v5352_v4 = vadd.f32 %v5351_v20, %v5250_v10  ;;  %v1894_v40 = vld [vmem:[%s16740_s1 + $0x1000] sm:$0xff]  ;;  %v14569_v22 = vpop.f32.mrf.mxu0 }
 0xbaf   :  { %9155 = vmatmul.msk.f32.gmra.mxu0 %vm2174_vm6, %v1894_v40  ;;  %v1890_v40 = vld [vmem:[%s16740_s1 + $0xfe0] sm:$0xff] }
 0xbb0   :  { %v5453_v49 = vadd.f32 %v5452_v55, %v5352_v4  ;;  %v1895_v4 = vld [vmem:[%s16740_s1 + $0x1008] sm:$0xff] }
 0xbb1   :  { %5828 = vmatmul.f32.gmra.mxu1 %v1895_v4  ;;  %v1896_v4 = vld [vmem:[%s16740_s1 + $0x1010] sm:$0xff] }
 0xbb2   :  { %5401 = vmatmul.f32.gmra.mxu2 %v1884_v53  ;;  %9135 = vmatmul.msk.f32.gmra.mxu3 %vm2174_vm6, %v5453_v49  ;;  %v14584_v32 = vpop.f32.mrf.mxu1 }
 0xbb5   :  { %v5073_v10 = vpop.f32.mrf.mxu3  ;;  %v5354_v16 = vpop.f32.mrf.mxu2 }
 0xbb6   :  { %v14562_v12 = vadd.f32 %v5073_v10, %v14274_v43  ;;  %v5355_v55 = vadd.f32 %v5354_v16, %v5253_v50  ;;  %v1897_v43 = vld [vmem:[%s16740_s1 + $0x1018] sm:$0xff]  ;;  %v14590_v10 = vpop.f32.mrf.mxu0 }
 0xbb7   :  { %9156 = vmatmul.msk.f32.gmra.mxu0 %vm2174_vm6, %v1897_v43 }
 0xbb8   :  { %v5456_v20 = vadd.f32 %v5455_v33, %v5355_v55  ;;  %v1893_v55 = vld [vmem:[%s16740_s1 + $0xff8] sm:$0xff] }
 0xbba   :  { %9136 = vmatmul.msk.f32.gmra.mxu3 %vm2174_vm6, %v5456_v20  ;;  %5920 = vmatmul.f32.vlgmr.msrb.gmra.mxu2 %v1887_v56  ;;  %v14606_v16 = vpop.f32.mrf.mxu1 }
 0xbbb   :  { %7104 = vmatpush.msrb.mxu2 %v17217_v45 }
 0xbbd   :  { %7105 = vmatpush.msrb.mxu2 %v17220_v37  ;;  %v5076_v50 = vpop.f32.mrf.mxu3  ;;  %v5357_v33 = vpop.f32.mrf.mxu2  ;;  %v1898_v37 = vld [vmem:[%s16740_s1 + $0x1020] sm:$0xff] }
 0xbbe   :  { %v14582_v53 = vadd.f32 %v5076_v50, %v14284_v58  ;;  %v5358_v49 = vadd.f32 %v5357_v33, %v5256_v17  ;;  %5831 = vmatmul.f32.gmra.mxu1 %v1898_v37  ;;  %v14612_v56 = vpop.f32.mrf.mxu0  ;;  %v1899_v33 = vld [vmem:[%s16740_s1 + $0x1028] sm:$0xff] }
 0xbbf   :  { %7106 = vmatpush.msrb.mxu2 %v17222_v47  ;;  %v1900_v47 = vld [vmem:[%s16740_s1 + $0x1030] sm:$0xff] }
 0xbc0   :  { %v5459_v45 = vadd.f32 %v5458_v3, %v5358_v49  ;;  %9157 = vmatmul.msk.f32.gmra.mxu0 %vm2174_vm6, %v1900_v47 }
 0xbc1   :  { %7107 = vmatpush.msrb.mxu2 %v17223_v31 }
 0xbc2   :  { %9137 = vmatmul.msk.f32.gmra.mxu3 %vm2174_vm6, %v5459_v45  ;;  %5923 = vmatmul.f32.gmra.mxu2 %v1890_v40  ;;  %v5274_v20 = vpop.f32.mrf.mxu1 }
 0xbc3   :  { %7108 = vmatpush.msrb.mxu2 %v17225_v5 }
 0xbc5   :  { %7109 = vmatpush.msrb.mxu2 %v17228_v36  ;;  %v5079_v58 = vpop.f32.mrf.mxu3  ;;  %v5360_v17 = vpop.f32.mrf.mxu2  ;;  %v1901_v36 = vld [vmem:[%s16740_s1 + $0x1038] sm:$0xff] }
 0xbc6   :  { %v14604_v3 = vadd.f32 %v5079_v58, %v14297_v0  ;;  %v5361_v31 = vadd.f32 %v5360_v17, %v5259_v61  ;;  %5834 = vmatmul.f32.gmra.mxu1 %v1901_v36  ;;  %v5476_v43 = vpop.f32.mrf.mxu0  ;;  %v1910_v58 = vld [vmem:[%s16740_s1 + $0x1080] sm:$0xff] }
 0xbc7   :  { %7110 = vmatpush.msrb.mxu2 %v17230_v21  ;;  %v1903_v21 = vld [vmem:[%s16740_s1 + $0x1048] sm:$0xff] }
 0xbc8   :  { %v5462_v5 = vadd.f32 %v14533_v27, %v5361_v31  ;;  %9158 = vmatmul.msk.f32.gmra.mxu0 %vm2174_vm6, %v1903_v21 }
 0xbc9   :  { %7111 = vmatpush.msrb.mxu2 %v17231_v39 }
 0xbca   :  { %9138 = vmatmul.msk.f32.gmra.mxu3 %vm2174_vm6, %v5462_v5  ;;  %5926 = vmatmul.f32.gmra.mxu2 %v1893_v55  ;;  %v5277_v50 = vpop.f32.mrf.mxu1  ;;  %v1905_v5 = vld [vmem:[%s16740_s1 + $0x1058] sm:$0xff] }
 0xbcb   :  { %7112 = vmatpush.msrb.mxu2 %v17296_v54 }
 0xbcd   :  { %7113 = vmatpush.msrb.mxu2 %v17298_v34  ;;  %v5082_v0 = vpop.f32.mrf.mxu3  ;;  %v5363_v61 = vpop.f32.mrf.mxu2  ;;  %v1904_v34 = vld [vmem:[%s16740_s1 + $0x1050] sm:$0xff] }
 0xbce   :  { %v14627_v27 = vadd.f32 %v5082_v0, %v14310_v23  ;;  %v5364_v39 = vadd.f32 %v5363_v61, %v14546_v1  ;;  %5837 = vmatmul.f32.gmra.mxu1 %v1904_v34  ;;  %v5479_v49 = vpop.f32.mrf.mxu0  ;;  %v1913_v0 = vld [vmem:[%s16740_s1 + $0x1098] sm:$0xff] }
 0xbcf   :  { %7114 = vmatpush.msrb.mxu2 %v17299_v9  ;;  %v1906_v9 = vld [vmem:[%s16740_s1 + $0x1060] sm:$0xff] }
 0xbd0   :  { %v5465_v54 = vadd.f32 %v14551_v25, %v5364_v39  ;;  %9159 = vmatmul.msk.f32.gmra.mxu0 %vm2174_vm6, %v1906_v9 }
 0xbd1   :  { %7115 = vmatpush.msrb.mxu2 %v17300_v46 }
 0xbd2   :  { %9139 = vmatmul.msk.f32.gmra.mxu3 %vm2174_vm6, %v5465_v54  ;;  %5929 = vmatmul.f32.gmra.mxu2 %v1896_v4  ;;  %v5280_v45 = vpop.f32.mrf.mxu1  ;;  %v1908_v54 = vld [vmem:[%s16740_s1 + $0x1070] sm:$0xff] }
 0xbd3   :  { %7116 = vmatpush.msrb.mxu2 %v17377_v26 }
 0xbd5   :  { %7117 = vmatpush.msrb.mxu2 %v17379_v44  ;;  %v5085_v23 = vpop.f32.mrf.mxu3  ;;  %v5366_v1 = vpop.f32.mrf.mxu2  ;;  %v1907_v44 = vld [vmem:[%s16740_s1 + $0x1068] sm:$0xff] }
 0xbd6   :  { %v14647_v25 = vadd.f32 %v5085_v23, %v14323_v15  ;;  %v5367_v46 = vadd.f32 %v5366_v1, %v14564_v30  ;;  %5840 = vmatmul.f32.gmra.mxu1 %v1907_v44  ;;  %v1909_v15 = vld [vmem:[%s16740_s1 + $0x1078] sm:$0xff]  ;;  %v5482_v37 = vpop.f32.mrf.mxu0  ;;  %v1916_v23 = vld [vmem:[%s16740_s1 + $0x10b0] sm:$0xff] }
 0xbd7   :  { %7118 = vmatpush.msrb.mxu2 %v17381_v2 }
 0xbd8   :  { %v5468_v26 = vadd.f32 %v14569_v22, %v5367_v46  ;;  %9160 = vmatmul.msk.f32.gmra.mxu0 %vm2174_vm6, %v1909_v15 }
 0xbd9   :  { %7119 = vmatpush.msrb.mxu2 %v17383_v11  ;;  %v1902_v11 = vld [vmem:[%s16740_s1 + $0x1040] sm:$0xff] }
 0xbda   :  { %9140 = vmatmul.msk.f32.gmra.mxu3 %vm2174_vm6, %v5468_v26  ;;  %5932 = vmatmul.f32.gmra.mxu2 %v1899_v33  ;;  %v5283_v55 = vpop.f32.mrf.mxu1  ;;  %v1911_v26 = vld [vmem:[%s16740_s1 + $0x1088] sm:$0xff] }
 0xbdd   :  { %v5088_v2 = vpop.f32.mrf.mxu3  ;;  %v5369_v30 = vpop.f32.mrf.mxu2 }
 0xbde   :  { %v14665_v22 = vadd.f32 %v5088_v2, %v14335_v51  ;;  %v5370_v40 = vadd.f32 %v5369_v30, %v14584_v32  ;;  %5843 = vmatmul.f32.gmra.mxu1 %v1910_v58  ;;  %v1912_v51 = vld [vmem:[%s16740_s1 + $0x1090] sm:$0xff]  ;;  %v5485_v36 = vpop.f32.mrf.mxu0  ;;  %v1919_v2 = vld [vmem:[%s16740_s1 + $0x10c8] sm:$0xff] }
 0xbe0   :  { %v5471_v47 = vadd.f32 %v14590_v10, %v5370_v40  ;;  %9161 = vmatmul.msk.f32.gmra.mxu0 %vm2174_vm6, %v1912_v51 }
 0xbe2   :  { %9141 = vmatmul.msk.f32.gmra.mxu3 %vm2174_vm6, %v5471_v47  ;;  %5935 = vmatmul.f32.gmra.mxu2 %v1902_v11  ;;  %v1914_v47 = vld [vmem:[%s16740_s1 + $0x10a0] sm:$0xff] }
 0xbe5   :  { %v5372_v32 = vpop.f32.mrf.mxu2  ;;  %v5607_v17 = vpop.f32.mrf.mxu3 }
 0xbe6   :  { %v5373_v31 = vadd.f32 %v5372_v32, %v14606_v16  ;;  %v14682_v10 = vadd.f32 %v5607_v17, %v14345_v60  ;;  %5846 = vmatmul.f32.gmra.mxu1 %v1913_v0  ;;  %v1915_v60 = vld [vmem:[%s16740_s1 + $0x10a8] sm:$0xff]  ;;  %v5488_v34 = vpop.f32.mrf.mxu0  ;;  %v1922_v32 = vld [vmem:[%s16740_s1 + $0x10e0] sm:$0xff] }
 0xbe8   :  { %v5474_v21 = vadd.f32 %v14612_v56, %v5373_v31  ;;  %9162 = vmatmul.msk.f32.gmra.mxu0 %vm2174_vm6, %v1915_v60  ;;  %v5286_v56 = vpop.f32.mrf.mxu1 }
 0xbea   :  { %9142 = vmatmul.msk.f32.gmra.mxu3 %vm2174_vm6, %v5474_v21  ;;  %5938 = vmatmul.f32.gmra.mxu2 %v1905_v5  ;;  %v1917_v21 = vld [vmem:[%s16740_s1 + $0x10b8] sm:$0xff] }
 0xbed   :  { %v5375_v16 = vpop.f32.mrf.mxu2  ;;  %v5610_v61 = vpop.f32.mrf.mxu3 }
 0xbee   :  { %v5376_v39 = vadd.f32 %v5375_v16, %v5274_v20  ;;  %v14697_v4 = vadd.f32 %v5610_v61, %v14354_v13  ;;  %5849 = vmatmul.f32.gmra.mxu1 %v1916_v23  ;;  %v1918_v13 = vld [vmem:[%s16740_s1 + $0x10c0] sm:$0xff]  ;;  %v5491_v44 = vpop.f32.mrf.mxu0  ;;  %v1925_v16 = vld [vmem:[%s16740_s1 + $0x10f8] sm:$0xff] }
 0xbf0   :  { %v5477_v9 = vadd.f32 %v5476_v43, %v5376_v39  ;;  %9163 = vmatmul.msk.f32.gmra.mxu0 %vm2174_vm6, %v1918_v13  ;;  %v5289_v43 = vpop.f32.mrf.mxu1 }
 0xbf2   :  { %9143 = vmatmul.msk.f32.gmra.mxu3 %vm2174_vm6, %v5477_v9  ;;  %5941 = vmatmul.f32.gmra.mxu2 %v1908_v54  ;;  %v1920_v9 = vld [vmem:[%s16740_s1 + $0x10d0] sm:$0xff] }
 0xbf5   :  { %v5378_v20 = vpop.f32.mrf.mxu2  ;;  %v5613_v1 = vpop.f32.mrf.mxu3 }
 0xbf6   :  { %v5379_v46 = vadd.f32 %v5378_v20, %v5277_v50  ;;  %v14711_v33 = vadd.f32 %v5613_v1, %v14363_v6  ;;  %5852 = vmatmul.f32.gmra.mxu1 %v1919_v2  ;;  %v1921_v6 = vld [vmem:[%s16740_s1 + $0x10d8] sm:$0xff]  ;;  %v5494_v58 = vpop.f32.mrf.mxu0  ;;  %v1928_v20 = vld [vmem:[%s16740_s1 + $0x1110] sm:$0xff] }
 0xbf8   :  { %v5480_v15 = vadd.f32 %v5479_v49, %v5379_v46  ;;  %9164 = vmatmul.msk.f32.gmra.mxu0 %vm2174_vm6, %v1921_v6  ;;  %v5292_v49 = vpop.f32.mrf.mxu1 }
 0xbfa   :  { %9144 = vmatmul.msk.f32.gmra.mxu3 %vm2174_vm6, %v5480_v15  ;;  %5944 = vmatmul.f32.gmra.mxu2 %v1911_v26  ;;  %v1923_v15 = vld [vmem:[%s16740_s1 + $0x10e8] sm:$0xff] }
 0xbfd   :  { %v5381_v50 = vpop.f32.mrf.mxu2  ;;  %v5616_v30 = vpop.f32.mrf.mxu3 }
 0xbfe   :  { %v5382_v40 = vadd.f32 %v5381_v50, %v5280_v45  ;;  %v14725_v11 = vadd.f32 %v5616_v30, %v14372_v7  ;;  %5855 = vmatmul.f32.gmra.mxu1 %v1922_v32  ;;  %v1924_v7 = vld [vmem:[%s16740_s1 + $0x10f0] sm:$0xff]  ;;  %v14744_v0 = vpop.f32.mrf.mxu0  ;;  %v1931_v50 = vld [vmem:[%s16740_s1 + $0x1128] sm:$0xff] }
 0xbff   :  { %v2164_v32 = vld [vmem:[%s16741_s7 + $0xd0] sm:$0xff] }
 0xc00   :  { %v5483_v51 = vadd.f32 %v5482_v37, %v5382_v40  ;;  %9165 = vmatmul.msk.f32.gmra.mxu0 %vm2174_vm6, %v1924_v7  ;;  %v5295_v37 = vpop.f32.mrf.mxu1  ;;  %v1926_v7 = vld [vmem:[%s16740_s1 + $0x1100] sm:$0xff] }
 0xc02   :  { %9145 = vmatmul.msk.f32.gmra.mxu3 %vm2174_vm6, %v5483_v51  ;;  %5947 = vmatmul.f32.gmra.mxu2 %v1914_v47 }
 0xc05   :  { %v5384_v45 = vpop.f32.mrf.mxu2  ;;  %v5619_v17 = vpop.f32.mrf.mxu3 }
 0xc06   :  { %v5385_v31 = vadd.f32 %v5384_v45, %v5283_v55  ;;  %v14739_v5 = vadd.f32 %v5619_v17, %v14381_v52  ;;  %5858 = vmatmul.f32.gmra.mxu1 %v1925_v16  ;;  %v1927_v52 = vld [vmem:[%s16740_s1 + $0x1108] sm:$0xff]  ;;  %v14760_v23 = vpop.f32.mrf.mxu0 }
 0xc08   :  { %v5486_v60 = vadd.f32 %v5485_v36, %v5385_v31  ;;  %9166 = vmatmul.msk.f32.gmra.mxu0 %vm2174_vm6, %v1927_v52  ;;  %v5298_v36 = vpop.f32.mrf.mxu1  ;;  %v2163_v31 = vld [vmem:[%s16741_s7 + $0xc8] sm:$0xff] }
 0xc0a   :  { %9146 = vmatmul.msk.f32.gmra.mxu3 %vm2174_vm6, %v5486_v60  ;;  %5950 = vmatmul.f32.gmra.mxu2 %v1917_v21 }
 0xc0d   :  { %v5387_v55 = vpop.f32.mrf.mxu2  ;;  %v5622_v61 = vpop.f32.mrf.mxu3 }
 0xc0e   :  { %v5388_v39 = vadd.f32 %v5387_v55, %v5286_v56  ;;  %v14755_v54 = vadd.f32 %v5622_v61, %v14390_v62  ;;  %5861 = vmatmul.f32.gmra.mxu1 %v1928_v20  ;;  %v1930_v62 = vld [vmem:[%s16740_s1 + $0x1120] sm:$0xff]  ;;  %v14776_v2 = vpop.f32.mrf.mxu0  ;;  %v1929_v61 = vld [vmem:[%s16740_s1 + $0x1118] sm:$0xff] }
 0xc10   :  { %v5489_v13 = vadd.f32 %v5488_v34, %v5388_v39  ;;  %9167 = vmatmul.msk.f32.gmra.mxu0 %vm2174_vm6, %v1930_v62  ;;  %v5301_v34 = vpop.f32.mrf.mxu1 }
 0xc12   :  { %9147 = vmatmul.msk.f32.gmra.mxu3 %vm2174_vm6, %v5489_v13  ;;  %5953 = vmatmul.f32.gmra.mxu2 %v1920_v9  ;;  %v1937_v13 = vld [vmem:[%s16740_s1 + $0x1158] sm:$0xff] }
 0xc15   :  { %v5390_v56 = vpop.f32.mrf.mxu2  ;;  %v5625_v1 = vpop.f32.mrf.mxu3 }
 0xc16   :  { %v5391_v46 = vadd.f32 %v5390_v56, %v5289_v43  ;;  %v14771_v26 = vadd.f32 %v5625_v1, %v14399_v19  ;;  %5864 = vmatmul.f32.gmra.mxu1 %v1931_v50  ;;  %v1933_v19 = vld [vmem:[%s16740_s1 + $0x1138] sm:$0xff]  ;;  %v6022_v45 = vpop.f32.mrf.mxu0  ;;  %v1932_v1 = vld [vmem:[%s16740_s1 + $0x1130] sm:$0xff] }
 0xc17   :  { %v2165_v43 = vld [vmem:[%s16741_s7 + $0xd8] sm:$0xff] }
 0xc18   :  { %v5492_v6 = vadd.f32 %v5491_v44, %v5391_v46  ;;  %9168 = vmatmul.msk.f32.gmra.mxu0 %vm2174_vm6, %v1933_v19  ;;  %6202 = vmatpush.msra.mxu3 %v2165_v43  ;;  %v5820_v51 = vpop.f32.mrf.mxu1 }
 0xc1a   :  { %9148 = vmatmul.msk.f32.gmra.mxu3 %vm2174_vm6, %v5492_v6  ;;  %5956 = vmatmul.f32.gmra.mxu2 %v1923_v15  ;;  %v1940_v6 = vld [vmem:[%s16740_s1 + $0x1170] sm:$0xff] }
 0xc1b   :  { %6203 = vmatpush.msra.mxu3 %v2164_v32  ;;  %v1943_v32 = vld [vmem:[%s16740_s1 + $0x1188] sm:$0xff] }
 0xc1d   :  { %v5393_v44 = vpop.f32.mrf.mxu2  ;;  %v5628_v30 = vpop.f32.mrf.mxu3  ;;  %6204 = vmatpush.msra.mxu3 %v2163_v31 }
 0xc1e   :  { %v5394_v40 = vadd.f32 %v5393_v44, %v5292_v49  ;;  %v14790_v47 = vadd.f32 %v5628_v30, %v14411_v48  ;;  %v1934_v48 = vld [vmem:[%s16740_s1 + $0x1140] sm:$0xff]  ;;  %v1935_v44 = vld [vmem:[%s16740_s1 + $0x1148] sm:$0xff] }
 0xc1f   :  { %v2162_v49 = vld [vmem:[%s16741_s7 + $0xc0] sm:$0xff]  ;;  %5867 = vmatmul.f32.gmra.mxu1 %v1934_v48 }
 0xc20   :  { %v5495_v17 = vadd.f32 %v5494_v58, %v5394_v40  ;;  %v1936_v58 = vld [vmem:[%s16740_s1 + $0x1150] sm:$0xff]  ;;  %6205 = vmatpush.msra.mxu3 %v2162_v49  ;;  %v5823_v55 = vpop.f32.mrf.mxu1  ;;  %v1938_v48 = vld [vmem:[%s16740_s1 + $0x1160] sm:$0xff] }
 0xc21   :  { %9169 = vmatmul.msk.f32.gmra.mxu0 %vm2174_vm6, %v1936_v58 }
 0xc22   :  { %9149 = vmatmul.msk.f32.gmra.mxu3 %vm2174_vm6, %v5495_v17  ;;  %5959 = vmatmul.f32.gmra.mxu2 %v1926_v7 }
 0xc24   :  { %v6025_v9 = vpop.f32.mrf.mxu0 }
 0xc25   :  { %v5396_v21 = vpop.f32.mrf.mxu2  ;;  %v5631_v60 = vpop.f32.mrf.mxu3 }
 0xc26   :  { %v5397_v16 = vadd.f32 %v5396_v21, %v5295_v37  ;;  %v14813_v52 = vadd.f32 %v5631_v60, %v14429_v29  ;;  %v1939_v29 = vld [vmem:[%s16740_s1 + $0x1168] sm:$0xff]  ;;  %v1946_v21 = vld [vmem:[%s16740_s1 + $0x11a0] sm:$0xff] }
 0xc27   :  { %5870 = vmatmul.f32.gmra.mxu1 %v1937_v13 }
 0xc28   :  { %v5498_v39 = vadd.f32 %v14744_v0, %v5397_v16  ;;  %v5826_v56 = vpop.f32.mrf.mxu1 }
 0xc29   :  { %9170 = vmatmul.msk.f32.gmra.mxu0 %vm2174_vm6, %v1939_v29 }
 0xc2a   :  { %9150 = vmatmul.msk.f32.gmra.mxu3 %vm2174_vm6, %v5498_v39  ;;  %5962 = vmatmul.f32.gmra.mxu2 %v1929_v61  ;;  %v1941_v39 = vld [vmem:[%s16740_s1 + $0x1178] sm:$0xff] }
 0xc2c   :  { %v6028_v15 = vpop.f32.mrf.mxu0 }
 0xc2d   :  { %v5399_v37 = vpop.f32.mrf.mxu2  ;;  %v5634_v20 = vpop.f32.mrf.mxu3 }
 0xc2e   :  { %v5400_v62 = vadd.f32 %v5399_v37, %v5298_v36  ;;  %v14828_v0 = vadd.f32 %v5634_v20, %v14438_v63  ;;  %v1942_v63 = vld [vmem:[%s16740_s1 + $0x1180] sm:$0xff]  ;;  %v1949_v37 = vld [vmem:[%s16740_s1 + $0x11b8] sm:$0xff] }
 0xc2f   :  { %5873 = vmatmul.f32.gmra.mxu1 %v1940_v6 }
 0xc30   :  { %v5501_v46 = vadd.f32 %v14760_v23, %v5400_v62  ;;  %v5829_v43 = vpop.f32.mrf.mxu1 }
 0xc31   :  { %9171 = vmatmul.msk.f32.gmra.mxu0 %vm2174_vm6, %v1942_v63 }
 0xc32   :  { %9151 = vmatmul.msk.f32.gmra.mxu3 %vm2174_vm6, %v5501_v46  ;;  %5965 = vmatmul.f32.gmra.mxu2 %v1932_v1  ;;  %v1944_v46 = vld [vmem:[%s16740_s1 + $0x1190] sm:$0xff] }
 0xc34   :  { %v6031_v40 = vpop.f32.mrf.mxu0 }
 0xc35   :  { %v5402_v36 = vpop.f32.mrf.mxu2  ;;  %v5637_v50 = vpop.f32.mrf.mxu3 }
 0xc36   :  { %v5403_v19 = vadd.f32 %v5402_v36, %v5301_v34  ;;  %v14843_v23 = vadd.f32 %v5637_v50, %v14447_v59  ;;  %v1945_v59 = vld [vmem:[%s16740_s1 + $0x1198] sm:$0xff]  ;;  %v1952_v36 = vld [vmem:[%s16740_s1 + $0x11d0] sm:$0xff] }
 0xc37   :  { %5876 = vmatmul.f32.gmra.mxu1 %v1943_v32 }
 0xc38   :  { %v5504_v30 = vadd.f32 %v14776_v2, %v5403_v19 }
 0xc39   :  { %9172 = vmatmul.msk.f32.gmra.mxu0 %vm2174_vm6, %v1945_v59 }
 0xc3a   :  { %9152 = vmatmul.msk.f32.gmra.mxu3 %vm2174_vm6, %v5504_v30  ;;  %5968 = vmatmul.f32.gmra.mxu2 %v1935_v44  ;;  %v1947_v30 = vld [vmem:[%s16740_s1 + $0x11a8] sm:$0xff] }
 0xc3b   :  { %v5832_v31 = vpop.f32.mrf.mxu1 }
 0xc3d   :  { %v5640_v34 = vpop.f32.mrf.mxu3  ;;  %v5921_v7 = vpop.f32.mrf.mxu2 }
 0xc3e   :  { %v14858_v17 = vadd.f32 %v5640_v34, %v14455_v38  ;;  %v5922_v2 = vadd.f32 %v5921_v7, %v5820_v51  ;;  %v6034_v58 = vpop.f32.mrf.mxu0  ;;  %v1948_v38 = vld [vmem:[%s16740_s1 + $0x11b0] sm:$0xff]  ;;  %v1955_v34 = vld [vmem:[%s16740_s1 + $0x11e8] sm:$0xff] }
 0xc3f   :  { %5879 = vmatmul.f32.gmra.mxu1 %v1946_v21  ;;  %v1950_v21 = vld [vmem:[%s16740_s1 + $0x11c0] sm:$0xff] }
 0xc40   :  { %v6023_v49 = vadd.f32 %v6022_v45, %v5922_v2  ;;  %v17421_v2 = vld [vmem:[#allocation82_spill] sm:$0xff] }
 0xc41   :  { %9173 = vmatmul.msk.f32.gmra.mxu0 %vm2174_vm6, %v1948_v38 }
 0xc42   :  { %5971 = vmatmul.f32.gmra.mxu2 %v1938_v48  ;;  %9181 = vmatmul.msk.f32.vlgmr.msra.gmra.mxu3 %vm2174_vm6, %v6023_v49 }
 0xc43   :  { %v5835_v61 = vpop.f32.mrf.mxu1 }
 0xc45   :  { %v5643_v51 = vpop.f32.mrf.mxu3  ;;  %v5924_v60 = vpop.f32.mrf.mxu2 }
 0xc46   :  { %v14872_v16 = vadd.f32 %v5643_v51, %v14464_v57  ;;  %v5925_v45 = vadd.f32 %v5924_v60, %v5823_v55  ;;  %v6037_v29 = vpop.f32.mrf.mxu0  ;;  %v1951_v57 = vld [vmem:[%s16740_s1 + $0x11c8] sm:$0xff]  ;;  %v1958_v60 = vld [vmem:[%s16740_s1 + $0x1200] sm:$0xff] }
 0xc47   :  { %5882 = vmatmul.f32.gmra.mxu1 %v1949_v37 }
 0xc48   :  { %v6026_v13 = vadd.f32 %v6025_v9, %v5925_v45  ;;  %v1960_v45 = vld [vmem:[%s16740_s1 + $0x1210] sm:$0xff] }
 0xc49   :  { %9174 = vmatmul.msk.f32.gmra.mxu0 %vm2174_vm6, %v1951_v57  ;;  %v1953_v57 = vld [vmem:[%s16740_s1 + $0x11d8] sm:$0xff] }
 0xc4a   :  { %5974 = vmatmul.f32.gmra.mxu2 %v1941_v39  ;;  %9182 = vmatmul.msk.f32.gmra.mxu3 %vm2174_vm6, %v6026_v13 }
 0xc4b   :  { %v5838_v1 = vpop.f32.mrf.mxu1 }
 0xc4d   :  { %v5646_v55 = vpop.f32.mrf.mxu3  ;;  %v5927_v20 = vpop.f32.mrf.mxu2 }
 0xc4e   :  { %v14886_v62 = vadd.f32 %v5646_v55, %v14473_v35  ;;  %v5928_v9 = vadd.f32 %v5927_v20, %v5826_v56  ;;  %v6040_v63 = vpop.f32.mrf.mxu0  ;;  %v1954_v35 = vld [vmem:[%s16740_s1 + $0x11e0] sm:$0xff] }
 0xc4f   :  { %5885 = vmatmul.f32.gmra.mxu1 %v1952_v36 }
 0xc50   :  { %v6029_v6 = vadd.f32 %v6028_v15, %v5928_v9  ;;  %v1961_v9 = vld [vmem:[%s16740_s1 + $0x1218] sm:$0xff] }
 0xc51   :  { %9175 = vmatmul.msk.f32.gmra.mxu0 %vm2174_vm6, %v1954_v35  ;;  %v1956_v35 = vld [vmem:[%s16740_s1 + $0x11f0] sm:$0xff] }
 0xc52   :  { %5977 = vmatmul.f32.gmra.mxu2 %v1944_v46  ;;  %9183 = vmatmul.msk.f32.gmra.mxu3 %vm2174_vm6, %v6029_v6 }
 0xc53   :  { %v5841_v44 = vpop.f32.mrf.mxu1 }
 0xc55   :  { %v5649_v56 = vpop.f32.mrf.mxu3  ;;  %v5930_v50 = vpop.f32.mrf.mxu2 }
 0xc56   :  { %v14900_v19 = vadd.f32 %v5649_v56, %v14482_v24  ;;  %v5931_v15 = vadd.f32 %v5930_v50, %v5829_v43  ;;  %v6043_v59 = vpop.f32.mrf.mxu0  ;;  %v1957_v24 = vld [vmem:[%s16740_s1 + $0x11f8] sm:$0xff] }
 0xc57   :  { %5888 = vmatmul.f32.gmra.mxu1 %v1955_v34 }
 0xc58   :  { %v6032_v32 = vadd.f32 %v6031_v40, %v5931_v15  ;;  %v1964_v15 = vld [vmem:[%s16740_s1 + $0x1230] sm:$0xff] }
 0xc59   :  { %9176 = vmatmul.msk.f32.gmra.mxu0 %vm2174_vm6, %v1957_v24  ;;  %v1959_v24 = vld [vmem:[%s16740_s1 + $0x1208] sm:$0xff] }
 0xc5a   :  { %5980 = vmatmul.f32.gmra.mxu2 %v1947_v30  ;;  %9184 = vmatmul.msk.f32.gmra.mxu3 %vm2174_vm6, %v6032_v32 }
 0xc5b   :  { %v5844_v49 = vpop.f32.mrf.mxu1 }
 0xc5d   :  { %v5652_v43 = vpop.f32.mrf.mxu3  ;;  %v5933_v7 = vpop.f32.mrf.mxu2 }
 0xc5e   :  { %v14914_v48 = vadd.f32 %v5652_v43, %v17421_v2  ;;  %v5934_v40 = vadd.f32 %v5933_v7, %v5832_v31  ;;  %v6046_v51 = vpop.f32.mrf.mxu0  ;;  %v1967_v2 = vld [vmem:[%s16740_s1 + $0x1248] sm:$0xff] }
 0xc5f   :  { %5891 = vmatmul.f32.gmra.mxu1 %v1958_v60  ;;  %v1962_v60 = vld [vmem:[%s16740_s1 + $0x1220] sm:$0xff] }
 0xc60   :  { %v6035_v38 = vadd.f32 %v6034_v58, %v5934_v40  ;;  %v1969_v40 = vld [vmem:[%s16740_s1 + $0x1258] sm:$0xff] }
 0xc61   :  { %9177 = vmatmul.msk.f32.gmra.mxu0 %vm2174_vm6, %v1960_v45 }
 0xc62   :  { %5983 = vmatmul.f32.gmra.mxu2 %v1950_v21  ;;  %9185 = vmatmul.msk.f32.gmra.mxu3 %vm2174_vm6, %v6035_v38 }
 0xc63   :  { %v5847_v37 = vpop.f32.mrf.mxu1 }
 0xc65   :  { %v5655_v31 = vpop.f32.mrf.mxu3  ;;  %v5936_v39 = vpop.f32.mrf.mxu2 }
 0xc66   :  { %v14928_v13 = vadd.f32 %v5655_v31, %v14500_v14  ;;  %v5937_v58 = vadd.f32 %v5936_v39, %v5835_v61  ;;  %v6049_v20 = vpop.f32.mrf.mxu0  ;;  %v1963_v14 = vld [vmem:[%s16740_s1 + $0x1228] sm:$0xff]  ;;  %v1970_v39 = vld [vmem:[%s16740_s1 + $0x1260] sm:$0xff] }
 0xc67   :  { %5894 = vmatmul.f32.gmra.mxu1 %v1961_v9  ;;  %v1965_v9 = vld [vmem:[%s16740_s1 + $0x1238] sm:$0xff] }
 0xc68   :  { %v6038_v55 = vadd.f32 %v6037_v29, %v5937_v58 }
 0xc69   :  { %9178 = vmatmul.msk.f32.gmra.mxu0 %vm2174_vm6, %v1963_v14 }
 0xc6a   :  { %5986 = vmatmul.f32.gmra.mxu2 %v1953_v57  ;;  %9186 = vmatmul.msk.f32.gmra.mxu3 %vm2174_vm6, %v6038_v55 }
 0xc6b   :  { %v5850_v36 = vpop.f32.mrf.mxu1 }
 0xc6d   :  { %v5658_v61 = vpop.f32.mrf.mxu3  ;;  %v5939_v46 = vpop.f32.mrf.mxu2 }
 0xc6e   :  { %v14942_v6 = vadd.f32 %v5658_v61, %v14507_v41  ;;  %v5940_v29 = vadd.f32 %v5939_v46, %v5838_v1  ;;  %v6052_v50 = vpop.f32.mrf.mxu0  ;;  %v1966_v41 = vld [vmem:[%s16740_s1 + $0x1240] sm:$0xff]  ;;  %v1973_v46 = vld [vmem:[%s16740_s1 + $0x1278] sm:$0xff] }
 0xc6f   :  { %5897 = vmatmul.f32.gmra.mxu1 %v1964_v15  ;;  %v1968_v15 = vld [vmem:[%s16740_s1 + $0x1250] sm:$0xff] }
 0xc70   :  { %v6041_v56 = vadd.f32 %v6040_v63, %v5940_v29 }
 0xc71   :  { %9179 = vmatmul.msk.f32.gmra.mxu0 %vm2174_vm6, %v1966_v41 }
 0xc72   :  { %5989 = vmatmul.f32.gmra.mxu2 %v1956_v35  ;;  %9187 = vmatmul.msk.f32.gmra.mxu3 %vm2174_vm6, %v6041_v56 }
 0xc73   :  { %v5853_v34 = vpop.f32.mrf.mxu1 }
 0xc75   :  { %v5661_v1 = vpop.f32.mrf.mxu3  ;;  %v5942_v30 = vpop.f32.mrf.mxu2 }
 0xc76   :  { %v14956_v32 = vadd.f32 %v5661_v1, %v14514_v18  ;;  %v5943_v63 = vadd.f32 %v5942_v30, %v5841_v44  ;;  %v6055_v7 = vpop.f32.mrf.mxu0  ;;  %v1976_v30 = vld [vmem:[%s16740_s1 + $0x1290] sm:$0xff] }
 0xc77   :  { %5900 = vmatmul.f32.gmra.mxu1 %v1967_v2  ;;  %v1971_v2 = vld [vmem:[%s16740_s1 + $0x1268] sm:$0xff] }
 0xc78   :  { %v6044_v43 = vadd.f32 %v6043_v59, %v5943_v63 }
 0xc79   :  { %9180 = vmatmul.msk.f32.gmra.mxu0 %vm2174_vm6, %v1969_v40 }
 0xc7a   :  { %5992 = vmatmul.f32.gmra.mxu2 %v1959_v24  ;;  %9188 = vmatmul.msk.f32.gmra.mxu3 %vm2174_vm6, %v6044_v43 }
 0xc7b   :  { %v5856_v38 = vpop.f32.mrf.mxu1 }
 0xc7d   :  { %v5664_v18 = vpop.f32.mrf.mxu3  ;;  %v5945_v44 = vpop.f32.mrf.mxu2 }
 0xc7e   :  { %v14970_v21 = vadd.f32 %v5664_v18, %v14521_v42  ;;  %v5946_v59 = vadd.f32 %v5945_v44, %v5844_v49  ;;  %v6058_v31 = vpop.f32.mrf.mxu0  ;;  %v1972_v42 = vld [vmem:[%s16740_s1 + $0x1270] sm:$0xff]  ;;  %v1979_v44 = vld [vmem:[%s16740_s1 + $0x12a8] sm:$0xff] }
 0xc7f   :  { %6419 = vmatmul.f32.vlgmr.msra.gmra.mxu1 %v1970_v39  ;;  %v1974_v39 = vld [vmem:[%s16740_s1 + $0x1280] sm:$0xff] }
 0xc80   :  { %v6047_v45 = vadd.f32 %v6046_v51, %v5946_v59 }
 0xc81   :  { %9209 = vmatmul.msk.f32.vlgmr.msrb.gmra.mxu0 %vm2174_vm6, %v1972_v42 }
 0xc82   :  { %5995 = vmatmul.f32.gmra.mxu2 %v1962_v60  ;;  %9189 = vmatmul.msk.f32.gmra.mxu3 %vm2174_vm6, %v6047_v45 }
 0xc83   :  { %v5859_v55 = vpop.f32.mrf.mxu1 }
 0xc85   :  { %v5667_v49 = vpop.f32.mrf.mxu3  ;;  %v5948_v58 = vpop.f32.mrf.mxu2 }
 0xc86   :  { %v14984_v57 = vadd.f32 %v5667_v49, %v14528_v28  ;;  %v5949_v51 = vadd.f32 %v5948_v58, %v5847_v37  ;;  %v6061_v61 = vpop.f32.mrf.mxu0  ;;  %v1975_v28 = vld [vmem:[%s16740_s1 + $0x1288] sm:$0xff]  ;;  %v1982_v58 = vld [vmem:[%s16740_s1 + $0x12c0] sm:$0xff] }
 0xc87   :  { %6422 = vmatmul.f32.gmra.mxu1 %v1973_v46  ;;  %v1977_v46 = vld [vmem:[%s16740_s1 + $0x1298] sm:$0xff] }
 0xc88   :  { %v6050_v14 = vadd.f32 %v6049_v20, %v5949_v51 }
 0xc89   :  { %9210 = vmatmul.msk.f32.gmra.mxu0 %vm2174_vm6, %v1975_v28 }
 0xc8a   :  { %5998 = vmatmul.f32.gmra.mxu2 %v1965_v9  ;;  %9190 = vmatmul.msk.f32.gmra.mxu3 %vm2174_vm6, %v6050_v14 }
 0xc8b   :  { %v5862_v56 = vpop.f32.mrf.mxu1 }
 0xc8d   :  { %v5670_v37 = vpop.f32.mrf.mxu3  ;;  %v5951_v29 = vpop.f32.mrf.mxu2 }
 0xc8e   :  { %v14998_v35 = vadd.f32 %v5670_v37, %v14544_v8  ;;  %v5952_v20 = vadd.f32 %v5951_v29, %v5850_v36  ;;  %v6064_v1 = vpop.f32.mrf.mxu0  ;;  %v1978_v8 = vld [vmem:[%s16740_s1 + $0x12a0] sm:$0xff]  ;;  %v1985_v29 = vld [vmem:[%s16740_s1 + $0x12d8] sm:$0xff] }
 0xc8f   :  { %6425 = vmatmul.f32.gmra.mxu1 %v1976_v30  ;;  %v1980_v30 = vld [vmem:[%s16740_s1 + $0x12b0] sm:$0xff] }
 0xc90   :  { %v6053_v41 = vadd.f32 %v6052_v50, %v5952_v20 }
 0xc91   :  { %9211 = vmatmul.msk.f32.gmra.mxu0 %vm2174_vm6, %v1978_v8 }
 0xc92   :  { %6001 = vmatmul.f32.gmra.mxu2 %v1968_v15  ;;  %9191 = vmatmul.msk.f32.gmra.mxu3 %vm2174_vm6, %v6053_v41 }
 0xc93   :  { %v5865_v43 = vpop.f32.mrf.mxu1 }
 0xc95   :  { %v5673_v36 = vpop.f32.mrf.mxu3  ;;  %v5954_v63 = vpop.f32.mrf.mxu2 }
 0xc96   :  { %v15012_v24 = vadd.f32 %v5673_v36, %v14562_v12  ;;  %v5955_v50 = vadd.f32 %v5954_v63, %v5853_v34  ;;  %v6067_v18 = vpop.f32.mrf.mxu0  ;;  %v1981_v12 = vld [vmem:[%s16740_s1 + $0x12b8] sm:$0xff]  ;;  %v1988_v63 = vld [vmem:[%s16740_s1 + $0x12f0] sm:$0xff] }
 0xc97   :  { %6428 = vmatmul.f32.gmra.mxu1 %v1979_v44  ;;  %v1983_v44 = vld [vmem:[%s16740_s1 + $0x12c8] sm:$0xff] }
 0xc98   :  { %v6056_v40 = vadd.f32 %v6055_v7, %v5955_v50 }
 0xc99   :  { %9212 = vmatmul.msk.f32.gmra.mxu0 %vm2174_vm6, %v1981_v12 }
 0xc9a   :  { %9192 = vmatmul.msk.f32.gmra.mxu3 %vm2174_vm6, %v6056_v40  ;;  %6520 = vmatmul.f32.vlgmr.msra.gmra.mxu2 %v1971_v2 }
 0xc9c   :  { %v5868_v45 = vpop.f32.mrf.mxu1 }
 0xc9d   :  { %v5676_v34 = vpop.f32.mrf.mxu3  ;;  %v5957_v59 = vpop.f32.mrf.mxu2 }
 0xc9e   :  { %v15026_v60 = vadd.f32 %v5676_v34, %v14582_v53  ;;  %v5958_v7 = vadd.f32 %v5957_v59, %v5856_v38  ;;  %v6070_v49 = vpop.f32.mrf.mxu0  ;;  %v1984_v53 = vld [vmem:[%s16740_s1 + $0x12d0] sm:$0xff]  ;;  %v1991_v59 = vld [vmem:[%s16740_s1 + $0x1308] sm:$0xff] }
 0xc9f   :  { %6431 = vmatmul.f32.gmra.mxu1 %v1982_v58  ;;  %v1986_v58 = vld [vmem:[%s16740_s1 + $0x12e0] sm:$0xff] }
 0xca0   :  { %v6059_v42 = vadd.f32 %v6058_v31, %v5958_v7 }
 0xca1   :  { %9213 = vmatmul.msk.f32.gmra.mxu0 %vm2174_vm6, %v1984_v53 }
 0xca2   :  { %9193 = vmatmul.msk.f32.gmra.mxu3 %vm2174_vm6, %v6059_v42  ;;  %6523 = vmatmul.f32.gmra.mxu2 %v1974_v39 }
 0xca4   :  { %v5871_v14 = vpop.f32.mrf.mxu1 }
 0xca5   :  { %v5679_v38 = vpop.f32.mrf.mxu3  ;;  %v5960_v51 = vpop.f32.mrf.mxu2 }
 0xca6   :  { %v15040_v9 = vadd.f32 %v5679_v38, %v14604_v3  ;;  %v5961_v31 = vadd.f32 %v5960_v51, %v5859_v55  ;;  %v6073_v37 = vpop.f32.mrf.mxu0  ;;  %v1987_v3 = vld [vmem:[%s16740_s1 + $0x12e8] sm:$0xff]  ;;  %v1994_v51 = vld [vmem:[%s16740_s1 + $0x1320] sm:$0xff] }
 0xca7   :  { %6434 = vmatmul.f32.gmra.mxu1 %v1985_v29  ;;  %v1989_v29 = vld [vmem:[%s16740_s1 + $0x12f8] sm:$0xff] }
 0xca8   :  { %v6062_v28 = vadd.f32 %v6061_v61, %v5961_v31 }
 0xca9   :  { %9214 = vmatmul.msk.f32.gmra.mxu0 %vm2174_vm6, %v1987_v3 }
 0xcaa   :  { %9194 = vmatmul.msk.f32.gmra.mxu3 %vm2174_vm6, %v6062_v28  ;;  %6526 = vmatmul.f32.gmra.mxu2 %v1977_v46 }
 0xcac   :  { %v5874_v41 = vpop.f32.mrf.mxu1 }
 0xcad   :  { %v5682_v55 = vpop.f32.mrf.mxu3  ;;  %v5963_v20 = vpop.f32.mrf.mxu2 }
 0xcae   :  { %v15054_v15 = vadd.f32 %v5682_v55, %v14627_v27  ;;  %v5964_v61 = vadd.f32 %v5963_v20, %v5862_v56  ;;  %v6076_v36 = vpop.f32.mrf.mxu0  ;;  %v1990_v27 = vld [vmem:[%s16740_s1 + $0x1300] sm:$0xff]  ;;  %v1997_v20 = vld [vmem:[%s16740_s1 + $0x1338] sm:$0xff] }
 0xcaf   :  { %6437 = vmatmul.f32.gmra.mxu1 %v1988_v63  ;;  %v1992_v63 = vld [vmem:[%s16740_s1 + $0x1310] sm:$0xff] }
 0xcb0   :  { %v6065_v8 = vadd.f32 %v6064_v1, %v5964_v61 }
 0xcb1   :  { %9215 = vmatmul.msk.f32.gmra.mxu0 %vm2174_vm6, %v1990_v27 }
 0xcb2   :  { %9195 = vmatmul.msk.f32.gmra.mxu3 %vm2174_vm6, %v6065_v8  ;;  %6529 = vmatmul.f32.gmra.mxu2 %v1980_v30 }
 0xcb4   :  { %v5877_v40 = vpop.f32.mrf.mxu1 }
 0xcb5   :  { %v5685_v56 = vpop.f32.mrf.mxu3  ;;  %v5966_v50 = vpop.f32.mrf.mxu2 }
 0xcb6   :  { %v15068_v2 = vadd.f32 %v5685_v56, %v14647_v25  ;;  %v5967_v1 = vadd.f32 %v5966_v50, %v5865_v43  ;;  %v6079_v34 = vpop.f32.mrf.mxu0  ;;  %v1993_v25 = vld [vmem:[%s16740_s1 + $0x1318] sm:$0xff]  ;;  %v2000_v50 = vld [vmem:[%s16740_s1 + $0x1350] sm:$0xff] }
 0xcb7   :  { %6440 = vmatmul.f32.gmra.mxu1 %v1991_v59  ;;  %v1995_v59 = vld [vmem:[%s16740_s1 + $0x1328] sm:$0xff] }
 0xcb8   :  { %v6068_v12 = vadd.f32 %v6067_v18, %v5967_v1 }
 0xcb9   :  { %9216 = vmatmul.msk.f32.gmra.mxu0 %vm2174_vm6, %v1993_v25 }
 0xcba   :  { %9196 = vmatmul.msk.f32.gmra.mxu3 %vm2174_vm6, %v6068_v12  ;;  %6532 = vmatmul.f32.gmra.mxu2 %v1983_v44 }
 0xcbc   :  { %v5880_v42 = vpop.f32.mrf.mxu1 }
 0xcbd   :  { %v5688_v43 = vpop.f32.mrf.mxu3  ;;  %v5969_v7 = vpop.f32.mrf.mxu2 }
 0xcbe   :  { %v15082_v39 = vadd.f32 %v5688_v43, %v14665_v22  ;;  %v5970_v18 = vadd.f32 %v5969_v7, %v5868_v45  ;;  %v6082_v38 = vpop.f32.mrf.mxu0  ;;  %v1996_v22 = vld [vmem:[%s16740_s1 + $0x1330] sm:$0xff]  ;;  %v2003_v7 = vld [vmem:[%s16740_s1 + $0x1368] sm:$0xff] }
 0xcbf   :  { %6443 = vmatmul.f32.gmra.mxu1 %v1994_v51  ;;  %v1998_v51 = vld [vmem:[%s16740_s1 + $0x1340] sm:$0xff] }
 0xcc0   :  { %v6071_v53 = vadd.f32 %v6070_v49, %v5970_v18 }
 0xcc1   :  { %9217 = vmatmul.msk.f32.gmra.mxu0 %vm2174_vm6, %v1996_v22 }
 0xcc2   :  { %9197 = vmatmul.msk.f32.gmra.mxu3 %vm2174_vm6, %v6071_v53  ;;  %6535 = vmatmul.f32.gmra.mxu2 %v1986_v58 }
 0xcc4   :  { %v5883_v28 = vpop.f32.mrf.mxu1 }
 0xcc5   :  { %v5972_v45 = vpop.f32.mrf.mxu2  ;;  %v6207_v31 = vpop.f32.mrf.mxu3 }
 0xcc6   :  { %v5973_v46 = vadd.f32 %v5972_v45, %v5871_v14  ;;  %v15096_v49 = vadd.f32 %v6207_v31, %v14682_v10  ;;  %v6085_v55 = vpop.f32.mrf.mxu0  ;;  %v1999_v10 = vld [vmem:[%s16740_s1 + $0x1348] sm:$0xff]  ;;  %v2006_v31 = vld [vmem:[%s16740_s1 + $0x1380] sm:$0xff] }
 0xcc7   :  { %6446 = vmatmul.f32.gmra.mxu1 %v1997_v20  ;;  %v2001_v20 = vld [vmem:[%s16740_s1 + $0x1358] sm:$0xff] }
 0xcc8   :  { %v6074_v3 = vadd.f32 %v6073_v37, %v5973_v46 }
 0xcc9   :  { %9218 = vmatmul.msk.f32.gmra.mxu0 %vm2174_vm6, %v1999_v10 }
 0xcca   :  { %9198 = vmatmul.msk.f32.gmra.mxu3 %vm2174_vm6, %v6074_v3  ;;  %6538 = vmatmul.f32.gmra.mxu2 %v1989_v29 }
 0xccc   :  { %v5886_v8 = vpop.f32.mrf.mxu1 }
 0xccd   :  { %v5975_v14 = vpop.f32.mrf.mxu2  ;;  %v6210_v61 = vpop.f32.mrf.mxu3 }
 0xcce   :  { %v5976_v30 = vadd.f32 %v5975_v14, %v5874_v41  ;;  %v15110_v37 = vadd.f32 %v6210_v61, %v14697_v4  ;;  %v6088_v56 = vpop.f32.mrf.mxu0  ;;  %v2002_v4 = vld [vmem:[%s16740_s1 + $0x1360] sm:$0xff]  ;;  %v2009_v61 = vld [vmem:[%s16740_s1 + $0x1398] sm:$0xff] }
 0xccf   :  { %6449 = vmatmul.f32.gmra.mxu1 %v2000_v50  ;;  %v2004_v50 = vld [vmem:[%s16740_s1 + $0x1370] sm:$0xff] }
 0xcd0   :  { %v6077_v27 = vadd.f32 %v6076_v36, %v5976_v30 }
 0xcd1   :  { %9219 = vmatmul.msk.f32.gmra.mxu0 %vm2174_vm6, %v2002_v4 }
 0xcd2   :  { %9199 = vmatmul.msk.f32.gmra.mxu3 %vm2174_vm6, %v6077_v27  ;;  %6541 = vmatmul.f32.gmra.mxu2 %v1992_v63 }
 0xcd4   :  { %v5889_v12 = vpop.f32.mrf.mxu1 }
 0xcd5   :  { %v5978_v41 = vpop.f32.mrf.mxu2  ;;  %v6213_v1 = vpop.f32.mrf.mxu3 }
 0xcd6   :  { %v5979_v44 = vadd.f32 %v5978_v41, %v5877_v40  ;;  %v15124_v36 = vadd.f32 %v6213_v1, %v14711_v33  ;;  %v6091_v43 = vpop.f32.mrf.mxu0  ;;  %v2005_v33 = vld [vmem:[%s16740_s1 + $0x1378] sm:$0xff]  ;;  %v2012_v1 = vld [vmem:[%s16740_s1 + $0x13b0] sm:$0xff] }
 0xcd7   :  { %6452 = vmatmul.f32.gmra.mxu1 %v2003_v7  ;;  %v2007_v7 = vld [vmem:[%s16740_s1 + $0x1388] sm:$0xff] }
 0xcd8   :  { %v6080_v25 = vadd.f32 %v6079_v34, %v5979_v44 }
 0xcd9   :  { %9220 = vmatmul.msk.f32.gmra.mxu0 %vm2174_vm6, %v2005_v33 }
 0xcda   :  { %9200 = vmatmul.msk.f32.gmra.mxu3 %vm2174_vm6, %v6080_v25  ;;  %6544 = vmatmul.f32.gmra.mxu2 %v1995_v59 }
 0xcdc   :  { %v5892_v53 = vpop.f32.mrf.mxu1 }
 0xcdd   :  { %v5981_v40 = vpop.f32.mrf.mxu2  ;;  %v6216_v18 = vpop.f32.mrf.mxu3 }
 0xcde   :  { %v5982_v58 = vadd.f32 %v5981_v40, %v5880_v42  ;;  %v15138_v34 = vadd.f32 %v6216_v18, %v14725_v11  ;;  %v6094_v45 = vpop.f32.mrf.mxu0  ;;  %v2008_v11 = vld [vmem:[%s16740_s1 + $0x1390] sm:$0xff]  ;;  %v2015_v18 = vld [vmem:[%s16740_s1 + $0x13c8] sm:$0xff] }
 0xcdf   :  { %6455 = vmatmul.f32.gmra.mxu1 %v2006_v31 }
 0xce0   :  { %v6083_v22 = vadd.f32 %v6082_v38, %v5982_v58 }
 0xce1   :  { %9221 = vmatmul.msk.f32.gmra.mxu0 %vm2174_vm6, %v2008_v11  ;;  %v2168_v11 = vld [vmem:[%s16741_s7 + $0xf0] sm:$0xff] }
 0xce2   :  { %9201 = vmatmul.msk.f32.gmra.mxu3 %vm2174_vm6, %v6083_v22  ;;  %6547 = vmatmul.f32.gmra.mxu2 %v1998_v51 }
 0xce4   :  { %v5895_v3 = vpop.f32.mrf.mxu1 }
 0xce5   :  { %v5984_v42 = vpop.f32.mrf.mxu2  ;;  %v6219_v46 = vpop.f32.mrf.mxu3 }
 0xce6   :  { %v5985_v29 = vadd.f32 %v5984_v42, %v5883_v28  ;;  %v15152_v38 = vadd.f32 %v6219_v46, %v14739_v5  ;;  %v15157_v14 = vpop.f32.mrf.mxu0  ;;  %v2011_v5 = vld [vmem:[%s16740_s1 + $0x13a8] sm:$0xff]  ;;  %v2010_v42 = vld [vmem:[%s16740_s1 + $0x13a0] sm:$0xff] }
 0xce7   :  { %6458 = vmatmul.f32.gmra.mxu1 %v2009_v61 }
 0xce8   :  { %v6086_v10 = vadd.f32 %v6085_v55, %v5985_v29 }
 0xce9   :  { %9222 = vmatmul.msk.f32.gmra.mxu0 %vm2174_vm6, %v2011_v5 }
 0xcea   :  { %9202 = vmatmul.msk.f32.gmra.mxu3 %vm2174_vm6, %v6086_v10  ;;  %6550 = vmatmul.f32.gmra.mxu2 %v2001_v20  ;;  %v2167_v20 = vld [vmem:[%s16741_s7 + $0xe8] sm:$0xff] }
 0xcec   :  { %v5898_v27 = vpop.f32.mrf.mxu1 }
 0xced   :  { %v5987_v28 = vpop.f32.mrf.mxu2  ;;  %v6222_v30 = vpop.f32.mrf.mxu3 }
 0xcee   :  { %v5988_v63 = vadd.f32 %v5987_v28, %v5886_v8  ;;  %v15168_v55 = vadd.f32 %v6222_v30, %v14755_v54  ;;  %v15173_v41 = vpop.f32.mrf.mxu0  ;;  %v2014_v54 = vld [vmem:[%s16740_s1 + $0x13c0] sm:$0xff] }
 0xcef   :  { %6461 = vmatmul.f32.gmra.mxu1 %v2012_v1  ;;  %v2021_v1 = vld [vmem:[%s16740_s1 + $0x13f8] sm:$0xff] }
 0xcf0   :  { %v6089_v4 = vadd.f32 %v6088_v56, %v5988_v63  ;;  %v2013_v63 = vld [vmem:[%s16740_s1 + $0x13b8] sm:$0xff] }
 0xcf1   :  { %9223 = vmatmul.msk.f32.gmra.mxu0 %vm2174_vm6, %v2014_v54 }
 0xcf2   :  { %9203 = vmatmul.msk.f32.gmra.mxu3 %vm2174_vm6, %v6089_v4  ;;  %6553 = vmatmul.f32.gmra.mxu2 %v2004_v50 }
 0xcf4   :  { %v5901_v25 = vpop.f32.mrf.mxu1 }
 0xcf5   :  { %v5990_v8 = vpop.f32.mrf.mxu2  ;;  %v6225_v44 = vpop.f32.mrf.mxu3 }
 0xcf6   :  { %v5991_v59 = vadd.f32 %v5990_v8, %v5889_v12  ;;  %v15184_v56 = vadd.f32 %v6225_v44, %v14771_v26  ;;  %v15189_v40 = vpop.f32.mrf.mxu0  ;;  %v2017_v26 = vld [vmem:[%s16740_s1 + $0x13d8] sm:$0xff] }
 0xcf7   :  { %6464 = vmatmul.f32.gmra.mxu1 %v2015_v18  ;;  %v2169_v12 = vld [vmem:[%s16741_s7 + $0xf8] sm:$0xff]  ;;  %v2024_v18 = vld [vmem:[%s16740_s1 + $0x1410] sm:$0xff] }
 0xcf8   :  { %v6092_v33 = vadd.f32 %v6091_v43, %v5991_v59  ;;  %6802 = vmatpush.msrb.mxu3 %v2169_v12  ;;  %v2016_v59 = vld [vmem:[%s16740_s1 + $0x13d0] sm:$0xff] }
 0xcf9   :  { %9224 = vmatmul.msk.f32.gmra.mxu0 %vm2174_vm6, %v2017_v26 }
 0xcfa   :  { %9204 = vmatmul.msk.f32.gmra.mxu3 %vm2174_vm6, %v6092_v33  ;;  %6556 = vmatmul.f32.gmra.mxu2 %v2007_v7 }
 0xcfb   :  { %6803 = vmatpush.msrb.mxu3 %v2168_v11 }
 0xcfc   :  { %v6420_v31 = vpop.f32.mrf.mxu1 }
 0xcfd   :  { %v5993_v43 = vpop.f32.mrf.mxu2  ;;  %v6228_v58 = vpop.f32.mrf.mxu3  ;;  %6804 = vmatpush.msrb.mxu3 %v2167_v20 }
 0xcfe   :  { %v5994_v51 = vadd.f32 %v5993_v43, %v5892_v53  ;;  %v15203_v22 = vadd.f32 %v6228_v58, %v14790_v47  ;;  %v6622_v29 = vpop.f32.mrf.mxu0  ;;  %v2018_v47 = vld [vmem:[%s16740_s1 + $0x13e0] sm:$0xff]  ;;  %v2019_v58 = vld [vmem:[%s16740_s1 + $0x13e8] sm:$0xff] }
 0xcff   :  { %v2166_v53 = vld [vmem:[%s16741_s7 + $0xe0] sm:$0xff]  ;;  %6467 = vmatmul.f32.gmra.mxu1 %v2018_v47 }
 0xd00   :  { %v6095_v46 = vadd.f32 %v6094_v45, %v5994_v51  ;;  %v2020_v45 = vld [vmem:[%s16740_s1 + $0x13f0] sm:$0xff]  ;;  %6805 = vmatpush.msrb.mxu3 %v2166_v53  ;;  %v2022_v53 = vld [vmem:[%s16740_s1 + $0x1400] sm:$0xff] }
 0xd01   :  { %9225 = vmatmul.msk.f32.gmra.mxu0 %vm2174_vm6, %v2020_v45 }
 0xd02   :  { %9205 = vmatmul.msk.f32.gmra.mxu3 %vm2174_vm6, %v6095_v46  ;;  %6559 = vmatmul.f32.gmra.mxu2 %v2010_v42  ;;  %v2027_v42 = vld [vmem:[%s16740_s1 + $0x1428] sm:$0xff] }
 0xd04   :  { %v6423_v30 = vpop.f32.mrf.mxu1 }
 0xd05   :  { %v5996_v10 = vpop.f32.mrf.mxu2  ;;  %v6231_v61 = vpop.f32.mrf.mxu3 }
 0xd06   :  { %v5997_v5 = vadd.f32 %v5996_v10, %v5895_v3  ;;  %v15226_v28 = vadd.f32 %v6231_v61, %v14813_v52  ;;  %v6625_v4 = vpop.f32.mrf.mxu0  ;;  %v2023_v52 = vld [vmem:[%s16740_s1 + $0x1408] sm:$0xff]  ;;  %v2030_v61 = vld [vmem:[%s16740_s1 + $0x1440] sm:$0xff] }
 0xd07   :  { %6470 = vmatmul.f32.gmra.mxu1 %v2021_v1  ;;  %v2025_v1 = vld [vmem:[%s16740_s1 + $0x1418] sm:$0xff] }
 0xd08   :  { %v6098_v50 = vadd.f32 %v15157_v14, %v5997_v5 }
 0xd09   :  { %9226 = vmatmul.msk.f32.gmra.mxu0 %vm2174_vm6, %v2023_v52 }
 0xd0a   :  { %9206 = vmatmul.msk.f32.gmra.mxu3 %vm2174_vm6, %v6098_v50  ;;  %6562 = vmatmul.f32.gmra.mxu2 %v2013_v63 }
 0xd0c   :  { %v6426_v44 = vpop.f32.mrf.mxu1 }
 0xd0d   :  { %v5999_v3 = vpop.f32.mrf.mxu2  ;;  %v6234_v54 = vpop.f32.mrf.mxu3 }
 0xd0e   :  { %v6000_v8 = vadd.f32 %v5999_v3, %v5898_v27  ;;  %v15241_v14 = vadd.f32 %v6234_v54, %v14828_v0  ;;  %v6628_v33 = vpop.f32.mrf.mxu0  ;;  %v2026_v0 = vld [vmem:[%s16740_s1 + $0x1420] sm:$0xff]  ;;  %v2033_v54 = vld [vmem:[%s16740_s1 + $0x1458] sm:$0xff] }
 0xd0f   :  { %6473 = vmatmul.f32.gmra.mxu1 %v2024_v18  ;;  %v2028_v18 = vld [vmem:[%s16740_s1 + $0x1430] sm:$0xff] }
 0xd10   :  { %v6101_v7 = vadd.f32 %v15173_v41, %v6000_v8 }
 0xd11   :  { %9227 = vmatmul.msk.f32.gmra.mxu0 %vm2174_vm6, %v2026_v0 }
 0xd12   :  { %9207 = vmatmul.msk.f32.gmra.mxu3 %vm2174_vm6, %v6101_v7  ;;  %6565 = vmatmul.f32.gmra.mxu2 %v2016_v59 }
 0xd14   :  { %v6429_v43 = vpop.f32.mrf.mxu1 }
 0xd15   :  { %v6002_v27 = vpop.f32.mrf.mxu2  ;;  %v6237_v26 = vpop.f32.mrf.mxu3 }
 0xd16   :  { %v6003_v12 = vadd.f32 %v6002_v27, %v5901_v25  ;;  %v15256_v41 = vadd.f32 %v6237_v26, %v14843_v23  ;;  %v6631_v11 = vpop.f32.mrf.mxu0  ;;  %v2029_v23 = vld [vmem:[%s16740_s1 + $0x1438] sm:$0xff]  ;;  %v2036_v26 = vld [vmem:[%s16740_s1 + $0x1470] sm:$0xff] }
 0xd17   :  { %6476 = vmatmul.f32.gmra.mxu1 %v2027_v42  ;;  %v2031_v42 = vld [vmem:[%s16740_s1 + $0x1448] sm:$0xff] }
 0xd18   :  { %v6104_v51 = vadd.f32 %v15189_v40, %v6003_v12 }
 0xd19   :  { %9228 = vmatmul.msk.f32.gmra.mxu0 %vm2174_vm6, %v2029_v23 }
 0xd1a   :  { %9208 = vmatmul.msk.f32.gmra.mxu3 %vm2174_vm6, %v6104_v51  ;;  %6568 = vmatmul.f32.gmra.mxu2 %v2019_v58 }
 0xd1c   :  { %v6432_v47 = vpop.f32.mrf.mxu1 }
 0xd1d   :  { %v6240_v25 = vpop.f32.mrf.mxu3  ;;  %v6521_v46 = vpop.f32.mrf.mxu2 }
 0xd1e   :  { %v15271_v20 = vadd.f32 %v6240_v25, %v14858_v17  ;;  %v6522_v40 = vadd.f32 %v6521_v46, %v6420_v31  ;;  %v6634_v10 = vpop.f32.mrf.mxu0  ;;  %v2032_v17 = vld [vmem:[%s16740_s1 + $0x1450] sm:$0xff]  ;;  %v2039_v46 = vld [vmem:[%s16740_s1 + $0x1488] sm:$0xff] }
 0xd1f   :  { %6479 = vmatmul.f32.gmra.mxu1 %v2030_v61  ;;  %v2034_v61 = vld [vmem:[%s16740_s1 + $0x1460] sm:$0xff] }
 0xd20   :  { %v6623_v45 = vadd.f32 %v6622_v29, %v6522_v40 }
 0xd21   :  { %9229 = vmatmul.msk.f32.gmra.mxu0 %vm2174_vm6, %v2032_v17 }
 0xd22   :  { %6571 = vmatmul.f32.gmra.mxu2 %v2022_v53  ;;  %9237 = vmatmul.msk.f32.vlgmr.msrb.gmra.mxu3 %vm2174_vm6, %v6623_v45 }
 0xd24   :  { %v6435_v50 = vpop.f32.mrf.mxu1 }
 0xd25   :  { %v6243_v31 = vpop.f32.mrf.mxu3  ;;  %v6524_v5 = vpop.f32.mrf.mxu2 }
 0xd26   :  { %v15285_v63 = vadd.f32 %v6243_v31, %v14872_v16  ;;  %v6525_v29 = vadd.f32 %v6524_v5, %v6423_v30  ;;  %v6637_v3 = vpop.f32.mrf.mxu0  ;;  %v2035_v16 = vld [vmem:[%s16740_s1 + $0x1468] sm:$0xff]  ;;  %v2042_v5 = vld [vmem:[%s16740_s1 + $0x14a0] sm:$0xff] }
 0xd27   :  { %6482 = vmatmul.f32.gmra.mxu1 %v2033_v54  ;;  %v2037_v54 = vld [vmem:[%s16740_s1 + $0x1478] sm:$0xff] }
 0xd28   :  { %v6626_v52 = vadd.f32 %v6625_v4, %v6525_v29 }
 0xd29   :  { %9230 = vmatmul.msk.f32.gmra.mxu0 %vm2174_vm6, %v2035_v16 }
 0xd2a   :  { %6574 = vmatmul.f32.gmra.mxu2 %v2025_v1  ;;  %9238 = vmatmul.msk.f32.gmra.mxu3 %vm2174_vm6, %v6626_v52 }
 0xd2c   :  { %v6438_v7 = vpop.f32.mrf.mxu1 }
 0xd2d   :  { %v6246_v30 = vpop.f32.mrf.mxu3  ;;  %v6527_v8 = vpop.f32.mrf.mxu2 }
 0xd2e   :  { %v15299_v59 = vadd.f32 %v6246_v30, %v14886_v62  ;;  %v6528_v4 = vadd.f32 %v6527_v8, %v6426_v44  ;;  %v6640_v27 = vpop.f32.mrf.mxu0  ;;  %v2038_v62 = vld [vmem:[%s16740_s1 + $0x1480] sm:$0xff]  ;;  %v2045_v8 = vld [vmem:[%s16740_s1 + $0x14b8] sm:$0xff] }
 0xd2f   :  { %6485 = vmatmul.f32.gmra.mxu1 %v2036_v26  ;;  %v2040_v26 = vld [vmem:[%s16740_s1 + $0x1490] sm:$0xff] }
 0xd30   :  { %v6629_v0 = vadd.f32 %v6628_v33, %v6528_v4 }
 0xd31   :  { %9231 = vmatmul.msk.f32.gmra.mxu0 %vm2174_vm6, %v2038_v62 }
 0xd32   :  { %6577 = vmatmul.f32.gmra.mxu2 %v2028_v18  ;;  %9239 = vmatmul.msk.f32.gmra.mxu3 %vm2174_vm6, %v6629_v0 }
 0xd34   :  { %v6441_v51 = vpop.f32.mrf.mxu1 }
 0xd35   :  { %v6249_v44 = vpop.f32.mrf.mxu3  ;;  %v6530_v12 = vpop.f32.mrf.mxu2 }
 0xd36   :  { %v15313_v58 = vadd.f32 %v6249_v44, %v14900_v19  ;;  %v6531_v33 = vadd.f32 %v6530_v12, %v6429_v43  ;;  %v6643_v25 = vpop.f32.mrf.mxu0  ;;  %v2041_v19 = vld [vmem:[%s16740_s1 + $0x1498] sm:$0xff]  ;;  %v2048_v12 = vld [vmem:[%s16740_s1 + $0x14d0] sm:$0xff] }
 0xd37   :  { %6488 = vmatmul.f32.gmra.mxu1 %v2039_v46  ;;  %v2043_v46 = vld [vmem:[%s16740_s1 + $0x14a8] sm:$0xff] }
 0xd38   :  { %v6632_v23 = vadd.f32 %v6631_v11, %v6531_v33 }
 0xd39   :  { %9232 = vmatmul.msk.f32.gmra.mxu0 %vm2174_vm6, %v2041_v19 }
 0xd3a   :  { %6580 = vmatmul.f32.gmra.mxu2 %v2031_v42  ;;  %9240 = vmatmul.msk.f32.gmra.mxu3 %vm2174_vm6, %v6632_v23 }
 0xd3c   :  { %v6444_v45 = vpop.f32.mrf.mxu1 }
 0xd3d   :  { %v6252_v43 = vpop.f32.mrf.mxu3  ;;  %v6533_v40 = vpop.f32.mrf.mxu2 }
 0xd3e   :  { %v15327_v53 = vadd.f32 %v6252_v43, %v14914_v48  ;;  %v6534_v11 = vadd.f32 %v6533_v40, %v6432_v47  ;;  %v6646_v31 = vpop.f32.mrf.mxu0  ;;  %v2044_v48 = vld [vmem:[%s16740_s1 + $0x14b0] sm:$0xff]  ;;  %v2051_v40 = vld [vmem:[%s16740_s1 + $0x14e8] sm:$0xff] }
 0xd3f   :  { %6491 = vmatmul.f32.gmra.mxu1 %v2042_v5  ;;  %v2046_v5 = vld [vmem:[%s16740_s1 + $0x14c0] sm:$0xff] }
 0xd40   :  { %v6635_v17 = vadd.f32 %v6634_v10, %v6534_v11  ;;  %v2053_v11 = vld [vmem:[%s16740_s1 + $0x14f8] sm:$0xff] }
 0xd41   :  { %9233 = vmatmul.msk.f32.gmra.mxu0 %vm2174_vm6, %v2044_v48 }
 0xd42   :  { %6583 = vmatmul.f32.gmra.mxu2 %v2034_v61  ;;  %9241 = vmatmul.msk.f32.gmra.mxu3 %vm2174_vm6, %v6635_v17 }
 0xd44   :  { %v6447_v52 = vpop.f32.mrf.mxu1 }
 0xd45   :  { %v6255_v47 = vpop.f32.mrf.mxu3  ;;  %v6536_v29 = vpop.f32.mrf.mxu2 }
 0xd46   :  { %v15341_v1 = vadd.f32 %v6255_v47, %v14928_v13  ;;  %v6537_v10 = vadd.f32 %v6536_v29, %v6435_v50  ;;  %v6649_v30 = vpop.f32.mrf.mxu0  ;;  %v2047_v13 = vld [vmem:[%s16740_s1 + $0x14c8] sm:$0xff]  ;;  %v2054_v29 = vld [vmem:[%s16740_s1 + $0x1500] sm:$0xff] }
 0xd47   :  { %6494 = vmatmul.f32.gmra.mxu1 %v2045_v8  ;;  %v2049_v8 = vld [vmem:[%s16740_s1 + $0x14d8] sm:$0xff] }
 0xd48   :  { %v6638_v16 = vadd.f32 %v6637_v3, %v6537_v10 }
 0xd49   :  { %9234 = vmatmul.msk.f32.gmra.mxu0 %vm2174_vm6, %v2047_v13 }
 0xd4a   :  { %6586 = vmatmul.f32.gmra.mxu2 %v2037_v54  ;;  %9242 = vmatmul.msk.f32.gmra.mxu3 %vm2174_vm6, %v6638_v16 }
 0xd4c   :  { %v6450_v0 = vpop.f32.mrf.mxu1 }
 0xd4d   :  { %v6258_v50 = vpop.f32.mrf.mxu3  ;;  %v6539_v4 = vpop.f32.mrf.mxu2 }
 0xd4e   :  { %v15355_v18 = vadd.f32 %v6258_v50, %v14942_v6  ;;  %v6540_v3 = vadd.f32 %v6539_v4, %v6438_v7  ;;  %v6652_v44 = vpop.f32.mrf.mxu0  ;;  %v2050_v6 = vld [vmem:[%s16740_s1 + $0x14e0] sm:$0xff]  ;;  %v2057_v4 = vld [vmem:[%s16740_s1 + $0x1518] sm:$0xff] }
 0xd4f   :  { %6497 = vmatmul.f32.gmra.mxu1 %v2048_v12  ;;  %v2052_v12 = vld [vmem:[%s16740_s1 + $0x14f0] sm:$0xff] }
 0xd50   :  { %v6641_v62 = vadd.f32 %v6640_v27, %v6540_v3 }
 0xd51   :  { %9235 = vmatmul.msk.f32.gmra.mxu0 %vm2174_vm6, %v2050_v6 }
 0xd52   :  { %6589 = vmatmul.f32.gmra.mxu2 %v2040_v26  ;;  %9243 = vmatmul.msk.f32.gmra.mxu3 %vm2174_vm6, %v6641_v62 }
 0xd54   :  { %v6453_v23 = vpop.f32.mrf.mxu1 }
 0xd55   :  { %v6261_v7 = vpop.f32.mrf.mxu3  ;;  %v6542_v33 = vpop.f32.mrf.mxu2 }
 0xd56   :  { %v15369_v42 = vadd.f32 %v6261_v7, %v14956_v32  ;;  %v6543_v27 = vadd.f32 %v6542_v33, %v6441_v51  ;;  %v6655_v43 = vpop.f32.mrf.mxu0  ;;  %v2060_v33 = vld [vmem:[%s16740_s1 + $0x1530] sm:$0xff] }
 0xd57   :  { %6500 = vmatmul.f32.gmra.mxu1 %v2051_v40  ;;  %v2055_v40 = vld [vmem:[%s16740_s1 + $0x1508] sm:$0xff] }
 0xd58   :  { %v6644_v19 = vadd.f32 %v6643_v25, %v6543_v27 }
 0xd59   :  { %9236 = vmatmul.msk.f32.gmra.mxu0 %vm2174_vm6, %v2053_v11 }
 0xd5a   :  { %6592 = vmatmul.f32.gmra.mxu2 %v2043_v46  ;;  %9244 = vmatmul.msk.f32.gmra.mxu3 %vm2174_vm6, %v6644_v19 }
 0xd5c   :  { %v6456_v17 = vpop.f32.mrf.mxu1 }
 0xd5d   :  { %v6264_v32 = vpop.f32.mrf.mxu3  ;;  %v6545_v51 = vpop.f32.mrf.mxu2 }
 0xd5e   :  { %v15383_v61 = vadd.f32 %v6264_v32, %v14970_v21  ;;  %v6546_v25 = vadd.f32 %v6545_v51, %v6444_v45  ;;  %v6658_v47 = vpop.f32.mrf.mxu0  ;;  %v2056_v21 = vld [vmem:[%s16740_s1 + $0x1510] sm:$0xff]  ;;  %v2063_v51 = vld [vmem:[%s16740_s1 + $0x1548] sm:$0xff] }
 0xd5f   :  { %7019 = vmatmul.f32.vlgmr.msrb.gmra.mxu1 %v2054_v29  ;;  %v2058_v29 = vld [vmem:[%s16740_s1 + $0x1520] sm:$0xff] }
 0xd60   :  { %v6647_v48 = vadd.f32 %v6646_v31, %v6546_v25 }
 0xd61   :  { %9265 = vmatmul.msk.f32.vlgmr.msra.gmra.mxu0 %vm2174_vm6, %v2056_v21 }
 0xd62   :  { %6595 = vmatmul.f32.gmra.mxu2 %v2046_v5  ;;  %9245 = vmatmul.msk.f32.gmra.mxu3 %vm2174_vm6, %v6647_v48 }
 0xd64   :  { %v6459_v16 = vpop.f32.mrf.mxu1 }
 0xd65   :  { %v6267_v45 = vpop.f32.mrf.mxu3  ;;  %v6548_v10 = vpop.f32.mrf.mxu2 }
 0xd66   :  { %v15397_v54 = vadd.f32 %v6267_v45, %v14984_v57  ;;  %v6549_v31 = vadd.f32 %v6548_v10, %v6447_v52  ;;  %v6661_v50 = vpop.f32.mrf.mxu0  ;;  %v2059_v57 = vld [vmem:[%s16740_s1 + $0x1528] sm:$0xff]  ;;  %v2066_v10 = vld [vmem:[%s16740_s1 + $0x1560] sm:$0xff] }
 0xd67   :  { %7022 = vmatmul.f32.gmra.mxu1 %v2057_v4  ;;  %v2061_v4 = vld [vmem:[%s16740_s1 + $0x1538] sm:$0xff] }
 0xd68   :  { %v6650_v13 = vadd.f32 %v6649_v30, %v6549_v31 }
 0xd69   :  { %9266 = vmatmul.msk.f32.gmra.mxu0 %vm2174_vm6, %v2059_v57 }
 0xd6a   :  { %6598 = vmatmul.f32.gmra.mxu2 %v2049_v8  ;;  %9246 = vmatmul.msk.f32.gmra.mxu3 %vm2174_vm6, %v6650_v13 }
 0xd6c   :  { %v6462_v62 = vpop.f32.mrf.mxu1 }
 0xd6d   :  { %v6270_v52 = vpop.f32.mrf.mxu3  ;;  %v6551_v3 = vpop.f32.mrf.mxu2 }
 0xd6e   :  { %v15411_v26 = vadd.f32 %v6270_v52, %v14998_v35  ;;  %v6552_v30 = vadd.f32 %v6551_v3, %v6450_v0  ;;  %v6664_v7 = vpop.f32.mrf.mxu0  ;;  %v2062_v35 = vld [vmem:[%s16740_s1 + $0x1540] sm:$0xff]  ;;  %v2069_v3 = vld [vmem:[%s16740_s1 + $0x1578] sm:$0xff] }
 0xd6f   :  { %7025 = vmatmul.f32.gmra.mxu1 %v2060_v33  ;;  %v2064_v33 = vld [vmem:[%s16740_s1 + $0x1550] sm:$0xff] }
 0xd70   :  { %v6653_v6 = vadd.f32 %v6652_v44, %v6552_v30 }
 0xd71   :  { %9267 = vmatmul.msk.f32.gmra.mxu0 %vm2174_vm6, %v2062_v35 }
 0xd72   :  { %6601 = vmatmul.f32.gmra.mxu2 %v2052_v12  ;;  %9247 = vmatmul.msk.f32.gmra.mxu3 %vm2174_vm6, %v6653_v6 }
 0xd74   :  { %v6465_v19 = vpop.f32.mrf.mxu1 }
 0xd75   :  { %v6273_v0 = vpop.f32.mrf.mxu3  ;;  %v6554_v27 = vpop.f32.mrf.mxu2 }
 0xd76   :  { %v15425_v46 = vadd.f32 %v6273_v0, %v15012_v24  ;;  %v6555_v44 = vadd.f32 %v6554_v27, %v6453_v23  ;;  %v6667_v32 = vpop.f32.mrf.mxu0  ;;  %v2065_v24 = vld [vmem:[%s16740_s1 + $0x1558] sm:$0xff]  ;;  %v2072_v27 = vld [vmem:[%s16740_s1 + $0x1590] sm:$0xff] }
 0xd77   :  { %7028 = vmatmul.f32.gmra.mxu1 %v2063_v51  ;;  %v2067_v51 = vld [vmem:[%s16740_s1 + $0x1568] sm:$0xff] }
 0xd78   :  { %v6656_v11 = vadd.f32 %v6655_v43, %v6555_v44 }
 0xd79   :  { %9268 = vmatmul.msk.f32.gmra.mxu0 %vm2174_vm6, %v2065_v24 }
 0xd7a   :  { %9248 = vmatmul.msk.f32.gmra.mxu3 %vm2174_vm6, %v6656_v11  ;;  %7120 = vmatmul.f32.vlgmr.msrb.gmra.mxu2 %v2055_v40 }
 0xd7c   :  { %v6468_v48 = vpop.f32.mrf.mxu1 }
 0xd7d   :  { %v6276_v23 = vpop.f32.mrf.mxu3  ;;  %v6557_v25 = vpop.f32.mrf.mxu2 }
 0xd7e   :  { %v15439_v5 = vadd.f32 %v6276_v23, %v15026_v60  ;;  %v6558_v43 = vadd.f32 %v6557_v25, %v6456_v17  ;;  %v6670_v45 = vpop.f32.mrf.mxu0  ;;  %v2068_v60 = vld [vmem:[%s16740_s1 + $0x1570] sm:$0xff]  ;;  %v2075_v25 = vld [vmem:[%s16740_s1 + $0x15a8] sm:$0xff] }
 0xd7f   :  { %7031 = vmatmul.f32.gmra.mxu1 %v2066_v10  ;;  %v2070_v10 = vld [vmem:[%s16740_s1 + $0x1580] sm:$0xff] }
 0xd80   :  { %v6659_v21 = vadd.f32 %v6658_v47, %v6558_v43 }
 0xd81   :  { %9269 = vmatmul.msk.f32.gmra.mxu0 %vm2174_vm6, %v2068_v60 }
 0xd82   :  { %9249 = vmatmul.msk.f32.gmra.mxu3 %vm2174_vm6, %v6659_v21  ;;  %7123 = vmatmul.f32.gmra.mxu2 %v2058_v29 }
 0xd84   :  { %v6471_v13 = vpop.f32.mrf.mxu1 }
 0xd85   :  { %v6279_v17 = vpop.f32.mrf.mxu3  ;;  %v6560_v31 = vpop.f32.mrf.mxu2 }
 0xd86   :  { %v15453_v8 = vadd.f32 %v6279_v17, %v15040_v9  ;;  %v6561_v47 = vadd.f32 %v6560_v31, %v6459_v16  ;;  %v6673_v52 = vpop.f32.mrf.mxu0  ;;  %v2071_v9 = vld [vmem:[%s16740_s1 + $0x1588] sm:$0xff]  ;;  %v2078_v31 = vld [vmem:[%s16740_s1 + $0x15c0] sm:$0xff] }
 0xd87   :  { %7034 = vmatmul.f32.gmra.mxu1 %v2069_v3  ;;  %v2073_v3 = vld [vmem:[%s16740_s1 + $0x1598] sm:$0xff] }
 0xd88   :  { %v6662_v57 = vadd.f32 %v6661_v50, %v6561_v47 }
 0xd89   :  { %9270 = vmatmul.msk.f32.gmra.mxu0 %vm2174_vm6, %v2071_v9 }
 0xd8a   :  { %9250 = vmatmul.msk.f32.gmra.mxu3 %vm2174_vm6, %v6662_v57  ;;  %7126 = vmatmul.f32.gmra.mxu2 %v2061_v4 }
 0xd8c   :  { %v6474_v6 = vpop.f32.mrf.mxu1 }
 0xd8d   :  { %v6282_v16 = vpop.f32.mrf.mxu3  ;;  %v6563_v30 = vpop.f32.mrf.mxu2 }
 0xd8e   :  { %v15467_v12 = vadd.f32 %v6282_v16, %v15054_v15  ;;  %v6564_v50 = vadd.f32 %v6563_v30, %v6462_v62  ;;  %v6676_v0 = vpop.f32.mrf.mxu0  ;;  %v2074_v15 = vld [vmem:[%s16740_s1 + $0x15a0] sm:$0xff]  ;;  %v2081_v30 = vld [vmem:[%s16740_s1 + $0x15d8] sm:$0xff] }
 0xd8f   :  { %7037 = vmatmul.f32.gmra.mxu1 %v2072_v27  ;;  %v2076_v27 = vld [vmem:[%s16740_s1 + $0x15b0] sm:$0xff] }
 0xd90   :  { %v6665_v35 = vadd.f32 %v6664_v7, %v6564_v50 }
 0xd91   :  { %9271 = vmatmul.msk.f32.gmra.mxu0 %vm2174_vm6, %v2074_v15 }
 0xd92   :  { %9251 = vmatmul.msk.f32.gmra.mxu3 %vm2174_vm6, %v6665_v35  ;;  %7129 = vmatmul.f32.gmra.mxu2 %v2064_v33 }
 0xd94   :  { %v6477_v11 = vpop.f32.mrf.mxu1 }
 0xd95   :  { %v6285_v62 = vpop.f32.mrf.mxu3  ;;  %v6566_v44 = vpop.f32.mrf.mxu2 }
 0xd96   :  { %v15481_v40 = vadd.f32 %v6285_v62, %v15068_v2  ;;  %v6567_v7 = vadd.f32 %v6566_v44, %v6465_v19  ;;  %v6679_v23 = vpop.f32.mrf.mxu0  ;;  %v2077_v2 = vld [vmem:[%s16740_s1 + $0x15b8] sm:$0xff]  ;;  %v2084_v44 = vld [vmem:[%s16740_s1 + $0x15f0] sm:$0xff] }
 0xd97   :  { %7040 = vmatmul.f32.gmra.mxu1 %v2075_v25  ;;  %v2079_v25 = vld [vmem:[%s16740_s1 + $0x15c8] sm:$0xff] }
 0xd98   :  { %v6668_v24 = vadd.f32 %v6667_v32, %v6567_v7 }
 0xd99   :  { %9272 = vmatmul.msk.f32.gmra.mxu0 %vm2174_vm6, %v2077_v2 }
 0xd9a   :  { %9252 = vmatmul.msk.f32.gmra.mxu3 %vm2174_vm6, %v6668_v24  ;;  %7132 = vmatmul.f32.gmra.mxu2 %v2067_v51 }
 0xd9c   :  { %v6480_v21 = vpop.f32.mrf.mxu1 }
 0xd9d   :  { %v6288_v19 = vpop.f32.mrf.mxu3  ;;  %v6569_v43 = vpop.f32.mrf.mxu2 }
 0xd9e   :  { %v15495_v29 = vadd.f32 %v6288_v19, %v15082_v39  ;;  %v6570_v32 = vadd.f32 %v6569_v43, %v6468_v48  ;;  %v6682_v17 = vpop.f32.mrf.mxu0  ;;  %v2080_v39 = vld [vmem:[%s16740_s1 + $0x15d0] sm:$0xff]  ;;  %v2087_v43 = vld [vmem:[%s16740_s1 + $0x1608] sm:$0xff] }
 0xd9f   :  { %7043 = vmatmul.f32.gmra.mxu1 %v2078_v31  ;;  %v2082_v31 = vld [vmem:[%s16740_s1 + $0x15e0] sm:$0xff] }
 0xda0   :  { %v6671_v60 = vadd.f32 %v6670_v45, %v6570_v32 }
 0xda1   :  { %9273 = vmatmul.msk.f32.gmra.mxu0 %vm2174_vm6, %v2080_v39 }
 0xda2   :  { %9253 = vmatmul.msk.f32.gmra.mxu3 %vm2174_vm6, %v6671_v60  ;;  %7135 = vmatmul.f32.gmra.mxu2 %v2070_v10 }
 0xda4   :  { %v6483_v57 = vpop.f32.mrf.mxu1 }
 0xda5   :  { %v6572_v48 = vpop.f32.mrf.mxu2  ;;  %v6807_v47 = vpop.f32.mrf.mxu3 }
 0xda6   :  { %v6573_v4 = vadd.f32 %v6572_v48, %v6471_v13  ;;  %v15509_v45 = vadd.f32 %v6807_v47, %v15096_v49  ;;  %v6685_v16 = vpop.f32.mrf.mxu0  ;;  %v2083_v49 = vld [vmem:[%s16740_s1 + $0x15e8] sm:$0xff]  ;;  %v2090_v47 = vld [vmem:[%s16740_s1 + $0x1620] sm:$0xff] }
 0xda7   :  { %7046 = vmatmul.f32.gmra.mxu1 %v2081_v30  ;;  %v2085_v30 = vld [vmem:[%s16740_s1 + $0x15f8] sm:$0xff] }
 0xda8   :  { %v6674_v9 = vadd.f32 %v6673_v52, %v6573_v4 }
 0xda9   :  { %9274 = vmatmul.msk.f32.gmra.mxu0 %vm2174_vm6, %v2083_v49 }
 0xdaa   :  { %9254 = vmatmul.msk.f32.gmra.mxu3 %vm2174_vm6, %v6674_v9  ;;  %7138 = vmatmul.f32.gmra.mxu2 %v2073_v3 }
 0xdac   :  { %v6486_v35 = vpop.f32.mrf.mxu1 }
 0xdad   :  { %v6575_v13 = vpop.f32.mrf.mxu2  ;;  %v6810_v50 = vpop.f32.mrf.mxu3 }
 0xdae   :  { %v6576_v33 = vadd.f32 %v6575_v13, %v6474_v6  ;;  %v15523_v52 = vadd.f32 %v6810_v50, %v15110_v37  ;;  %v6688_v62 = vpop.f32.mrf.mxu0  ;;  %v2086_v37 = vld [vmem:[%s16740_s1 + $0x1600] sm:$0xff]  ;;  %v2093_v50 = vld [vmem:[%s16740_s1 + $0x1638] sm:$0xff] }
 0xdaf   :  { %7049 = vmatmul.f32.gmra.mxu1 %v2084_v44  ;;  %v2088_v44 = vld [vmem:[%s16740_s1 + $0x1610] sm:$0xff] }
 0xdb0   :  { %v6677_v15 = vadd.f32 %v6676_v0, %v6576_v33 }
 0xdb1   :  { %9275 = vmatmul.msk.f32.gmra.mxu0 %vm2174_vm6, %v2086_v37 }
 0xdb2   :  { %9255 = vmatmul.msk.f32.gmra.mxu3 %vm2174_vm6, %v6677_v15  ;;  %7141 = vmatmul.f32.gmra.mxu2 %v2076_v27 }
 0xdb4   :  { %v6489_v24 = vpop.f32.mrf.mxu1 }
 0xdb5   :  { %v6578_v6 = vpop.f32.mrf.mxu2  ;;  %v6813_v7 = vpop.f32.mrf.mxu3 }
 0xdb6   :  { %v6579_v51 = vadd.f32 %v6578_v6, %v6477_v11  ;;  %v15537_v0 = vadd.f32 %v6813_v7, %v15124_v36  ;;  %v6691_v19 = vpop.f32.mrf.mxu0  ;;  %v2089_v36 = vld [vmem:[%s16740_s1 + $0x1618] sm:$0xff]  ;;  %v2096_v7 = vld [vmem:[%s16740_s1 + $0x1650] sm:$0xff] }
 0xdb7   :  { %7052 = vmatmul.f32.gmra.mxu1 %v2087_v43  ;;  %v2091_v43 = vld [vmem:[%s16740_s1 + $0x1628] sm:$0xff] }
 0xdb8   :  { %v6680_v2 = vadd.f32 %v6679_v23, %v6579_v51 }
 0xdb9   :  { %9276 = vmatmul.msk.f32.gmra.mxu0 %vm2174_vm6, %v2089_v36 }
 0xdba   :  { %9256 = vmatmul.msk.f32.gmra.mxu3 %vm2174_vm6, %v6680_v2  ;;  %7144 = vmatmul.f32.gmra.mxu2 %v2079_v25 }
 0xdbc   :  { %v6492_v60 = vpop.f32.mrf.mxu1 }
 0xdbd   :  { %v6581_v11 = vpop.f32.mrf.mxu2  ;;  %v6816_v32 = vpop.f32.mrf.mxu3 }
 0xdbe   :  { %v6582_v10 = vadd.f32 %v6581_v11, %v6480_v21  ;;  %v15551_v23 = vadd.f32 %v6816_v32, %v15138_v34  ;;  %v6694_v48 = vpop.f32.mrf.mxu0  ;;  %v2092_v34 = vld [vmem:[%s16740_s1 + $0x1630] sm:$0xff]  ;;  %v2099_v32 = vld [vmem:[%s16740_s1 + $0x1668] sm:$0xff] }
 0xdbf   :  { %7055 = vmatmul.f32.gmra.mxu1 %v2090_v47 }
 0xdc0   :  { %v6683_v39 = vadd.f32 %v6682_v17, %v6582_v10 }
 0xdc1   :  { %9277 = vmatmul.msk.f32.gmra.mxu0 %vm2174_vm6, %v2092_v34  ;;  %v2172_v34 = vld [vmem:[%s16741_s7 + $0x110] sm:$0xff] }
 0xdc2   :  { %9257 = vmatmul.msk.f32.gmra.mxu3 %vm2174_vm6, %v6683_v39  ;;  %7147 = vmatmul.f32.gmra.mxu2 %v2082_v31 }
 0xdc4   :  { %v6495_v9 = vpop.f32.mrf.mxu1 }
 0xdc5   :  { %v6584_v21 = vpop.f32.mrf.mxu2  ;;  %v6819_v4 = vpop.f32.mrf.mxu3 }
 0xdc6   :  { %v6585_v3 = vadd.f32 %v6584_v21, %v6483_v57  ;;  %v15565_v17 = vadd.f32 %v6819_v4, %v15152_v38  ;;  %v15570_v13 = vpop.f32.mrf.mxu0  ;;  %v2095_v38 = vld [vmem:[%s16740_s1 + $0x1648] sm:$0xff]  ;;  %v2094_v21 = vld [vmem:[%s16740_s1 + $0x1640] sm:$0xff] }
 0xdc7   :  { %7058 = vmatmul.f32.gmra.mxu1 %v2093_v50 }
 0xdc8   :  { %v6686_v49 = vadd.f32 %v6685_v16, %v6585_v3 }
 0xdc9   :  { %9278 = vmatmul.msk.f32.gmra.mxu0 %vm2174_vm6, %v2095_v38 }
 0xdca   :  { %9258 = vmatmul.msk.f32.gmra.mxu3 %vm2174_vm6, %v6686_v49  ;;  %7150 = vmatmul.f32.gmra.mxu2 %v2085_v30  ;;  %v2171_v30 = vld [vmem:[%s16741_s7 + $0x108] sm:$0xff] }
 0xdcc   :  { %v6498_v15 = vpop.f32.mrf.mxu1 }
 0xdcd   :  { %v6587_v57 = vpop.f32.mrf.mxu2  ;;  %v6822_v33 = vpop.f32.mrf.mxu3 }
 0xdce   :  { %v6588_v27 = vadd.f32 %v6587_v57, %v6486_v35  ;;  %v15581_v16 = vadd.f32 %v6822_v33, %v15168_v55  ;;  %v15586_v6 = vpop.f32.mrf.mxu0  ;;  %v2098_v55 = vld [vmem:[%s16740_s1 + $0x1660] sm:$0xff] }
 0xdcf   :  { %7061 = vmatmul.f32.gmra.mxu1 %v2096_v7  ;;  %v2105_v7 = vld [vmem:[%s16740_s1 + $0x1698] sm:$0xff] }
 0xdd0   :  { %v6689_v37 = vadd.f32 %v6688_v62, %v6588_v27  ;;  %v2097_v27 = vld [vmem:[%s16740_s1 + $0x1658] sm:$0xff] }
 0xdd1   :  { %9279 = vmatmul.msk.f32.gmra.mxu0 %vm2174_vm6, %v2098_v55 }
 0xdd2   :  { %9259 = vmatmul.msk.f32.gmra.mxu3 %vm2174_vm6, %v6689_v37  ;;  %7153 = vmatmul.f32.gmra.mxu2 %v2088_v44 }
 0xdd4   :  { %v6501_v2 = vpop.f32.mrf.mxu1 }
 0xdd5   :  { %v6590_v35 = vpop.f32.mrf.mxu2  ;;  %v6825_v51 = vpop.f32.mrf.mxu3 }
 0xdd6   :  { %v6591_v25 = vadd.f32 %v6590_v35, %v6489_v24  ;;  %v15597_v62 = vadd.f32 %v6825_v51, %v15184_v56  ;;  %v15602_v11 = vpop.f32.mrf.mxu0  ;;  %v2101_v56 = vld [vmem:[%s16740_s1 + $0x1678] sm:$0xff] }
 0xdd7   :  { %7064 = vmatmul.f32.gmra.mxu1 %v2099_v32  ;;  %v2173_v24 = vld [vmem:[%s16741_s7 + $0x118] sm:$0xff]  ;;  %v2108_v32 = vld [vmem:[%s16740_s1 + $0x16b0] sm:$0xff] }
 0xdd8   :  { %v6692_v36 = vadd.f32 %v6691_v19, %v6591_v25  ;;  %7402 = vmatpush.msra.mxu3 %v2173_v24  ;;  %v2100_v25 = vld [vmem:[%s16740_s1 + $0x1670] sm:$0xff] }
 0xdd9   :  { %9280 = vmatmul.msk.f32.gmra.mxu0 %vm2174_vm6, %v2101_v56 }
 0xdda   :  { %9260 = vmatmul.msk.f32.gmra.mxu3 %vm2174_vm6, %v6692_v36  ;;  %7156 = vmatmul.f32.gmra.mxu2 %v2091_v43 }
 0xddb   :  { %7403 = vmatpush.msra.mxu3 %v2172_v34 }
 0xddc   :  { %v7020_v47 = vpop.f32.mrf.mxu1 }
 0xddd   :  { %v6593_v19 = vpop.f32.mrf.mxu2  ;;  %v6828_v10 = vpop.f32.mrf.mxu3  ;;  %7404 = vmatpush.msra.mxu3 %v2171_v30 }
 0xdde   :  { %v6594_v31 = vadd.f32 %v6593_v19, %v6492_v60  ;;  %v15616_v39 = vadd.f32 %v6828_v10, %v15203_v22  ;;  %v7222_v3 = vpop.f32.mrf.mxu0  ;;  %v2102_v22 = vld [vmem:[%s16740_s1 + $0x1680] sm:$0xff]  ;;  %v2103_v10 = vld [vmem:[%s16740_s1 + $0x1688] sm:$0xff] }
 0xddf   :  { %v2170_v60 = vld [vmem:[%s16741_s7 + $0x100] sm:$0xff]  ;;  %7067 = vmatmul.f32.gmra.mxu1 %v2102_v22 }
 0xde0   :  { %v6695_v4 = vadd.f32 %v6694_v48, %v6594_v31  ;;  %v2104_v48 = vld [vmem:[%s16740_s1 + $0x1690] sm:$0xff]  ;;  %7405 = vmatpush.msra.mxu3 %v2170_v60  ;;  %v2106_v60 = vld [vmem:[%s16740_s1 + $0x16a0] sm:$0xff] }
 0xde1   :  { %9281 = vmatmul.msk.f32.gmra.mxu0 %vm2174_vm6, %v2104_v48 }
 0xde2   :  { %9261 = vmatmul.msk.f32.gmra.mxu3 %vm2174_vm6, %v6695_v4  ;;  %7159 = vmatmul.f32.gmra.mxu2 %v2094_v21  ;;  %v2111_v21 = vld [vmem:[%s16740_s1 + $0x16c8] sm:$0xff] }
 0xde4   :  { %v7023_v33 = vpop.f32.mrf.mxu1 }
 0xde5   :  { %v6596_v49 = vpop.f32.mrf.mxu2  ;;  %v6831_v50 = vpop.f32.mrf.mxu3 }
 0xde6   :  { %v6597_v38 = vadd.f32 %v6596_v49, %v6495_v9  ;;  %v15639_v57 = vadd.f32 %v6831_v50, %v15226_v28  ;;  %v7225_v37 = vpop.f32.mrf.mxu0  ;;  %v2107_v28 = vld [vmem:[%s16740_s1 + $0x16a8] sm:$0xff]  ;;  %v2114_v50 = vld [vmem:[%s16740_s1 + $0x16e0] sm:$0xff] }
 0xde7   :  { %7070 = vmatmul.f32.gmra.mxu1 %v2105_v7  ;;  %v2109_v7 = vld [vmem:[%s16740_s1 + $0x16b8] sm:$0xff] }
 0xde8   :  { %v6698_v44 = vadd.f32 %v15570_v13, %v6597_v38 }
 0xde9   :  { %9282 = vmatmul.msk.f32.gmra.mxu0 %vm2174_vm6, %v2107_v28 }
 0xdea   :  { %9262 = vmatmul.msk.f32.gmra.mxu3 %vm2174_vm6, %v6698_v44  ;;  %7162 = vmatmul.f32.gmra.mxu2 %v2097_v27 }
 0xdec   :  { %v7026_v51 = vpop.f32.mrf.mxu1 }
 0xded   :  { %v6599_v9 = vpop.f32.mrf.mxu2  ;;  %v6834_v55 = vpop.f32.mrf.mxu3 }
 0xdee   :  { %v6600_v35 = vadd.f32 %v6599_v9, %v6498_v15  ;;  %v15654_v13 = vadd.f32 %v6834_v55, %v15241_v14  ;;  %v7228_v36 = vpop.f32.mrf.mxu0  ;;  %v2110_v14 = vld [vmem:[%s16740_s1 + $0x16c0] sm:$0xff]  ;;  %v2117_v55 = vld [vmem:[%s16740_s1 + $0x16f8] sm:$0xff] }
 0xdef   :  { %7073 = vmatmul.f32.gmra.mxu1 %v2108_v32  ;;  %v2112_v32 = vld [vmem:[%s16740_s1 + $0x16d0] sm:$0xff] }
 0xdf0   :  { %v6701_v43 = vadd.f32 %v15586_v6, %v6600_v35 }
 0xdf1   :  { %9283 = vmatmul.msk.f32.gmra.mxu0 %vm2174_vm6, %v2110_v14 }
 0xdf2   :  { %9263 = vmatmul.msk.f32.gmra.mxu3 %vm2174_vm6, %v6701_v43  ;;  %7165 = vmatmul.f32.gmra.mxu2 %v2100_v25 }
 0xdf4   :  { %v7029_v19 = vpop.f32.mrf.mxu1 }
 0xdf5   :  { %v6602_v15 = vpop.f32.mrf.mxu2  ;;  %v6837_v56 = vpop.f32.mrf.mxu3 }
 0xdf6   :  { %v6603_v24 = vadd.f32 %v6602_v15, %v6501_v2  ;;  %v15669_v6 = vadd.f32 %v6837_v56, %v15256_v41  ;;  %v7231_v34 = vpop.f32.mrf.mxu0  ;;  %v2113_v41 = vld [vmem:[%s16740_s1 + $0x16d8] sm:$0xff]  ;;  %v2120_v56 = vld [vmem:[%s16740_s1 + $0x1710] sm:$0xff] }
 0xdf7   :  { %7076 = vmatmul.f32.gmra.mxu1 %v2111_v21  ;;  %v2115_v21 = vld [vmem:[%s16740_s1 + $0x16e8] sm:$0xff] }
 0xdf8   :  { %v6704_v31 = vadd.f32 %v15602_v11, %v6603_v24 }
 0xdf9   :  { %9284 = vmatmul.msk.f32.gmra.mxu0 %vm2174_vm6, %v2113_v41 }
 0xdfa   :  { %9264 = vmatmul.msk.f32.gmra.mxu3 %vm2174_vm6, %v6704_v31  ;;  %7168 = vmatmul.f32.gmra.mxu2 %v2103_v10 }
 0xdfc   :  { %v7032_v22 = vpop.f32.mrf.mxu1 }
 0xdfd   :  { %v6840_v2 = vpop.f32.mrf.mxu3  ;;  %v7121_v4 = vpop.f32.mrf.mxu2 }
 0xdfe   :  { %v15684_v30 = vadd.f32 %v6840_v2, %v15271_v20  ;;  %v7122_v11 = vadd.f32 %v7121_v4, %v7020_v47  ;;  %v7234_v49 = vpop.f32.mrf.mxu0  ;;  %v2116_v20 = vld [vmem:[%s16740_s1 + $0x16f0] sm:$0xff]  ;;  %v2123_v4 = vld [vmem:[%s16740_s1 + $0x1728] sm:$0xff] }
 0xdff   :  { %7079 = vmatmul.f32.gmra.mxu1 %v2114_v50  ;;  %v2118_v50 = vld [vmem:[%s16740_s1 + $0x1700] sm:$0xff] }
 0xe00   :  { %v7223_v48 = vadd.f32 %v7222_v3, %v7122_v11 }
 0xe01   :  { %9285 = vmatmul.msk.f32.gmra.mxu0 %vm2174_vm6, %v2116_v20 }
 0xe02   :  { %7171 = vmatmul.f32.gmra.mxu2 %v2106_v60  ;;  %9293 = vmatmul.msk.f32.vlgmr.msra.gmra.mxu3 %vm2174_vm6, %v7223_v48 }
 0xe04   :  { %v7035_v44 = vpop.f32.mrf.mxu1 }
 0xe05   :  { %v6843_v47 = vpop.f32.mrf.mxu3  ;;  %v7124_v38 = vpop.f32.mrf.mxu2 }
 0xe06   :  { %v15698_v27 = vadd.f32 %v6843_v47, %v15285_v63  ;;  %v7125_v3 = vadd.f32 %v7124_v38, %v7023_v33  ;;  %v7237_v9 = vpop.f32.mrf.mxu0  ;;  %v2119_v63 = vld [vmem:[%s16740_s1 + $0x1708] sm:$0xff]  ;;  %v2126_v38 = vld [vmem:[%s16740_s1 + $0x1740] sm:$0xff] }
 0xe07   :  { %7082 = vmatmul.f32.gmra.mxu1 %v2117_v55  ;;  %v2121_v55 = vld [vmem:[%s16740_s1 + $0x1718] sm:$0xff] }
 0xe08   :  { %v7226_v28 = vadd.f32 %v7225_v37, %v7125_v3 }
 0xe09   :  { %9286 = vmatmul.msk.f32.gmra.mxu0 %vm2174_vm6, %v2119_v63 }
 0xe0a   :  { %7174 = vmatmul.f32.gmra.mxu2 %v2109_v7  ;;  %9294 = vmatmul.msk.f32.gmra.mxu3 %vm2174_vm6, %v7226_v28 }
 0xe0c   :  { %v7038_v43 = vpop.f32.mrf.mxu1 }
 0xe0d   :  { %v6846_v33 = vpop.f32.mrf.mxu3  ;;  %v7127_v35 = vpop.f32.mrf.mxu2 }
 0xe0e   :  { %v15712_v25 = vadd.f32 %v6846_v33, %v15299_v59  ;;  %v7128_v37 = vadd.f32 %v7127_v35, %v7026_v51  ;;  %v7240_v15 = vpop.f32.mrf.mxu0  ;;  %v2122_v59 = vld [vmem:[%s16740_s1 + $0x1720] sm:$0xff]  ;;  %v2129_v35 = vld [vmem:[%s16740_s1 + $0x1758] sm:$0xff] }
 0xe0f   :  { %7085 = vmatmul.f32.gmra.mxu1 %v2120_v56  ;;  %v2124_v56 = vld [vmem:[%s16740_s1 + $0x1730] sm:$0xff] }
 0xe10   :  { %v7229_v14 = vadd.f32 %v7228_v36, %v7128_v37 }
 0xe11   :  { %9287 = vmatmul.msk.f32.gmra.mxu0 %vm2174_vm6, %v2122_v59 }
 0xe12   :  { %7177 = vmatmul.f32.gmra.mxu2 %v2112_v32  ;;  %9295 = vmatmul.msk.f32.gmra.mxu3 %vm2174_vm6, %v7229_v14 }
 0xe14   :  { %v7041_v31 = vpop.f32.mrf.mxu1 }
 0xe15   :  { %v6849_v51 = vpop.f32.mrf.mxu3  ;;  %v7130_v24 = vpop.f32.mrf.mxu2 }
 0xe16   :  { %v15726_v10 = vadd.f32 %v6849_v51, %v15313_v58  ;;  %v7131_v36 = vadd.f32 %v7130_v24, %v7029_v19  ;;  %v7243_v2 = vpop.f32.mrf.mxu0  ;;  %v2125_v58 = vld [vmem:[%s16740_s1 + $0x1738] sm:$0xff]  ;;  %v2132_v24 = vld [vmem:[%s16740_s1 + $0x1770] sm:$0xff] }
 0xe17   :  { %7088 = vmatmul.f32.gmra.mxu1 %v2123_v4  ;;  %v2127_v4 = vld [vmem:[%s16740_s1 + $0x1748] sm:$0xff] }
 0xe18   :  { %v7232_v41 = vadd.f32 %v7231_v34, %v7131_v36 }
 0xe19   :  { %9288 = vmatmul.msk.f32.gmra.mxu0 %vm2174_vm6, %v2125_v58 }
 0xe1a   :  { %7180 = vmatmul.f32.gmra.mxu2 %v2115_v21  ;;  %9296 = vmatmul.msk.f32.gmra.mxu3 %vm2174_vm6, %v7232_v41 }
 0xe1c   :  { %v7044_v48 = vpop.f32.mrf.mxu1 }
 0xe1d   :  { %v6852_v19 = vpop.f32.mrf.mxu3  ;;  %v7133_v11 = vpop.f32.mrf.mxu2 }
 0xe1e   :  { %v15740_v60 = vadd.f32 %v6852_v19, %v15327_v53  ;;  %v7134_v34 = vadd.f32 %v7133_v11, %v7032_v22  ;;  %v7246_v47 = vpop.f32.mrf.mxu0  ;;  %v2128_v53 = vld [vmem:[%s16740_s1 + $0x1750] sm:$0xff]  ;;  %v2135_v11 = vld [vmem:[%s16740_s1 + $0x1788] sm:$0xff] }
 0xe1f   :  { %7091 = vmatmul.f32.gmra.mxu1 %v2126_v38  ;;  %v2130_v38 = vld [vmem:[%s16740_s1 + $0x1760] sm:$0xff] }
 0xe20   :  { %v7235_v20 = vadd.f32 %v7234_v49, %v7134_v34  ;;  %v2137_v34 = vld [vmem:[%s16740_s1 + $0x1798] sm:$0xff] }
 0xe21   :  { %9289 = vmatmul.msk.f32.gmra.mxu0 %vm2174_vm6, %v2128_v53 }
 0xe22   :  { %7183 = vmatmul.f32.gmra.mxu2 %v2118_v50  ;;  %9297 = vmatmul.msk.f32.gmra.mxu3 %vm2174_vm6, %v7235_v20 }
 0xe24   :  { %v7047_v28 = vpop.f32.mrf.mxu1 }
 0xe25   :  { %v6855_v22 = vpop.f32.mrf.mxu3  ;;  %v7136_v3 = vpop.f32.mrf.mxu2 }
 0xe26   :  { %v15754_v7 = vadd.f32 %v6855_v22, %v15341_v1  ;;  %v7137_v49 = vadd.f32 %v7136_v3, %v7035_v44  ;;  %v7249_v33 = vpop.f32.mrf.mxu0  ;;  %v2131_v1 = vld [vmem:[%s16740_s1 + $0x1768] sm:$0xff] }
 0xe27   :  { %7094 = vmatmul.f32.gmra.mxu1 %v2129_v35 }
 0xe28   :  { %v7238_v63 = vadd.f32 %v7237_v9, %v7137_v49 }
 0xe29   :  { %9290 = vmatmul.msk.f32.gmra.mxu0 %vm2174_vm6, %v2131_v1 }
 0xe2a   :  { %7186 = vmatmul.f32.gmra.mxu2 %v2121_v55  ;;  %9298 = vmatmul.msk.f32.gmra.mxu3 %vm2174_vm6, %v7238_v63 }
 0xe2c   :  { %v7050_v14 = vpop.f32.mrf.mxu1 }
 0xe2d   :  { %v6858_v44 = vpop.f32.mrf.mxu3  ;;  %v7139_v37 = vpop.f32.mrf.mxu2 }
 0xe2e   :  { %v15768_v32 = vadd.f32 %v6858_v44, %v15355_v18  ;;  %v7140_v9 = vadd.f32 %v7139_v37, %v7038_v43  ;;  %v7252_v51 = vpop.f32.mrf.mxu0  ;;  %v2134_v18 = vld [vmem:[%s16740_s1 + $0x1780] sm:$0xff] }
 0xe2f   :  { %7097 = vmatmul.f32.gmra.mxu1 %v2132_v24 }
 0xe30   :  { %v7241_v59 = vadd.f32 %v7240_v15, %v7140_v9 }
 0xe31   :  { %9291 = vmatmul.msk.f32.gmra.mxu0 %vm2174_vm6, %v2134_v18 }
 0xe32   :  { %7189 = vmatmul.f32.gmra.mxu2 %v2124_v56  ;;  %9299 = vmatmul.msk.f32.gmra.mxu3 %vm2174_vm6, %v7241_v59 }
 0xe34   :  { %v7053_v41 = vpop.f32.mrf.mxu1 }
 0xe35   :  { %v6861_v43 = vpop.f32.mrf.mxu3  ;;  %v7142_v36 = vpop.f32.mrf.mxu2 }
 0xe36   :  { %v15782_v21 = vadd.f32 %v6861_v43, %v15369_v42  ;;  %v7143_v15 = vadd.f32 %v7142_v36, %v7041_v31  ;;  %v7255_v19 = vpop.f32.mrf.mxu0 }
 0xe37   :  { %7100 = vmatmul.f32.gmra.mxu1 %v2135_v11 }
 0xe38   :  { %v7244_v58 = vadd.f32 %v7243_v2, %v7143_v15 }
 0xe39   :  { %9292 = vmatmul.msk.f32.gmra.mxu0 %vm2174_vm6, %v2137_v34 }
 0xe3a   :  { %7192 = vmatmul.f32.gmra.mxu2 %v2127_v4  ;;  %9300 = vmatmul.msk.f32.gmra.mxu3 %vm2174_vm6, %v7244_v58 }
 0xe3c   :  { %v7056_v20 = vpop.f32.mrf.mxu1 }
 0xe3d   :  { %v6864_v42 = vpop.f32.mrf.mxu3  ;;  %v7145_v31 = vpop.f32.mrf.mxu2 }
 0xe3e   :  { %v15796_v50 = vadd.f32 %v6864_v42, %v15383_v61  ;;  %v7146_v2 = vadd.f32 %v7145_v31, %v7044_v48  ;;  %v7258_v22 = vpop.f32.mrf.mxu0  ;;  %v2133_v61 = vld [vmem:[%s16740_s1 + $0x1778] sm:$0xff] }
 0xe40   :  { %v7247_v53 = vadd.f32 %v7246_v47, %v7146_v2 }
 0xe42   :  { %7195 = vmatmul.f32.gmra.mxu2 %v2130_v38  ;;  %9301 = vmatmul.msk.f32.gmra.mxu3 %vm2174_vm6, %v7247_v53 }
 0xe44   :  { %v7059_v35 = vpop.f32.mrf.mxu1 }
 0xe45   :  { %v6867_v3 = vpop.f32.mrf.mxu3  ;;  %v7148_v49 = vpop.f32.mrf.mxu2 }
 0xe46   :  { %v15803_v55 = vadd.f32 %v6867_v3, %v15397_v54  ;;  %v7149_v63 = vadd.f32 %v7148_v49, %v7047_v28  ;;  %v7261_v1 = vpop.f32.mrf.mxu0  ;;  %v2136_v54 = vld [vmem:[%s16740_s1 + $0x1790] sm:$0xff] }
 0xe48   :  { %v7250_v48 = vadd.f32 %v7249_v33, %v7149_v63 }
 0xe4a   :  { %7198 = vmatmul.f32.gmra.mxu2 %v2133_v61  ;;  %9302 = vmatmul.msk.f32.gmra.mxu3 %vm2174_vm6, %v7250_v48 }
 0xe4c   :  { %v7062_v56 = vpop.f32.mrf.mxu1 }
 0xe4d   :  { %v6870_v47 = vpop.f32.mrf.mxu3  ;;  %v7151_v44 = vpop.f32.mrf.mxu2 }
 0xe4e   :  { %v15810_v37 = vadd.f32 %v6870_v47, %v15411_v26  ;;  %v7152_v9 = vadd.f32 %v7151_v44, %v7050_v14  ;;  %v7264_v33 = vpop.f32.mrf.mxu0 }
 0xe50   :  { %v7253_v28 = vadd.f32 %v7252_v51, %v7152_v9 }
 0xe52   :  { %7201 = vmatmul.f32.gmra.mxu2 %v2136_v54  ;;  %9303 = vmatmul.msk.f32.gmra.mxu3 %vm2174_vm6, %v7253_v28 }
 0xe54   :  { %v7065_v26 = vpop.f32.mrf.mxu1 }
 0xe55   :  { %v6873_v59 = vpop.f32.mrf.mxu3  ;;  %v7154_v24 = vpop.f32.mrf.mxu2 }
 0xe56   :  { %v15817_v18 = vadd.f32 %v6873_v59, %v15425_v46  ;;  %v7155_v43 = vadd.f32 %v7154_v24, %v7053_v41  ;;  %v7267_v14 = vpop.f32.mrf.mxu0 }
 0xe58   :  { %v7256_v36 = vadd.f32 %v7255_v19, %v7155_v43 }
 0xe5a   :  { %9304 = vmatmul.msk.f32.gmra.mxu3 %vm2174_vm6, %v7256_v36 }
 0xe5c   :  { %v7068_v34 = vpop.f32.mrf.mxu1 }
 0xe5d   :  { %v6876_v15 = vpop.f32.mrf.mxu3  ;;  %v7157_v4 = vpop.f32.mrf.mxu2 }
 0xe5e   :  { %v15821_v51 = vadd.f32 %v6876_v15, %v15439_v5  ;;  %v7158_v58 = vadd.f32 %v7157_v4, %v7056_v20  ;;  %v7270_v19 = vpop.f32.mrf.mxu0 }
 0xe60   :  { %v7259_v11 = vadd.f32 %v7258_v22, %v7158_v58 }
 0xe62   :  { %9305 = vmatmul.msk.f32.gmra.mxu3 %vm2174_vm6, %v7259_v11 }
 0xe64   :  { %v7071_v22 = vpop.f32.mrf.mxu1 }
 0xe65   :  { %v6879_v42 = vpop.f32.mrf.mxu3  ;;  %v7160_v31 = vpop.f32.mrf.mxu2 }
 0xe66   :  { %v15825_v46 = vadd.f32 %v6879_v42, %v15453_v8  ;;  %v7161_v41 = vadd.f32 %v7160_v31, %v7059_v35  ;;  %v7273_v49 = vpop.f32.mrf.mxu0 }
 0xe68   :  { %v7262_v2 = vadd.f32 %v7261_v1, %v7161_v41 }
 0xe6a   :  { %9306 = vmatmul.msk.f32.gmra.mxu3 %vm2174_vm6, %v7262_v2 }
 0xe6c   :  { %v7074_v1 = vpop.f32.mrf.mxu1 }
 0xe6d   :  { %v6882_v38 = vpop.f32.mrf.mxu3  ;;  %v7163_v53 = vpop.f32.mrf.mxu2 }
 0xe6e   :  { %v15829_v5 = vadd.f32 %v6882_v38, %v15467_v12  ;;  %v7164_v20 = vadd.f32 %v7163_v53, %v7062_v56  ;;  %v7276_v47 = vpop.f32.mrf.mxu0 }
 0xe70   :  { %v7265_v3 = vadd.f32 %v7264_v33, %v7164_v20 }
 0xe72   :  { %9307 = vmatmul.msk.f32.gmra.mxu3 %vm2174_vm6, %v7265_v3 }
 0xe74   :  { %v7077_v56 = vpop.f32.mrf.mxu1 }
 0xe75   :  { %v6885_v63 = vpop.f32.mrf.mxu3  ;;  %v7166_v61 = vpop.f32.mrf.mxu2 }
 0xe76   :  { %v15833_v8 = vadd.f32 %v6885_v63, %v15481_v40  ;;  %v7167_v35 = vadd.f32 %v7166_v61, %v7065_v26  ;;  %v7279_v33 = vpop.f32.mrf.mxu0 }
 0xe78   :  { %v7268_v48 = vadd.f32 %v7267_v14, %v7167_v35 }
 0xe7a   :  { %9308 = vmatmul.msk.f32.gmra.mxu3 %vm2174_vm6, %v7268_v48 }
 0xe7c   :  { %v7080_v26 = vpop.f32.mrf.mxu1 }
 0xe7d   :  { %v6888_v44 = vpop.f32.mrf.mxu3  ;;  %v7169_v12 = vpop.f32.mrf.mxu2 }
 0xe7e   :  { %v15837_v9 = vadd.f32 %v6888_v44, %v15495_v29  ;;  %v7170_v54 = vadd.f32 %v7169_v12, %v7068_v34  ;;  %v7282_v58 = vpop.f32.mrf.mxu0 }
 0xe80   :  { %v7271_v28 = vadd.f32 %v7270_v19, %v7170_v54 }
 0xe82   :  { %9309 = vmatmul.msk.f32.gmra.mxu3 %vm2174_vm6, %v7271_v28 }
 0xe85   :  { %v7172_v59 = vpop.f32.mrf.mxu2  ;;  %v7407_v40 = vpop.f32.mrf.mxu3 }
 0xe86   :  { %v7173_v24 = vadd.f32 %v7172_v59, %v7071_v22  ;;  %v7491_v43 = vadd.f32 %v7407_v40, %v15509_v45  ;;  %v7083_v45 = vpop.f32.mrf.mxu1  ;;  %v7285_v2 = vpop.f32.mrf.mxu0 }
 0xe88   :  { %v7274_v36 = vadd.f32 %v7273_v49, %v7173_v24 }
 0xe8a   :  { %9310 = vmatmul.msk.f32.gmra.mxu3 %vm2174_vm6, %v7274_v36 }
 0xe8d   :  { %v7175_v14 = vpop.f32.mrf.mxu2  ;;  %v7410_v15 = vpop.f32.mrf.mxu3 }
 0xe8e   :  { %v7176_v4 = vadd.f32 %v7175_v14, %v7074_v1  ;;  %v7492_v29 = vadd.f32 %v7410_v15, %v15523_v52  ;;  %v7086_v3 = vpop.f32.mrf.mxu1  ;;  %v7288_v49 = vpop.f32.mrf.mxu0 }
 0xe90   :  { %v7277_v11 = vadd.f32 %v7276_v47, %v7176_v4 }
 0xe92   :  { %9311 = vmatmul.msk.f32.gmra.mxu3 %vm2174_vm6, %v7277_v11 }
 0xe95   :  { %v7178_v34 = vpop.f32.mrf.mxu2  ;;  %v7413_v42 = vpop.f32.mrf.mxu3 }
 0xe96   :  { %v7179_v31 = vadd.f32 %v7178_v34, %v7077_v56  ;;  %v15845_v41 = vadd.f32 %v7413_v42, %v15537_v0  ;;  %v7089_v1 = vpop.f32.mrf.mxu1  ;;  %v7291_v47 = vpop.f32.mrf.mxu0 }
 0xe98   :  { %v7280_v19 = vadd.f32 %v7279_v33, %v7179_v31 }
 0xe9a   :  { %9312 = vmatmul.msk.f32.gmra.mxu3 %vm2174_vm6, %v7280_v19 }
 0xe9d   :  { %v7181_v38 = vpop.f32.mrf.mxu2  ;;  %v7416_v53 = vpop.f32.mrf.mxu3 }
 0xe9e   :  { %v7182_v20 = vadd.f32 %v7181_v38, %v7080_v26  ;;  %v15849_v52 = vadd.f32 %v7416_v53, %v15551_v23  ;;  %v7092_v56 = vpop.f32.mrf.mxu1  ;;  %v7294_v24 = vpop.f32.mrf.mxu0  ;;  %v15865_v26 = vld [vmem:[%s16742_s8] ss:$0 sm:$0xff] }
 0xe9f   :  { %v15869_v11 = vadd.f32 %v15865_v26, %v7491_v43 }
 0xea0   :  { %v7283_v22 = vadd.f32 %v7282_v58, %v7182_v20 }
 0xea2   :  { %9313 = vmatmul.msk.f32.gmra.mxu3 %vm2174_vm6, %v7283_v22 }
 0xea5   :  { %v7184_v63 = vpop.f32.mrf.mxu2  ;;  %v7419_v61 = vpop.f32.mrf.mxu3 }
 0xea6   :  { %v7185_v0 = vadd.f32 %v7184_v63, %v7083_v45  ;;  %v15853_v35 = vadd.f32 %v7419_v61, %v15565_v17  ;;  %v7095_v58 = vpop.f32.mrf.mxu1  ;;  %v7297_v42 = vpop.f32.mrf.mxu0 }
 0xea8   :  { %v7286_v48 = vadd.f32 %v7285_v2, %v7185_v0 }
 0xeaa   :  { %9314 = vmatmul.msk.f32.gmra.mxu3 %vm2174_vm6, %v7286_v48 }
 0xead   :  { %v7187_v44 = vpop.f32.mrf.mxu2  ;;  %v7422_v12 = vpop.f32.mrf.mxu3 }
 0xeae   :  { %v7188_v23 = vadd.f32 %v7187_v44, %v7086_v3  ;;  %v15857_v54 = vadd.f32 %v7422_v12, %v15581_v16  ;;  %v7098_v20 = vpop.f32.mrf.mxu1  ;;  %v7300_v3 = vpop.f32.mrf.mxu0 }
 0xeb0   :  { %v7289_v28 = vadd.f32 %v7288_v49, %v7188_v23 }
 0xeb2   :  { %9315 = vmatmul.msk.f32.gmra.mxu3 %vm2174_vm6, %v7289_v28 }
 0xeb5   :  { %v7190_v33 = vpop.f32.mrf.mxu2  ;;  %v7425_v59 = vpop.f32.mrf.mxu3 }
 0xeb6   :  { %v7191_v40 = vadd.f32 %v7190_v33, %v7089_v1  ;;  %v7497_v17 = vadd.f32 %v7425_v59, %v15597_v62  ;;  %v7303_v44 = vpop.f32.mrf.mxu0  ;;  %v7526_v33 = vadd.f32 %v15865_v26, %v15849_v52  ;;  %v7528_v52 = vadd.f32 %v15865_v26, %v15857_v54 }
 0xeb8   :  { %v7292_v36 = vadd.f32 %v7291_v47, %v7191_v40  ;;  %v7101_v47 = vpop.f32.mrf.mxu1 }
 0xeba   :  { %9316 = vmatmul.msk.f32.gmra.mxu3 %vm2174_vm6, %v7292_v36  ;;  %v7527_v36 = vadd.f32 %v15865_v26, %v15853_v35 }
 0xebd   :  { %v7193_v16 = vpop.f32.mrf.mxu2  ;;  %v7428_v14 = vpop.f32.mrf.mxu3 }
 0xebe   :  { %v7194_v15 = vadd.f32 %v7193_v16, %v7092_v56  ;;  %v7498_v4 = vadd.f32 %v7428_v14, %v15616_v39  ;;  %v15879_v39 = vadd.f32 %v15865_v26, %v7492_v29 }
 0xec0   :  { %v15872_v62 = vadd.f32 %v15865_v26, %v7498_v4  ;;  %v7295_v34 = vadd.f32 %v7294_v24, %v7194_v15 }
 0xec2   :  { %v7551_v31 = vmax.f32 %v15869_v11, %v15872_v62  ;;  %9317 = vmatmul.msk.f32.gmra.mxu3 %vm2174_vm6, %v7295_v34 }
 0xec5   :  { %v7196_v45 = vpop.f32.mrf.mxu2  ;;  %v7431_v19 = vpop.f32.mrf.mxu3 }
 0xec6   :  { %v7197_v2 = vadd.f32 %v7196_v45, %v7095_v58  ;;  %v7499_v38 = vadd.f32 %v7431_v19, %v15639_v57  ;;  %v7525_v57 = vadd.f32 %v15865_v26, %v15845_v41 }
 0xec8   :  { %v15882_v43 = vadd.f32 %v15865_v26, %v7499_v38  ;;  %v7298_v53 = vadd.f32 %v7297_v42, %v7197_v2 }
 0xeca   :  { %v7552_v22 = vmax.f32 %v15879_v39, %v15882_v43  ;;  %9318 = vmatmul.msk.f32.gmra.mxu3 %vm2174_vm6, %v7298_v53 }
 0xecd   :  { %v7199_v49 = vpop.f32.mrf.mxu2  ;;  %v7434_v63 = vpop.f32.mrf.mxu3 }
 0xece   :  { %v7200_v61 = vadd.f32 %v7199_v49, %v7098_v20  ;;  %v7500_v0 = vadd.f32 %v7434_v63, %v15654_v13 }
 0xed0   :  { %v7532_v29 = vadd.f32 %v15865_v26, %v7500_v0  ;;  %v7301_v48 = vadd.f32 %v7300_v3, %v7200_v61 }
 0xed2   :  { %v7553_v1 = vmax.f32 %v7525_v57, %v7532_v29  ;;  %9319 = vmatmul.msk.f32.gmra.mxu3 %vm2174_vm6, %v7301_v48 }
 0xed5   :  { %v7202_v12 = vpop.f32.mrf.mxu2  ;;  %v7437_v23 = vpop.f32.mrf.mxu3 }
 0xed6   :  { %v7203_v28 = vadd.f32 %v7202_v12, %v7101_v47  ;;  %v7501_v56 = vadd.f32 %v7437_v23, %v15669_v6 }
 0xed8   :  { %v7533_v13 = vadd.f32 %v15865_v26, %v7501_v56  ;;  %v7304_v59 = vadd.f32 %v7303_v44, %v7203_v28 }
 0xeda   :  { %v7554_v41 = vmax.f32 %v7526_v33, %v7533_v13  ;;  %9320 = vmatmul.msk.f32.gmra.mxu3 %vm2174_vm6, %v7304_v59 }
 0xedd   :  { %v7440_v40 = vpop.f32.mrf.mxu3 }
 0xede   :  { %v7502_v24 = vadd.f32 %v7440_v40, %v15684_v30  ;;  %v7529_v30 = vadd.f32 %v15865_v26, %v7497_v17 }
 0xee0   :  { %v7534_v16 = vadd.f32 %v15865_v26, %v7502_v24 }
 0xee2   :  { %v7555_v14 = vmax.f32 %v7527_v36, %v7534_v16 }
 0xee5   :  { %v7443_v15 = vpop.f32.mrf.mxu3 }
 0xee6   :  { %v7503_v6 = vadd.f32 %v7443_v15, %v15698_v27 }
 0xee8   :  { %v7535_v4 = vadd.f32 %v15865_v26, %v7503_v6 }
 0xeea   :  { %v7556_v58 = vmax.f32 %v7528_v52, %v7535_v4 }
 0xeed   :  { %v7446_v34 = vpop.f32.mrf.mxu3 }
 0xeee   :  { %v7504_v42 = vadd.f32 %v7446_v34, %v15712_v25 }
 0xef0   :  { %v7536_v45 = vadd.f32 %v15865_v26, %v7504_v42 }
 0xef2   :  { %v7557_v35 = vmax.f32 %v7529_v30, %v7536_v45 }
 0xef5   :  { %v7449_v19 = vpop.f32.mrf.mxu3 }
 0xef6   :  { %v7505_v2 = vadd.f32 %v7449_v19, %v15726_v10 }
 0xef8   :  { %v7537_v10 = vadd.f32 %v15865_v26, %v7505_v2 }
 0xefd   :  { %v7452_v38 = vpop.f32.mrf.mxu3 }
 0xefe   :  { %v7506_v27 = vadd.f32 %v7452_v38, %v15740_v60 }
 0xf00   :  { %v7538_v57 = vadd.f32 %v15865_v26, %v7506_v27 }
 0xf05   :  { %v7455_v39 = vpop.f32.mrf.mxu3 }
 0xf06   :  { %v7507_v54 = vadd.f32 %v7455_v39, %v15754_v7 }
 0xf08   :  { %v7539_v44 = vadd.f32 %v15865_v26, %v7507_v54 }
 0xf0d   :  { %v7458_v43 = vpop.f32.mrf.mxu3 }
 0xf0e   :  { %v7508_v53 = vadd.f32 %v7458_v43, %v15768_v32 }
 0xf15   :  { %v7461_v20 = vpop.f32.mrf.mxu3 }
 0xf16   :  { %v7509_v25 = vadd.f32 %v7461_v20, %v15782_v21 }
 0xf1d   :  { %v7464_v3 = vpop.f32.mrf.mxu3 }
 0xf1e   :  { %v7510_v17 = vadd.f32 %v7464_v3, %v15796_v50 }
 0xf25   :  { %v7467_v49 = vpop.f32.mrf.mxu3 }
 0xf26   :  { %v7511_v6 = vadd.f32 %v7467_v49, %v15803_v55  ;;  %v9391_v55 = vld [vmem:[%s16743_s9] ss:$0 sm:$0xff] }
 0xf28   :  { %v7543_v4 = vadd.f32 %v15865_v26, %v7511_v6  ;;  %v7817_v6 = vld [vmem:[%s16746_s11 + $0x48] sm:$0xff] }
 0xf2d   :  { %v7470_v63 = vpop.f32.mrf.mxu3 }
 0xf2e   :  { %v7512_v61 = vadd.f32 %v7470_v63, %v15810_v37 }
 0xf30   :  { %v7544_v60 = vadd.f32 %v15865_v26, %v7512_v61 }
 0xf32   :  { %v7558_v0 = vmax.f32 %v7537_v10, %v7544_v60 }
 0xf34   :  { %v15920_v7 = vmax.f32 %v7551_v31, %v7558_v0 }
 0xf35   :  { %v7473_v32 = vpop.f32.mrf.mxu3 }
 0xf36   :  { %v7513_v21 = vadd.f32 %v7473_v32, %v15817_v18  ;;  %v7540_v18 = vadd.f32 %v15865_v26, %v7508_v53  ;;  %v7579_v20 = vmul.f32 0.01, %v15920_v7  ;;  %vm7572_vm13 = vcmp.gt.f32.partialorder %v15920_v7, 0.0 }
 0xf38   :  { %v7545_v50 = vadd.f32 %v15865_v26, %v7513_v21  ;;  %v7586_v10 = vsel %vm7572_vm13, %v15920_v7, %v7579_v20  ;;  %v7616_v7 = vld [vmem:[%s16745_s2 + $0x8] sm:$0xff]  ;;  %v7631_v20 = vld [vmem:[%s16745_s2 + $0x80] sm:$0xff] }
 0xf39   :  { %v7597_v21 = vmul.f32 %v9391_v55, %v7586_v10  ;;  %v7632_v10 = vld [vmem:[%s16745_s2 + $0x88] sm:$0xff] }
 0xf3a   :  { %v7559_v29 = vmax.f32 %v7538_v57, %v7545_v50 }
 0xf3c   :  { %v7566_v48 = vmax.f32 %v7552_v22, %v7559_v29  ;;  %v7615_v29 = vld [vmem:[%s16745_s2] sm:$0xff] }
 0xf3d   :  { %v7476_v37 = vpop.f32.mrf.mxu3 }
 0xf3e   :  { %v7514_v47 = vadd.f32 %v7476_v37, %v15821_v51  ;;  %v7541_v51 = vadd.f32 %v15865_v26, %v7509_v25  ;;  %vm7573_vm12 = vcmp.gt.f32.partialorder %v7566_v48, 0.0  ;;  %v7618_v37 = vld [vmem:[%s16745_s2 + $0x18] sm:$0xff] }
 0xf40   :  { %v7546_v12 = vadd.f32 %v15865_v26, %v7514_v47  ;;  %v7619_v47 = vld [vmem:[%s16745_s2 + $0x20] sm:$0xff] }
 0xf42   :  { %v7560_v23 = vmax.f32 %v7539_v44, %v7546_v12  ;;  %v7620_v44 = vld [vmem:[%s16745_s2 + $0x28] sm:$0xff]  ;;  %v7621_v12 = vld [vmem:[%s16745_s2 + $0x30] sm:$0xff] }
 0xf44   :  { %v7567_v11 = vmax.f32 %v7553_v1, %v7560_v23  ;;  %v7622_v23 = vld [vmem:[%s16745_s2 + $0x38] sm:$0xff] }
 0xf45   :  { %v7479_v62 = vpop.f32.mrf.mxu3 }
 0xf46   :  { %v7515_v31 = vadd.f32 %v7479_v62, %v15825_v46  ;;  %v7542_v46 = vadd.f32 %v15865_v26, %v7510_v17  ;;  %vm7574_vm11 = vcmp.gt.f32.partialorder %v7567_v11, 0.0  ;;  %v7624_v62 = vld [vmem:[%s16745_s2 + $0x48] sm:$0xff] }
 0xf48   :  { %v7547_v28 = vadd.f32 %v15865_v26, %v7515_v31  ;;  %v7625_v31 = vld [vmem:[%s16745_s2 + $0x50] sm:$0xff] }
 0xf4a   :  { %v7561_v56 = vmax.f32 %v7540_v18, %v7547_v28  ;;  %v7815_v18 = vld [vmem:[%s16746_s11 + $0x38] sm:$0xff] }
 0xf4b   :  { %v7823_v28 = vld [vmem:[%s16746_s11 + $0x78] sm:$0xff]  ;;  %8043 = vmatpush.msrb.mxu0 %v7815_v18  ;;  %v7870_v18 = vld [vmem:[%s16746_s11 + $0x1f0] sm:$0xff] }
 0xf4c   :  { %v7568_v33 = vmax.f32 %v7554_v41, %v7561_v56  ;;  %8020 = vmatpush.msra.mxu2 %v7823_v28  ;;  %v7814_v56 = vld [vmem:[%s16746_s11 + $0x30] sm:$0xff]  ;;  %v7861_v28 = vld [vmem:[%s16746_s11 + $0x1a8] sm:$0xff] }
 0xf4d   :  { %v7482_v13 = vpop.f32.mrf.mxu3  ;;  %8044 = vmatpush.msrb.mxu0 %v7814_v56  ;;  %v7869_v56 = vld [vmem:[%s16746_s11 + $0x1e8] sm:$0xff] }
 0xf4e   :  { %v7516_v22 = vadd.f32 %v7482_v13, %v15829_v5  ;;  %v7582_v45 = vmul.f32 0.01, %v7568_v33  ;;  %vm7575_vm10 = vcmp.gt.f32.partialorder %v7568_v33, 0.0  ;;  %v7813_v13 = vld [vmem:[%s16746_s11 + $0x28] sm:$0xff] }
 0xf4f   :  { %8045 = vmatpush.msrb.mxu0 %v7813_v13  ;;  %v7868_v13 = vld [vmem:[%s16746_s11 + $0x1e0] sm:$0xff] }
 0xf50   :  { %v7548_v59 = vadd.f32 %v15865_v26, %v7516_v22  ;;  %v7589_v54 = vsel %vm7575_vm10, %v7568_v33, %v7582_v45  ;;  %v7822_v33 = vld [vmem:[%s16746_s11 + $0x70] sm:$0xff]  ;;  %v7626_v22 = vld [vmem:[%s16745_s2 + $0x58] sm:$0xff] }
 0xf51   :  { %v7600_v17 = vmul.f32 %v9391_v55, %v7589_v54  ;;  %8021 = vmatpush.msra.mxu2 %v7822_v33  ;;  %v7826_v45 = vld [vmem:[%s16746_s11 + $0x90] sm:$0xff]  ;;  %v7832_v54 = vld [vmem:[%s16746_s11 + $0xc0] sm:$0xff] }
 0xf52   :  { %v7562_v40 = vmax.f32 %v7541_v51, %v7548_v59  ;;  %v7821_v51 = vld [vmem:[%s16746_s11 + $0x68] sm:$0xff]  ;;  %v7812_v59 = vld [vmem:[%s16746_s11 + $0x20] sm:$0xff] }
 0xf53   :  { %8022 = vmatpush.msra.mxu2 %v7821_v51  ;;  %8046 = vmatpush.msrb.mxu0 %v7812_v59  ;;  %v7860_v33 = vld [vmem:[%s16746_s11 + $0x1a0] sm:$0xff]  ;;  %v7867_v51 = vld [vmem:[%s16746_s11 + $0x1d8] sm:$0xff] }
 0xf54   :  { %v7569_v24 = vmax.f32 %v7555_v14, %v7562_v40  ;;  %v7820_v40 = vld [vmem:[%s16746_s11 + $0x60] sm:$0xff] }
 0xf55   :  { %v7485_v36 = vpop.f32.mrf.mxu3  ;;  %8023 = vmatpush.msra.mxu2 %v7820_v40  ;;  %v7635_v40 = vld [vmem:[%s16745_s2 + $0xa0] sm:$0xff] }
 0xf56   :  { %v7517_v1 = vadd.f32 %v7485_v36, %v15833_v8  ;;  %v7583_v30 = vmul.f32 0.01, %v7569_v24  ;;  %vm7576_vm8 = vcmp.gt.f32.partialorder %v7569_v24, 0.0  ;;  %v7819_v36 = vld [vmem:[%s16746_s11 + $0x58] sm:$0xff] }
 0xf57   :  { %8024 = vmatpush.msra.mxu2 %v7819_v36  ;;  %v7866_v36 = vld [vmem:[%s16746_s11 + $0x1d0] sm:$0xff] }
 0xf58   :  { %v7549_v16 = vadd.f32 %v15865_v26, %v7517_v1  ;;  %v7590_v38 = vsel %vm7576_vm8, %v7569_v24, %v7583_v30  ;;  %v7811_v24 = vld [vmem:[%s16746_s11 + $0x18] sm:$0xff]  ;;  %v7810_v1 = vld [vmem:[%s16746_s11 + $0x10] sm:$0xff] }
 0xf59   :  { %v7601_v53 = vmul.f32 %v9391_v55, %v7590_v38  ;;  %8047 = vmatpush.msrb.mxu0 %v7811_v24  ;;  %v7827_v30 = vld [vmem:[%s16746_s11 + $0x98] sm:$0xff]  ;;  %v7836_v38 = vld [vmem:[%s16746_s11 + $0xe0] sm:$0xff]  ;;  %v7858_v24 = vld [vmem:[%s16746_s11 + $0x190] sm:$0xff] }
 0xf5a   :  { %v7563_v15 = vmax.f32 %v7542_v46, %v7549_v16  ;;  %v7818_v46 = vld [vmem:[%s16746_s11 + $0x50] sm:$0xff]  ;;  %v7809_v16 = vld [vmem:[%s16746_s11 + $0x8] sm:$0xff] }
 0xf5b   :  { %8048 = vmatpush.msrb.mxu0 %v7810_v1  ;;  %8025 = vmatpush.msra.mxu2 %v7818_v46  ;;  %v7857_v1 = vld [vmem:[%s16746_s11 + $0x188] sm:$0xff] }
 0xf5c   :  { %v7570_v41 = vmax.f32 %v7556_v58, %v7563_v15  ;;  %v7627_v15 = vld [vmem:[%s16745_s2 + $0x60] sm:$0xff]  ;;  %v7865_v46 = vld [vmem:[%s16746_s11 + $0x1c8] sm:$0xff] }
 0xf5d   :  { %v7488_v52 = vpop.f32.mrf.mxu3  ;;  %8049 = vmatpush.msrb.mxu0 %v7809_v16  ;;  %8026 = vmatpush.msra.mxu2 %v7817_v6  ;;  %v7856_v16 = vld [vmem:[%s16746_s11 + $0x180] sm:$0xff] }
 0xf5e   :  { %v7518_v5 = vadd.f32 %v7488_v52, %v15837_v9  ;;  %v7584_v42 = vmul.f32 0.01, %v7570_v41  ;;  %vm7577_vm7 = vcmp.gt.f32.partialorder %v7570_v41, 0.0  ;;  %v7581_v9 = vmul.f32 0.01, %v7567_v11  ;;  %v7816_v52 = vld [vmem:[%s16746_s11 + $0x40] sm:$0xff] }
 0xf5f   :  { %8027 = vmatpush.msra.mxu2 %v7816_v52  ;;  %v7864_v6 = vld [vmem:[%s16746_s11 + $0x1c0] sm:$0xff]  ;;  %v7887_v52 = vld [vmem:[%s16746_s11 + $0x278] sm:$0xff] }
 0xf60   :  { %v7550_v34 = vadd.f32 %v15865_v26, %v7518_v5  ;;  %v7591_v2 = vsel %vm7577_vm7, %v7570_v41, %v7584_v42  ;;  %v9392_v26 = vld [vmem:[%s16744_s10] ss:$0 sm:$0xff]  ;;  %v7588_v25 = vsel %vm7574_vm11, %v7567_v11, %v7581_v9  ;;  %v7831_v5 = vld [vmem:[%s16746_s11 + $0xb8] sm:$0xff]  ;;  %v7628_v42 = vld [vmem:[%s16745_s2 + $0x68] sm:$0xff] }
 0xf61   :  { %v7602_v39 = vmul.f32 %v9391_v55, %v7591_v2  ;;  %v7612_v63 = vadd.f32 %v9392_v26, %v7601_v53  ;;  %v7599_v61 = vmul.f32 %v9391_v55, %v7588_v25  ;;  %v7611_v60 = vadd.f32 %v9392_v26, %v7600_v17  ;;  %v7623_v11 = vld [vmem:[%s16745_s2 + $0x40] sm:$0xff]  ;;  %8066 = vmatpush.msrb.mxu2 %v7831_v5  ;;  %v7825_v2 = vld [vmem:[%s16746_s11 + $0x88] sm:$0xff]  ;;  %v7629_v9 = vld [vmem:[%s16745_s2 + $0x70] sm:$0xff] }
 0xf62   :  { %v7564_v14 = vmax.f32 %v7543_v4, %v7550_v34  ;;  %v7608_v50 = vadd.f32 %v9392_v26, %v7597_v21  ;;  %v7808_v41 = vld [vmem:[%s16746_s11] sm:$0xff]  ;;  %v7830_v4 = vld [vmem:[%s16746_s11 + $0xb0] sm:$0xff]  ;;  %v7829_v34 = vld [vmem:[%s16746_s11 + $0xa8] sm:$0xff] }
 0xf63   :  { %v7613_v3 = vadd.f32 %v9392_v26, %v7602_v39  ;;  %v7610_v32 = vadd.f32 %v9392_v26, %v7599_v61  ;;  %8050 = vmatpush.msrb.mxu0 %v7808_v41  ;;  %8067 = vmatpush.msrb.mxu2 %v7830_v4  ;;  %v7833_v39 = vld [vmem:[%s16746_s11 + $0xc8] sm:$0xff]  ;;  %v7854_v25 = vld [vmem:[%s16746_s11 + $0x170] sm:$0xff]  ;;  %v7852_v17 = vld [vmem:[%s16746_s11 + $0x160] sm:$0xff] }
 0xf64   :  { %v7571_v8 = vmax.f32 %v7557_v35, %v7564_v14  ;;  %v7580_v35 = vmul.f32 0.01, %v7566_v48  ;;  %v7828_v14 = vld [vmem:[%s16746_s11 + $0xa0] sm:$0xff]  ;;  %v7849_v21 = vld [vmem:[%s16746_s11 + $0x148] sm:$0xff]  ;;  %v7878_v41 = vld [vmem:[%s16746_s11 + $0x230] sm:$0xff] }
 0xf65   :  { %8068 = vmatpush.msrb.mxu2 %v7829_v34  ;;  %v7636_v4 = vld [vmem:[%s16745_s2 + $0xa8] sm:$0xff] }
 0xf66   :  { %vm7578_vm9 = vcmp.gt.f32.partialorder %v7571_v8, 0.0  ;;  %v7585_v19 = vmul.f32 0.01, %v7571_v8  ;;  %v7587_v49 = vsel %vm7573_vm12, %v7566_v48, %v7580_v35  ;;  %v7617_v48 = vld [vmem:[%s16745_s2 + $0x10] sm:$0xff]  ;;  %v7630_v35 = vld [vmem:[%s16745_s2 + $0x78] sm:$0xff]  ;;  %v7877_v34 = vld [vmem:[%s16746_s11 + $0x228] sm:$0xff] }
 0xf67   :  { %v7598_v0 = vmul.f32 %v9391_v55, %v7587_v49  ;;  %8069 = vmatpush.msrb.mxu2 %v7828_v14  ;;  %v7847_v49 = vld [vmem:[%s16746_s11 + $0x138] sm:$0xff]  ;;  %v7876_v14 = vld [vmem:[%s16746_s11 + $0x220] sm:$0xff] }
 0xf68   :  { %v7592_v58 = vsel %vm7578_vm9, %v7571_v8, %v7585_v19  ;;  %v7839_v8 = vld [vmem:[%s16746_s11 + $0xf8] sm:$0xff]  ;;  %v7838_v19 = vld [vmem:[%s16746_s11 + $0xf0] sm:$0xff] }
 0xf69   :  { %v7603_v27 = vmul.f32 %v9391_v55, %v7592_v58  ;;  %v7609_v57 = vadd.f32 %v9392_v26, %v7598_v0  ;;  %8070 = vmatpush.msrb.mxu2 %v7827_v30  ;;  %8090 = vmatpush.msra.mxu0 %v7839_v8  ;;  %v7837_v55 = vld [vmem:[%s16746_s11 + $0xe8] sm:$0xff]  ;;  %v7824_v58 = vld [vmem:[%s16746_s11 + $0x80] sm:$0xff]  ;;  %v7850_v0 = vld [vmem:[%s16746_s11 + $0x150] sm:$0xff] }
 0xf6a   :  { %v7885_v30 = vld [vmem:[%s16746_s11 + $0x268] sm:$0xff]  ;;  %v7875_v8 = vld [vmem:[%s16746_s11 + $0x218] sm:$0xff] }
 0xf6b   :  { %v7614_v43 = vadd.f32 %v9392_v26, %v7603_v27  ;;  %8071 = vmatpush.msrb.mxu2 %v7826_v45  ;;  %8091 = vmatpush.msra.mxu0 %v7838_v19  ;;  %v7835_v27 = vld [vmem:[%s16746_s11 + $0xd8] sm:$0xff]  ;;  %v7834_v26 = vld [vmem:[%s16746_s11 + $0xd0] sm:$0xff]  ;;  %v7884_v45 = vld [vmem:[%s16746_s11 + $0x260] sm:$0xff] }
 0xf6c   :  { %v7874_v19 = vld [vmem:[%s16746_s11 + $0x210] sm:$0xff] }
 0xf6d   :  { %7725 = vmatpush.msra.mxu1 %v7614_v43  ;;  %8072 = vmatpush.msrb.mxu2 %v7825_v2  ;;  %v7855_v43 = vld [vmem:[%s16746_s11 + $0x178] sm:$0xff] }
 0xf6e   :  { %8092 = vmatpush.msra.mxu0 %v7837_v55  ;;  %v7883_v2 = vld [vmem:[%s16746_s11 + $0x258] sm:$0xff] }
 0xf6f   :  { %7726 = vmatpush.msra.mxu1 %v7613_v3  ;;  %8073 = vmatpush.msrb.mxu2 %v7824_v58  ;;  %v7853_v3 = vld [vmem:[%s16746_s11 + $0x168] sm:$0xff] }
 0xf70   :  { %8093 = vmatpush.msra.mxu0 %v7836_v38  ;;  %v7873_v58 = vld [vmem:[%s16746_s11 + $0x208] sm:$0xff]  ;;  %v7882_v38 = vld [vmem:[%s16746_s11 + $0x250] sm:$0xff] }
 0xf71   :  { %7727 = vmatpush.msra.mxu1 %v7612_v63  ;;  %v7851_v63 = vld [vmem:[%s16746_s11 + $0x158] sm:$0xff] }
 0xf72   :  { %8094 = vmatpush.msra.mxu0 %v7835_v27  ;;  %v7872_v27 = vld [vmem:[%s16746_s11 + $0x200] sm:$0xff] }
 0xf73   :  { %7728 = vmatpush.msra.mxu1 %v7611_v60  ;;  %v7846_v60 = vld [vmem:[%s16746_s11 + $0x130] sm:$0xff] }
 0xf74   :  { %8095 = vmatpush.msra.mxu0 %v7834_v26  ;;  %v7881_v26 = vld [vmem:[%s16746_s11 + $0x248] sm:$0xff] }
 0xf75   :  { %7729 = vmatpush.msra.mxu1 %v7610_v32  ;;  %v7845_v32 = vld [vmem:[%s16746_s11 + $0x128] sm:$0xff] }
 0xf76   :  { %8096 = vmatpush.msra.mxu0 %v7833_v39  ;;  %v7895_v39 = vld [vmem:[%s16746_s11 + $0x2b8] sm:$0xff] }
 0xf77   :  { %7730 = vmatpush.msra.mxu1 %v7609_v57  ;;  %v7844_v57 = vld [vmem:[%s16746_s11 + $0x120] sm:$0xff] }
 0xf78   :  { %8097 = vmatpush.msra.mxu0 %v7832_v54  ;;  %v7894_v54 = vld [vmem:[%s16746_s11 + $0x2b0] sm:$0xff] }
 0xf79   :  { %7731 = vmatpush.msra.mxu1 %v7608_v50  ;;  %v7848_v50 = vld [vmem:[%s16746_s11 + $0x140] sm:$0xff] }
 0xf7a   :  { %9321 = vmatmul.msk.f32.vlgmr.msra.gmra.mxu1 %vm7640_vm14, %v7615_v29  ;;  %v7843_v29 = vld [vmem:[%s16746_s11 + $0x118] sm:$0xff] }
 0xf82   :  { %9322 = vmatmul.msk.f32.gmra.mxu1 %vm7640_vm14, %v7616_v7 }
 0xf8a   :  { %9323 = vmatmul.msk.f32.gmra.mxu1 %vm7640_vm14, %v7617_v48  ;;  %v7633_v48 = vld [vmem:[%s16745_s2 + $0x90] sm:$0xff] }
 0xf92   :  { %9324 = vmatmul.msk.f32.gmra.mxu1 %vm7640_vm14, %v7618_v37  ;;  %v7842_v37 = vld [vmem:[%s16746_s11 + $0x110] sm:$0xff] }
 0xf9a   :  { %9325 = vmatmul.msk.f32.gmra.mxu1 %vm7640_vm14, %v7619_v47  ;;  %v7841_v47 = vld [vmem:[%s16746_s11 + $0x108] sm:$0xff] }
 0xfa2   :  { %9326 = vmatmul.msk.f32.gmra.mxu1 %vm7640_vm14, %v7620_v44  ;;  %v7840_v44 = vld [vmem:[%s16746_s11 + $0x100] sm:$0xff] }
 0xfaa   :  { %9327 = vmatmul.msk.f32.gmra.mxu1 %vm7640_vm14, %v7621_v12  ;;  %v7863_v12 = vld [vmem:[%s16746_s11 + $0x1b8] sm:$0xff] }
 0xfb2   :  { %9328 = vmatmul.msk.f32.gmra.mxu1 %vm7640_vm14, %v7622_v23  ;;  %v7871_v23 = vld [vmem:[%s16746_s11 + $0x1f8] sm:$0xff] }
 0xfba   :  { %9329 = vmatmul.msk.f32.gmra.mxu1 %vm7640_vm14, %v7623_v11 }
 0xfc2   :  { %9330 = vmatmul.msk.f32.gmra.mxu1 %vm7640_vm14, %v7624_v62  ;;  %v7634_v62 = vld [vmem:[%s16745_s2 + $0x98] sm:$0xff] }
 0xfca   :  { %9331 = vmatmul.msk.f32.gmra.mxu1 %vm7640_vm14, %v7625_v31  ;;  %v7862_v31 = vld [vmem:[%s16746_s11 + $0x1b0] sm:$0xff] }
 0xfd2   :  { %9332 = vmatmul.msk.f32.gmra.mxu1 %vm7640_vm14, %v7626_v22  ;;  %v7859_v22 = vld [vmem:[%s16746_s11 + $0x198] sm:$0xff] }
 0xfda   :  { %9333 = vmatmul.msk.f32.gmra.mxu1 %vm7640_vm14, %v7627_v15  ;;  %v7879_v15 = vld [vmem:[%s16746_s11 + $0x238] sm:$0xff] }
 0xfe2   :  { %9334 = vmatmul.msk.f32.gmra.mxu1 %vm7640_vm14, %v7628_v42  ;;  %v7886_v42 = vld [vmem:[%s16746_s11 + $0x270] sm:$0xff] }
 0xfea   :  { %9335 = vmatmul.msk.f32.gmra.mxu1 %vm7640_vm14, %v7629_v9  ;;  %v7637_v9 = vld [vmem:[%s16745_s2 + $0xb0] sm:$0xff] }
 0xff2   :  { %9336 = vmatmul.msk.f32.gmra.mxu1 %vm7640_vm14, %v7630_v35  ;;  %v7880_v35 = vld [vmem:[%s16746_s11 + $0x240] sm:$0xff] }
 0xff7   :  { %v7733_v53 = vpop.f32.mrf.mxu1 }
 0xff8   :  { %9347 = vmatmul.msk.f32.vlgmr.msrb.gmra.mxu0 %vm8008_vm15, %v7733_v53 }
 0xff9   :  { %8138 = vmatpush.msrb.mxu0 %v7855_v43  ;;  %v7903_v43 = vld [vmem:[%s16746_s11 + $0x2f8] sm:$0xff] }
 0xffa   :  { %9337 = vmatmul.msk.f32.gmra.mxu1 %vm7640_vm14, %v7631_v20  ;;  %v7638_v20 = vld [vmem:[%s16745_s2 + $0xb8] sm:$0xff] }
 0xffb   :  { %8139 = vmatpush.msrb.mxu0 %v7854_v25  ;;  %v7893_v25 = vld [vmem:[%s16746_s11 + $0x2a8] sm:$0xff] }
 0xffd   :  { %8140 = vmatpush.msrb.mxu0 %v7853_v3  ;;  %v7902_v3 = vld [vmem:[%s16746_s11 + $0x2f0] sm:$0xff] }
 0xfff   :  { %v7736_v61 = vpop.f32.mrf.mxu1  ;;  %8141 = vmatpush.msrb.mxu0 %v7852_v17  ;;  %v7892_v17 = vld [vmem:[%s16746_s11 + $0x2a0] sm:$0xff] }
0x1000   :  { %9346 = vmatmul.msk.f32.vlgmr.msra.gmra.mxu2 %vm8008_vm15, %v7736_v61  ;;  %v7900_v61 = vld [vmem:[%s16746_s11 + $0x2e0] sm:$0xff] }
0x1001   :  { %8114 = vmatpush.msra.mxu2 %v7847_v49  ;;  %8142 = vmatpush.msrb.mxu0 %v7851_v63  ;;  %v7901_v49 = vld [vmem:[%s16746_s11 + $0x2e8] sm:$0xff]  ;;  %v7891_v63 = vld [vmem:[%s16746_s11 + $0x298] sm:$0xff] }
0x1002   :  { %9338 = vmatmul.msk.f32.gmra.mxu1 %vm7640_vm14, %v7632_v10  ;;  %v7890_v10 = vld [vmem:[%s16746_s11 + $0x290] sm:$0xff] }
0x1003   :  { %8115 = vmatpush.msra.mxu2 %v7846_v60  ;;  %8143 = vmatpush.msrb.mxu0 %v7850_v0  ;;  %v7899_v60 = vld [vmem:[%s16746_s11 + $0x2d8] sm:$0xff] }
0x1005   :  { %8116 = vmatpush.msra.mxu2 %v7845_v32  ;;  %8144 = vmatpush.msrb.mxu0 %v7849_v21  ;;  %v7639_v32 = vld [vmem:[%s16745_s2 + $0xc0] sm:$0xff]  ;;  %v7889_v21 = vld [vmem:[%s16746_s11 + $0x288] sm:$0xff] }
0x1007   :  { %v7739_v7 = vpop.f32.mrf.mxu1  ;;  %8117 = vmatpush.msra.mxu2 %v7844_v57  ;;  %8145 = vmatpush.msrb.mxu0 %v7848_v50  ;;  %v7898_v57 = vld [vmem:[%s16746_s11 + $0x2d0] sm:$0xff]  ;;  %v7888_v50 = vld [vmem:[%s16746_s11 + $0x280] sm:$0xff] }
0x1008   :  { %9348 = vmatmul.msk.f32.vlgmr.msrb.gmra.mxu2 %vm8008_vm15, %v7739_v7  ;;  %v7897_v7 = vld [vmem:[%s16746_s11 + $0x2c8] sm:$0xff] }
0x1009   :  { %8118 = vmatpush.msra.mxu2 %v7843_v29  ;;  %v7911_v29 = vld [vmem:[%s16746_s11 + $0x338] sm:$0xff] }
0x100a   :  { %9339 = vmatmul.msk.f32.gmra.mxu1 %vm7640_vm14, %v7633_v48  ;;  %v7910_v48 = vld [vmem:[%s16746_s11 + $0x330] sm:$0xff] }
0x100b   :  { %8119 = vmatpush.msra.mxu2 %v7842_v37  ;;  %v7896_v37 = vld [vmem:[%s16746_s11 + $0x2c0] sm:$0xff] }
0x100d   :  { %8120 = vmatpush.msra.mxu2 %v7841_v47  ;;  %v7909_v47 = vld [vmem:[%s16746_s11 + $0x328] sm:$0xff] }
0x100f   :  { %v7742_v11 = vpop.f32.mrf.mxu1  ;;  %8121 = vmatpush.msra.mxu2 %v7840_v44  ;;  %v7919_v44 = vld [vmem:[%s16746_s11 + $0x378] sm:$0xff] }
0x1010   :  { %9349 = vmatmul.msk.f32.vlgmr.msra.gmra.mxu0 %vm8008_vm15, %v7742_v11  ;;  %v7918_v11 = vld [vmem:[%s16746_s11 + $0x370] sm:$0xff] }
0x1011   :  { %8162 = vmatpush.msrb.mxu2 %v7863_v12  ;;  %8186 = vmatpush.msra.mxu0 %v7871_v23  ;;  %v7908_v23 = vld [vmem:[%s16746_s11 + $0x320] sm:$0xff] }
0x1012   :  { %9340 = vmatmul.msk.f32.gmra.mxu1 %vm7640_vm14, %v7634_v62  ;;  %v7907_v62 = vld [vmem:[%s16746_s11 + $0x318] sm:$0xff] }
0x1013   :  { %8163 = vmatpush.msrb.mxu2 %v7862_v31  ;;  %8187 = vmatpush.msra.mxu0 %v7870_v18  ;;  %v7917_v31 = vld [vmem:[%s16746_s11 + $0x368] sm:$0xff]  ;;  %v7906_v18 = vld [vmem:[%s16746_s11 + $0x310] sm:$0xff] }
0x1015   :  { %8164 = vmatpush.msrb.mxu2 %v7861_v28  ;;  %8188 = vmatpush.msra.mxu0 %v7869_v56  ;;  %v7916_v28 = vld [vmem:[%s16746_s11 + $0x360] sm:$0xff]  ;;  %v7905_v56 = vld [vmem:[%s16746_s11 + $0x308] sm:$0xff] }
0x1017   :  { %8165 = vmatpush.msrb.mxu2 %v7860_v33  ;;  %v7745_v59 = vpop.f32.mrf.mxu1  ;;  %8189 = vmatpush.msra.mxu0 %v7868_v13  ;;  %v7915_v33 = vld [vmem:[%s16746_s11 + $0x358] sm:$0xff] }
0x1018   :  { %9350 = vmatmul.msk.f32.vlgmr.msra.gmra.mxu2 %vm8008_vm15, %v7745_v59  ;;  %v7927_v59 = vld [vmem:[%s16746_s11 + $0x3b8] sm:$0xff] }
0x1019   :  { %8166 = vmatpush.msrb.mxu2 %v7859_v22  ;;  %8190 = vmatpush.msra.mxu0 %v7867_v51  ;;  %v7904_v22 = vld [vmem:[%s16746_s11 + $0x300] sm:$0xff]  ;;  %v7914_v51 = vld [vmem:[%s16746_s11 + $0x350] sm:$0xff] }
0x101a   :  { %9341 = vmatmul.msk.f32.gmra.mxu1 %vm7640_vm14, %v7635_v40  ;;  %v7913_v40 = vld [vmem:[%s16746_s11 + $0x348] sm:$0xff] }
0x101b   :  { %8167 = vmatpush.msrb.mxu2 %v7858_v24  ;;  %8191 = vmatpush.msra.mxu0 %v7866_v36  ;;  %v7926_v24 = vld [vmem:[%s16746_s11 + $0x3b0] sm:$0xff]  ;;  %v7912_v36 = vld [vmem:[%s16746_s11 + $0x340] sm:$0xff] }
0x101d   :  { %8168 = vmatpush.msrb.mxu2 %v7857_v1  ;;  %8192 = vmatpush.msra.mxu0 %v7865_v46  ;;  %v7925_v1 = vld [vmem:[%s16746_s11 + $0x3a8] sm:$0xff]  ;;  %v7935_v46 = vld [vmem:[%s16746_s11 + $0x3f8] sm:$0xff] }
0x101f   :  { %8169 = vmatpush.msrb.mxu2 %v7856_v16  ;;  %v7748_v5 = vpop.f32.mrf.mxu1  ;;  %8193 = vmatpush.msra.mxu0 %v7864_v6  ;;  %v7934_v6 = vld [vmem:[%s16746_s11 + $0x3f0] sm:$0xff] }
0x1020   :  { %9351 = vmatmul.msk.f32.vlgmr.msrb.gmra.mxu0 %vm8008_vm15, %v7748_v5  ;;  %v7922_v5 = vld [vmem:[%s16746_s11 + $0x390] sm:$0xff] }
0x1021   :  { %8210 = vmatpush.msra.mxu2 %v7879_v15  ;;  %8234 = vmatpush.msrb.mxu0 %v7887_v52  ;;  %v7924_v15 = vld [vmem:[%s16746_s11 + $0x3a0] sm:$0xff]  ;;  %v7933_v52 = vld [vmem:[%s16746_s11 + $0x3e8] sm:$0xff] }
0x1022   :  { %9342 = vmatmul.msk.f32.gmra.mxu1 %vm7640_vm14, %v7636_v4  ;;  %v7932_v4 = vld [vmem:[%s16746_s11 + $0x3e0] sm:$0xff] }
0x1023   :  { %8211 = vmatpush.msra.mxu2 %v7878_v41  ;;  %8235 = vmatpush.msrb.mxu0 %v7886_v42  ;;  %v7923_v41 = vld [vmem:[%s16746_s11 + $0x398] sm:$0xff] }
0x1024   :  { %v7931_v42 = vld [vmem:[%s16746_s11 + $0x3d8] sm:$0xff] }
0x1025   :  { %8212 = vmatpush.msra.mxu2 %v7877_v34  ;;  %8236 = vmatpush.msrb.mxu0 %v7885_v30  ;;  %v7921_v34 = vld [vmem:[%s16746_s11 + $0x388] sm:$0xff]  ;;  %v7920_v30 = vld [vmem:[%s16746_s11 + $0x380] sm:$0xff] }
0x1027   :  { %8213 = vmatpush.msra.mxu2 %v7876_v14  ;;  %v7751_v55 = vpop.f32.mrf.mxu1  ;;  %8237 = vmatpush.msrb.mxu0 %v7884_v45  ;;  %v7930_v45 = vld [vmem:[%s16746_s11 + $0x3d0] sm:$0xff] }
0x1028   :  { %9352 = vmatmul.msk.f32.vlgmr.msrb.gmra.mxu2 %vm8008_vm15, %v7751_v55  ;;  %v7941_v55 = vld [vmem:[%s16746_s11 + $0x428] sm:$0xff] }
0x1029   :  { %8214 = vmatpush.msra.mxu2 %v7875_v8  ;;  %8238 = vmatpush.msrb.mxu0 %v7883_v2  ;;  %v7943_v8 = vld [vmem:[%s16746_s11 + $0x438] sm:$0xff]  ;;  %v7929_v2 = vld [vmem:[%s16746_s11 + $0x3c8] sm:$0xff] }
0x102a   :  { %9343 = vmatmul.msk.f32.gmra.mxu1 %vm7640_vm14, %v7637_v9  ;;  %v7928_v9 = vld [vmem:[%s16746_s11 + $0x3c0] sm:$0xff] }
0x102b   :  { %8215 = vmatpush.msra.mxu2 %v7874_v19  ;;  %8239 = vmatpush.msrb.mxu0 %v7882_v38  ;;  %v7942_v19 = vld [vmem:[%s16746_s11 + $0x430] sm:$0xff]  ;;  %v7951_v38 = vld [vmem:[%s16746_s11 + $0x478] sm:$0xff] }
0x102d   :  { %8216 = vmatpush.msra.mxu2 %v7873_v58  ;;  %8240 = vmatpush.msrb.mxu0 %v7881_v26  ;;  %v7940_v58 = vld [vmem:[%s16746_s11 + $0x420] sm:$0xff]  ;;  %v7939_v26 = vld [vmem:[%s16746_s11 + $0x418] sm:$0xff] }
0x102f   :  { %8217 = vmatpush.msra.mxu2 %v7872_v27  ;;  %v7754_v53 = vpop.f32.mrf.mxu1  ;;  %8241 = vmatpush.msrb.mxu0 %v7880_v35  ;;  %v7938_v35 = vld [vmem:[%s16746_s11 + $0x410] sm:$0xff] }
0x1030   :  { %9353 = vmatmul.msk.f32.vlgmr.msra.gmra.mxu0 %vm8008_vm15, %v7754_v53  ;;  %v7948_v53 = vld [vmem:[%s16746_s11 + $0x460] sm:$0xff] }
0x1031   :  { %8258 = vmatpush.msrb.mxu2 %v7895_v39  ;;  %8282 = vmatpush.msra.mxu0 %v7903_v43  ;;  %v7950_v39 = vld [vmem:[%s16746_s11 + $0x470] sm:$0xff]  ;;  %v7937_v43 = vld [vmem:[%s16746_s11 + $0x408] sm:$0xff] }
0x1032   :  { %9344 = vmatmul.msk.f32.gmra.mxu1 %vm7640_vm14, %v7638_v20  ;;  %v7936_v20 = vld [vmem:[%s16746_s11 + $0x400] sm:$0xff] }
0x1033   :  { %8259 = vmatpush.msrb.mxu2 %v7894_v54  ;;  %8283 = vmatpush.msra.mxu0 %v7902_v3  ;;  %v7949_v54 = vld [vmem:[%s16746_s11 + $0x468] sm:$0xff] }
0x1035   :  { %8260 = vmatpush.msrb.mxu2 %v7893_v25  ;;  %8284 = vmatpush.msra.mxu0 %v7901_v49  ;;  %v7947_v25 = vld [vmem:[%s16746_s11 + $0x458] sm:$0xff]  ;;  %v7946_v49 = vld [vmem:[%s16746_s11 + $0x450] sm:$0xff] }
0x1037   :  { %8261 = vmatpush.msrb.mxu2 %v7892_v17  ;;  %v7757_v0 = vpop.f32.mrf.mxu1  ;;  %8285 = vmatpush.msra.mxu0 %v7900_v61  ;;  %v7959_v17 = vld [vmem:[%s16746_s11 + $0x4b8] sm:$0xff]  ;;  %v7945_v61 = vld [vmem:[%s16746_s11 + $0x448] sm:$0xff] }
0x1038   :  { %9354 = vmatmul.msk.f32.vlgmr.msra.gmra.mxu2 %vm8008_vm15, %v7757_v0  ;;  %v7956_v0 = vld [vmem:[%s16746_s11 + $0x4a0] sm:$0xff] }
0x1039   :  { %8262 = vmatpush.msrb.mxu2 %v7891_v63  ;;  %8286 = vmatpush.msra.mxu0 %v7899_v60  ;;  %v7958_v63 = vld [vmem:[%s16746_s11 + $0x4b0] sm:$0xff]  ;;  %v7944_v60 = vld [vmem:[%s16746_s11 + $0x440] sm:$0xff] }
0x103a   :  { %9345 = vmatmul.msk.f32.gmra.mxu1 %vm7640_vm14, %v7639_v32  ;;  %v7967_v32 = vld [vmem:[%s16746_s11 + $0x4f8] sm:$0xff] }
0x103b   :  { %8263 = vmatpush.msrb.mxu2 %v7890_v10  ;;  %8287 = vmatpush.msra.mxu0 %v7898_v57  ;;  %v7957_v10 = vld [vmem:[%s16746_s11 + $0x4a8] sm:$0xff]  ;;  %v7955_v57 = vld [vmem:[%s16746_s11 + $0x498] sm:$0xff] }
0x103d   :  { %8264 = vmatpush.msrb.mxu2 %v7889_v21  ;;  %8288 = vmatpush.msra.mxu0 %v7897_v7  ;;  %v7965_v7 = vld [vmem:[%s16746_s11 + $0x4e8] sm:$0xff] }
0x103f   :  { %8265 = vmatpush.msrb.mxu2 %v7888_v50  ;;  %v7760_v12 = vpop.f32.mrf.mxu1  ;;  %8289 = vmatpush.msra.mxu0 %v7896_v37  ;;  %v7966_v50 = vld [vmem:[%s16746_s11 + $0x4f0] sm:$0xff]  ;;  %v7964_v37 = vld [vmem:[%s16746_s11 + $0x4e0] sm:$0xff] }
0x1040   :  { %9355 = vmatmul.msk.f32.vlgmr.msrb.gmra.mxu0 %vm8008_vm15, %v7760_v12 }
0x1041   :  { %8306 = vmatpush.msra.mxu2 %v7911_v29  ;;  %8330 = vmatpush.msrb.mxu0 %v7919_v44  ;;  %v7954_v29 = vld [vmem:[%s16746_s11 + $0x490] sm:$0xff]  ;;  %v7963_v44 = vld [vmem:[%s16746_s11 + $0x4d8] sm:$0xff] }
0x1043   :  { %8307 = vmatpush.msra.mxu2 %v7910_v48  ;;  %8331 = vmatpush.msrb.mxu0 %v7918_v11  ;;  %v7953_v48 = vld [vmem:[%s16746_s11 + $0x488] sm:$0xff]  ;;  %v7962_v11 = vld [vmem:[%s16746_s11 + $0x4d0] sm:$0xff] }
0x1045   :  { %8308 = vmatpush.msra.mxu2 %v7909_v47  ;;  %8332 = vmatpush.msrb.mxu0 %v7917_v31  ;;  %v7952_v47 = vld [vmem:[%s16746_s11 + $0x480] sm:$0xff]  ;;  %v7961_v31 = vld [vmem:[%s16746_s11 + $0x4c8] sm:$0xff] }
0x1047   :  { %8309 = vmatpush.msra.mxu2 %v7908_v23  ;;  %v7763_v13 = vpop.f32.mrf.mxu1  ;;  %8333 = vmatpush.msrb.mxu0 %v7916_v28  ;;  %v7975_v23 = vld [vmem:[%s16746_s11 + $0x538] sm:$0xff]  ;;  %v7960_v28 = vld [vmem:[%s16746_s11 + $0x4c0] sm:$0xff] }
0x1048   :  { %9356 = vmatmul.msk.f32.vlgmr.msrb.gmra.mxu2 %vm8008_vm15, %v7763_v13 }
0x1049   :  { %8310 = vmatpush.msra.mxu2 %v7907_v62  ;;  %8334 = vmatpush.msrb.mxu0 %v7915_v33  ;;  %v7974_v62 = vld [vmem:[%s16746_s11 + $0x530] sm:$0xff]  ;;  %v7983_v33 = vld [vmem:[%s16746_s11 + $0x578] sm:$0xff] }
0x104b   :  { %8311 = vmatpush.msra.mxu2 %v7906_v18  ;;  %8335 = vmatpush.msrb.mxu0 %v7914_v51  ;;  %v7973_v18 = vld [vmem:[%s16746_s11 + $0x528] sm:$0xff]  ;;  %v7982_v51 = vld [vmem:[%s16746_s11 + $0x570] sm:$0xff] }
0x104d   :  { %8312 = vmatpush.msra.mxu2 %v7905_v56  ;;  %8336 = vmatpush.msrb.mxu0 %v7913_v40  ;;  %v7972_v56 = vld [vmem:[%s16746_s11 + $0x520] sm:$0xff]  ;;  %v7981_v40 = vld [vmem:[%s16746_s11 + $0x568] sm:$0xff] }
0x104f   :  { %8313 = vmatpush.msra.mxu2 %v7904_v22  ;;  %v7766_v16 = vpop.f32.mrf.mxu1  ;;  %8337 = vmatpush.msrb.mxu0 %v7912_v36  ;;  %v7971_v22 = vld [vmem:[%s16746_s11 + $0x518] sm:$0xff]  ;;  %v7980_v36 = vld [vmem:[%s16746_s11 + $0x560] sm:$0xff] }
0x1050   :  { %9357 = vmatmul.msk.f32.vlgmr.msra.gmra.mxu0 %vm8008_vm15, %v7766_v16 }
0x1051   :  { %8354 = vmatpush.msrb.mxu2 %v7927_v59  ;;  %8378 = vmatpush.msra.mxu0 %v7935_v46  ;;  %v7970_v59 = vld [vmem:[%s16746_s11 + $0x510] sm:$0xff]  ;;  %v7979_v46 = vld [vmem:[%s16746_s11 + $0x558] sm:$0xff] }
0x1053   :  { %8355 = vmatpush.msrb.mxu2 %v7926_v24  ;;  %8379 = vmatpush.msra.mxu0 %v7934_v6  ;;  %v7969_v24 = vld [vmem:[%s16746_s11 + $0x508] sm:$0xff]  ;;  %v7978_v6 = vld [vmem:[%s16746_s11 + $0x550] sm:$0xff] }
0x1055   :  { %8356 = vmatpush.msrb.mxu2 %v7925_v1  ;;  %8380 = vmatpush.msra.mxu0 %v7933_v52  ;;  %v7968_v1 = vld [vmem:[%s16746_s11 + $0x500] sm:$0xff]  ;;  %v7977_v52 = vld [vmem:[%s16746_s11 + $0x548] sm:$0xff] }
0x1057   :  { %8357 = vmatpush.msrb.mxu2 %v7924_v15  ;;  %v7769_v14 = vpop.f32.mrf.mxu1  ;;  %8381 = vmatpush.msra.mxu0 %v7932_v4  ;;  %v7991_v15 = vld [vmem:[%s16746_s11 + $0x5b8] sm:$0xff]  ;;  %v7976_v4 = vld [vmem:[%s16746_s11 + $0x540] sm:$0xff] }
0x1058   :  { %9358 = vmatmul.msk.f32.vlgmr.msra.gmra.mxu2 %vm8008_vm15, %v7769_v14 }
0x1059   :  { %8358 = vmatpush.msrb.mxu2 %v7923_v41  ;;  %8382 = vmatpush.msra.mxu0 %v7931_v42  ;;  %v7990_v41 = vld [vmem:[%s16746_s11 + $0x5b0] sm:$0xff]  ;;  %v7999_v42 = vld [vmem:[%s16746_s11 + $0x5f8] sm:$0xff] }
0x105b   :  { %8359 = vmatpush.msrb.mxu2 %v7922_v5  ;;  %8383 = vmatpush.msra.mxu0 %v7930_v45  ;;  %v7989_v5 = vld [vmem:[%s16746_s11 + $0x5a8] sm:$0xff]  ;;  %v7986_v45 = vld [vmem:[%s16746_s11 + $0x590] sm:$0xff] }
0x105d   :  { %8360 = vmatpush.msrb.mxu2 %v7921_v34  ;;  %8384 = vmatpush.msra.mxu0 %v7929_v2  ;;  %v7988_v34 = vld [vmem:[%s16746_s11 + $0x5a0] sm:$0xff]  ;;  %v7985_v2 = vld [vmem:[%s16746_s11 + $0x588] sm:$0xff] }
0x105f   :  { %8361 = vmatpush.msrb.mxu2 %v7920_v30  ;;  %v7772_v27 = vpop.f32.mrf.mxu1  ;;  %8385 = vmatpush.msra.mxu0 %v7928_v9  ;;  %v7987_v30 = vld [vmem:[%s16746_s11 + $0x598] sm:$0xff]  ;;  %v7984_v9 = vld [vmem:[%s16746_s11 + $0x580] sm:$0xff] }
0x1060   :  { %9359 = vmatmul.msk.f32.vlgmr.msrb.gmra.mxu0 %vm8008_vm15, %v7772_v27  ;;  %v8007_v27 = vld [vmem:[%s16746_s11 + $0x638] sm:$0xff] }
0x1061   :  { %8402 = vmatpush.msra.mxu2 %v7943_v8  ;;  %8426 = vmatpush.msrb.mxu0 %v7951_v38  ;;  %v7998_v8 = vld [vmem:[%s16746_s11 + $0x5f0] sm:$0xff] }
0x1063   :  { %8403 = vmatpush.msra.mxu2 %v7942_v19  ;;  %8427 = vmatpush.msrb.mxu0 %v7950_v39  ;;  %v7997_v19 = vld [vmem:[%s16746_s11 + $0x5e8] sm:$0xff]  ;;  %v8006_v39 = vld [vmem:[%s16746_s11 + $0x630] sm:$0xff] }
0x1065   :  { %8404 = vmatpush.msra.mxu2 %v7941_v55  ;;  %8428 = vmatpush.msrb.mxu0 %v7949_v54  ;;  %v7996_v55 = vld [vmem:[%s16746_s11 + $0x5e0] sm:$0xff]  ;;  %v8005_v54 = vld [vmem:[%s16746_s11 + $0x628] sm:$0xff] }
0x1067   :  { %8405 = vmatpush.msra.mxu2 %v7940_v58  ;;  %v7775_v3 = vpop.f32.mrf.mxu1  ;;  %8429 = vmatpush.msrb.mxu0 %v7948_v53  ;;  %v7995_v58 = vld [vmem:[%s16746_s11 + $0x5d8] sm:$0xff]  ;;  %v8004_v53 = vld [vmem:[%s16746_s11 + $0x620] sm:$0xff] }
0x1068   :  { %9360 = vmatmul.msk.f32.vlgmr.msrb.gmra.mxu2 %vm8008_vm15, %v7775_v3  ;;  %v8002_v3 = vld [vmem:[%s16746_s11 + $0x610] sm:$0xff] }
0x1069   :  { %8406 = vmatpush.msra.mxu2 %v7939_v26  ;;  %8430 = vmatpush.msrb.mxu0 %v7947_v25  ;;  %v7994_v26 = vld [vmem:[%s16746_s11 + $0x5d0] sm:$0xff]  ;;  %v8003_v25 = vld [vmem:[%s16746_s11 + $0x618] sm:$0xff] }
0x106b   :  { %8407 = vmatpush.msra.mxu2 %v7938_v35  ;;  %8431 = vmatpush.msrb.mxu0 %v7946_v49  ;;  %v7993_v35 = vld [vmem:[%s16746_s11 + $0x5c8] sm:$0xff]  ;;  %v8000_v49 = vld [vmem:[%s16746_s11 + $0x600] sm:$0xff] }
0x106d   :  { %8408 = vmatpush.msra.mxu2 %v7937_v43  ;;  %8432 = vmatpush.msrb.mxu0 %v7945_v61  ;;  %v7992_v43 = vld [vmem:[%s16746_s11 + $0x5c0] sm:$0xff] }
0x106f   :  { %8409 = vmatpush.msra.mxu2 %v7936_v20  ;;  %v7778_v21 = vpop.f32.mrf.mxu1  ;;  %8433 = vmatpush.msrb.mxu0 %v7944_v60 }
0x1070   :  { %9361 = vmatmul.msk.f32.vlgmr.msra.gmra.mxu0 %vm8008_vm15, %v7778_v21 }
0x1071   :  { %8450 = vmatpush.msrb.mxu2 %v7959_v17  ;;  %8474 = vmatpush.msra.mxu0 %v7967_v32  ;;  %v8001_v17 = vld [vmem:[%s16746_s11 + $0x608] sm:$0xff] }
0x1073   :  { %8451 = vmatpush.msrb.mxu2 %v7958_v63  ;;  %8475 = vmatpush.msra.mxu0 %v7966_v50  ;;  %v8628_v50 = vld [vmem:[%s16749_s13 + $0x78] sm:$0xff] }
0x1074   :  { %8633 = vmatpush.msrb.mxu1 %v8628_v50 }
0x1075   :  { %8452 = vmatpush.msrb.mxu2 %v7957_v10  ;;  %8476 = vmatpush.msra.mxu0 %v7965_v7 }
0x1077   :  { %8453 = vmatpush.msrb.mxu2 %v7956_v0  ;;  %v7781_v12 = vpop.f32.mrf.mxu1  ;;  %8477 = vmatpush.msra.mxu0 %v7964_v37  ;;  %v8052_v0 = vpop.f32.mrf.mxu0  ;;  %v8625_v37 = vld [vmem:[%s16749_s13 + $0x60] sm:$0xff] }
0x1078   :  { %9362 = vmatmul.msk.f32.vlgmr.msra.gmra.mxu2 %vm8008_vm15, %v7781_v12 }
0x1079   :  { %8454 = vmatpush.msrb.mxu2 %v7955_v57  ;;  %8478 = vmatpush.msra.mxu0 %v7963_v44 }
0x107b   :  { %8455 = vmatpush.msrb.mxu2 %v7954_v29  ;;  %8479 = vmatpush.msra.mxu0 %v7962_v11  ;;  %v8627_v29 = vld [vmem:[%s16749_s13 + $0x70] sm:$0xff] }
0x107c   :  { %8634 = vmatpush.msrb.mxu1 %v8627_v29 }
0x107d   :  { %8456 = vmatpush.msrb.mxu2 %v7953_v48  ;;  %8480 = vmatpush.msra.mxu0 %v7961_v31  ;;  %v8626_v48 = vld [vmem:[%s16749_s13 + $0x68] sm:$0xff]  ;;  %v8623_v31 = vld [vmem:[%s16749_s13 + $0x50] sm:$0xff] }
0x107e   :  { %8635 = vmatpush.msrb.mxu1 %v8626_v48 }
0x107f   :  { %8457 = vmatpush.msrb.mxu2 %v7952_v47  ;;  %v7784_v13 = vpop.f32.mrf.mxu1  ;;  %8481 = vmatpush.msra.mxu0 %v7960_v28  ;;  %v8622_v28 = vld [vmem:[%s16749_s13 + $0x48] sm:$0xff] }
0x1080   :  { %9363 = vmatmul.msk.f32.vlgmr.msrb.gmra.mxu0 %vm8008_vm15, %v7784_v13  ;;  %8636 = vmatpush.msrb.mxu1 %v8625_v37  ;;  %v8621_v13 = vld [vmem:[%s16749_s13 + $0x40] sm:$0xff] }
0x1081   :  { %8498 = vmatpush.msra.mxu2 %v7975_v23  ;;  %8522 = vmatpush.msrb.mxu0 %v7983_v33 }
0x1083   :  { %8499 = vmatpush.msra.mxu2 %v7974_v62  ;;  %8523 = vmatpush.msrb.mxu0 %v7982_v51  ;;  %v8029_v60 = vpop.f32.mrf.mxu2  ;;  %v8624_v62 = vld [vmem:[%s16749_s13 + $0x58] sm:$0xff] }
0x1084   :  { %v8053_v12 = vadd.f32 %v8052_v0, %v8029_v60  ;;  %8637 = vmatpush.msrb.mxu1 %v8624_v62 }
0x1085   :  { %8500 = vmatpush.msra.mxu2 %v7973_v18  ;;  %8524 = vmatpush.msrb.mxu0 %v7981_v40 }
0x1086   :  { %8638 = vmatpush.msrb.mxu1 %v8623_v31 }
0x1087   :  { %8501 = vmatpush.msra.mxu2 %v7972_v56  ;;  %v7787_v16 = vpop.f32.mrf.mxu1  ;;  %8525 = vmatpush.msrb.mxu0 %v7980_v36 }
0x1088   :  { %9364 = vmatmul.msk.f32.vlgmr.msrb.gmra.mxu2 %vm8008_vm15, %v7787_v16  ;;  %8639 = vmatpush.msrb.mxu1 %v8622_v28  ;;  %v8619_v16 = vld [vmem:[%s16749_s13 + $0x30] sm:$0xff] }
0x1089   :  { %8502 = vmatpush.msra.mxu2 %v7971_v22  ;;  %8526 = vmatpush.msrb.mxu0 %v7979_v46  ;;  %v8620_v46 = vld [vmem:[%s16749_s13 + $0x38] sm:$0xff] }
0x108a   :  { %8640 = vmatpush.msrb.mxu1 %v8621_v13 }
0x108b   :  { %8503 = vmatpush.msra.mxu2 %v7970_v59  ;;  %8527 = vmatpush.msrb.mxu0 %v7978_v6  ;;  %v8075_v32 = vpop.f32.mrf.mxu2 }
0x108c   :  { %v8078_v23 = vadd.f32 %v8075_v32, %v8053_v12  ;;  %8641 = vmatpush.msrb.mxu1 %v8620_v46 }
0x108d   :  { %8504 = vmatpush.msra.mxu2 %v7969_v24  ;;  %8528 = vmatpush.msrb.mxu0 %v7977_v52  ;;  %v8099_v21 = vpop.f32.mrf.mxu0  ;;  %v8617_v52 = vld [vmem:[%s16749_s13 + $0x20] sm:$0xff] }
0x108e   :  { %v8102_v18 = vadd.f32 %v8099_v21, %v8078_v23  ;;  %8642 = vmatpush.msrb.mxu1 %v8619_v16 }
0x108f   :  { %8505 = vmatpush.msra.mxu2 %v7968_v1  ;;  %v7790_v14 = vpop.f32.mrf.mxu1  ;;  %8529 = vmatpush.msrb.mxu0 %v7976_v4 }
0x1090   :  { %9365 = vmatmul.msk.f32.vlgmr.msra.gmra.mxu0 %vm8008_vm15, %v7790_v14 }
0x1091   :  { %8546 = vmatpush.msrb.mxu2 %v7991_v15  ;;  %8570 = vmatpush.msra.mxu0 %v7999_v42  ;;  %v8618_v15 = vld [vmem:[%s16749_s13 + $0x28] sm:$0xff] }
0x1092   :  { %8643 = vmatpush.msrb.mxu1 %v8618_v15 }
0x1093   :  { %8547 = vmatpush.msrb.mxu2 %v7990_v41  ;;  %8571 = vmatpush.msra.mxu0 %v7998_v8 }
0x1094   :  { %8644 = vmatpush.msrb.mxu1 %v8617_v52 }
0x1095   :  { %8548 = vmatpush.msrb.mxu2 %v7989_v5  ;;  %8572 = vmatpush.msra.mxu0 %v7997_v19 }
0x1097   :  { %8549 = vmatpush.msrb.mxu2 %v7988_v34  ;;  %v7793_v38 = vpop.f32.mrf.mxu1  ;;  %8573 = vmatpush.msra.mxu0 %v7996_v55 }
0x1098   :  { %9366 = vmatmul.msk.f32.vlgmr.msra.gmra.mxu2 %vm8008_vm15, %v7793_v38 }
0x1099   :  { %8550 = vmatpush.msrb.mxu2 %v7987_v30  ;;  %8574 = vmatpush.msra.mxu0 %v7995_v58  ;;  %v8613_v58 = vld [vmem:[%s16749_s13] sm:$0xff] }
0x109b   :  { %8551 = vmatpush.msrb.mxu2 %v7986_v45  ;;  %8575 = vmatpush.msra.mxu0 %v7994_v26  ;;  %v8123_v57 = vpop.f32.mrf.mxu2  ;;  %v8616_v45 = vld [vmem:[%s16749_s13 + $0x18] sm:$0xff] }
0x109c   :  { %v8126_v33 = vadd.f32 %v8123_v57, %v8102_v18  ;;  %8645 = vmatpush.msrb.mxu1 %v8616_v45  ;;  %v9394_v57 = vld [vmem:[%s16748_s14] ss:$0 sm:$0xff] }
0x109d   :  { %8552 = vmatpush.msrb.mxu2 %v7985_v2  ;;  %8576 = vmatpush.msra.mxu0 %v7993_v35  ;;  %v8147_v7 = vpop.f32.mrf.mxu0  ;;  %v8615_v2 = vld [vmem:[%s16749_s13 + $0x10] sm:$0xff] }
0x109e   :  { %v8150_v51 = vadd.f32 %v8147_v7, %v8126_v33  ;;  %8646 = vmatpush.msrb.mxu1 %v8615_v2 }
0x109f   :  { %8553 = vmatpush.msrb.mxu2 %v7984_v9  ;;  %v7796_v20 = vpop.f32.mrf.mxu1  ;;  %8577 = vmatpush.msra.mxu0 %v7992_v43  ;;  %v8614_v9 = vld [vmem:[%s16749_s13 + $0x8] sm:$0xff] }
0x10a0   :  { %9367 = vmatmul.msk.f32.vlgmr.msrb.gmra.mxu0 %vm8008_vm15, %v7796_v20  ;;  %8647 = vmatpush.msrb.mxu1 %v8614_v9 }
0x10a1   :  { %8594 = vmatpush.msra.mxu2 %v8007_v27 }
0x10a2   :  { %8648 = vmatpush.msrb.mxu1 %v8613_v58 }
0x10a3   :  { %8595 = vmatpush.msra.mxu2 %v8006_v39 }
0x10a5   :  { %8596 = vmatpush.msra.mxu2 %v8005_v54 }
0x10a7   :  { %8597 = vmatpush.msra.mxu2 %v8004_v53  ;;  %v7799_v63 = vpop.f32.mrf.mxu1 }
0x10a8   :  { %9368 = vmatmul.msk.f32.vlgmr.msrb.gmra.mxu2 %vm8008_vm15, %v7799_v63 }
0x10a9   :  { %8598 = vmatpush.msra.mxu2 %v8003_v25 }
0x10ab   :  { %8599 = vmatpush.msra.mxu2 %v8002_v3  ;;  %v8171_v47 = vpop.f32.mrf.mxu2 }
0x10ac   :  { %v8174_v59 = vadd.f32 %v8171_v47, %v8150_v51 }
0x10ad   :  { %8600 = vmatpush.msra.mxu2 %v8001_v17  ;;  %v8195_v44 = vpop.f32.mrf.mxu0 }
0x10ae   :  { %v8198_v24 = vadd.f32 %v8195_v44, %v8174_v59 }
0x10af   :  { %8601 = vmatpush.msra.mxu2 %v8000_v49  ;;  %v7802_v61 = vpop.f32.mrf.mxu1 }
0x10b0   :  { %9369 = vmatmul.msk.f32.vlgmr.msra.gmra.mxu0 %vm8008_vm15, %v7802_v61 }
0x10b7   :  { %v7805_v10 = vpop.f32.mrf.mxu1 }
0x10b8   :  { %9370 = vmatmul.msk.f32.vlgmr.msra.gmra.mxu2 %vm8008_vm15, %v7805_v10  ;;  %v9393_v10 = vld [vmem:[%s16747_s12] ss:$0 sm:$0xff] }
0x10bb   :  { %v8219_v11 = vpop.f32.mrf.mxu2 }
0x10bc   :  { %v8222_v1 = vadd.f32 %v8219_v11, %v8198_v24 }
0x10bd   :  { %v8243_v56 = vpop.f32.mrf.mxu0 }
0x10be   :  { %v8246_v41 = vadd.f32 %v8243_v56, %v8222_v1 }
0x10cb   :  { %v8267_v22 = vpop.f32.mrf.mxu2 }
0x10cc   :  { %v8270_v5 = vadd.f32 %v8267_v22, %v8246_v41 }
0x10cd   :  { %v8291_v40 = vpop.f32.mrf.mxu0 }
0x10ce   :  { %v8294_v34 = vadd.f32 %v8291_v40, %v8270_v5 }
0x10db   :  { %v8315_v36 = vpop.f32.mrf.mxu2 }
0x10dc   :  { %v8318_v14 = vadd.f32 %v8315_v36, %v8294_v34 }
0x10dd   :  { %v8339_v6 = vpop.f32.mrf.mxu0 }
0x10de   :  { %v8342_v8 = vadd.f32 %v8339_v6, %v8318_v14 }
0x10eb   :  { %v8363_v4 = vpop.f32.mrf.mxu2 }
0x10ec   :  { %v8366_v19 = vadd.f32 %v8363_v4, %v8342_v8 }
0x10ed   :  { %v8387_v42 = vpop.f32.mrf.mxu0 }
0x10ee   :  { %v8390_v38 = vadd.f32 %v8387_v42, %v8366_v19 }
0x10fb   :  { %v8411_v30 = vpop.f32.mrf.mxu2 }
0x10fc   :  { %v8414_v26 = vadd.f32 %v8411_v30, %v8390_v38 }
0x10fd   :  { %v8435_v55 = vpop.f32.mrf.mxu0 }
0x10fe   :  { %v8438_v35 = vadd.f32 %v8435_v55, %v8414_v26 }
0x110b   :  { %v8459_v27 = vpop.f32.mrf.mxu2 }
0x110c   :  { %v8462_v54 = vadd.f32 %v8459_v27, %v8438_v35 }
0x110d   :  { %v8483_v39 = vpop.f32.mrf.mxu0 }
0x110e   :  { %v8486_v53 = vadd.f32 %v8483_v39, %v8462_v54 }
0x111b   :  { %v8507_v43 = vpop.f32.mrf.mxu2 }
0x111c   :  { %v8510_v25 = vadd.f32 %v8507_v43, %v8486_v53 }
0x111d   :  { %v8531_v20 = vpop.f32.mrf.mxu0 }
0x111e   :  { %v8534_v17 = vadd.f32 %v8531_v20, %v8510_v25 }
0x112b   :  { %v8555_v3 = vpop.f32.mrf.mxu2 }
0x112c   :  { %v8558_v49 = vadd.f32 %v8555_v3, %v8534_v17 }
0x112d   :  { %v8579_v63 = vpop.f32.mrf.mxu0 }
0x112e   :  { %v8582_v61 = vadd.f32 %v8579_v63, %v8558_v49 }
0x113b   :  { %v8603_v60 = vpop.f32.mrf.mxu2 }
0x113c   :  { %v8606_v0 = vadd.f32 %v8603_v60, %v8582_v61 }
0x113e   :  { %v8611_v32 = vadd.f32 %v9393_v10, %v8606_v0 }
0x1140   :  { %v8612_v21 = vmax.f32 %v8611_v32, 0.0 }
0x1142   :  { %8649 = vmatmul.f32.vlgmr.msrb.gmra.mxu1 %v8612_v21 }
0x11bf   :  { %v8650_v50 = vpop.f32.mrf.mxu1 }
0x11c0   :  { %v8651_v29 = vadd.f32 %v9394_v57, %v8650_v50 }
0x11c2   :  { %v8654_v7 = vsel %vm8653_vm0, %v8651_v29, -inf }
0x11c3   :  { %8655 = vmax.xlane.f32.xlu0 %v8654_v7 }
0x1236   :  { %v8656_v48 = vpop.xlane.xlu0 %8655 }
0x1237   :  { %v8657_v37 = vsub.f32 %v8651_v29, %v8656_v48 }
0x1239   :  { %v8658_v47 = vmul.f32 1.442695, %v8657_v37 }
0x123b   :  { %9395 = vpow2.f32 %v8658_v47 }
0x1241   :  { %v9396_v44 = vpop.eup %9395 }
0x1242   :  { %v8660_v12 = vsel %vm8653_vm0, %v9396_v44, 0.0 }
0x1243   :  { %8661 = vadd.xlane.f32.xlu0 %v8660_v12 }
0x12b6   :  { %v8662_v23 = vpop.xlane.xlu0 %8661 }
0x12b7   :  { %9397 = vlog2.f32 %v8662_v23 }
0x12bd   :  { %v9398_v11 = vpop.eup %9397 }
0x12be   :  { %v8664_v62 = vmul.f32 0.6931472, %v9398_v11 }
0x12c0   :  { %v8665_v31 = vadd.f32 %v8664_v62, %v8656_v48 }
0x12c2   :  { %v8666_v18 = vsub.f32 %v8651_v29, %v8665_v31 }
0x12c4   :  { %8667 = vst.msk [vmem:[%s16750_s15] sm:$0xff] %vm8653_vm0, %v8666_v18 }

</bundles_post_ra>
